<compile_context>
chip_gen: v7x
topology: tpu7x:2x2x1
jax: 0.10.0
libtpu: 0.0.40
codegen_flags: <defaults>
</compile_context>

<pallas_src>
import functools

import jax
import jax.numpy as jnp
from jax import lax
from jax.experimental import pallas as pl
from jax.experimental.pallas import tpu as pltpu

IMG = 14                     # 1x14x14 input images
KC1, KC2 = 5, 3              # conv kernel sizes
C1 = IMG - KC1 + 1           # 10: conv1 output side
P1 = C1 - 1                  # 9 : max_pool(2, stride=1) output side
C2 = P1 - KC2 + 1            # 7 : conv2 output side
NCLS = 10                    # fc1 output size


# ------------------------------ fused kernel ------------------------------

def _fused_kernel(x1_ref, wp_ref, xc_ref, xo_ref, y1_ref, ps_ref, a2_ref,
                  *, B, BP, H1, H2, H3, OFF):
    R1 = y1_ref.shape[0]                        # 100*BP  (valid conv1 pixels)
    R2 = a2_ref.shape[0]                        # 61*BP   (conv2 pixels, 9-wide frame)

    # ---- conv1 (+bias): one im2col matmul, row-chunked to bound live vregs ----
    w1 = wp_ref[OFF["w1"]:OFF["w1"] + 32, 0:H1]                       # (32, H1)
    for s in range(0, R1, 20 * BP):
        e = min(s + 20 * BP, R1)
        y1_ref[s:e, :] = jnp.dot(x1_ref[s:e, :], w1,
                                 preferred_element_type=jnp.float32)

    # ---- max_pool2d(2, stride=1) + relu, compacted to the 9x9 valid grid ----
    n = P1 * BP                                                       # rows per pool row
    for yp in range(P1):
        src = yp * C1 * BP
        m = jnp.maximum(
            jnp.maximum(y1_ref[src:src + n, :],
                        y1_ref[src + BP:src + BP + n, :]),
            jnp.maximum(y1_ref[src + C1 * BP:src + C1 * BP + n, :],
                        y1_ref[src + (C1 + 1) * BP:src + (C1 + 1) * BP + n, :]))
        ps_ref[yp * n:(yp + 1) * n, :] = jnp.maximum(m, 0.0)

    # ---- conv2 + bias + relu: 9 taps lane-concatenated -> one K=72 matmul ----
    w2 = wp_ref[OFF["w2"]:OFF["w2"] + KC2 * KC2 * H1, 0:H2]           # (72, H2)
    b2 = wp_ref[OFF["b2"]:OFF["b2"] + 1, 0:H2]                        # (1, H2)
    for s in range(0, R2, 21 * BP):
        e = min(s + 21 * BP, R2)
        taps = [ps_ref[s + (ki * P1 + kj) * BP: e + (ki * P1 + kj) * BP, :]
                for ki in range(KC2) for kj in range(KC2)]
        lhs = jnp.concatenate(taps, axis=1)                           # (chunk, 9*H1)
        acc = jnp.dot(lhs, w2, preferred_element_type=jnp.float32)
        a2_ref[s:e, :] = jnp.maximum(acc + b2, 0.0)

    # ---- fc1 + sigmoid: 49 valid pixel blocks -> one K=392 matmul ----
    wf1 = wp_ref[OFF["wf1"]:OFF["wf1"] + C2 * C2 * H2, 0:NCLS]        # (392, 10)
    bf1 = wp_ref[OFF["bf1"]:OFF["bf1"] + 1, 0:NCLS]
    blocks = [a2_ref[(yy * P1 + xx) * BP:(yy * P1 + xx) * BP + BP, :]
              for yy in range(C2) for xx in range(C2)]
    xf = jnp.concatenate(blocks, axis=1)                              # (BP, 49*H2)
    z = jnp.dot(xf, wf1, preferred_element_type=jnp.float32) + bf1
    xc = pl.reciprocal(1.0 + jnp.exp(-z), approx=True)                # sigmoid on EUP
    xc_ref[...] = xc[0:B, :]

    # ---- pair head: fc2(relu) + fc3 on the valid (even,odd) pairs only ----
    w2a = wp_ref[OFF["w2a"]:OFF["w2a"] + NCLS, 0:H3]                  # (10, H3)
    w2b = wp_ref[OFF["w2b"]:OFF["w2b"] + NCLS, 0:H3]
    bf2 = wp_ref[OFF["bf2"]:OFF["bf2"] + 1, 0:H3]
    wf3 = wp_ref[OFF["wf3"]:OFF["wf3"] + H3, 0:2]                     # (H3, 2)
    bf3 = wp_ref[OFF["bf3"]:OFF["bf3"] + 1, 0:2]
    pe = jnp.dot(xc, w2a, preferred_element_type=jnp.float32)         # (BP, H3)
    po = jnp.dot(xc, w2b, preferred_element_type=jnp.float32)         # (BP, H3)
    pairs = [jnp.maximum(pe[2 * k:2 * k + 1, :] + po[2 * k + 1:2 * k + 2, :] + bf2, 0.0)
             for k in range(B // 2)]
    h = jnp.concatenate(pairs, axis=0)                                # (B//2, H3)
    xo_ref[...] = jnp.dot(h, wf3, preferred_element_type=jnp.float32) + bf3


# --------------------------- host-side wrappers ----------------------------

def prepare_params(params):
    """One-time weight re-layout + packing into a single lane-dense slab.

    Folds the im2col tap order, the torch `.view(B, h2*7*7)` feature order and
    the (B,10)->(B/2,20) pair split into the weight layout, and concatenates
    every weight/bias into one (rows, 32) f32 array (sliced at static,
    sublane-aligned row offsets in-kernel): one weight DMA instead of ten.
    """
    (w1, b1, w2, b2, wf1, bf1, wf2, bf2, wf3, bf3) = params
    h1, h2, h3 = w1.shape[0], w2.shape[0], wf2.shape[0]
    packw = max(32, h1, h2, NCLS, h3, 2)

    w1s = jnp.concatenate([w1.reshape(h1, KC1 * KC1).T, b1.reshape(1, h1)], axis=0)
    w2s = w2.transpose(2, 3, 1, 0).reshape(KC2 * KC2 * h1, h2)
    wf1s = wf1.reshape(NCLS, h2, C2 * C2).transpose(2, 1, 0).reshape(C2 * C2 * h2, NCLS)
    sections = [
        ("w1", w1s), ("w2", w2s), ("b2", b2.reshape(1, h2)),
        ("wf1", wf1s), ("bf1", bf1.reshape(1, NCLS)),
        ("w2a", wf2[:, :NCLS].T), ("w2b", wf2[:, NCLS:].T),
        ("bf2", bf2.reshape(1, h3)), ("wf3", wf3.T), ("bf3", bf3.reshape(1, 2)),
    ]
    offs, chunks, r = {}, [], 0
    for name, sec in sections:
        rows = -(-sec.shape[0] // 8) * 8                      # sublane-align sections
        buf = jnp.zeros((rows, packw), jnp.float32)
        buf = buf.at[:sec.shape[0], :sec.shape[1]].set(sec.astype(jnp.float32))
        offs[name] = r
        chunks.append(buf)
        r += rows
    wpack = jnp.concatenate(chunks, axis=0)                   # (rows, 32)
    dims = dict(h1=h1, h2=h2, h3=h3)
    return wpack, offs, dims


def net_small_all_forward(x, wpack, *, offs, dims):
    B = x.shape[0]
    assert B % 2 == 0, "Net_small_all pairs images: batch must be even"
    BP = -(-B // 8) * 8                                       # batch padded to 8
    h1, h2, h3 = dims["h1"], dims["h2"], dims["h3"]

    # Host-side conv1 im2col: rows r = (y1*10+x1)*BP + b (valid conv1 pixels only),
    # lanes t = ki*5+kj, plus a ones column (folds the conv1 bias) -> lane-dense (32).
    xi = jnp.zeros((BP, IMG, IMG), jnp.float32).at[:B].set(x[:, 0].astype(jnp.float32))
    taps = [xi[:, ki:ki + C1, kj:kj + C1] for ki in range(KC1) for kj in range(KC1)]
    p = jnp.stack(taps, axis=-1)                              # (BP, 10, 10, 25)
    x1 = p.transpose(1, 2, 0, 3).reshape(C1 * C1 * BP, KC1 * KC1)
    x1 = jnp.concatenate(
        [x1, jnp.ones((C1 * C1 * BP, 1), jnp.float32),
         jnp.zeros((C1 * C1 * BP, 32 - KC1 * KC1 - 1), jnp.float32)], axis=1)

    vmem = pl.BlockSpec(memory_space=pltpu.MemorySpace.VMEM)
    kern = functools.partial(_fused_kernel, B=B, BP=BP, H1=h1, H2=h2, H3=h3, OFF=offs)
    xc, xo = pl.pallas_call(
        kern,
        out_shape=(jax.ShapeDtypeStruct((B, NCLS), jnp.float32),
                   jax.ShapeDtypeStruct((B // 2, 2), jnp.float32)),
        in_specs=[vmem, vmem],
        out_specs=(vmem, vmem),
        scratch_shapes=[
            pltpu.VMEM((C1 * C1 * BP, h1), jnp.float32),              # conv1 out (10x10)
            pltpu.VMEM((P1 * P1 * BP, h1), jnp.float32),              # pool+relu (9x9)
            pltpu.VMEM(((P1 * (C2 - 1) + C2) * BP, h2), jnp.float32), # conv2+relu
        ],
    )(x1, wpack)
    return xc, xo


# ----------------------- reference + parameter init -----------------------

def reference_forward(x, params):
    (w1, b1, w2, b2, wf1, bf1, wf2, bf2, wf3, bf3) = params
    dn = ("NCHW", "OIHW", "NCHW")
    y = lax.conv_general_dilated(x, w1, (1, 1), "VALID", dimension_numbers=dn)
    y = y + b1[None, :, None, None]
    y = lax.reduce_window(y, -jnp.inf, lax.max, (1, 1, 2, 2), (1, 1, 1, 1), "VALID")
    y = jnp.maximum(y, 0.0)
    y = lax.conv_general_dilated(y, w2, (1, 1), "VALID", dimension_numbers=dn)
    y = jnp.maximum(y + b2[None, :, None, None], 0.0)
    xc = jax.nn.sigmoid(y.reshape(y.shape[0], -1) @ wf1.T + bf1)
    h = jnp.maximum(xc.reshape(-1, 20) @ wf2.T + bf2, 0.0)
    xo = h @ wf3.T + bf3
    return xc, xo


def init_params(key, nb_h1, nb_h2, nb_h3):
    ks = jax.random.split(key, 10)

    def u(k, shape, fan_in):
        bound = 1.0 / (float(fan_in) ** 0.5)
        return jax.random.uniform(k, shape, jnp.float32, -bound, bound)

    w1 = u(ks[0], (nb_h1, 1, 5, 5), 25)
    b1 = u(ks[1], (nb_h1,), 25)
    w2 = u(ks[2], (nb_h2, nb_h1, 3, 3), nb_h1 * 9)
    b2 = u(ks[3], (nb_h2,), nb_h1 * 9)
    wf1 = u(ks[4], (10, nb_h2 * 7 * 7), nb_h2 * 7 * 7)
    bf1 = u(ks[5], (10,), nb_h2 * 7 * 7)
    wf2 = u(ks[6], (nb_h3, 20), 20)
    bf2 = u(ks[7], (nb_h3,), 20)
    wf3 = u(ks[8], (2, nb_h3), nb_h3)
    bf3 = u(ks[9], (2,), nb_h3)
    return (w1, b1, w2, b2, wf1, bf1, wf2, bf2, wf3, bf3)


if __name__ == "__main__":
    nb_h1, nb_h2, nb_h3 = 8, 8, 32
    B = 4  # 2 pairs of 14x14 single-channel images (pairing requires even batch)

    key = jax.random.PRNGKey(0)
    kx, kp = jax.random.split(key)
    x = jax.random.normal(kx, (B, 1, IMG, IMG), dtype=jnp.float32)
    params = init_params(kp, nb_h1, nb_h2, nb_h3)
    wpack, offs, dims = prepare_params(params)

    fwd = jax.jit(functools.partial(net_small_all_forward, offs=offs, dims=dims))
    x_classes, x_out = fwd(x, wpack)
    jax.block_until_ready((x_classes, x_out))

    ref_c, ref_o = reference_forward(x, params)
    assert x_classes.shape == (B, NCLS) and x_out.shape == (B // 2, 2)
    assert jnp.allclose(x_classes, ref_c, atol=1e-2, rtol=1e-2), (
        float(jnp.max(jnp.abs(x_classes - ref_c))))
    assert jnp.allclose(x_out, ref_o, atol=1e-2, rtol=1e-2), (
        float(jnp.max(jnp.abs(x_out - ref_o))))

    print("KERNEL_OK")
</pallas_src>

<mosaic_0001>
module attributes {stable_mosaic.version = 11 : i64} {
  func.func @_fused_kernel(%arg0: memref<800x32xf32, #tpu.memory_space<vmem>>, %arg1: memref<592x32xf32, #tpu.memory_space<vmem>>, %arg2: memref<4x10xf32, #tpu.memory_space<vmem>>, %arg3: memref<2x2xf32, #tpu.memory_space<vmem>>, %arg4: memref<800x8xf32, #tpu.memory_space<vmem>>, %arg5: memref<648x8xf32, #tpu.memory_space<vmem>>, %arg6: memref<488x8xf32, #tpu.memory_space<vmem>>) attributes {dimension_semantics = [], scalar_prefetch = 0 : i64, scratch_operands = 3 : i64, tpu.core_type = #tpu.core_type<tc>} {
    %c0 = arith.constant 0 : index
    %c0_0 = arith.constant 0 : index
    %0 = vector.load %arg1[%c0, %c0_0] : memref<592x32xf32, #tpu.memory_space<vmem>>, vector<32x8xf32>
    %c0_1 = arith.constant 0 : index
    %c0_2 = arith.constant 0 : index
    %1 = vector.load %arg0[%c0_1, %c0_2] : memref<800x32xf32, #tpu.memory_space<vmem>>, vector<160x32xf32>
    %cst = arith.constant dense<0.000000e+00> : vector<160x8xf32>
    %2 = tpu.matmul %1, %0, %cst {dimension_numbers = #tpu.dot_dimension_numbers<[1], [0], [0], [1], [0, 0, 1, 1], [], []>} : vector<160x32xf32>, vector<32x8xf32>, vector<160x8xf32> -> vector<160x8xf32>
    %c0_3 = arith.constant 0 : index
    %c0_4 = arith.constant 0 : index
    %3 = vector.load %arg4[%c0_3, %c0_4] : memref<800x8xf32, #tpu.memory_space<vmem>>, vector<160x8xf32>
    tpu.vector_store %arg4[%c0_3, %c0_4], %2 {strides = array<i32>} : memref<800x8xf32, #tpu.memory_space<vmem>>, vector<160x8xf32>,
    %c160 = arith.constant 160 : index
    %c0_5 = arith.constant 0 : index
    %4 = vector.load %arg0[%c160, %c0_5] : memref<800x32xf32, #tpu.memory_space<vmem>>, vector<160x32xf32>
    %cst_6 = arith.constant dense<0.000000e+00> : vector<160x8xf32>
    %5 = tpu.matmul %4, %0, %cst_6 {dimension_numbers = #tpu.dot_dimension_numbers<[1], [0], [0], [1], [0, 0, 1, 1], [], []>} : vector<160x32xf32>, vector<32x8xf32>, vector<160x8xf32> -> vector<160x8xf32>
    %c160_7 = arith.constant 160 : index
    %c0_8 = arith.constant 0 : index
    %6 = vector.load %arg4[%c160_7, %c0_8] : memref<800x8xf32, #tpu.memory_space<vmem>>, vector<160x8xf32>
    tpu.vector_store %arg4[%c160_7, %c0_8], %5 {strides = array<i32>} : memref<800x8xf32, #tpu.memory_space<vmem>>, vector<160x8xf32>,
    %c320 = arith.constant 320 : index
    %c0_9 = arith.constant 0 : index
    %7 = vector.load %arg0[%c320, %c0_9] : memref<800x32xf32, #tpu.memory_space<vmem>>, vector<160x32xf32>
    %cst_10 = arith.constant dense<0.000000e+00> : vector<160x8xf32>
    %8 = tpu.matmul %7, %0, %cst_10 {dimension_numbers = #tpu.dot_dimension_numbers<[1], [0], [0], [1], [0, 0, 1, 1], [], []>} : vector<160x32xf32>, vector<32x8xf32>, vector<160x8xf32> -> vector<160x8xf32>
    %c320_11 = arith.constant 320 : index
    %c0_12 = arith.constant 0 : index
    %9 = vector.load %arg4[%c320_11, %c0_12] : memref<800x8xf32, #tpu.memory_space<vmem>>, vector<160x8xf32>
    tpu.vector_store %arg4[%c320_11, %c0_12], %8 {strides = array<i32>} : memref<800x8xf32, #tpu.memory_space<vmem>>, vector<160x8xf32>,
    %c480 = arith.constant 480 : index
    %c0_13 = arith.constant 0 : index
    %10 = vector.load %arg0[%c480, %c0_13] : memref<800x32xf32, #tpu.memory_space<vmem>>, vector<160x32xf32>
    %cst_14 = arith.constant dense<0.000000e+00> : vector<160x8xf32>
    %11 = tpu.matmul %10, %0, %cst_14 {dimension_numbers = #tpu.dot_dimension_numbers<[1], [0], [0], [1], [0, 0, 1, 1], [], []>} : vector<160x32xf32>, vector<32x8xf32>, vector<160x8xf32> -> vector<160x8xf32>
    %c480_15 = arith.constant 480 : index
    %c0_16 = arith.constant 0 : index
    %12 = vector.load %arg4[%c480_15, %c0_16] : memref<800x8xf32, #tpu.memory_space<vmem>>, vector<160x8xf32>
    tpu.vector_store %arg4[%c480_15, %c0_16], %11 {strides = array<i32>} : memref<800x8xf32, #tpu.memory_space<vmem>>, vector<160x8xf32>,
    %c640 = arith.constant 640 : index
    %c0_17 = arith.constant 0 : index
    %13 = vector.load %arg0[%c640, %c0_17] : memref<800x32xf32, #tpu.memory_space<vmem>>, vector<160x32xf32>
    %cst_18 = arith.constant dense<0.000000e+00> : vector<160x8xf32>
    %14 = tpu.matmul %13, %0, %cst_18 {dimension_numbers = #tpu.dot_dimension_numbers<[1], [0], [0], [1], [0, 0, 1, 1], [], []>} : vector<160x32xf32>, vector<32x8xf32>, vector<160x8xf32> -> vector<160x8xf32>
    %c640_19 = arith.constant 640 : index
    %c0_20 = arith.constant 0 : index
    %15 = vector.load %arg4[%c640_19, %c0_20] : memref<800x8xf32, #tpu.memory_space<vmem>>, vector<160x8xf32>
    tpu.vector_store %arg4[%c640_19, %c0_20], %14 {strides = array<i32>} : memref<800x8xf32, #tpu.memory_space<vmem>>, vector<160x8xf32>,
    %c0_21 = arith.constant 0 : index
    %c0_22 = arith.constant 0 : index
    %16 = vector.load %arg4[%c0_21, %c0_22] : memref<800x8xf32, #tpu.memory_space<vmem>>, vector<72x8xf32>
    %c8 = arith.constant 8 : index
    %c0_23 = arith.constant 0 : index
    %17 = vector.load %arg4[%c8, %c0_23] : memref<800x8xf32, #tpu.memory_space<vmem>>, vector<72x8xf32>
    %18 = arith.maximumf %16, %17 : vector<72x8xf32>
    %c80 = arith.constant 80 : index
    %c0_24 = arith.constant 0 : index
    %19 = vector.load %arg4[%c80, %c0_24] : memref<800x8xf32, #tpu.memory_space<vmem>>, vector<72x8xf32>
    %c88 = arith.constant 88 : index
    %c0_25 = arith.constant 0 : index
    %20 = vector.load %arg4[%c88, %c0_25] : memref<800x8xf32, #tpu.memory_space<vmem>>, vector<72x8xf32>
    %21 = arith.maximumf %19, %20 : vector<72x8xf32>
    %22 = arith.maximumf %18, %21 : vector<72x8xf32>
    %cst_26 = arith.constant 0.000000e+00 : f32
    %23 = vector.broadcast %cst_26 : f32 to vector<72x8xf32>
    %24 = arith.maximumf %22, %23 : vector<72x8xf32>
    %c0_27 = arith.constant 0 : index
    %c0_28 = arith.constant 0 : index
    %25 = vector.load %arg5[%c0_27, %c0_28] : memref<648x8xf32, #tpu.memory_space<vmem>>, vector<72x8xf32>
    tpu.vector_store %arg5[%c0_27, %c0_28], %24 {strides = array<i32>} : memref<648x8xf32, #tpu.memory_space<vmem>>, vector<72x8xf32>,
    %c80_29 = arith.constant 80 : index
    %c0_30 = arith.constant 0 : index
    %26 = vector.load %arg4[%c80_29, %c0_30] : memref<800x8xf32, #tpu.memory_space<vmem>>, vector<72x8xf32>
    %c88_31 = arith.constant 88 : index
    %c0_32 = arith.constant 0 : index
    %27 = vector.load %arg4[%c88_31, %c0_32] : memref<800x8xf32, #tpu.memory_space<vmem>>, vector<72x8xf32>
    %28 = arith.maximumf %26, %27 : vector<72x8xf32>
    %c160_33 = arith.constant 160 : index
    %c0_34 = arith.constant 0 : index
    %29 = vector.load %arg4[%c160_33, %c0_34] : memref<800x8xf32, #tpu.memory_space<vmem>>, vector<72x8xf32>
    %c168 = arith.constant 168 : index
    %c0_35 = arith.constant 0 : index
    %30 = vector.load %arg4[%c168, %c0_35] : memref<800x8xf32, #tpu.memory_space<vmem>>, vector<72x8xf32>
    %31 = arith.maximumf %29, %30 : vector<72x8xf32>
    %32 = arith.maximumf %28, %31 : vector<72x8xf32>
    %cst_36 = arith.constant 0.000000e+00 : f32
    %33 = vector.broadcast %cst_36 : f32 to vector<72x8xf32>
    %34 = arith.maximumf %32, %33 : vector<72x8xf32>
    %c72 = arith.constant 72 : index
    %c0_37 = arith.constant 0 : index
    %35 = vector.load %arg5[%c72, %c0_37] : memref<648x8xf32, #tpu.memory_space<vmem>>, vector<72x8xf32>
    tpu.vector_store %arg5[%c72, %c0_37], %34 {strides = array<i32>} : memref<648x8xf32, #tpu.memory_space<vmem>>, vector<72x8xf32>,
    %c160_38 = arith.constant 160 : index
    %c0_39 = arith.constant 0 : index
    %36 = vector.load %arg4[%c160_38, %c0_39] : memref<800x8xf32, #tpu.memory_space<vmem>>, vector<72x8xf32>
    %c168_40 = arith.constant 168 : index
    %c0_41 = arith.constant 0 : index
    %37 = vector.load %arg4[%c168_40, %c0_41] : memref<800x8xf32, #tpu.memory_space<vmem>>, vector<72x8xf32>
    %38 = arith.maximumf %36, %37 : vector<72x8xf32>
    %c240 = arith.constant 240 : index
    %c0_42 = arith.constant 0 : index
    %39 = vector.load %arg4[%c240, %c0_42] : memref<800x8xf32, #tpu.memory_space<vmem>>, vector<72x8xf32>
    %c248 = arith.constant 248 : index
    %c0_43 = arith.constant 0 : index
    %40 = vector.load %arg4[%c248, %c0_43] : memref<800x8xf32, #tpu.memory_space<vmem>>, vector<72x8xf32>
    %41 = arith.maximumf %39, %40 : vector<72x8xf32>
    %42 = arith.maximumf %38, %41 : vector<72x8xf32>
    %cst_44 = arith.constant 0.000000e+00 : f32
    %43 = vector.broadcast %cst_44 : f32 to vector<72x8xf32>
    %44 = arith.maximumf %42, %43 : vector<72x8xf32>
    %c144 = arith.constant 144 : index
    %c0_45 = arith.constant 0 : index
    %45 = vector.load %arg5[%c144, %c0_45] : memref<648x8xf32, #tpu.memory_space<vmem>>, vector<72x8xf32>
    tpu.vector_store %arg5[%c144, %c0_45], %44 {strides = array<i32>} : memref<648x8xf32, #tpu.memory_space<vmem>>, vector<72x8xf32>,
    %c240_46 = arith.constant 240 : index
    %c0_47 = arith.constant 0 : index
    %46 = vector.load %arg4[%c240_46, %c0_47] : memref<800x8xf32, #tpu.memory_space<vmem>>, vector<72x8xf32>
    %c248_48 = arith.constant 248 : index
    %c0_49 = arith.constant 0 : index
    %47 = vector.load %arg4[%c248_48, %c0_49] : memref<800x8xf32, #tpu.memory_space<vmem>>, vector<72x8xf32>
    %48 = arith.maximumf %46, %47 : vector<72x8xf32>
    %c320_50 = arith.constant 320 : index
    %c0_51 = arith.constant 0 : index
    %49 = vector.load %arg4[%c320_50, %c0_51] : memref<800x8xf32, #tpu.memory_space<vmem>>, vector<72x8xf32>
    %c328 = arith.constant 328 : index
    %c0_52 = arith.constant 0 : index
    %50 = vector.load %arg4[%c328, %c0_52] : memref<800x8xf32, #tpu.memory_space<vmem>>, vector<72x8xf32>
    %51 = arith.maximumf %49, %50 : vector<72x8xf32>
    %52 = arith.maximumf %48, %51 : vector<72x8xf32>
    %cst_53 = arith.constant 0.000000e+00 : f32
    %53 = vector.broadcast %cst_53 : f32 to vector<72x8xf32>
    %54 = arith.maximumf %52, %53 : vector<72x8xf32>
    %c216 = arith.constant 216 : index
    %c0_54 = arith.constant 0 : index
    %55 = vector.load %arg5[%c216, %c0_54] : memref<648x8xf32, #tpu.memory_space<vmem>>, vector<72x8xf32>
    tpu.vector_store %arg5[%c216, %c0_54], %54 {strides = array<i32>} : memref<648x8xf32, #tpu.memory_space<vmem>>, vector<72x8xf32>,
    %c320_55 = arith.constant 320 : index
    %c0_56 = arith.constant 0 : index
    %56 = vector.load %arg4[%c320_55, %c0_56] : memref<800x8xf32, #tpu.memory_space<vmem>>, vector<72x8xf32>
    %c328_57 = arith.constant 328 : index
    %c0_58 = arith.constant 0 : index
    %57 = vector.load %arg4[%c328_57, %c0_58] : memref<800x8xf32, #tpu.memory_space<vmem>>, vector<72x8xf32>
    %58 = arith.maximumf %56, %57 : vector<72x8xf32>
    %c400 = arith.constant 400 : index
    %c0_59 = arith.constant 0 : index
    %59 = vector.load %arg4[%c400, %c0_59] : memref<800x8xf32, #tpu.memory_space<vmem>>, vector<72x8xf32>
    %c408 = arith.constant 408 : index
    %c0_60 = arith.constant 0 : index
    %60 = vector.load %arg4[%c408, %c0_60] : memref<800x8xf32, #tpu.memory_space<vmem>>, vector<72x8xf32>
    %61 = arith.maximumf %59, %60 : vector<72x8xf32>
    %62 = arith.maximumf %58, %61 : vector<72x8xf32>
    %cst_61 = arith.constant 0.000000e+00 : f32
    %63 = vector.broadcast %cst_61 : f32 to vector<72x8xf32>
    %64 = arith.maximumf %62, %63 : vector<72x8xf32>
    %c288 = arith.constant 288 : index
    %c0_62 = arith.constant 0 : index
    %65 = vector.load %arg5[%c288, %c0_62] : memref<648x8xf32, #tpu.memory_space<vmem>>, vector<72x8xf32>
    tpu.vector_store %arg5[%c288, %c0_62], %64 {strides = array<i32>} : memref<648x8xf32, #tpu.memory_space<vmem>>, vector<72x8xf32>,
    %c400_63 = arith.constant 400 : index
    %c0_64 = arith.constant 0 : index
    %66 = vector.load %arg4[%c400_63, %c0_64] : memref<800x8xf32, #tpu.memory_space<vmem>>, vector<72x8xf32>
    %c408_65 = arith.constant 408 : index
    %c0_66 = arith.constant 0 : index
    %67 = vector.load %arg4[%c408_65, %c0_66] : memref<800x8xf32, #tpu.memory_space<vmem>>, vector<72x8xf32>
    %68 = arith.maximumf %66, %67 : vector<72x8xf32>
    %c480_67 = arith.constant 480 : index
    %c0_68 = arith.constant 0 : index
    %69 = vector.load %arg4[%c480_67, %c0_68] : memref<800x8xf32, #tpu.memory_space<vmem>>, vector<72x8xf32>
    %c488 = arith.constant 488 : index
    %c0_69 = arith.constant 0 : index
    %70 = vector.load %arg4[%c488, %c0_69] : memref<800x8xf32, #tpu.memory_space<vmem>>, vector<72x8xf32>
    %71 = arith.maximumf %69, %70 : vector<72x8xf32>
    %72 = arith.maximumf %68, %71 : vector<72x8xf32>
    %cst_70 = arith.constant 0.000000e+00 : f32
    %73 = vector.broadcast %cst_70 : f32 to vector<72x8xf32>
    %74 = arith.maximumf %72, %73 : vector<72x8xf32>
    %c360 = arith.constant 360 : index
    %c0_71 = arith.constant 0 : index
    %75 = vector.load %arg5[%c360, %c0_71] : memref<648x8xf32, #tpu.memory_space<vmem>>, vector<72x8xf32>
    tpu.vector_store %arg5[%c360, %c0_71], %74 {strides = array<i32>} : memref<648x8xf32, #tpu.memory_space<vmem>>, vector<72x8xf32>,
    %c480_72 = arith.constant 480 : index
    %c0_73 = arith.constant 0 : index
    %76 = vector.load %arg4[%c480_72, %c0_73] : memref<800x8xf32, #tpu.memory_space<vmem>>, vector<72x8xf32>
    %c488_74 = arith.constant 488 : index
    %c0_75 = arith.constant 0 : index
    %77 = vector.load %arg4[%c488_74, %c0_75] : memref<800x8xf32, #tpu.memory_space<vmem>>, vector<72x8xf32>
    %78 = arith.maximumf %76, %77 : vector<72x8xf32>
    %c560 = arith.constant 560 : index
    %c0_76 = arith.constant 0 : index
    %79 = vector.load %arg4[%c560, %c0_76] : memref<800x8xf32, #tpu.memory_space<vmem>>, vector<72x8xf32>
    %c568 = arith.constant 568 : index
    %c0_77 = arith.constant 0 : index
    %80 = vector.load %arg4[%c568, %c0_77] : memref<800x8xf32, #tpu.memory_space<vmem>>, vector<72x8xf32>
    %81 = arith.maximumf %79, %80 : vector<72x8xf32>
    %82 = arith.maximumf %78, %81 : vector<72x8xf32>
    %cst_78 = arith.constant 0.000000e+00 : f32
    %83 = vector.broadcast %cst_78 : f32 to vector<72x8xf32>
    %84 = arith.maximumf %82, %83 : vector<72x8xf32>
    %c432 = arith.constant 432 : index
    %c0_79 = arith.constant 0 : index
    %85 = vector.load %arg5[%c432, %c0_79] : memref<648x8xf32, #tpu.memory_space<vmem>>, vector<72x8xf32>
    tpu.vector_store %arg5[%c432, %c0_79], %84 {strides = array<i32>} : memref<648x8xf32, #tpu.memory_space<vmem>>, vector<72x8xf32>,
    %c560_80 = arith.constant 560 : index
    %c0_81 = arith.constant 0 : index
    %86 = vector.load %arg4[%c560_80, %c0_81] : memref<800x8xf32, #tpu.memory_space<vmem>>, vector<72x8xf32>
    %c568_82 = arith.constant 568 : index
    %c0_83 = arith.constant 0 : index
    %87 = vector.load %arg4[%c568_82, %c0_83] : memref<800x8xf32, #tpu.memory_space<vmem>>, vector<72x8xf32>
    %88 = arith.maximumf %86, %87 : vector<72x8xf32>
    %c640_84 = arith.constant 640 : index
    %c0_85 = arith.constant 0 : index
    %89 = vector.load %arg4[%c640_84, %c0_85] : memref<800x8xf32, #tpu.memory_space<vmem>>, vector<72x8xf32>
    %c648 = arith.constant 648 : index
    %c0_86 = arith.constant 0 : index
    %90 = vector.load %arg4[%c648, %c0_86] : memref<800x8xf32, #tpu.memory_space<vmem>>, vector<72x8xf32>
    %91 = arith.maximumf %89, %90 : vector<72x8xf32>
    %92 = arith.maximumf %88, %91 : vector<72x8xf32>
    %cst_87 = arith.constant 0.000000e+00 : f32
    %93 = vector.broadcast %cst_87 : f32 to vector<72x8xf32>
    %94 = arith.maximumf %92, %93 : vector<72x8xf32>
    %c504 = arith.constant 504 : index
    %c0_88 = arith.constant 0 : index
    %95 = vector.load %arg5[%c504, %c0_88] : memref<648x8xf32, #tpu.memory_space<vmem>>, vector<72x8xf32>
    tpu.vector_store %arg5[%c504, %c0_88], %94 {strides = array<i32>} : memref<648x8xf32, #tpu.memory_space<vmem>>, vector<72x8xf32>,
    %c640_89 = arith.constant 640 : index
    %c0_90 = arith.constant 0 : index
    %96 = vector.load %arg4[%c640_89, %c0_90] : memref<800x8xf32, #tpu.memory_space<vmem>>, vector<72x8xf32>
    %c648_91 = arith.constant 648 : index
    %c0_92 = arith.constant 0 : index
    %97 = vector.load %arg4[%c648_91, %c0_92] : memref<800x8xf32, #tpu.memory_space<vmem>>, vector<72x8xf32>
    %98 = arith.maximumf %96, %97 : vector<72x8xf32>
    %c720 = arith.constant 720 : index
    %c0_93 = arith.constant 0 : index
    %99 = vector.load %arg4[%c720, %c0_93] : memref<800x8xf32, #tpu.memory_space<vmem>>, vector<72x8xf32>
    %c728 = arith.constant 728 : index
    %c0_94 = arith.constant 0 : index
    %100 = vector.load %arg4[%c728, %c0_94] : memref<800x8xf32, #tpu.memory_space<vmem>>, vector<72x8xf32>
    %101 = arith.maximumf %99, %100 : vector<72x8xf32>
    %102 = arith.maximumf %98, %101 : vector<72x8xf32>
    %cst_95 = arith.constant 0.000000e+00 : f32
    %103 = vector.broadcast %cst_95 : f32 to vector<72x8xf32>
    %104 = arith.maximumf %102, %103 : vector<72x8xf32>
    %c576 = arith.constant 576 : index
    %c0_96 = arith.constant 0 : index
    %105 = vector.load %arg5[%c576, %c0_96] : memref<648x8xf32, #tpu.memory_space<vmem>>, vector<72x8xf32>
    tpu.vector_store %arg5[%c576, %c0_96], %104 {strides = array<i32>} : memref<648x8xf32, #tpu.memory_space<vmem>>, vector<72x8xf32>,
    %c32 = arith.constant 32 : index
    %c0_97 = arith.constant 0 : index
    %106 = vector.load %arg1[%c32, %c0_97] : memref<592x32xf32, #tpu.memory_space<vmem>>, vector<72x8xf32>
    %c104 = arith.constant 104 : index
    %c0_98 = arith.constant 0 : index
    %107 = vector.load %arg1[%c104, %c0_98] : memref<592x32xf32, #tpu.memory_space<vmem>>, vector<1x8xf32>
    %c0_99 = arith.constant 0 : index
    %c0_100 = arith.constant 0 : index
    %108 = vector.load %arg5[%c0_99, %c0_100] : memref<648x8xf32, #tpu.memory_space<vmem>>, vector<168x8xf32>
    %c8_101 = arith.constant 8 : index
    %c0_102 = arith.constant 0 : index
    %109 = vector.load %arg5[%c8_101, %c0_102] : memref<648x8xf32, #tpu.memory_space<vmem>>, vector<168x8xf32>
    %c16 = arith.constant 16 : index
    %c0_103 = arith.constant 0 : index
    %110 = vector.load %arg5[%c16, %c0_103] : memref<648x8xf32, #tpu.memory_space<vmem>>, vector<168x8xf32>
    %c72_104 = arith.constant 72 : index
    %c0_105 = arith.constant 0 : index
    %111 = vector.load %arg5[%c72_104, %c0_105] : memref<648x8xf32, #tpu.memory_space<vmem>>, vector<168x8xf32>
    %c80_106 = arith.constant 80 : index
    %c0_107 = arith.constant 0 : index
    %112 = vector.load %arg5[%c80_106, %c0_107] : memref<648x8xf32, #tpu.memory_space<vmem>>, vector<168x8xf32>
    %c88_108 = arith.constant 88 : index
    %c0_109 = arith.constant 0 : index
    %113 = vector.load %arg5[%c88_108, %c0_109] : memref<648x8xf32, #tpu.memory_space<vmem>>, vector<168x8xf32>
    %c144_110 = arith.constant 144 : index
    %c0_111 = arith.constant 0 : index
    %114 = vector.load %arg5[%c144_110, %c0_111] : memref<648x8xf32, #tpu.memory_space<vmem>>, vector<168x8xf32>
    %c152 = arith.constant 152 : index
    %c0_112 = arith.constant 0 : index
    %115 = vector.load %arg5[%c152, %c0_112] : memref<648x8xf32, #tpu.memory_space<vmem>>, vector<168x8xf32>
    %c160_113 = arith.constant 160 : index
    %c0_114 = arith.constant 0 : index
    %116 = vector.load %arg5[%c160_113, %c0_114] : memref<648x8xf32, #tpu.memory_space<vmem>>, vector<168x8xf32>
    %117 = tpu.concatenate %108, %109, %110, %111, %112, %113, %114, %115, %116 in 1 : vector<168x8xf32>, vector<168x8xf32>, vector<168x8xf32>, vector<168x8xf32>, vector<168x8xf32>, vector<168x8xf32>, vector<168x8xf32>, vector<168x8xf32>, vector<168x8xf32> -> vector<168x72xf32>
    %cst_115 = arith.constant dense<0.000000e+00> : vector<168x8xf32>
    %118 = tpu.matmul %117, %106, %cst_115 {dimension_numbers = #tpu.dot_dimension_numbers<[1], [0], [0], [1], [0, 0, 1, 1], [], []>} : vector<168x72xf32>, vector<72x8xf32>, vector<168x8xf32> -> vector<168x8xf32>
    %119 = vector.broadcast %107 : vector<1x8xf32> to vector<168x8xf32>
    %120 = arith.addf %118, %119 : vector<168x8xf32>
    %cst_116 = arith.constant 0.000000e+00 : f32
    %121 = vector.broadcast %cst_116 : f32 to vector<168x8xf32>
    %122 = arith.maximumf %120, %121 : vector<168x8xf32>
    %c0_117 = arith.constant 0 : index
    %c0_118 = arith.constant 0 : index
    %123 = vector.load %arg6[%c0_117, %c0_118] : memref<488x8xf32, #tpu.memory_space<vmem>>, vector<168x8xf32>
    tpu.vector_store %arg6[%c0_117, %c0_118], %122 {strides = array<i32>} : memref<488x8xf32, #tpu.memory_space<vmem>>, vector<168x8xf32>,
    %c168_119 = arith.constant 168 : index
    %c0_120 = arith.constant 0 : index
    %124 = vector.load %arg5[%c168_119, %c0_120] : memref<648x8xf32, #tpu.memory_space<vmem>>, vector<168x8xf32>
    %c176 = arith.constant 176 : index
    %c0_121 = arith.constant 0 : index
    %125 = vector.load %arg5[%c176, %c0_121] : memref<648x8xf32, #tpu.memory_space<vmem>>, vector<168x8xf32>
    %c184 = arith.constant 184 : index
    %c0_122 = arith.constant 0 : index
    %126 = vector.load %arg5[%c184, %c0_122] : memref<648x8xf32, #tpu.memory_space<vmem>>, vector<168x8xf32>
    %c240_123 = arith.constant 240 : index
    %c0_124 = arith.constant 0 : index
    %127 = vector.load %arg5[%c240_123, %c0_124] : memref<648x8xf32, #tpu.memory_space<vmem>>, vector<168x8xf32>
    %c248_125 = arith.constant 248 : index
    %c0_126 = arith.constant 0 : index
    %128 = vector.load %arg5[%c248_125, %c0_126] : memref<648x8xf32, #tpu.memory_space<vmem>>, vector<168x8xf32>
    %c256 = arith.constant 256 : index
    %c0_127 = arith.constant 0 : index
    %129 = vector.load %arg5[%c256, %c0_127] : memref<648x8xf32, #tpu.memory_space<vmem>>, vector<168x8xf32>
    %c312 = arith.constant 312 : index
    %c0_128 = arith.constant 0 : index
    %130 = vector.load %arg5[%c312, %c0_128] : memref<648x8xf32, #tpu.memory_space<vmem>>, vector<168x8xf32>
    %c320_129 = arith.constant 320 : index
    %c0_130 = arith.constant 0 : index
    %131 = vector.load %arg5[%c320_129, %c0_130] : memref<648x8xf32, #tpu.memory_space<vmem>>, vector<168x8xf32>
    %c328_131 = arith.constant 328 : index
    %c0_132 = arith.constant 0 : index
    %132 = vector.load %arg5[%c328_131, %c0_132] : memref<648x8xf32, #tpu.memory_space<vmem>>, vector<168x8xf32>
    %133 = tpu.concatenate %124, %125, %126, %127, %128, %129, %130, %131, %132 in 1 : vector<168x8xf32>, vector<168x8xf32>, vector<168x8xf32>, vector<168x8xf32>, vector<168x8xf32>, vector<168x8xf32>, vector<168x8xf32>, vector<168x8xf32>, vector<168x8xf32> -> vector<168x72xf32>
    %cst_133 = arith.constant dense<0.000000e+00> : vector<168x8xf32>
    %134 = tpu.matmul %133, %106, %cst_133 {dimension_numbers = #tpu.dot_dimension_numbers<[1], [0], [0], [1], [0, 0, 1, 1], [], []>} : vector<168x72xf32>, vector<72x8xf32>, vector<168x8xf32> -> vector<168x8xf32>
    %135 = vector.broadcast %107 : vector<1x8xf32> to vector<168x8xf32>
    %136 = arith.addf %134, %135 : vector<168x8xf32>
    %cst_134 = arith.constant 0.000000e+00 : f32
    %137 = vector.broadcast %cst_134 : f32 to vector<168x8xf32>
    %138 = arith.maximumf %136, %137 : vector<168x8xf32>
    %c168_135 = arith.constant 168 : index
    %c0_136 = arith.constant 0 : index
    %139 = vector.load %arg6[%c168_135, %c0_136] : memref<488x8xf32, #tpu.memory_space<vmem>>, vector<168x8xf32>
    tpu.vector_store %arg6[%c168_135, %c0_136], %138 {strides = array<i32>} : memref<488x8xf32, #tpu.memory_space<vmem>>, vector<168x8xf32>,
    %c336 = arith.constant 336 : index
    %c0_137 = arith.constant 0 : index
    %140 = vector.load %arg5[%c336, %c0_137] : memref<648x8xf32, #tpu.memory_space<vmem>>, vector<152x8xf32>
    %c344 = arith.constant 344 : index
    %c0_138 = arith.constant 0 : index
    %141 = vector.load %arg5[%c344, %c0_138] : memref<648x8xf32, #tpu.memory_space<vmem>>, vector<152x8xf32>
    %c352 = arith.constant 352 : index
    %c0_139 = arith.constant 0 : index
    %142 = vector.load %arg5[%c352, %c0_139] : memref<648x8xf32, #tpu.memory_space<vmem>>, vector<152x8xf32>
    %c408_140 = arith.constant 408 : index
    %c0_141 = arith.constant 0 : index
    %143 = vector.load %arg5[%c408_140, %c0_141] : memref<648x8xf32, #tpu.memory_space<vmem>>, vector<152x8xf32>
    %c416 = arith.constant 416 : index
    %c0_142 = arith.constant 0 : index
    %144 = vector.load %arg5[%c416, %c0_142] : memref<648x8xf32, #tpu.memory_space<vmem>>, vector<152x8xf32>
    %c424 = arith.constant 424 : index
    %c0_143 = arith.constant 0 : index
    %145 = vector.load %arg5[%c424, %c0_143] : memref<648x8xf32, #tpu.memory_space<vmem>>, vector<152x8xf32>
    %c480_144 = arith.constant 480 : index
    %c0_145 = arith.constant 0 : index
    %146 = vector.load %arg5[%c480_144, %c0_145] : memref<648x8xf32, #tpu.memory_space<vmem>>, vector<152x8xf32>
    %c488_146 = arith.constant 488 : index
    %c0_147 = arith.constant 0 : index
    %147 = vector.load %arg5[%c488_146, %c0_147] : memref<648x8xf32, #tpu.memory_space<vmem>>, vector<152x8xf32>
    %c496 = arith.constant 496 : index
    %c0_148 = arith.constant 0 : index
    %148 = vector.load %arg5[%c496, %c0_148] : memref<648x8xf32, #tpu.memory_space<vmem>>, vector<152x8xf32>
    %149 = tpu.concatenate %140, %141, %142, %143, %144, %145, %146, %147, %148 in 1 : vector<152x8xf32>, vector<152x8xf32>, vector<152x8xf32>, vector<152x8xf32>, vector<152x8xf32>, vector<152x8xf32>, vector<152x8xf32>, vector<152x8xf32>, vector<152x8xf32> -> vector<152x72xf32>
    %cst_149 = arith.constant dense<0.000000e+00> : vector<152x8xf32>
    %150 = tpu.matmul %149, %106, %cst_149 {dimension_numbers = #tpu.dot_dimension_numbers<[1], [0], [0], [1], [0, 0, 1, 1], [], []>} : vector<152x72xf32>, vector<72x8xf32>, vector<152x8xf32> -> vector<152x8xf32>
    %151 = vector.broadcast %107 : vector<1x8xf32> to vector<152x8xf32>
    %152 = arith.addf %150, %151 : vector<152x8xf32>
    %cst_150 = arith.constant 0.000000e+00 : f32
    %153 = vector.broadcast %cst_150 : f32 to vector<152x8xf32>
    %154 = arith.maximumf %152, %153 : vector<152x8xf32>
    %c336_151 = arith.constant 336 : index
    %c0_152 = arith.constant 0 : index
    %155 = vector.load %arg6[%c336_151, %c0_152] : memref<488x8xf32, #tpu.memory_space<vmem>>, vector<152x8xf32>
    tpu.vector_store %arg6[%c336_151, %c0_152], %154 {strides = array<i32>} : memref<488x8xf32, #tpu.memory_space<vmem>>, vector<152x8xf32>,
    %c112 = arith.constant 112 : index
    %c0_153 = arith.constant 0 : index
    %156 = vector.load %arg1[%c112, %c0_153] : memref<592x32xf32, #tpu.memory_space<vmem>>, vector<392x10xf32>
    %c504_154 = arith.constant 504 : index
    %c0_155 = arith.constant 0 : index
    %157 = vector.load %arg1[%c504_154, %c0_155] : memref<592x32xf32, #tpu.memory_space<vmem>>, vector<1x10xf32>
    %c0_156 = arith.constant 0 : index
    %c0_157 = arith.constant 0 : index
    %158 = vector.load %arg6[%c0_156, %c0_157] : memref<488x8xf32, #tpu.memory_space<vmem>>, vector<8x8xf32>
    %c8_158 = arith.constant 8 : index
    %c0_159 = arith.constant 0 : index
    %159 = vector.load %arg6[%c8_158, %c0_159] : memref<488x8xf32, #tpu.memory_space<vmem>>, vector<8x8xf32>
    %c16_160 = arith.constant 16 : index
    %c0_161 = arith.constant 0 : index
    %160 = vector.load %arg6[%c16_160, %c0_161] : memref<488x8xf32, #tpu.memory_space<vmem>>, vector<8x8xf32>
    %c24 = arith.constant 24 : index
    %c0_162 = arith.constant 0 : index
    %161 = vector.load %arg6[%c24, %c0_162] : memref<488x8xf32, #tpu.memory_space<vmem>>, vector<8x8xf32>
    %c32_163 = arith.constant 32 : index
    %c0_164 = arith.constant 0 : index
    %162 = vector.load %arg6[%c32_163, %c0_164] : memref<488x8xf32, #tpu.memory_space<vmem>>, vector<8x8xf32>
    %c40 = arith.constant 40 : index
    %c0_165 = arith.constant 0 : index
    %163 = vector.load %arg6[%c40, %c0_165] : memref<488x8xf32, #tpu.memory_space<vmem>>, vector<8x8xf32>
    %c48 = arith.constant 48 : index
    %c0_166 = arith.constant 0 : index
    %164 = vector.load %arg6[%c48, %c0_166] : memref<488x8xf32, #tpu.memory_space<vmem>>, vector<8x8xf32>
    %c72_167 = arith.constant 72 : index
    %c0_168 = arith.constant 0 : index
    %165 = vector.load %arg6[%c72_167, %c0_168] : memref<488x8xf32, #tpu.memory_space<vmem>>, vector<8x8xf32>
    %c80_169 = arith.constant 80 : index
    %c0_170 = arith.constant 0 : index
    %166 = vector.load %arg6[%c80_169, %c0_170] : memref<488x8xf32, #tpu.memory_space<vmem>>, vector<8x8xf32>
    %c88_171 = arith.constant 88 : index
    %c0_172 = arith.constant 0 : index
    %167 = vector.load %arg6[%c88_171, %c0_172] : memref<488x8xf32, #tpu.memory_space<vmem>>, vector<8x8xf32>
    %c96 = arith.constant 96 : index
    %c0_173 = arith.constant 0 : index
    %168 = vector.load %arg6[%c96, %c0_173] : memref<488x8xf32, #tpu.memory_space<vmem>>, vector<8x8xf32>
    %c104_174 = arith.constant 104 : index
    %c0_175 = arith.constant 0 : index
    %169 = vector.load %arg6[%c104_174, %c0_175] : memref<488x8xf32, #tpu.memory_space<vmem>>, vector<8x8xf32>
    %c112_176 = arith.constant 112 : index
    %c0_177 = arith.constant 0 : index
    %170 = vector.load %arg6[%c112_176, %c0_177] : memref<488x8xf32, #tpu.memory_space<vmem>>, vector<8x8xf32>
    %c120 = arith.constant 120 : index
    %c0_178 = arith.constant 0 : index
    %171 = vector.load %arg6[%c120, %c0_178] : memref<488x8xf32, #tpu.memory_space<vmem>>, vector<8x8xf32>
    %c144_179 = arith.constant 144 : index
    %c0_180 = arith.constant 0 : index
    %172 = vector.load %arg6[%c144_179, %c0_180] : memref<488x8xf32, #tpu.memory_space<vmem>>, vector<8x8xf32>
    %c152_181 = arith.constant 152 : index
    %c0_182 = arith.constant 0 : index
    %173 = vector.load %arg6[%c152_181, %c0_182] : memref<488x8xf32, #tpu.memory_space<vmem>>, vector<8x8xf32>
    %c160_183 = arith.constant 160 : index
    %c0_184 = arith.constant 0 : index
    %174 = vector.load %arg6[%c160_183, %c0_184] : memref<488x8xf32, #tpu.memory_space<vmem>>, vector<8x8xf32>
    %c168_185 = arith.constant 168 : index
    %c0_186 = arith.constant 0 : index
    %175 = vector.load %arg6[%c168_185, %c0_186] : memref<488x8xf32, #tpu.memory_space<vmem>>, vector<8x8xf32>
    %c176_187 = arith.constant 176 : index
    %c0_188 = arith.constant 0 : index
    %176 = vector.load %arg6[%c176_187, %c0_188] : memref<488x8xf32, #tpu.memory_space<vmem>>, vector<8x8xf32>
    %c184_189 = arith.constant 184 : index
    %c0_190 = arith.constant 0 : index
    %177 = vector.load %arg6[%c184_189, %c0_190] : memref<488x8xf32, #tpu.memory_space<vmem>>, vector<8x8xf32>
    %c192 = arith.constant 192 : index
    %c0_191 = arith.constant 0 : index
    %178 = vector.load %arg6[%c192, %c0_191] : memref<488x8xf32, #tpu.memory_space<vmem>>, vector<8x8xf32>
    %c216_192 = arith.constant 216 : index
    %c0_193 = arith.constant 0 : index
    %179 = vector.load %arg6[%c216_192, %c0_193] : memref<488x8xf32, #tpu.memory_space<vmem>>, vector<8x8xf32>
    %c224 = arith.constant 224 : index
    %c0_194 = arith.constant 0 : index
    %180 = vector.load %arg6[%c224, %c0_194] : memref<488x8xf32, #tpu.memory_space<vmem>>, vector<8x8xf32>
    %c232 = arith.constant 232 : index
    %c0_195 = arith.constant 0 : index
    %181 = vector.load %arg6[%c232, %c0_195] : memref<488x8xf32, #tpu.memory_space<vmem>>, vector<8x8xf32>
    %c240_196 = arith.constant 240 : index
    %c0_197 = arith.constant 0 : index
    %182 = vector.load %arg6[%c240_196, %c0_197] : memref<488x8xf32, #tpu.memory_space<vmem>>, vector<8x8xf32>
    %c248_198 = arith.constant 248 : index
    %c0_199 = arith.constant 0 : index
    %183 = vector.load %arg6[%c248_198, %c0_199] : memref<488x8xf32, #tpu.memory_space<vmem>>, vector<8x8xf32>
    %c256_200 = arith.constant 256 : index
    %c0_201 = arith.constant 0 : index
    %184 = vector.load %arg6[%c256_200, %c0_201] : memref<488x8xf32, #tpu.memory_space<vmem>>, vector<8x8xf32>
    %c264 = arith.constant 264 : index
    %c0_202 = arith.constant 0 : index
    %185 = vector.load %arg6[%c264, %c0_202] : memref<488x8xf32, #tpu.memory_space<vmem>>, vector<8x8xf32>
    %c288_203 = arith.constant 288 : index
    %c0_204 = arith.constant 0 : index
    %186 = vector.load %arg6[%c288_203, %c0_204] : memref<488x8xf32, #tpu.memory_space<vmem>>, vector<8x8xf32>
    %c296 = arith.constant 296 : index
    %c0_205 = arith.constant 0 : index
    %187 = vector.load %arg6[%c296, %c0_205] : memref<488x8xf32, #tpu.memory_space<vmem>>, vector<8x8xf32>
    %c304 = arith.constant 304 : index
    %c0_206 = arith.constant 0 : index
    %188 = vector.load %arg6[%c304, %c0_206] : memref<488x8xf32, #tpu.memory_space<vmem>>, vector<8x8xf32>
    %c312_207 = arith.constant 312 : index
    %c0_208 = arith.constant 0 : index
    %189 = vector.load %arg6[%c312_207, %c0_208] : memref<488x8xf32, #tpu.memory_space<vmem>>, vector<8x8xf32>
    %c320_209 = arith.constant 320 : index
    %c0_210 = arith.constant 0 : index
    %190 = vector.load %arg6[%c320_209, %c0_210] : memref<488x8xf32, #tpu.memory_space<vmem>>, vector<8x8xf32>
    %c328_211 = arith.constant 328 : index
    %c0_212 = arith.constant 0 : index
    %191 = vector.load %arg6[%c328_211, %c0_212] : memref<488x8xf32, #tpu.memory_space<vmem>>, vector<8x8xf32>
    %c336_213 = arith.constant 336 : index
    %c0_214 = arith.constant 0 : index
    %192 = vector.load %arg6[%c336_213, %c0_214] : memref<488x8xf32, #tpu.memory_space<vmem>>, vector<8x8xf32>
    %c360_215 = arith.constant 360 : index
    %c0_216 = arith.constant 0 : index
    %193 = vector.load %arg6[%c360_215, %c0_216] : memref<488x8xf32, #tpu.memory_space<vmem>>, vector<8x8xf32>
    %c368 = arith.constant 368 : index
    %c0_217 = arith.constant 0 : index
    %194 = vector.load %arg6[%c368, %c0_217] : memref<488x8xf32, #tpu.memory_space<vmem>>, vector<8x8xf32>
    %c376 = arith.constant 376 : index
    %c0_218 = arith.constant 0 : index
    %195 = vector.load %arg6[%c376, %c0_218] : memref<488x8xf32, #tpu.memory_space<vmem>>, vector<8x8xf32>
    %c384 = arith.constant 384 : index
    %c0_219 = arith.constant 0 : index
    %196 = vector.load %arg6[%c384, %c0_219] : memref<488x8xf32, #tpu.memory_space<vmem>>, vector<8x8xf32>
    %c392 = arith.constant 392 : index
    %c0_220 = arith.constant 0 : index
    %197 = vector.load %arg6[%c392, %c0_220] : memref<488x8xf32, #tpu.memory_space<vmem>>, vector<8x8xf32>
    %c400_221 = arith.constant 400 : index
    %c0_222 = arith.constant 0 : index
    %198 = vector.load %arg6[%c400_221, %c0_222] : memref<488x8xf32, #tpu.memory_space<vmem>>, vector<8x8xf32>
    %c408_223 = arith.constant 408 : index
    %c0_224 = arith.constant 0 : index
    %199 = vector.load %arg6[%c408_223, %c0_224] : memref<488x8xf32, #tpu.memory_space<vmem>>, vector<8x8xf32>
    %c432_225 = arith.constant 432 : index
    %c0_226 = arith.constant 0 : index
    %200 = vector.load %arg6[%c432_225, %c0_226] : memref<488x8xf32, #tpu.memory_space<vmem>>, vector<8x8xf32>
    %c440 = arith.constant 440 : index
    %c0_227 = arith.constant 0 : index
    %201 = vector.load %arg6[%c440, %c0_227] : memref<488x8xf32, #tpu.memory_space<vmem>>, vector<8x8xf32>
    %c448 = arith.constant 448 : index
    %c0_228 = arith.constant 0 : index
    %202 = vector.load %arg6[%c448, %c0_228] : memref<488x8xf32, #tpu.memory_space<vmem>>, vector<8x8xf32>
    %c456 = arith.constant 456 : index
    %c0_229 = arith.constant 0 : index
    %203 = vector.load %arg6[%c456, %c0_229] : memref<488x8xf32, #tpu.memory_space<vmem>>, vector<8x8xf32>
    %c464 = arith.constant 464 : index
    %c0_230 = arith.constant 0 : index
    %204 = vector.load %arg6[%c464, %c0_230] : memref<488x8xf32, #tpu.memory_space<vmem>>, vector<8x8xf32>
    %c472 = arith.constant 472 : index
    %c0_231 = arith.constant 0 : index
    %205 = vector.load %arg6[%c472, %c0_231] : memref<488x8xf32, #tpu.memory_space<vmem>>, vector<8x8xf32>
    %c480_232 = arith.constant 480 : index
    %c0_233 = arith.constant 0 : index
    %206 = vector.load %arg6[%c480_232, %c0_233] : memref<488x8xf32, #tpu.memory_space<vmem>>, vector<8x8xf32>
    %207 = tpu.concatenate %158, %159, %160, %161, %162, %163, %164, %165, %166, %167, %168, %169, %170, %171, %172, %173 in 1 : vector<8x8xf32>, vector<8x8xf32>, vector<8x8xf32>, vector<8x8xf32>, vector<8x8xf32>, vector<8x8xf32>, vector<8x8xf32>, vector<8x8xf32>, vector<8x8xf32>, vector<8x8xf32>, vector<8x8xf32>, vector<8x8xf32>, vector<8x8xf32>, vector<8x8xf32>, vector<8x8xf32>, vector<8x8xf32> -> vector<8x128xf32>
    %208 = tpu.concatenate %174, %175, %176, %177, %178, %179, %180, %181, %182, %183, %184, %185, %186, %187, %188, %189 in 1 : vector<8x8xf32>, vector<8x8xf32>, vector<8x8xf32>, vector<8x8xf32>, vector<8x8xf32>, vector<8x8xf32>, vector<8x8xf32>, vector<8x8xf32>, vector<8x8xf32>, vector<8x8xf32>, vector<8x8xf32>, vector<8x8xf32>, vector<8x8xf32>, vector<8x8xf32>, vector<8x8xf32>, vector<8x8xf32> -> vector<8x128xf32>
    %209 = tpu.concatenate %190, %191, %192, %193, %194, %195, %196, %197, %198, %199, %200, %201, %202, %203, %204, %205 in 1 : vector<8x8xf32>, vector<8x8xf32>, vector<8x8xf32>, vector<8x8xf32>, vector<8x8xf32>, vector<8x8xf32>, vector<8x8xf32>, vector<8x8xf32>, vector<8x8xf32>, vector<8x8xf32>, vector<8x8xf32>, vector<8x8xf32>, vector<8x8xf32>, vector<8x8xf32>, vector<8x8xf32>, vector<8x8xf32> -> vector<8x128xf32>
    %210 = tpu.concatenate %207, %208, %209, %206 in 1 : vector<8x128xf32>, vector<8x128xf32>, vector<8x128xf32>, vector<8x8xf32> -> vector<8x392xf32>
    %cst_234 = arith.constant dense<0.000000e+00> : vector<8x10xf32>
    %211 = tpu.matmul %210, %156, %cst_234 {dimension_numbers = #tpu.dot_dimension_numbers<[1], [0], [0], [1], [0, 0, 1, 1], [], []>} : vector<8x392xf32>, vector<392x10xf32>, vector<8x10xf32> -> vector<8x10xf32>
    %212 = vector.broadcast %157 : vector<1x10xf32> to vector<8x10xf32>
    %213 = arith.addf %211, %212 : vector<8x10xf32>
    %cst_235 = arith.constant 0.000000e+00 : f32
    %214 = vector.broadcast %cst_235 : f32 to vector<8x10xf32>
    %215 = arith.subf %214, %213 : vector<8x10xf32>
    %216 = math.exp %215 : vector<8x10xf32>
    %cst_236 = arith.constant 1.000000e+00 : f32
    %217 = vector.broadcast %cst_236 : f32 to vector<8x10xf32>
    %218 = arith.addf %217, %216 : vector<8x10xf32>
    %219 = tpu.reciprocal %218 {approx = true} : vector<8x10xf32> -> vector<8x10xf32>
    %220 = vector.extract_strided_slice %219 {offsets = [0, 0], sizes = [4, 10], strides = [1, 1]} : vector<8x10xf32> to vector<4x10xf32>
    %c0_237 = arith.constant 0 : index
    %c0_238 = arith.constant 0 : index
    %221 = vector.load %arg2[%c0_237, %c0_238] : memref<4x10xf32, #tpu.memory_space<vmem>>, vector<4x10xf32>
    tpu.vector_store %arg2[%c0_237, %c0_238], %220 {strides = array<i32>} : memref<4x10xf32, #tpu.memory_space<vmem>>, vector<4x10xf32>,
    %c512 = arith.constant 512 : index
    %c0_239 = arith.constant 0 : index
    %222 = vector.load %arg1[%c512, %c0_239] : memref<592x32xf32, #tpu.memory_space<vmem>>, vector<10x32xf32>
    %c528 = arith.constant 528 : index
    %c0_240 = arith.constant 0 : index
    %223 = vector.load %arg1[%c528, %c0_240] : memref<592x32xf32, #tpu.memory_space<vmem>>, vector<10x32xf32>
    %c544 = arith.constant 544 : index
    %c0_241 = arith.constant 0 : index
    %224 = vector.load %arg1[%c544, %c0_241] : memref<592x32xf32, #tpu.memory_space<vmem>>, vector<1x32xf32>
    %c552 = arith.constant 552 : index
    %c0_242 = arith.constant 0 : index
    %225 = vector.load %arg1[%c552, %c0_242] : memref<592x32xf32, #tpu.memory_space<vmem>>, vector<32x2xf32>
    %c584 = arith.constant 584 : index
    %c0_243 = arith.constant 0 : index
    %226 = vector.load %arg1[%c584, %c0_243] : memref<592x32xf32, #tpu.memory_space<vmem>>, vector<1x2xf32>
    %cst_244 = arith.constant dense<0.000000e+00> : vector<8x32xf32>
    %227 = tpu.matmul %219, %222, %cst_244 {dimension_numbers = #tpu.dot_dimension_numbers<[1], [0], [0], [1], [0, 0, 1, 1], [], []>} : vector<8x10xf32>, vector<10x32xf32>, vector<8x32xf32> -> vector<8x32xf32>
    %cst_245 = arith.constant dense<0.000000e+00> : vector<8x32xf32>
    %228 = tpu.matmul %219, %223, %cst_245 {dimension_numbers = #tpu.dot_dimension_numbers<[1], [0], [0], [1], [0, 0, 1, 1], [], []>} : vector<8x10xf32>, vector<10x32xf32>, vector<8x32xf32> -> vector<8x32xf32>
    %229 = vector.extract_strided_slice %227 {offsets = [0, 0], sizes = [1, 32], strides = [1, 1]} : vector<8x32xf32> to vector<1x32xf32>
    %230 = vector.extract_strided_slice %228 {offsets = [1, 0], sizes = [1, 32], strides = [1, 1]} : vector<8x32xf32> to vector<1x32xf32>
    %231 = arith.addf %229, %230 : vector<1x32xf32>
    %232 = arith.addf %231, %224 : vector<1x32xf32>
    %cst_246 = arith.constant 0.000000e+00 : f32
    %233 = vector.broadcast %cst_246 : f32 to vector<1x32xf32>
    %234 = arith.maximumf %232, %233 : vector<1x32xf32>
    %235 = vector.extract_strided_slice %227 {offsets = [2, 0], sizes = [1, 32], strides = [1, 1]} : vector<8x32xf32> to vector<1x32xf32>
    %236 = vector.extract_strided_slice %228 {offsets = [3, 0], sizes = [1, 32], strides = [1, 1]} : vector<8x32xf32> to vector<1x32xf32>
    %237 = arith.addf %235, %236 : vector<1x32xf32>
    %238 = arith.addf %237, %224 : vector<1x32xf32>
    %cst_247 = arith.constant 0.000000e+00 : f32
    %239 = vector.broadcast %cst_247 : f32 to vector<1x32xf32>
    %240 = arith.maximumf %238, %239 : vector<1x32xf32>
    %241 = tpu.concatenate %234, %240 in 0 : vector<1x32xf32>, vector<1x32xf32> -> vector<2x32xf32>
    %cst_248 = arith.constant dense<0.000000e+00> : vector<2x2xf32>
    %242 = tpu.matmul %241, %225, %cst_248 {dimension_numbers = #tpu.dot_dimension_numbers<[1], [0], [0], [1], [0, 0, 1, 1], [], []>} : vector<2x32xf32>, vector<32x2xf32>, vector<2x2xf32> -> vector<2x2xf32>
    %243 = vector.broadcast %226 : vector<1x2xf32> to vector<2x2xf32>
    %244 = arith.addf %242, %243 : vector<2x2xf32>
    %c0_249 = arith.constant 0 : index
    %c0_250 = arith.constant 0 : index
    %245 = vector.load %arg3[%c0_249, %c0_250] : memref<2x2xf32, #tpu.memory_space<vmem>>, vector<2x2xf32>
    tpu.vector_store %arg3[%c0_249, %c0_250], %244 {strides = array<i32>} : memref<2x2xf32, #tpu.memory_space<vmem>>, vector<2x2xf32>,
    return
  }
}

</mosaic_0001>

<bundles_post_ra>
// kernel: net_small_all_forward.1
= control target key start
LH: loop header
LB: loop body
LE: loop exit
PB: predicated region body
PF: predicated region fallthrough
CT: control target
= control target key end

     0   :  { %9 = vsyncpa [#allocation6], 0  ;;  %vm39_vm0 = vcmask 261120   ;;  %s10989_s0 = inlined_call_operand.vmem [shape: f32[800,32], index: 0, kind: input, shape index: {}]   ;;  %s10990_s1 = inlined_call_operand.vmem [shape: f32[592,32], index: 1, kind: input, shape index: {}]   ;;  %s10991_s2 = inlined_call_operand.hbm [shape: f32[4,10], index: 2, kind: output, shape index: {0}]   ;;  %s10992_s3 = inlined_call_operand.hbm [shape: f32[2,2], index: 3, kind: output, shape index: {1}]  }
   0x1   :  { %v15_v0 = vld [vmem:[%s10990_s1] sm:$0xff]  ;;  %v16_v1 = vld [vmem:[%s10990_s1 + $0x8] sm:$0xff]  ;;  %v17_v2 = vld [vmem:[%s10990_s1 + $0x10] sm:$0xff] }
   0x2   :  { %v7008_v3 = vpack.c.bf16 %v16_v1, %v15_v0  ;;  %v18_v4 = vld [vmem:[%s10990_s1 + $0x18] sm:$0xff]  ;;  %v19_v5 = vld [vmem:[%s10989_s0] sm:$0xff]  ;;  %v20_v8 = vld [vmem:[%s10989_s0 + $0x8] sm:$0xff] }
   0x3   :  { %v286_v6 = vld [vmem:[%s10989_s0 + $0xa0] sm:$0xff]  ;;  %v7019_v7 = vpack.c.bf16 %v18_v4, %v17_v2  ;;  %6148 = vmatprep.mubr.msk.f32.mxu0 %vm39_vm0, %v19_v5  ;;  %v287_v9 = vld [vmem:[%s10989_s0 + $0xa8] sm:$0xff]  ;;  %v21_v10 = vld [vmem:[%s10989_s0 + $0x10] sm:$0xff] }
   0x4   :  { %6186 = vmatprep.mubr.msk.f32.mxu1 %vm39_vm0, %v286_v6  ;;  %6593 = vmatprep.subr.bf16.mxu0 %v7008_v3  ;;  %v288_v11 = vld [vmem:[%s10989_s0 + $0xb0] sm:$0xff]  ;;  %v22_v12 = vld [vmem:[%s10989_s0 + $0x18] sm:$0xff]  ;;  %v23_v14 = vld [vmem:[%s10989_s0 + $0x20] sm:$0xff] }
   0x5   :  { %6601 = vmatprep.subr.bf16.mxu1 %v7008_v3  ;;  %6595 = vmatpush3.bf16.msra.mxu0 %v7008_v3  ;;  %v289_v13 = vld [vmem:[%s10989_s0 + $0xb8] sm:$0xff]  ;;  %v290_v15 = vld [vmem:[%s10989_s0 + $0xc0] sm:$0xff]  ;;  %v24_v16 = vld [vmem:[%s10989_s0 + $0x28] sm:$0xff] }
   0x6   :  { %6603 = vmatpush3.bf16.msra.mxu1 %v7008_v3  ;;  %6597 = vmatprep.subr.bf16.mxu0 %v7019_v7  ;;  %v291_v17 = vld [vmem:[%s10989_s0 + $0xc8] sm:$0xff]  ;;  %v25_v18 = vld [vmem:[%s10989_s0 + $0x30] sm:$0xff]  ;;  %v26_v20 = vld [vmem:[%s10989_s0 + $0x38] sm:$0xff] }
   0x7   :  { %6605 = vmatprep.subr.bf16.mxu1 %v7019_v7  ;;  %v292_v19 = vld [vmem:[%s10989_s0 + $0xd0] sm:$0xff]  ;;  %v293_v21 = vld [vmem:[%s10989_s0 + $0xd8] sm:$0xff] }
   0x9   :  { %6599 = vmatpush3.bf16.msra.mxu0 %v7019_v7 }
   0xa   :  { %6607 = vmatpush3.bf16.msra.mxu1 %v7019_v7  ;;  %6609 = vmatprep.subr.bf16.mxu0 %v7008_v3 }
   0xb   :  { %6617 = vmatprep.subr.bf16.mxu1 %v7008_v3 }
   0xc   :  { %6149 = vmatmul.mubr.msk.f32.vlgmr.msra.gmra.mrb[0].mxu0 %vm39_vm0, %v20_v8 }
   0xd   :  { %6187 = vmatmul.mubr.msk.f32.vlgmr.msra.gmra.mrb[0].mxu1 %vm39_vm0, %v287_v9  ;;  %6151 = vmatprep.mubr.msk.f32.mxu0 %vm39_vm0, %v21_v10 }
   0xe   :  { %6189 = vmatprep.mubr.msk.f32.mxu1 %vm39_vm0, %v288_v11  ;;  %6611 = vmatpush3.bf16.msra.mxu0 %v7008_v3 }
   0xf   :  { %6619 = vmatpush3.bf16.msra.mxu1 %v7008_v3  ;;  %6613 = vmatprep.subr.bf16.mxu0 %v7019_v7 }
  0x10   :  { %6621 = vmatprep.subr.bf16.mxu1 %v7019_v7  ;;  %6152 = vmatmul.mubr.msk.f32.gmra.mrb[2].mxu0 %vm39_vm0, %v22_v12 }
  0x11   :  { %6190 = vmatmul.mubr.msk.f32.gmra.mrb[2].mxu1 %vm39_vm0, %v289_v13  ;;  %6154 = vmatprep.mubr.msk.f32.mxu0 %vm39_vm0, %v23_v14 }
  0x12   :  { %6192 = vmatprep.mubr.msk.f32.mxu1 %vm39_vm0, %v290_v15  ;;  %6615 = vmatpush3.bf16.msra.mxu0 %v7019_v7 }
  0x13   :  { %6623 = vmatpush3.bf16.msra.mxu1 %v7019_v7  ;;  %6625 = vmatprep.subr.bf16.mxu0 %v7008_v3 }
  0x14   :  { %6155 = vmatmul.mubr.msk.f32.gmra.mrb[4].mxu0 %vm39_vm0, %v24_v16 }
  0x15   :  { %6193 = vmatmul.mubr.msk.f32.gmra.mrb[4].mxu1 %vm39_vm0, %v291_v17  ;;  %6157 = vmatprep.mubr.msk.f32.mxu0 %vm39_vm0, %v25_v18 }
  0x16   :  { %6195 = vmatprep.mubr.msk.f32.mxu1 %vm39_vm0, %v292_v19 }
  0x17   :  { %10 = vsyncpa [#allocation8], 0  ;;  %v27_v22 = vld [vmem:[%s10989_s0 + $0x40] sm:$0xff]  ;;  %v28_v24 = vld [vmem:[%s10989_s0 + $0x48] sm:$0xff]  ;;  %vm265_vm1 = vcmask 64512   ;;  %s6958_s6 = smov 16  }
  0x18   :  { %v294_v23 = vld [vmem:[%s10989_s0 + $0xe0] sm:$0xff]  ;;  %6158 = vmatmul.mubr.msk.f32.gmra.mrb[6].mxu0 %vm39_vm0, %v26_v20  ;;  %v295_v25 = vld [vmem:[%s10989_s0 + $0xe8] sm:$0xff]  ;;  %v29_v26 = vld [vmem:[%s10989_s0 + $0x50] sm:$0xff]  ;;  %s6959_s7 = smov 24   ;;  %s6960_s16 = smov 8   ;;  %vm6965_vm2 = vmmov 0  }
  0x19   :  { %6196 = vmatmul.mubr.msk.f32.gmra.mrb[6].mxu1 %vm39_vm0, %v293_v21  ;;  %6160 = vmatprep.mubr.msk.f32.mxu0 %vm39_vm0, %v27_v22  ;;  %v296_v27 = vld [vmem:[%s10989_s0 + $0xf0] sm:$0xff]  ;;  %v30_v28 = vld [vmem:[%s10989_s0 + $0x58] sm:$0xff]  ;;  %v31_v30 = vld [vmem:[%s10989_s0 + $0x60] sm:$0xff]  ;;  %s6961_s21 = smov 48   ;;  %s6963_s24 = smov 32   ;;  %vm2547_vm3 = vcmask 130048  }
  0x1a   :  { %6198 = vmatprep.mubr.msk.f32.mxu1 %vm39_vm0, %v294_v23  ;;  %v297_v29 = vld [vmem:[%s10989_s0 + $0xf8] sm:$0xff]  ;;  %v298_v31 = vld [vmem:[%s10989_s0 + $0x100] sm:$0xff]  ;;  %v32_v32 = vld [vmem:[%s10989_s0 + $0x68] sm:$0xff]  ;;  %s6964_s27 = smov 40   ;;  %s6967_s18 = smov 56   ;;  %vm2569_vm4 = vcmask 195584  }
  0x1b   :  { %v299_v33 = vld [vmem:[%s10989_s0 + $0x108] sm:$0xff]  ;;  %v33_v34 = vld [vmem:[%s10989_s0 + $0x70] sm:$0xff]  ;;  %v34_v36 = vld [vmem:[%s10989_s0 + $0x78] sm:$0xff]  ;;  %s6968_s19 = smov 64   ;;  %vm2612_vm5 = vcmask 326656   ;;  %vm2634_vm6 = vcmask 392192  }
  0x1c   :  { %6161 = vmatmul.mubr.msk.f32.gmra.mrb[8].mxu0 %vm39_vm0, %v28_v24  ;;  %v300_v35 = vld [vmem:[%s10989_s0 + $0x110] sm:$0xff]  ;;  %v301_v37 = vld [vmem:[%s10989_s0 + $0x118] sm:$0xff]  ;;  %v35_v38 = vld [vmem:[%s10989_s0 + $0x80] sm:$0xff]  ;;  %vm2656_vm7 = vcmask 457728   ;;  %vm2678_vm8 = vcmask 523264   ;;  %vm2704_vm9 = vcmask 588800  }
  0x1d   :  { %6199 = vmatmul.mubr.msk.f32.gmra.mrb[8].mxu1 %vm39_vm0, %v295_v25  ;;  %6163 = vmatprep.mubr.msk.f32.mxu0 %vm39_vm0, %v29_v26  ;;  %v302_v39 = vld [vmem:[%s10989_s0 + $0x120] sm:$0xff]  ;;  %v36_v40 = vld [vmem:[%s10989_s0 + $0x88] sm:$0xff]  ;;  %v37_v42 = vld [vmem:[%s10989_s0 + $0x90] sm:$0xff]  ;;  %s6969_s30 = smov 72   ;;  %s6970_s4 = smov 80   ;;  %vm5116_vm10 = vcmask 654336  }
  0x1e   :  { %6201 = vmatprep.mubr.msk.f32.mxu1 %vm39_vm0, %v296_v27  ;;  %v303_v41 = vld [vmem:[%s10989_s0 + $0x128] sm:$0xff]  ;;  %v304_v43 = vld [vmem:[%s10989_s0 + $0x130] sm:$0xff]  ;;  %v38_v44 = vld [vmem:[%s10989_s0 + $0x98] sm:$0xff]  ;;  %s6971_s5 = smov 88   ;;  %s6972_s8 = smov 96   ;;  %vm5118_vm11 = vcmask 719872  }
  0x1f   :  { %v305_v45 = vld [vmem:[%s10989_s0 + $0x138] sm:$0xff]  ;;  %v551_v46 = vld [vmem:[%s10989_s0 + $0x140] sm:$0xff]  ;;  %v552_v47 = vld [vmem:[%s10989_s0 + $0x148] sm:$0xff]  ;;  %s6973_s11 = smov 104   ;;  %s6974_s22 = smov 112   ;;  %vm5120_vm12 = vcmask 785408  }
  0x20   :  { %6164 = vmatmul.mubr.msk.f32.gmra.mrb[10].mxu0 %vm39_vm0, %v30_v28  ;;  %v553_v48 = vld [vmem:[%s10989_s0 + $0x150] sm:$0xff]  ;;  %v554_v49 = vld [vmem:[%s10989_s0 + $0x158] sm:$0xff]  ;;  %v555_v50 = vld [vmem:[%s10989_s0 + $0x160] sm:$0xff]  ;;  %vm5122_vm13 = vcmask 850944   ;;  %vm5124_vm14 = vcmask 916480   ;;  %vm5126_vm15 = vcmask 982016  }
  0x21   :  { %6202 = vmatmul.mubr.msk.f32.gmra.mrb[10].mxu1 %vm39_vm0, %v297_v29  ;;  %6166 = vmatprep.mubr.msk.f32.mxu0 %vm39_vm0, %v31_v30  ;;  %v556_v51 = vld [vmem:[%s10989_s0 + $0x168] sm:$0xff]  ;;  %v557_v52 = vld [vmem:[%s10989_s0 + $0x170] sm:$0xff]  ;;  %v558_v53 = vld [vmem:[%s10989_s0 + $0x178] sm:$0xff] }
  0x22   :  { %6204 = vmatprep.mubr.msk.f32.mxu1 %vm39_vm0, %v298_v31  ;;  %v559_v54 = vld [vmem:[%s10989_s0 + $0x180] sm:$0xff]  ;;  %v560_v55 = vld [vmem:[%s10989_s0 + $0x188] sm:$0xff]  ;;  %v561_v56 = vld [vmem:[%s10989_s0 + $0x190] sm:$0xff] }
  0x23   :  { %v562_v57 = vld [vmem:[%s10989_s0 + $0x198] sm:$0xff]  ;;  %v563_v58 = vld [vmem:[%s10989_s0 + $0x1a0] sm:$0xff]  ;;  %v564_v59 = vld [vmem:[%s10989_s0 + $0x1a8] sm:$0xff] }
  0x24   :  { %6167 = vmatmul.mubr.msk.f32.gmra.mrb[12].mxu0 %vm39_vm0, %v32_v32  ;;  %v565_v60 = vld [vmem:[%s10989_s0 + $0x1b0] sm:$0xff]  ;;  %v566_v61 = vld [vmem:[%s10989_s0 + $0x1b8] sm:$0xff]  ;;  %v567_v62 = vld [vmem:[%s10989_s0 + $0x1c0] sm:$0xff] }
  0x25   :  { %6205 = vmatmul.mubr.msk.f32.gmra.mrb[12].mxu1 %vm39_vm0, %v299_v33  ;;  %6169 = vmatprep.mubr.msk.f32.mxu0 %vm39_vm0, %v33_v34  ;;  %v568_v63 = vld [vmem:[%s10989_s0 + $0x1c8] sm:$0xff]  ;;  %v569_v0 = vld [vmem:[%s10989_s0 + $0x1d0] sm:$0xff]  ;;  %v570_v1 = vld [vmem:[%s10989_s0 + $0x1d8] sm:$0xff] }
  0x26   :  { %6207 = vmatprep.mubr.msk.f32.mxu1 %vm39_vm0, %v300_v35  ;;  %v816_v2 = vld [vmem:[%s10989_s0 + $0x1e0] sm:$0xff]  ;;  %v818_v4 = vld [vmem:[%s10989_s0 + $0x1f0] sm:$0xff]  ;;  %v819_v5 = vld [vmem:[%s10989_s0 + $0x1f8] sm:$0xff] }
  0x27   :  { %v820_v6 = vld [vmem:[%s10989_s0 + $0x200] sm:$0xff]  ;;  %v822_v8 = vld [vmem:[%s10989_s0 + $0x210] sm:$0xff]  ;;  %v823_v9 = vld [vmem:[%s10989_s0 + $0x218] sm:$0xff] }
  0x28   :  { %6170 = vmatmul.mubr.msk.f32.gmra.mrb[14].mxu0 %vm39_vm0, %v34_v36  ;;  %v824_v10 = vld [vmem:[%s10989_s0 + $0x220] sm:$0xff]  ;;  %v825_v11 = vld [vmem:[%s10989_s0 + $0x228] sm:$0xff] }
  0x29   :  { %6208 = vmatmul.mubr.msk.f32.gmra.mrb[14].mxu1 %vm39_vm0, %v301_v37  ;;  %6172 = vmatprep.mubr.msk.f32.mxu0 %vm39_vm0, %v35_v38 }
  0x2a   :  { %6210 = vmatprep.mubr.msk.f32.mxu1 %vm39_vm0, %v302_v39 }
  0x2c   :  { %6173 = vmatmul.mubr.msk.f32.gmra.mrb[16].mxu0 %vm39_vm0, %v36_v40 }
  0x2d   :  { %6211 = vmatmul.mubr.msk.f32.gmra.mrb[16].mxu1 %vm39_vm0, %v303_v41  ;;  %6175 = vmatprep.mubr.msk.f32.mxu0 %vm39_vm0, %v37_v42 }
  0x2e   :  { %6213 = vmatprep.mubr.msk.f32.mxu1 %vm39_vm0, %v304_v43 }
  0x30   :  { %6176 = vmatmul.mubr.msk.f32.gmra.mrb[18].mxu0 %vm39_vm0, %v38_v44 }
  0x31   :  { %6214 = vmatmul.mubr.msk.f32.gmra.mrb[18].mxu1 %vm39_vm0, %v305_v45  ;;  %6224 = vmatprep.mubr.msk.f32.mxu0 %vm39_vm0, %v551_v46 }
  0x32   :  { %6262 = vmatprep.mubr.msk.f32.mxu1 %vm39_vm0, %v816_v2 }
  0x34   :  { %6225 = vmatmul.mubr.msk.f32.vlgmr.msra.gmra.mrb[20].mxu0 %vm39_vm0, %v552_v47 }
  0x35   :  { %6227 = vmatprep.mubr.msk.f32.mxu0 %vm39_vm0, %v553_v48  ;;  %6627 = vmatpush3.bf16.msra.mxu0 %v7008_v3  ;;  %v817_v3 = vld [vmem:[%s10989_s0 + $0x1e8] sm:$0xff] }
  0x36   :  { %6629 = vmatprep.subr.bf16.mxu0 %v7019_v7  ;;  %6263 = vmatmul.mubr.msk.f32.vlgmr.msra.gmra.mrb[20].mxu1 %vm39_vm0, %v817_v3 }
  0x37   :  { %6265 = vmatprep.mubr.msk.f32.mxu1 %vm39_vm0, %v818_v4 }
  0x38   :  { %6228 = vmatmul.mubr.msk.f32.gmra.mrb[22].mxu0 %vm39_vm0, %v554_v49 }
  0x39   :  { %6230 = vmatprep.mubr.msk.f32.mxu0 %vm39_vm0, %v555_v50  ;;  %6631 = vmatpush3.bf16.msra.mxu0 %v7019_v7  ;;  %v821_v7 = vld [vmem:[%s10989_s0 + $0x208] sm:$0xff] }
  0x3a   :  { %6266 = vmatmul.mubr.msk.f32.gmra.mrb[22].mxu1 %vm39_vm0, %v819_v5 }
  0x3b   :  { %6268 = vmatprep.mubr.msk.f32.mxu1 %vm39_vm0, %v820_v6 }
  0x3c   :  { %6231 = vmatmul.mubr.msk.f32.gmra.mrb[24].mxu0 %vm39_vm0, %v556_v51 }
  0x3d   :  { %6233 = vmatprep.mubr.msk.f32.mxu0 %vm39_vm0, %v557_v52 }
  0x3e   :  { %6269 = vmatmul.mubr.msk.f32.gmra.mrb[24].mxu1 %vm39_vm0, %v821_v7 }
  0x3f   :  { %6271 = vmatprep.mubr.msk.f32.mxu1 %vm39_vm0, %v822_v8 }
  0x40   :  { %6234 = vmatmul.mubr.msk.f32.gmra.mrb[26].mxu0 %vm39_vm0, %v558_v53 }
  0x41   :  { %6236 = vmatprep.mubr.msk.f32.mxu0 %vm39_vm0, %v559_v54 }
  0x42   :  { %6272 = vmatmul.mubr.msk.f32.gmra.mrb[26].mxu1 %vm39_vm0, %v823_v9 }
  0x43   :  { %6274 = vmatprep.mubr.msk.f32.mxu1 %vm39_vm0, %v824_v10 }
  0x44   :  { %6237 = vmatmul.mubr.msk.f32.gmra.mrb[28].mxu0 %vm39_vm0, %v560_v55 }
  0x45   :  { %6239 = vmatprep.mubr.msk.f32.mxu0 %vm39_vm0, %v561_v56 }
  0x46   :  { %6275 = vmatmul.mubr.msk.f32.gmra.mrb[28].mxu1 %vm39_vm0, %v825_v11 }
  0x48   :  { %6240 = vmatmul.mubr.msk.f32.gmra.mrb[30].mxu0 %vm39_vm0, %v562_v57 }
  0x49   :  { %6242 = vmatprep.mubr.msk.f32.mxu0 %vm39_vm0, %v563_v58 }
  0x4c   :  { %6243 = vmatmul.mubr.msk.f32.gmra.mrb[32].mxu0 %vm39_vm0, %v564_v59 }
  0x4d   :  { %6245 = vmatprep.mubr.msk.f32.mxu0 %vm39_vm0, %v565_v60 }
  0x50   :  { %6246 = vmatmul.mubr.msk.f32.gmra.mrb[34].mxu0 %vm39_vm0, %v566_v61 }
  0x51   :  { %6248 = vmatprep.mubr.msk.f32.mxu0 %vm39_vm0, %v567_v62 }
  0x54   :  { %6249 = vmatmul.mubr.msk.f32.gmra.mrb[36].mxu0 %vm39_vm0, %v568_v63 }
  0x55   :  { %6251 = vmatprep.mubr.msk.f32.mxu0 %vm39_vm0, %v569_v0 }
  0x58   :  { %6252 = vmatmul.mubr.msk.f32.gmra.mrb[38].mxu0 %vm39_vm0, %v570_v1 }
  0xdf   :  { %v6150_v12 = vpop.f32.mrb[0].mxu0 }
  0xe0   :  { %v6188_v13 = vpop.f32.mrb[0].mxu1  ;;  %267 = vst.msk [vmem:[#allocation2 + $0x8] sm:$0xff] %vm265_vm1, %v6150_v12  ;;  %v166_v14 = vpop.f32.mrb[1].mxu0 }
  0xe1   :  { %532 = vst.msk [vmem:[#allocation2 + $0xa8] sm:$0xff] %vm265_vm1, %v6188_v13  ;;  %v432_v15 = vpop.f32.mrb[1].mxu1  ;;  %266 = vst.msk [vmem:[#allocation2] sm:$0xff] %vm265_vm1, %v166_v14  ;;  %v826_v13 = vld [vmem:[%s10989_s0 + $0x230] sm:$0xff] }
  0xe2   :  { %531 = vst.msk [vmem:[#allocation2 + $0xa0] sm:$0xff] %vm265_vm1, %v432_v15  ;;  %6277 = vmatprep.mubr.msk.f32.mxu1 %vm39_vm0, %v826_v13 }
  0xe3   :  { %v6153_v16 = vpop.f32.mrb[2].mxu0 }
  0xe4   :  { %v6191_v17 = vpop.f32.mrb[2].mxu1  ;;  %269 = vst.msk [vmem:[#allocation2 + $0x18] sm:$0xff] %vm265_vm1, %v6153_v16  ;;  %v176_v18 = vpop.f32.mrb[3].mxu0 }
  0xe5   :  { %534 = vst.msk [vmem:[#allocation2 + $0xb8] sm:$0xff] %vm265_vm1, %v6191_v17  ;;  %v442_v19 = vpop.f32.mrb[3].mxu1  ;;  %268 = vst.msk [vmem:[#allocation2 + $0x10] sm:$0xff] %vm265_vm1, %v176_v18 }
  0xe6   :  { %533 = vst.msk [vmem:[#allocation2 + $0xb0] sm:$0xff] %vm265_vm1, %v442_v19 }
  0xe7   :  { %v6156_v20 = vpop.f32.mrb[4].mxu0  ;;  %v7339_v36 = vld [vmem:[#allocation2 + $0x8] sm:$0xff] }
  0xe8   :  { %v6194_v21 = vpop.f32.mrb[4].mxu1  ;;  %271 = vst.msk [vmem:[#allocation2 + $0x28] sm:$0xff] %vm265_vm1, %v6156_v20  ;;  %v186_v22 = vpop.f32.mrb[5].mxu0  ;;  %v1431_v37 = vld [vmem:[#allocation2 + $0xa8] sm:$0xff]  ;;  %v1346_v40 = vld [vmem:[#allocation2] sm:$0xff] }
  0xe9   :  { %536 = vst.msk [vmem:[#allocation2 + $0xc8] sm:$0xff] %vm265_vm1, %v6194_v21  ;;  %v452_v23 = vpop.f32.mrb[5].mxu1  ;;  %270 = vst.msk [vmem:[#allocation2 + $0x20] sm:$0xff] %vm265_vm1, %v186_v22  ;;  %v1430_v41 = vld [vmem:[#allocation2 + $0xa0] sm:$0xff]  ;;  %v1356_v56 = vmax.f32 %v1346_v40, %v7339_v36 }
  0xea   :  { %535 = vst.msk [vmem:[#allocation2 + $0xc0] sm:$0xff] %vm265_vm1, %v452_v23  ;;  %v1440_v57 = vmax.f32 %v1430_v41, %v1431_v37  ;;  %v828_v40 = vld [vmem:[%s10989_s0 + $0x240] sm:$0xff] }
  0xeb   :  { %v6159_v24 = vpop.f32.mrb[6].mxu0  ;;  %v7341_v42 = vld [vmem:[#allocation2 + $0x18] sm:$0xff] }
  0xec   :  { %v6197_v25 = vpop.f32.mrb[6].mxu1  ;;  %273 = vst.msk [vmem:[#allocation2 + $0x38] sm:$0xff] %vm265_vm1, %v6159_v24  ;;  %v196_v26 = vpop.f32.mrb[7].mxu0  ;;  %v1433_v45 = vld [vmem:[#allocation2 + $0xb8] sm:$0xff]  ;;  %v7345_v46 = vld [vmem:[#allocation2 + $0x10] sm:$0xff] }
  0xed   :  { %538 = vst.msk [vmem:[#allocation2 + $0xd8] sm:$0xff] %vm265_vm1, %v6197_v25  ;;  %v462_v27 = vpop.f32.mrb[7].mxu1  ;;  %272 = vst.msk [vmem:[#allocation2 + $0x30] sm:$0xff] %vm265_vm1, %v196_v26  ;;  %v1432_v47 = vld [vmem:[#allocation2 + $0xb0] sm:$0xff]  ;;  %v1357_v58 = vmax.f32 %v7339_v36, %v7345_v46  ;;  %v1358_v0 = vmax.f32 %v7345_v46, %v7341_v42 }
  0xee   :  { %537 = vst.msk [vmem:[#allocation2 + $0xd0] sm:$0xff] %vm265_vm1, %v462_v27  ;;  %v7362_v1 = vmax.f32 %v1431_v37, %v1432_v47  ;;  %v7370_v7 = vmax.f32 %v1432_v47, %v1433_v45 }
  0xef   :  { %v6162_v28 = vpop.f32.mrb[8].mxu0  ;;  %v7349_v48 = vld [vmem:[#allocation2 + $0x28] sm:$0xff] }
  0xf0   :  { %v6200_v29 = vpop.f32.mrb[8].mxu1  ;;  %275 = vst.msk [vmem:[#allocation2 + $0x48] sm:$0xff] %vm265_vm1, %v6162_v28  ;;  %v206_v30 = vpop.f32.mrb[9].mxu0  ;;  %v1435_v49 = vld [vmem:[#allocation2 + $0xc8] sm:$0xff]  ;;  %v7351_v50 = vld [vmem:[#allocation2 + $0x20] sm:$0xff] }
  0xf1   :  { %540 = vst.msk [vmem:[#allocation2 + $0xe8] sm:$0xff] %vm265_vm1, %v6200_v29  ;;  %v472_v31 = vpop.f32.mrb[9].mxu1  ;;  %274 = vst.msk [vmem:[#allocation2 + $0x40] sm:$0xff] %vm265_vm1, %v206_v30  ;;  %v1434_v51 = vld [vmem:[#allocation2 + $0xc0] sm:$0xff]  ;;  %v1359_v8 = vmax.f32 %v7341_v42, %v7351_v50  ;;  %v1360_v9 = vmax.f32 %v7351_v50, %v7349_v48 }
  0xf2   :  { %539 = vst.msk [vmem:[#allocation2 + $0xe0] sm:$0xff] %vm265_vm1, %v472_v31  ;;  %v7376_v10 = vmax.f32 %v1433_v45, %v1434_v51  ;;  %v7385_v14 = vmax.f32 %v1434_v51, %v1435_v49  ;;  %v827_v31 = vld [vmem:[%s10989_s0 + $0x238] sm:$0xff] }
  0xf3   :  { %v6165_v32 = vpop.f32.mrb[10].mxu0  ;;  %v7356_v59 = vld [vmem:[#allocation2 + $0x38] sm:$0xff]  ;;  %6278 = vmatmul.mubr.msk.f32.gmra.mrb[30].mxu1 %vm39_vm0, %v827_v31 }
  0xf4   :  { %v6203_v33 = vpop.f32.mrb[10].mxu1  ;;  %277 = vst.msk [vmem:[#allocation2 + $0x58] sm:$0xff] %vm265_vm1, %v6165_v32  ;;  %v216_v34 = vpop.f32.mrb[11].mxu0  ;;  %v1437_v2 = vld [vmem:[#allocation2 + $0xd8] sm:$0xff]  ;;  %v7364_v3 = vld [vmem:[#allocation2 + $0x30] sm:$0xff]  ;;  %6280 = vmatprep.mubr.msk.f32.mxu1 %vm39_vm0, %v828_v40 }
  0xf5   :  { %542 = vst.msk [vmem:[#allocation2 + $0xf8] sm:$0xff] %vm265_vm1, %v6203_v33  ;;  %v482_v35 = vpop.f32.mrb[11].mxu1  ;;  %276 = vst.msk [vmem:[#allocation2 + $0x50] sm:$0xff] %vm265_vm1, %v216_v34  ;;  %v1436_v4 = vld [vmem:[#allocation2 + $0xd0] sm:$0xff]  ;;  %v1361_v23 = vmax.f32 %v7349_v48, %v7364_v3  ;;  %v1362_v24 = vmax.f32 %v7364_v3, %v7356_v59 }
  0xf6   :  { %541 = vst.msk [vmem:[#allocation2 + $0xf0] sm:$0xff] %vm265_vm1, %v482_v35  ;;  %v7395_v25 = vmax.f32 %v1435_v49, %v1436_v4  ;;  %v7397_v26 = vmax.f32 %v1436_v4, %v1437_v2 }
  0xf7   :  { %v6168_v38 = vpop.f32.mrb[12].mxu0  ;;  %v7378_v11 = vld [vmem:[#allocation2 + $0x48] sm:$0xff] }
  0xf8   :  { %v6206_v39 = vpop.f32.mrb[12].mxu1  ;;  %279 = vst.msk [vmem:[#allocation2 + $0x68] sm:$0xff] %vm265_vm1, %v6168_v38  ;;  %v226_v43 = vpop.f32.mrb[13].mxu0  ;;  %v7380_v12 = vld [vmem:[#allocation2 + $0x40] sm:$0xff] }
  0xf9   :  { %544 = vst.msk [vmem:[#allocation2 + $0x108] sm:$0xff] %vm265_vm1, %v6206_v39  ;;  %v492_v44 = vpop.f32.mrb[13].mxu1  ;;  %278 = vst.msk [vmem:[#allocation2 + $0x60] sm:$0xff] %vm265_vm1, %v226_v43  ;;  %v7387_v15 = vld [vmem:[#allocation2 + $0xe0] sm:$0xff]  ;;  %v1363_v36 = vmax.f32 %v7356_v59, %v7380_v12  ;;  %v1364_v41 = vmax.f32 %v7380_v12, %v7378_v11 }
  0xfa   :  { %543 = vst.msk [vmem:[#allocation2 + $0x100] sm:$0xff] %vm265_vm1, %v492_v44  ;;  %v7419_v43 = vmax.f32 %v1437_v2, %v7387_v15  ;;  %v1935_v59 = vld [vmem:[%s10990_s1 + $0x40] sm:$0xff] }
  0xfb   :  { %v1366_v52 = vld [vmem:[#allocation2 + $0x58] sm:$0xff]  ;;  %v6171_v54 = vpop.f32.mrb[14].mxu0 }
  0xfc   :  { %v1496_v53 = vld [vmem:[#allocation2 + $0xf8] sm:$0xff]  ;;  %v6209_v55 = vpop.f32.mrb[14].mxu1  ;;  %v1365_v60 = vld [vmem:[#allocation2 + $0x50] sm:$0xff]  ;;  %281 = vst.msk [vmem:[#allocation2 + $0x78] sm:$0xff] %vm265_vm1, %v6171_v54  ;;  %v236_v62 = vpop.f32.mrb[15].mxu0 }
  0xfd   :  { %v1495_v61 = vld [vmem:[#allocation2 + $0xf0] sm:$0xff]  ;;  %546 = vst.msk [vmem:[#allocation2 + $0x118] sm:$0xff] %vm265_vm1, %v6209_v55  ;;  %v502_v63 = vpop.f32.mrb[15].mxu1  ;;  %v1375_v5 = vmax.f32 %v1365_v60, %v1366_v52  ;;  %280 = vst.msk [vmem:[#allocation2 + $0x70] sm:$0xff] %vm265_vm1, %v236_v62 }
  0xfe   :  { %v7366_v6 = vmax.f32 %v1495_v61, %v1496_v53  ;;  %545 = vst.msk [vmem:[#allocation2 + $0x110] sm:$0xff] %vm265_vm1, %v502_v63  ;;  %v829_v61 = vld [vmem:[%s10989_s0 + $0x248] sm:$0xff] }
  0xff   :  { %v1384_v16 = vmax.f32 %v1356_v56, %v1375_v5  ;;  %v1449_v17 = vmax.f32 %v1375_v5, %v1440_v57  ;;  %v1368_v19 = vld [vmem:[#allocation2 + $0x68] sm:$0xff]  ;;  %v6174_v21 = vpop.f32.mrb[16].mxu0  ;;  %6281 = vmatmul.mubr.msk.f32.gmra.mrb[32].mxu1 %vm39_vm0, %v829_v61 }
 0x100   :  { %v1514_v18 = vmax.f32 %v1440_v57, %v7366_v6  ;;  %v1498_v20 = vld [vmem:[#allocation2 + $0x108] sm:$0xff]  ;;  %v6212_v22 = vpop.f32.mrb[16].mxu1  ;;  %v1367_v27 = vld [vmem:[#allocation2 + $0x60] sm:$0xff]  ;;  %283 = vst.msk [vmem:[#allocation2 + $0x88] sm:$0xff] %vm265_vm1, %v6174_v21  ;;  %v246_v29 = vpop.f32.mrb[17].mxu0 }
 0x101   :  { %v1497_v28 = vld [vmem:[#allocation2 + $0x100] sm:$0xff]  ;;  %548 = vst.msk [vmem:[#allocation2 + $0x128] sm:$0xff] %vm265_vm1, %v6212_v22  ;;  %v512_v30 = vpop.f32.mrb[17].mxu1  ;;  %v1393_v32 = vmax.f32 %v1384_v16, 0.0  ;;  %v1458_v33 = vmax.f32 %v1449_v17, 0.0  ;;  %v1376_v35 = vmax.f32 %v1366_v52, %v1367_v27  ;;  %282 = vst.msk [vmem:[#allocation2 + $0x80] sm:$0xff] %vm265_vm1, %v246_v29  ;;  %v1377_v37 = vmax.f32 %v1367_v27, %v1368_v19 }
 0x102   :  { %v1523_v34 = vmax.f32 %v1514_v18, 0.0  ;;  %547 = vst.msk [vmem:[#allocation2 + $0x120] sm:$0xff] %vm265_vm1, %v512_v30  ;;  %v7409_v38 = vmax.f32 %v1496_v53, %v1497_v28  ;;  %v7411_v39 = vmax.f32 %v1497_v28, %v1498_v20  ;;  %v1439_v22 = vld [vmem:[#allocation2 + $0xe8] sm:$0xff] }
 0x103   :  { %1402 = vst.msk [vmem:[#allocation3] sm:$0xff] %vm265_vm1, %v1393_v32  ;;  %1467 = vst.msk [vmem:[#allocation3 + $0x48] sm:$0xff] %vm265_vm1, %v1458_v33  ;;  %v1385_v44 = vmax.f32 %v1357_v58, %v1376_v35  ;;  %v1450_v45 = vmax.f32 %v1376_v35, %v7362_v1  ;;  %v1370_v46 = vld [vmem:[#allocation2 + $0x78] sm:$0xff]  ;;  %v6177_v49 = vpop.f32.mrb[18].mxu0  ;;  %v1386_v52 = vmax.f32 %v1358_v0, %v1377_v37  ;;  %v1932_v61 = vld [vmem:[%s10990_s1 + $0x28] sm:$0xff] }
 0x104   :  { %1532 = vst.msk [vmem:[#allocation3 + $0x90] sm:$0xff] %vm265_vm1, %v1523_v34  ;;  %v1500_v47 = vld [vmem:[#allocation2 + $0x118] sm:$0xff]  ;;  %v6215_v51 = vpop.f32.mrb[18].mxu1  ;;  %v1451_v53 = vmax.f32 %v1377_v37, %v7370_v7  ;;  %v1515_v54 = vmax.f32 %v7362_v1, %v7409_v38  ;;  %v1516_v55 = vmax.f32 %v7370_v7, %v7411_v39  ;;  %v1369_v56 = vld [vmem:[#allocation2 + $0x70] sm:$0xff]  ;;  %285 = vst.msk [vmem:[#allocation2 + $0x98] sm:$0xff] %vm265_vm1, %v6177_v49  ;;  %v256_v58 = vpop.f32.mrb[19].mxu0 }
 0x105   :  { %v1499_v57 = vld [vmem:[#allocation2 + $0x110] sm:$0xff]  ;;  %550 = vst.msk [vmem:[#allocation2 + $0x138] sm:$0xff] %vm265_vm1, %v6215_v51  ;;  %v522_v60 = vpop.f32.mrb[19].mxu1  ;;  %v1459_v62 = vmax.f32 %v1450_v45, 0.0  ;;  %v1378_v63 = vmax.f32 %v1368_v19, %v1369_v56  ;;  %v1379_v0 = vmax.f32 %v1369_v56, %v1370_v46  ;;  %284 = vst.msk [vmem:[#allocation2 + $0x90] sm:$0xff] %vm265_vm1, %v256_v58  ;;  %v1394_v28 = vmax.f32 %v1385_v44, 0.0 }
 0x106   :  { %v7436_v2 = vmax.f32 %v1498_v20, %v1499_v57  ;;  %549 = vst.msk [vmem:[#allocation2 + $0x130] sm:$0xff] %vm265_vm1, %v522_v60  ;;  %v1460_v1 = vmax.f32 %v1451_v53, 0.0  ;;  %v1524_v4 = vmax.f32 %v1515_v54, 0.0  ;;  %v1525_v5 = vmax.f32 %v1516_v55, 0.0  ;;  %v830_v56 = vld [vmem:[%s10989_s0 + $0x250] sm:$0xff]  ;;  %v1931_v60 = vld [vmem:[%s10990_s1 + $0x20] sm:$0xff] }
 0x107   :  { %v7441_v7 = vmax.f32 %v1499_v57, %v1500_v47  ;;  %1468 = vst.msk [vmem:[#allocation3 + $0x50] sm:$0xff] %vm265_vm1, %v1459_v62  ;;  %v7447_v13 = vmax.f32 %v1359_v8, %v1378_v63  ;;  %v7452_v16 = vmax.f32 %v1360_v9, %v1379_v0  ;;  %v1452_v17 = vmax.f32 %v1378_v63, %v7376_v10  ;;  %v1372_v19 = vld [vmem:[#allocation2 + $0x88] sm:$0xff]  ;;  %v6226_v21 = vpop.f32.mrb[20].mxu0  ;;  %v831_v62 = vld [vmem:[%s10989_s0 + $0x258] sm:$0xff] }
 0x108   :  { %v1453_v18 = vmax.f32 %v1379_v0, %v7385_v14  ;;  %v1502_v20 = vld [vmem:[#allocation2 + $0x128] sm:$0xff]  ;;  %1469 = vst.msk [vmem:[#allocation3 + $0x58] sm:$0xff] %vm265_vm1, %v1460_v1  ;;  %1533 = vst.msk [vmem:[#allocation3 + $0x98] sm:$0xff] %vm265_vm1, %v1524_v4  ;;  %v1517_v42 = vmax.f32 %v7376_v10, %v7436_v2  ;;  %v1371_v8 = vld [vmem:[#allocation2 + $0x80] sm:$0xff]  ;;  %v697_v27 = vpop.f32.mrb[21].mxu0  ;;  %v1395_v29 = vmax.f32 %v1386_v52, 0.0  ;;  %v7474_v40 = vmax.f32 %v7387_v15, %v1439_v22 }
 0x109   :  { %1534 = vst.msk [vmem:[#allocation3 + $0xa0] sm:$0xff] %vm265_vm1, %v1525_v5  ;;  %v1518_v50 = vmax.f32 %v7385_v14, %v7441_v7  ;;  %v1501_v9 = vld [vmem:[#allocation2 + $0x120] sm:$0xff]  ;;  %797 = vst.msk [vmem:[#allocation2 + $0x148] sm:$0xff] %vm265_vm1, %v6226_v21  ;;  %v1461_v30 = vmax.f32 %v1452_v17, 0.0  ;;  %v1380_v32 = vmax.f32 %v1370_v46, %v1371_v8  ;;  %v7464_v33 = vmax.f32 %v1371_v8, %v1372_v19  ;;  %v1933_v21 = vld [vmem:[%s10990_s1 + $0x30] sm:$0xff] }
 0x10a   :  { %v1462_v31 = vmax.f32 %v1453_v18, 0.0  ;;  %796 = vst.msk [vmem:[#allocation2 + $0x140] sm:$0xff] %vm265_vm1, %v697_v27  ;;  %v1526_v34 = vmax.f32 %v1517_v42, 0.0  ;;  %v7467_v10 = vmax.f32 %v1500_v47, %v1501_v9  ;;  %v7469_v37 = vmax.f32 %v1501_v9, %v1502_v20  ;;  %v1950_v14 = vld [vmem:[#allocation3 + $0x48] sm:$0xff]  ;;  %1403 = vst.msk [vmem:[#allocation3 + $0x8] sm:$0xff] %vm265_vm1, %v1394_v28  ;;  %6283 = vmatprep.mubr.msk.f32.mxu1 %vm39_vm0, %v830_v56  ;;  %v1938_v56 = vld [vmem:[%s10990_s1 + $0x58] sm:$0xff] }
 0x10b   :  { %v1527_v35 = vmax.f32 %v1518_v50, 0.0  ;;  %1404 = vst.msk [vmem:[#allocation3 + $0x10] sm:$0xff] %vm265_vm1, %v1395_v29  ;;  %1470 = vst.msk [vmem:[#allocation3 + $0x60] sm:$0xff] %vm265_vm1, %v1461_v30  ;;  %v7481_v44 = vmax.f32 %v1361_v23, %v1380_v32  ;;  %v1454_v45 = vmax.f32 %v1380_v32, %v7395_v25  ;;  %v1455_v46 = vmax.f32 %v7464_v33, %v7397_v26  ;;  %v1374_v47 = vld [vmem:[#allocation2 + $0x98] sm:$0xff]  ;;  %v6229_v15 = vpop.f32.mrb[22].mxu0  ;;  %v7515_v5 = vld [vmem:[#allocation3 + $0x90] sm:$0xff] }
 0x10c   :  { %1471 = vst.msk [vmem:[#allocation3 + $0x68] sm:$0xff] %vm265_vm1, %v1462_v31  ;;  %v1504_v49 = vld [vmem:[#allocation2 + $0x138] sm:$0xff]  ;;  %2081 = vrot.lane.b32.xlu0 %v1950_v14, %s6958_s6  ;;  %1535 = vst.msk [vmem:[#allocation3 + $0xa8] sm:$0xff] %vm265_vm1, %v1526_v34  ;;  %v1519_v48 = vmax.f32 %v7395_v25, %v7467_v10  ;;  %v1520_v23 = vmax.f32 %v7397_v26, %v7469_v37  ;;  %v1373_v51 = vld [vmem:[#allocation2 + $0x90] sm:$0xff]  ;;  %2137 = vrot.lane.b32.xlu1 %v1950_v14, %s6959_s7  ;;  %v707_v53 = vpop.f32.mrb[23].mxu0  ;;  %v1396_v54 = vmax.f32 %v7447_v13, 0.0 }
 0x10d   :  { %1536 = vst.msk [vmem:[#allocation3 + $0xb0] sm:$0xff] %vm265_vm1, %v1527_v35  ;;  %v1503_v52 = vld [vmem:[#allocation2 + $0x130] sm:$0xff]  ;;  %799 = vst.msk [vmem:[#allocation2 + $0x158] sm:$0xff] %vm265_vm1, %v6229_v15  ;;  %v1397_v55 = vmax.f32 %v7452_v16, 0.0  ;;  %v1463_v25 = vmax.f32 %v1454_v45, 0.0  ;;  %v1464_v57 = vmax.f32 %v1455_v46, 0.0  ;;  %v1382_v58 = vmax.f32 %v1372_v19, %v1373_v51  ;;  %6284 = vmatmul.mubr.msk.f32.gmra.mrb[34].mxu1 %vm39_vm0, %v831_v62 }
 0x10e   :  { %v1383_v26 = vmax.f32 %v1373_v51, %v1374_v47  ;;  %798 = vst.msk [vmem:[#allocation2 + $0x150] sm:$0xff] %vm265_vm1, %v707_v53  ;;  %v1528_v63 = vmax.f32 %v1519_v48, 0.0  ;;  %v1529_v0 = vmax.f32 %v1520_v23, 0.0  ;;  %v7511_v1 = vmax.f32 %v1502_v20, %v1503_v52  ;;  %1405 = vst.msk [vmem:[#allocation3 + $0x18] sm:$0xff] %vm265_vm1, %v1396_v54  ;;  %v832_v50 = vld [vmem:[%s10989_s0 + $0x260] sm:$0xff]  ;;  %v833_v45 = vld [vmem:[%s10989_s0 + $0x268] sm:$0xff] }
 0x10f   :  { %v7513_v4 = vmax.f32 %v1503_v52, %v1504_v49  ;;  %1406 = vst.msk [vmem:[#allocation3 + $0x20] sm:$0xff] %vm265_vm1, %v1397_v55  ;;  %1472 = vst.msk [vmem:[#allocation3 + $0x70] sm:$0xff] %vm265_vm1, %v1463_v25  ;;  %v1391_v13 = vmax.f32 %v1363_v36, %v1382_v58  ;;  %v1456_v17 = vmax.f32 %v1382_v58, %v7419_v43  ;;  %v6232_v20 = vpop.f32.mrb[24].mxu0  ;;  %v1934_v36 = vld [vmem:[%s10990_s1 + $0x38] sm:$0xff]  ;;  %v10993_v28 = vmov 0.0|0.0   ;;  %6286 = vmatprep.mubr.msk.f32.mxu1 %vm39_vm0, %v832_v50  ;;  %v834_v49 = vld [vmem:[%s10989_s0 + $0x270] sm:$0xff] }
 0x110   :  { %1473 = vst.msk [vmem:[#allocation3 + $0x78] sm:$0xff] %vm265_vm1, %v1464_v57  ;;  %v1392_v16 = vmax.f32 %v1364_v41, %v1383_v26  ;;  %v1457_v18 = vmax.f32 %v1383_v26, %v7474_v40  ;;  %v1561_v19 = vld [vmem:[#allocation2 + $0x148] sm:$0xff]  ;;  %2019 = vrot.lane.b32.xlu0 %v1950_v14, %s6960_s16  ;;  %1537 = vst.msk [vmem:[#allocation3 + $0xb8] sm:$0xff] %vm265_vm1, %v1528_v63  ;;  %v1521_v11 = vmax.f32 %v7419_v43, %v7511_v1  ;;  %v717_v22 = vpop.f32.mrb[25].mxu0  ;;  %v7608_v52 = vld [vmem:[#allocation3 + $0x50] sm:$0xff]  ;;  %v10995_v63 = vmov 0.0  }
 0x111   :  { %1538 = vst.msk [vmem:[#allocation3 + $0xc0] sm:$0xff] %vm265_vm1, %v1529_v0  ;;  %v1522_v12 = vmax.f32 %v7474_v40, %v7513_v4  ;;  %v1560_v41 = vld [vmem:[#allocation2 + $0x140] sm:$0xff]  ;;  %2335 = vrot.lane.b32.xlu1 %v7515_v5, %s6961_s21  ;;  %801 = vst.msk [vmem:[#allocation2 + $0x168] sm:$0xff] %vm265_vm1, %v6232_v20  ;;  %v7546_v42 = vpack.c.bf16 %v1932_v61, %v1931_v60  ;;  %v1400_v8 = vmax.f32 %v1391_v13, 0.0  ;;  %v1465_v43 = vmax.f32 %v1456_v17, 0.0  ;;  %v1936_v40 = vld [vmem:[%s10990_s1 + $0x48] sm:$0xff] }
 0x112   :  { %v1401_v9 = vmax.f32 %v1392_v16, 0.0  ;;  %v1466_v27 = vmax.f32 %v1457_v18, 0.0  ;;  %800 = vst.msk [vmem:[#allocation2 + $0x160] sm:$0xff] %vm265_vm1, %v717_v22  ;;  %6632 = vmatprep.subr.bf16.mxu1 %v10993_v28  ;;  %v1530_v29 = vmax.f32 %v1521_v11, 0.0  ;;  %v7554_v31 = vmax.f32 %v1560_v41, %v1561_v19  ;;  %6644 = vmatprep.subr.bf16.mxu0 %v10993_v28  ;;  %v1937_v54 = vld [vmem:[%s10990_s1 + $0x50] sm:$0xff]  ;;  %v835_v25 = vld [vmem:[%s10989_s0 + $0x278] sm:$0xff] }
 0x113   :  { %v1531_v30 = vmax.f32 %v1522_v12, 0.0  ;;  %6634 = vmatpush3.bf16.msra.mxu1 %v7546_v42  ;;  %v7557_v32 = vpack.c.bf16 %v1934_v36, %v1933_v21  ;;  %v1390_v34 = vmax.f32 %v1362_v24, %v7464_v33  ;;  %1474 = vst.msk [vmem:[#allocation3 + $0x80] sm:$0xff] %vm265_vm1, %v1465_v43  ;;  %1409 = vst.msk [vmem:[#allocation3 + $0x38] sm:$0xff] %vm265_vm1, %v1400_v8  ;;  %v6235_v14 = vpop.f32.mrb[26].mxu0  ;;  %v1398_v46 = vmax.f32 %v7481_v44, 0.0  ;;  %v7631_v61 = vld [vmem:[#allocation3 + $0x8] sm:$0xff] }
 0x114   :  { %1475 = vst.msk [vmem:[#allocation3 + $0x88] sm:$0xff] %vm265_vm1, %v1466_v27  ;;  %1410 = vst.msk [vmem:[#allocation3 + $0x40] sm:$0xff] %vm265_vm1, %v1401_v9  ;;  %v1563_v35 = vld [vmem:[#allocation2 + $0x158] sm:$0xff]  ;;  %2217 = vrot.lane.b32.xlu0 %v7515_v5, %s6963_s24  ;;  %6635 = vmatprep.subr.bf16.mxu1 %v10993_v28  ;;  %v1579_v3 = vmax.f32 %v7366_v6, %v7554_v31  ;;  %v727_v33 = vpop.f32.mrb[27].mxu0  ;;  %v7598_v48 = vpack.c.bf16 %v1936_v40, %v1935_v59  ;;  %v7655_v21 = vld [vmem:[#allocation3 + $0x10] sm:$0xff] }
 0x115   :  { %1539 = vst.msk [vmem:[#allocation3 + $0xc8] sm:$0xff] %vm265_vm1, %v1530_v29  ;;  %1540 = vst.msk [vmem:[#allocation3 + $0xd0] sm:$0xff] %vm265_vm1, %v1531_v30  ;;  %v1562_v24 = vld [vmem:[#allocation2 + $0x150] sm:$0xff]  ;;  %2279 = vrot.lane.b32.xlu1 %v7515_v5, %s6964_s27  ;;  %6287 = vmatmul.mubr.msk.f32.gmra.mrb[36].mxu1 %vm39_vm0, %v833_v45  ;;  %v1399_v55 = vmax.f32 %v1390_v34, 0.0  ;;  %v7634_v62 = vpack.c.bf16 %v1938_v56, %v1937_v54  ;;  %v7644_v13 = vld [vmem:[#allocation3 + $0x58] sm:$0xff] }
 0x116   :  { %803 = vst.msk [vmem:[#allocation2 + $0x178] sm:$0xff] %vm265_vm1, %v6235_v14  ;;  %v7588_v47 = vmax.f32 %v1561_v19, %v1562_v24  ;;  %v7590_v6 = vmax.f32 %v1562_v24, %v1563_v35  ;;  %802 = vst.msk [vmem:[#allocation2 + $0x170] sm:$0xff] %vm265_vm1, %v727_v33  ;;  %v1588_v15 = vmax.f32 %v1579_v3, 0.0  ;;  %6289 = vmatprep.mubr.msk.f32.mxu1 %vm39_vm0, %v834_v49  ;;  %v7672_v41 = vld [vmem:[%s10990_s1 + $0x60] sm:$0xff] }
 0x117   :  { %6637 = vmatpush3.bf16.msra.mxu1 %v7557_v32  ;;  %1407 = vst.msk [vmem:[#allocation3 + $0x28] sm:$0xff] %vm265_vm1, %v1398_v46  ;;  %v6238_v53 = vpop.f32.mrb[28].mxu0  ;;  %1408 = vst.msk [vmem:[#allocation3 + $0x30] sm:$0xff] %vm265_vm1, %v1399_v55  ;;  %v7681_v43 = vld [vmem:[#allocation3 + $0xa0] sm:$0xff] }
 0x118   :  { %v1580_v44 = vmax.f32 %v7409_v38, %v7588_v47  ;;  %v1581_v23 = vmax.f32 %v7411_v39, %v7590_v6  ;;  %v1565_v51 = vld [vmem:[#allocation2 + $0x168] sm:$0xff]  ;;  %2155 = vrot.lane.b32.xlu0 %v7515_v5, %s6959_s7  ;;  %6638 = vmatprep.subr.bf16.mxu1 %v10993_v28  ;;  %1597 = vst.msk [vmem:[#allocation3 + $0xd8] sm:$0xff] %vm265_vm1, %v1588_v15  ;;  %805 = vst.msk [vmem:[#allocation2 + $0x188] sm:$0xff] %vm265_vm1, %v6238_v53  ;;  %v737_v39 = vpop.f32.mrb[29].mxu0 }
 0x119   :  { %v1564_v38 = vld [vmem:[#allocation2 + $0x160] sm:$0xff]  ;;  %2201 = vrot.lane.b32.xlu1 %v7608_v52, %s6963_s24  ;;  %804 = vst.msk [vmem:[#allocation2 + $0x180] sm:$0xff] %vm265_vm1, %v737_v39  ;;  %6290 = vmatmul.mubr.msk.f32.gmra.mrb[38].mxu1 %vm39_vm0, %v835_v25 }
 0x11a   :  { %v1589_v57 = vmax.f32 %v1580_v44, 0.0  ;;  %v1590_v58 = vmax.f32 %v1581_v23, 0.0  ;;  %v7624_v26 = vmax.f32 %v1563_v35, %v1564_v38  ;;  %v7626_v60 = vmax.f32 %v1564_v38, %v1565_v51  ;;  %6348 = vmatprep.mubr.msk.f32.mxu1 %vm6965_vm2, %v10995_v63  ;;  %v7743_v38 = vld [vmem:[#allocation3 + $0x60] sm:$0xff] }
 0x11b   :  { %6640 = vmatpush3.bf16.msra.mxu1 %v7598_v48 }
 0x11c   :  { %1598 = vst.msk [vmem:[#allocation3 + $0xe0] sm:$0xff] %vm265_vm1, %v1589_v57  ;;  %1599 = vst.msk [vmem:[#allocation3 + $0xe8] sm:$0xff] %vm265_vm1, %v1590_v58  ;;  %v1582_v0 = vmax.f32 %v7436_v2, %v7624_v26  ;;  %v1583_v5 = vmax.f32 %v7441_v7, %v7626_v60  ;;  %2003 = vrot.lane.b32.xlu0 %v7631_v61, %s6960_s16  ;;  %6641 = vmatprep.subr.bf16.mxu1 %v10993_v28  ;;  %v7660_v7 = vld [vmem:[#allocation3 + $0x98] sm:$0xff]  ;;  %v7753_v57 = vld [vmem:[#allocation3 + $0xa8] sm:$0xff] }
 0x11d   :  { %v1567_v16 = vld [vmem:[#allocation2 + $0x178] sm:$0xff]  ;;  %2265 = vrot.lane.b32.xlu1 %v7644_v13, %s6964_s27  ;;  %v1566_v17 = vld [vmem:[#allocation2 + $0x170] sm:$0xff]  ;;  %v7761_v58 = vld [vmem:[#allocation3 + $0x68] sm:$0xff] }
 0x11e   :  { %v1591_v18 = vmax.f32 %v1582_v0, 0.0  ;;  %v1592_v19 = vmax.f32 %v1583_v5, 0.0  ;;  %v7651_v20 = vmax.f32 %v1565_v51, %v1566_v17  ;;  %v7653_v2 = vmax.f32 %v1566_v17, %v1567_v16  ;;  %v7773_v0 = vld [vmem:[#allocation3 + $0xb0] sm:$0xff] }
 0x11f   :  { %6643 = vmatpush3.bf16.msra.mxu1 %v7634_v62  ;;  %v1569_v12 = vld [vmem:[#allocation2 + $0x188] sm:$0xff] }
 0x120   :  { %1600 = vst.msk [vmem:[#allocation3 + $0xf0] sm:$0xff] %vm265_vm1, %v1591_v18  ;;  %1601 = vst.msk [vmem:[#allocation3 + $0xf8] sm:$0xff] %vm265_vm1, %v1592_v19  ;;  %2067 = vrot.lane.b32.xlu0 %v7655_v21, %s6958_s6  ;;  %v1584_v36 = vmax.f32 %v7467_v10, %v7651_v20  ;;  %v1585_v11 = vmax.f32 %v7469_v37, %v7653_v2  ;;  %6346 = vmatprep.subr.mxu1 %v10995_v63  ;;  %v1568_v22 = vld [vmem:[#allocation2 + $0x180] sm:$0xff]  ;;  %v6241_v37 = vpop.f32.mrb[30].mxu0 }
 0x121   :  { %2399 = vrot.lane.b32.xlu1 %v7660_v7, %s6967_s18  ;;  %v7676_v9 = vmax.f32 %v1567_v16, %v1568_v22  ;;  %v7678_v10 = vmax.f32 %v1568_v22, %v1569_v12  ;;  %807 = vst.msk [vmem:[#allocation2 + $0x198] sm:$0xff] %vm265_vm1, %v6241_v37  ;;  %v747_v30 = vpop.f32.mrb[31].mxu0 }
 0x122   :  { %v1593_v50 = vmax.f32 %v1584_v36, 0.0  ;;  %v1594_v8 = vmax.f32 %v1585_v11, 0.0  ;;  %806 = vst.msk [vmem:[#allocation2 + $0x190] sm:$0xff] %vm265_vm1, %v747_v30  ;;  %v6244_v34 = vpop.f32.mrb[32].mxu0  ;;  %v7789_v11 = vld [vmem:[#allocation3 + $0x18] sm:$0xff] }
 0x123   :  { %6347 = vmatpush3.msra.mxu1 %v7672_v41  ;;  %v1586_v27 = vmax.f32 %v7511_v1, %v7676_v9  ;;  %v1587_v29 = vmax.f32 %v7513_v4, %v7678_v10  ;;  %809 = vst.msk [vmem:[#allocation2 + $0x1a8] sm:$0xff] %vm265_vm1, %v6244_v34  ;;  %v757_v1 = vpop.f32.mrb[33].mxu0 }
 0x124   :  { %2005 = vrot.lane.b32.xlu0 %v7655_v21, %s6960_s16  ;;  %1602 = vst.msk [vmem:[#allocation3 + $0x100] sm:$0xff] %vm265_vm1, %v1593_v50  ;;  %1603 = vst.msk [vmem:[#allocation3 + $0x108] sm:$0xff] %vm265_vm1, %v1594_v8  ;;  %6656 = vmatprep.subr.bf16.mxu1 %v10993_v28  ;;  %v6247_v49 = vpop.f32.mrb[34].mxu0 }
 0x125   :  { %2463 = vrot.lane.b32.xlu1 %v7681_v43, %s6968_s19  ;;  %v1595_v35 = vmax.f32 %v1586_v27, 0.0  ;;  %v1596_v14 = vmax.f32 %v1587_v29, 0.0  ;;  %808 = vst.msk [vmem:[#allocation2 + $0x1a0] sm:$0xff] %vm265_vm1, %v757_v1  ;;  %811 = vst.msk [vmem:[#allocation2 + $0x1b8] sm:$0xff] %vm265_vm1, %v6247_v49 }
 0x127   :  { %1604 = vst.msk [vmem:[#allocation3 + $0x110] sm:$0xff] %vm265_vm1, %v1595_v35  ;;  %1605 = vst.msk [vmem:[#allocation3 + $0x118] sm:$0xff] %vm265_vm1, %v1596_v14  ;;  %v7833_v35 = vld [vmem:[#allocation3 + $0xb8] sm:$0xff] }
 0x128   :  { %2139 = vrot.lane.b32.xlu0 %v7608_v52, %s6959_s7  ;;  %v1626_v4 = vld [vmem:[#allocation2 + $0x198] sm:$0xff] }
 0x129   :  { %2337 = vrot.lane.b32.xlu1 %v7660_v7, %s6961_s21  ;;  %v1625_v59 = vld [vmem:[#allocation2 + $0x190] sm:$0xff] }
 0x12a   :  { %v7708_v3 = vmax.f32 %v1625_v59, %v1626_v4  ;;  %v1628_v24 = vld [vmem:[#allocation2 + $0x1a8] sm:$0xff] }
 0x12c   :  { %2203 = vrot.lane.b32.xlu0 %v7644_v13, %s6963_s24  ;;  %v1627_v33 = vld [vmem:[#allocation2 + $0x1a0] sm:$0xff]  ;;  %v1644_v40 = vmax.f32 %v7554_v31, %v7708_v3  ;;  %v767_v31 = vpop.f32.mrb[35].mxu0 }
 0x12d   :  { %2401 = vrot.lane.b32.xlu1 %v7681_v43, %s6967_s18  ;;  %v7712_v45 = vmax.f32 %v1626_v4, %v1627_v33  ;;  %v7714_v46 = vmax.f32 %v1627_v33, %v1628_v24  ;;  %810 = vst.msk [vmem:[#allocation2 + $0x1b0] sm:$0xff] %vm265_vm1, %v767_v31  ;;  %v6264_v4 = vpop.f32.mrb[20].mxu1 }
 0x12e   :  { %v1653_v15 = vmax.f32 %v1644_v40, 0.0  ;;  %1062 = vst.msk [vmem:[#allocation2 + $0x1e8] sm:$0xff] %vm265_vm1, %v6264_v4  ;;  %v962_v33 = vpop.f32.mrb[21].mxu1 }
 0x12f   :  { %v1645_v44 = vmax.f32 %v7588_v47, %v7712_v45  ;;  %v1646_v23 = vmax.f32 %v7590_v6, %v7714_v46  ;;  %v1630_v47 = vld [vmem:[#allocation2 + $0x1b8] sm:$0xff]  ;;  %1061 = vst.msk [vmem:[#allocation2 + $0x1e0] sm:$0xff] %vm265_vm1, %v962_v33  ;;  %v6267_v40 = vpop.f32.mrb[22].mxu1  ;;  %v1082_v33 = vld [vmem:[%s10989_s0 + $0x288] sm:$0xff] }
 0x130   :  { %2141 = vrot.lane.b32.xlu0 %v7644_v13, %s6959_s7  ;;  %1662 = vst.msk [vmem:[#allocation3 + $0x120] sm:$0xff] %vm265_vm1, %v1653_v15  ;;  %1064 = vst.msk [vmem:[#allocation2 + $0x1f8] sm:$0xff] %vm265_vm1, %v6267_v40  ;;  %v972_v15 = vpop.f32.mrb[23].mxu1 }
 0x131   :  { %2339 = vrot.lane.b32.xlu1 %v7681_v43, %s6961_s21  ;;  %v1654_v51 = vmax.f32 %v1645_v44, 0.0  ;;  %v1655_v53 = vmax.f32 %v1646_v23, 0.0  ;;  %1063 = vst.msk [vmem:[#allocation2 + $0x1f0] sm:$0xff] %vm265_vm1, %v972_v15 }
 0x133   :  { %1663 = vst.msk [vmem:[#allocation3 + $0x128] sm:$0xff] %vm265_vm1, %v1654_v51  ;;  %1664 = vst.msk [vmem:[#allocation3 + $0x130] sm:$0xff] %vm265_vm1, %v1655_v53  ;;  %v6270_v51 = vpop.f32.mrb[24].mxu1 }
 0x134   :  { %2083 = vrot.lane.b32.xlu0 %v7608_v52, %s6958_s6  ;;  %v1629_v6 = vld [vmem:[#allocation2 + $0x1b0] sm:$0xff]  ;;  %1066 = vst.msk [vmem:[#allocation2 + $0x208] sm:$0xff] %vm265_vm1, %v6270_v51 }
 0x135   :  { %2281 = vrot.lane.b32.xlu1 %v7660_v7, %s6964_s27  ;;  %v7737_v54 = vmax.f32 %v1628_v24, %v1629_v6  ;;  %v7739_v55 = vmax.f32 %v1629_v6, %v1630_v47  ;;  %v1691_v31 = vld [vmem:[#allocation2 + $0x1e8] sm:$0xff] }
 0x136   :  { %v1690_v6 = vld [vmem:[#allocation2 + $0x1e0] sm:$0xff] }
 0x137   :  { %v1647_v39 = vmax.f32 %v7624_v26, %v7737_v54  ;;  %v6250_v26 = vpop.f32.mrb[36].mxu0 }
 0x138   :  { %2021 = vrot.lane.b32.xlu0 %v7608_v52, %s6960_s16  ;;  %v1648_v52 = vmax.f32 %v7626_v60, %v7739_v55  ;;  %813 = vst.msk [vmem:[#allocation2 + $0x1c8] sm:$0xff] %vm265_vm1, %v6250_v26  ;;  %v777_v60 = vpop.f32.mrb[37].mxu0 }
 0x139   :  { %2283 = vrot.lane.b32.xlu1 %v7681_v43, %s6964_s27  ;;  %v1656_v56 = vmax.f32 %v1647_v39, 0.0  ;;  %812 = vst.msk [vmem:[#allocation2 + $0x1c0] sm:$0xff] %vm265_vm1, %v777_v60  ;;  %v1693_v39 = vld [vmem:[#allocation2 + $0x1f8] sm:$0xff] }
 0x13a   :  { %v1657_v25 = vmax.f32 %v1648_v52, 0.0 }
 0x13b   :  { %1665 = vst.msk [vmem:[#allocation3 + $0x138] sm:$0xff] %vm265_vm1, %v1656_v56 }
 0x13c   :  { %2085 = vrot.lane.b32.xlu0 %v7644_v13, %s6958_s6  ;;  %1666 = vst.msk [vmem:[#allocation3 + $0x140] sm:$0xff] %vm265_vm1, %v1657_v25  ;;  %v1692_v25 = vld [vmem:[#allocation2 + $0x1f0] sm:$0xff] }
 0x13d   :  { %2267 = vrot.lane.b32.xlu1 %v7743_v38, %s6964_s27  ;;  %v7898_v60 = vmax.f32 %v1691_v31, %v1692_v25 }
 0x13f   :  { %v1632_v5 = vld [vmem:[#allocation2 + $0x1c8] sm:$0xff] }
 0x140   :  { %2219 = vrot.lane.b32.xlu0 %v7660_v7, %s6963_s24 }
 0x141   :  { %2465 = vrot.lane.b32.xlu1 %v7753_v57, %s6968_s19 }
 0x144   :  { %2023 = vrot.lane.b32.xlu0 %v7644_v13, %s6960_s16  ;;  %v1631_v13 = vld [vmem:[#allocation2 + $0x1c0] sm:$0xff] }
 0x145   :  { %2269 = vrot.lane.b32.xlu1 %v7761_v58, %s6964_s27  ;;  %v7777_v16 = vmax.f32 %v1630_v47, %v1631_v13  ;;  %v7779_v17 = vmax.f32 %v1631_v13, %v1632_v5  ;;  %v982_v47 = vpop.f32.mrb[25].mxu1  ;;  %v1941_v13 = vld [vmem:[#allocation3] sm:$0xff] }
 0x146   :  { %1065 = vst.msk [vmem:[#allocation2 + $0x200] sm:$0xff] %vm265_vm1, %v982_v47  ;;  %v6273_v52 = vpop.f32.mrb[26].mxu1 }
 0x147   :  { %v1649_v18 = vmax.f32 %v7651_v20, %v7777_v16  ;;  %v1650_v19 = vmax.f32 %v7653_v2, %v7779_v17  ;;  %v7801_v20 = vld [vmem:[#allocation3 + $0x20] sm:$0xff]  ;;  %v6253_v2 = vpop.f32.mrb[38].mxu0  ;;  %1068 = vst.msk [vmem:[#allocation2 + $0x218] sm:$0xff] %vm265_vm1, %v6273_v52 }
 0x148   :  { %2157 = vrot.lane.b32.xlu0 %v7660_v7, %s6959_s7  ;;  %815 = vst.msk [vmem:[#allocation2 + $0x1d8] sm:$0xff] %vm265_vm1, %v6253_v2  ;;  %v787_v12 = vpop.f32.mrb[39].mxu0  ;;  %v1695_v2 = vld [vmem:[#allocation2 + $0x208] sm:$0xff] }
 0x149   :  { %2403 = vrot.lane.b32.xlu1 %v7753_v57, %s6967_s18  ;;  %v1658_v7 = vmax.f32 %v1649_v18, 0.0  ;;  %v1659_v36 = vmax.f32 %v1650_v19, 0.0  ;;  %814 = vst.msk [vmem:[#allocation2 + $0x1d0] sm:$0xff] %vm265_vm1, %v787_v12  ;;  %v1710_v19 = vmax.f32 %v7712_v45, %v7898_v60 }
 0x14b   :  { %1667 = vst.msk [vmem:[#allocation3 + $0x148] sm:$0xff] %vm265_vm1, %v1658_v7  ;;  %1668 = vst.msk [vmem:[#allocation3 + $0x150] sm:$0xff] %vm265_vm1, %v1659_v36 }
 0x14c   :  { %2221 = vrot.lane.b32.xlu0 %v7681_v43, %s6963_s24 }
 0x14d   :  { %2467 = vrot.lane.b32.xlu1 %v7773_v0, %s6968_s19 }
 0x14e   :  { %v7928_v4 = vld [vmem:[#allocation2 + $0x218] sm:$0xff] }
 0x14f   :  { %v1634_v22 = vld [vmem:[#allocation2 + $0x1d8] sm:$0xff] }
 0x150   :  { %2159 = vrot.lane.b32.xlu0 %v7681_v43, %s6959_s7  ;;  %v1633_v50 = vld [vmem:[#allocation2 + $0x1d0] sm:$0xff] }
 0x151   :  { %2341 = vrot.lane.b32.xlu1 %v7753_v57, %s6961_s21  ;;  %v7817_v8 = vmax.f32 %v1632_v5, %v1633_v50  ;;  %v7819_v37 = vmax.f32 %v1633_v50, %v1634_v22  ;;  %v7823_v43 = vld [vmem:[#allocation3 + $0x70] sm:$0xff]  ;;  %v7900_v5 = vmax.f32 %v1692_v25, %v1693_v39  ;;  %v7913_v22 = vld [vmem:[#allocation3 + $0x28] sm:$0xff]  ;;  %v1719_v50 = vmax.f32 %v1710_v19, 0.0 }
 0x153   :  { %v1651_v27 = vmax.f32 %v7676_v9, %v7817_v8  ;;  %v1652_v29 = vmax.f32 %v7678_v10, %v7819_v37  ;;  %v7841_v9 = vld [vmem:[#allocation3 + $0x78] sm:$0xff]  ;;  %v7851_v10 = vld [vmem:[#allocation3 + $0xc0] sm:$0xff]  ;;  %1728 = vst.msk [vmem:[#allocation3 + $0x170] sm:$0xff] %vm265_vm1, %v1719_v50 }
 0x154   :  { %2069 = vrot.lane.b32.xlu0 %v7789_v11, %s6958_s6 }
 0x155   :  { %2405 = vrot.lane.b32.xlu1 %v7773_v0, %s6967_s18  ;;  %v1660_v30 = vmax.f32 %v1651_v27, 0.0  ;;  %v1661_v34 = vmax.f32 %v1652_v29, 0.0  ;;  %v1694_v29 = vld [vmem:[#allocation2 + $0x200] sm:$0xff] }
 0x157   :  { %1669 = vst.msk [vmem:[#allocation3 + $0x158] sm:$0xff] %vm265_vm1, %v1660_v30  ;;  %1670 = vst.msk [vmem:[#allocation3 + $0x160] sm:$0xff] %vm265_vm1, %v1661_v34  ;;  %v7921_v30 = vmax.f32 %v1694_v29, %v1695_v2 }
 0x158   :  { %2007 = vrot.lane.b32.xlu0 %v7789_v11, %s6960_s16 }
 0x159   :  { %2343 = vrot.lane.b32.xlu1 %v7773_v0, %s6961_s21  ;;  %v1713_v51 = vmax.f32 %v7739_v55, %v7921_v30 }
 0x15b   :  { %v1722_v25 = vmax.f32 %v1713_v51, 0.0 }
 0x15c   :  { %2071 = vrot.lane.b32.xlu0 %v7801_v20, %s6958_s6 }
 0x15d   :  { %2285 = vrot.lane.b32.xlu1 %v7753_v57, %s6964_s27  ;;  %1731 = vst.msk [vmem:[#allocation3 + $0x188] sm:$0xff] %vm265_vm1, %v1722_v25 }
 0x160   :  { %2205 = vrot.lane.b32.xlu0 %v7743_v38, %s6963_s24 }
 0x161   :  { %2223 = vrot.lane.b32.xlu1 %v7753_v57, %s6963_s24 }
 0x164   :  { %2009 = vrot.lane.b32.xlu0 %v7801_v20, %s6960_s16 }
 0x165   :  { %2287 = vrot.lane.b32.xlu1 %v7773_v0, %s6964_s27 }
 0x168   :  { %2143 = vrot.lane.b32.xlu0 %v7743_v38, %s6959_s7 }
 0x169   :  { %2271 = vrot.lane.b32.xlu1 %v7823_v43, %s6964_s27 }
 0x16c   :  { %2207 = vrot.lane.b32.xlu0 %v7761_v58, %s6963_s24 }
 0x16d   :  { %2469 = vrot.lane.b32.xlu1 %v7833_v35, %s6968_s19 }
 0x170   :  { %2145 = vrot.lane.b32.xlu0 %v7761_v58, %s6959_s7 }
 0x171   :  { %2273 = vrot.lane.b32.xlu1 %v7841_v9, %s6964_s27 }
 0x174   :  { %2087 = vrot.lane.b32.xlu0 %v7743_v38, %s6958_s6 }
 0x175   :  { %2407 = vrot.lane.b32.xlu1 %v7833_v35, %s6967_s18 }
 0x178   :  { %2025 = vrot.lane.b32.xlu0 %v7743_v38, %s6960_s16  ;;  %v7893_v38 = vmax.f32 %v1690_v6, %v1691_v31 }
 0x179   :  { %2471 = vrot.lane.b32.xlu1 %v7851_v10, %s6968_s19 }
 0x17a   :  { %v1709_v26 = vmax.f32 %v7708_v3, %v7893_v38  ;;  %v1711_v3 = vmax.f32 %v7714_v46, %v7900_v5  ;;  %v7919_v46 = vmax.f32 %v1693_v39, %v1694_v29  ;;  %v1087_v29 = vld [vmem:[%s10989_s0 + $0x2b0] sm:$0xff] }
 0x17c   :  { %2089 = vrot.lane.b32.xlu0 %v7761_v58, %s6958_s6  ;;  %v1718_v18 = vmax.f32 %v1709_v26, 0.0  ;;  %v1720_v27 = vmax.f32 %v1711_v3, 0.0  ;;  %v1712_v31 = vmax.f32 %v7737_v54, %v7919_v46  ;;  %v1083_v54 = vld [vmem:[%s10989_s0 + $0x290] sm:$0xff] }
 0x17d   :  { %2345 = vrot.lane.b32.xlu1 %v7833_v35, %s6961_s21  ;;  %v7981_v3 = vld [vmem:[#allocation3 + $0x30] sm:$0xff] }
 0x17e   :  { %v7859_v14 = vpop.permute.xlu0 %2081  ;;  %v2138_v1 = vpop.permute.xlu1 %2137  ;;  %1727 = vst.msk [vmem:[#allocation3 + $0x168] sm:$0xff] %vm265_vm1, %v1718_v18  ;;  %1729 = vst.msk [vmem:[#allocation3 + $0x178] sm:$0xff] %vm265_vm1, %v1720_v27  ;;  %v1084_v18 = vld [vmem:[%s10989_s0 + $0x298] sm:$0xff] }
 0x180   :  { %3042 = vrot.lane.b32.xlu0 %v7773_v0, %s6960_s16 }
 0x181   :  { %2409 = vrot.lane.b32.xlu1 %v7851_v10, %s6967_s18 }
 0x182   :  { %v7865_v59 = vpop.permute.xlu0 %2019 }
 0x183   :  { %v7868_v24 = vpop.permute.xlu1 %2335 }
 0x184   :  { %2027 = vrot.lane.b32.xlu0 %v7761_v58, %s6960_s16 }
 0x185   :  { %2347 = vrot.lane.b32.xlu1 %v7851_v10, %s6961_s21 }
 0x186   :  { %v7875_v49 = vpop.permute.xlu0 %2217 }
 0x187   :  { %v7878_v44 = vpop.permute.xlu1 %2279 }
 0x188   :  { %2161 = vrot.lane.b32.xlu0 %v7753_v57, %s6959_s7  ;;  %v992_v57 = vpop.f32.mrb[27].mxu1 }
 0x189   :  { %3106 = vrot.lane.b32.xlu1 %v7833_v35, %s6958_s6  ;;  %1067 = vst.msk [vmem:[#allocation2 + $0x210] sm:$0xff] %vm265_vm1, %v992_v57 }
 0x18a   :  { %v7885_v23 = vpop.permute.xlu0 %2155 }
 0x18b   :  { %v2202_v53 = vpop.permute.xlu1 %2201 }
 0x18c   :  { %2225 = vrot.lane.b32.xlu0 %v7773_v0, %s6963_s24 }
 0x18d   :  { %2091 = vrot.lane.b32.xlu1 %v7823_v43, %s6958_s6 }
 0x18e   :  { %v2004_v56 = vpop.permute.xlu0 %2003 }
 0x18f   :  { %v2266_v58 = vpop.permute.xlu1 %2265  ;;  %v2526_v7 = vsel %vm265_vm1, %v1941_v13, %v2004_v56  ;;  %v7958_v56 = vld [vmem:[#allocation3 + $0x80] sm:$0xff]  ;;  %v6276_v13 = vpop.f32.mrb[28].mxu1 }
 0x190   :  { %2163 = vrot.lane.b32.xlu0 %v7773_v0, %s6959_s7  ;;  %1070 = vst.msk [vmem:[#allocation2 + $0x228] sm:$0xff] %vm265_vm1, %v6276_v13 }
 0x191   :  { %2289 = vrot.lane.b32.xlu1 %v7833_v35, %s6964_s27 }
 0x192   :  { %v2068_v36 = vpop.permute.xlu0 %2067 }
 0x193   :  { %v2400_v12 = vpop.permute.xlu1 %2399  ;;  %v2548_v0 = vsel %vm2547_vm3, %v2526_v7, %v2068_v36 }
 0x194   :  { %v2570_v45 = vsel %vm2569_vm4, %v2548_v0, %v2138_v1  ;;  %2073 = vrot.lane.b32.xlu0 %v7913_v22, %s6958_s6  ;;  %v1081_v1 = vld [vmem:[%s10989_s0 + $0x280] sm:$0xff]  ;;  %v1086_v0 = vld [vmem:[%s10989_s0 + $0x2a8] sm:$0xff] }
 0x195   :  { %v2591_v34 = vsel %vm39_vm0, %v2570_v45, %v2202_v53  ;;  %2291 = vrot.lane.b32.xlu1 %v7851_v10, %s6964_s27  ;;  %v1696_v53 = vld [vmem:[#allocation2 + $0x210] sm:$0xff]  ;;  %6300 = vmatprep.mubr.msk.f32.mxu0 %vm39_vm0, %v1081_v1  ;;  %v8016_v45 = vld [vmem:[#allocation3 + $0x88] sm:$0xff] }
 0x196   :  { %v2613_v40 = vsel %vm2612_vm5, %v2591_v34, %v2266_v58  ;;  %v7937_v15 = vpop.permute.xlu0 %2005  ;;  %v7946_v39 = vmax.f32 %v1695_v2, %v1696_v53  ;;  %v7949_v52 = vmax.f32 %v1696_v53, %v7928_v4  ;;  %6301 = vmatmul.mubr.msk.f32.vlgmr.msra.gmra.mrb[40].mxu0 %vm39_vm0, %v1082_v33  ;;  %v1085_v2 = vld [vmem:[%s10989_s0 + $0x2a0] sm:$0xff]  ;;  %v1088_v34 = vld [vmem:[%s10989_s0 + $0x2b8] sm:$0xff] }
 0x197   :  { %v2464_v47 = vpop.permute.xlu1 %2463  ;;  %v2635_v6 = vsel %vm2634_vm6, %v2613_v40, %v7868_v24  ;;  %v1721_v24 = vmax.f32 %v1712_v31, 0.0  ;;  %6303 = vmatprep.mubr.msk.f32.mxu0 %vm39_vm0, %v1083_v54  ;;  %6646 = vmatpush3.bf16.msra.mxu0 %v7546_v42  ;;  %v1089_v53 = vld [vmem:[%s10989_s0 + $0x2c0] sm:$0xff] }
 0x198   :  { %v2657_v55 = vsel %vm2656_vm7, %v2635_v6, %v2400_v12  ;;  %2011 = vrot.lane.b32.xlu0 %v7913_v22, %s6960_s16  ;;  %v1714_v58 = vmax.f32 %v7777_v16, %v7946_v39  ;;  %v1715_v26 = vmax.f32 %v7779_v17, %v7949_v52  ;;  %v1002_v16 = vpop.f32.mrb[29].mxu1  ;;  %6647 = vmatprep.subr.bf16.mxu0 %v10993_v28  ;;  %v7992_v12 = vld [vmem:[#allocation3 + $0xc8] sm:$0xff] }
 0x199   :  { %v2679_v57 = vsel %vm2678_vm8, %v2657_v55, %v2464_v47  ;;  %2275 = vrot.lane.b32.xlu1 %v7958_v56, %s6964_s27  ;;  %1730 = vst.msk [vmem:[#allocation3 + $0x180] sm:$0xff] %vm265_vm1, %v1721_v24  ;;  %1069 = vst.msk [vmem:[#allocation2 + $0x220] sm:$0xff] %vm265_vm1, %v1002_v16  ;;  %v1090_v47 = vld [vmem:[%s10989_s0 + $0x2c8] sm:$0xff]  ;;  %v8105_v16 = vld [vmem:[#allocation3 + $0xd8] sm:$0xff] }
 0x19a   :  { %6349 = vmatmul.mubr.msk.f32.vlgmr.msra.gmra.mrb[40].mxu1 %vm2704_vm9, %v2679_v57  ;;  %v7973_v19 = vpop.permute.xlu0 %2139  ;;  %v1723_v7 = vmax.f32 %v1714_v58, 0.0  ;;  %v1724_v36 = vmax.f32 %v1715_v26, 0.0  ;;  %6304 = vmatmul.mubr.msk.f32.gmra.mrb[42].mxu0 %vm39_vm0, %v1084_v18 }
 0x19b   :  { %v7979_v17 = vpop.permute.xlu1 %2337  ;;  %6351 = vmatprep.mubr.msk.f32.mxu1 %vm6965_vm2, %v10995_v63  ;;  %6306 = vmatprep.mubr.msk.f32.mxu0 %vm39_vm0, %v1085_v2 }
 0x19c   :  { %2075 = vrot.lane.b32.xlu0 %v7981_v3, %s6958_s6  ;;  %1732 = vst.msk [vmem:[#allocation3 + $0x190] sm:$0xff] %vm265_vm1, %v1723_v7  ;;  %1733 = vst.msk [vmem:[#allocation3 + $0x198] sm:$0xff] %vm265_vm1, %v1724_v36  ;;  %6649 = vmatpush3.bf16.msra.mxu0 %v7557_v32 }
 0x19d   :  { %2473 = vrot.lane.b32.xlu1 %v7992_v12, %s6968_s19  ;;  %6650 = vmatprep.subr.bf16.mxu0 %v10993_v28 }
 0x19e   :  { %v8003_v50 = vpop.permute.xlu0 %2203  ;;  %6658 = vmatpush3.bf16.msra.mxu1 %v7546_v42  ;;  %6307 = vmatmul.mubr.msk.f32.gmra.mrb[44].mxu0 %vm39_vm0, %v1086_v0  ;;  %v1699_v42 = vld [vmem:[#allocation2 + $0x228] sm:$0xff] }
 0x19f   :  { %v8007_v27 = vpop.permute.xlu1 %2401  ;;  %6659 = vmatprep.subr.bf16.mxu1 %v10993_v28  ;;  %6309 = vmatprep.mubr.msk.f32.mxu0 %vm39_vm0, %v1087_v29 }
 0x1a0   :  { %2209 = vrot.lane.b32.xlu0 %v7823_v43, %s6963_s24  ;;  %6652 = vmatpush3.bf16.msra.mxu0 %v7598_v48  ;;  %v1698_v33 = vld [vmem:[#allocation2 + $0x220] sm:$0xff] }
 0x1a1   :  { %2277 = vrot.lane.b32.xlu1 %v8016_v45, %s6964_s27  ;;  %6653 = vmatprep.subr.bf16.mxu0 %v10993_v28  ;;  %v8032_v31 = vmax.f32 %v7928_v4, %v1698_v33  ;;  %v8034_v51 = vmax.f32 %v1698_v33, %v1699_v42 }
 0x1a2   :  { %v8025_v1 = vpop.permute.xlu0 %2141  ;;  %6661 = vmatpush3.bf16.msra.mxu1 %v7557_v32  ;;  %6310 = vmatmul.mubr.msk.f32.gmra.mrb[46].mxu0 %vm39_vm0, %v1088_v34 }
 0x1a3   :  { %v8029_v40 = vpop.permute.xlu1 %2339  ;;  %6662 = vmatprep.subr.bf16.mxu1 %v10993_v28  ;;  %6312 = vmatprep.mubr.msk.f32.mxu0 %vm39_vm0, %v1089_v53  ;;  %v1716_v32 = vmax.f32 %v7817_v8, %v8032_v31  ;;  %v1717_v4 = vmax.f32 %v7819_v37, %v8034_v51  ;;  %v8064_v8 = vld [vmem:[#allocation3 + $0xd0] sm:$0xff]  ;;  %v8133_v53 = vld [vmem:[#allocation3 + $0xe0] sm:$0xff] }
 0x1a4   :  { %2013 = vrot.lane.b32.xlu0 %v7981_v3, %s6960_s16  ;;  %6655 = vmatpush3.bf16.msra.mxu0 %v7634_v62 }
 0x1a5   :  { %2411 = vrot.lane.b32.xlu1 %v7992_v12, %s6967_s18  ;;  %6427 = vmatprep.subr.mxu0 %v10995_v63  ;;  %v1725_v55 = vmax.f32 %v1716_v32, 0.0  ;;  %v1726_v24 = vmax.f32 %v1717_v4, 0.0 }
 0x1a6   :  { %v8054_v6 = vpop.permute.xlu0 %2083  ;;  %6664 = vmatpush3.bf16.msra.mxu1 %v7598_v48  ;;  %6313 = vmatmul.mubr.msk.f32.gmra.mrb[48].mxu0 %vm39_vm0, %v1090_v47 }
 0x1a7   :  { %v8058_v54 = vpop.permute.xlu1 %2281  ;;  %6665 = vmatprep.subr.bf16.mxu1 %v10993_v28  ;;  %1735 = vst.msk [vmem:[#allocation3 + $0x1a8] sm:$0xff] %vm265_vm1, %v1726_v24  ;;  %1734 = vst.msk [vmem:[#allocation3 + $0x1a0] sm:$0xff] %vm265_vm1, %v1725_v55 }
 0x1a8   :  { %2147 = vrot.lane.b32.xlu0 %v7823_v43, %s6959_s7  ;;  %6428 = vmatpush3.msra.mxu0 %v7672_v41 }
 0x1a9   :  { %2475 = vrot.lane.b32.xlu1 %v8064_v8, %s6968_s19 }
 0x1aa   :  { %v8071_v48 = vpop.permute.xlu0 %2021  ;;  %6667 = vmatpush3.bf16.msra.mxu1 %v7634_v62 }
 0x1ab   :  { %v8074_v37 = vpop.permute.xlu1 %2283  ;;  %6508 = vmatprep.subr.mxu1 %v10995_v63 }
 0x1ac   :  { %2211 = vrot.lane.b32.xlu0 %v7841_v9, %s6963_s24 }
 0x1ad   :  { %2349 = vrot.lane.b32.xlu1 %v7992_v12, %s6961_s21 }
 0x1ae   :  { %v8081_v25 = vpop.permute.xlu0 %2085  ;;  %6509 = vmatpush3.msra.mxu1 %v7672_v41 }
 0x1af   :  { %v2268_v57 = vpop.permute.xlu1 %2267  ;;  %6732 = vmatprep.subr.bf16.mxu1 %v10993_v28 }
 0x1b0   :  { %2149 = vrot.lane.b32.xlu0 %v7841_v9, %s6959_s7 }
 0x1b1   :  { %2413 = vrot.lane.b32.xlu1 %v8064_v8, %s6967_s18 }
 0x1b2   :  { %v8089_v62 = vpop.permute.xlu0 %2219 }
 0x1b3   :  { %v2466_v58 = vpop.permute.xlu1 %2465 }
 0x1b4   :  { %3044 = vrot.lane.b32.xlu0 %v7833_v35, %s6960_s16 }
 0x1b5   :  { %2351 = vrot.lane.b32.xlu1 %v8064_v8, %s6961_s21 }
 0x1b6   :  { %v8095_v26 = vpop.permute.xlu0 %2023 }
 0x1b7   :  { %11004 = vst [vmem:[#allocation11_spill] sm:$0xff] %v8095_v26  ;;  %v2270_v41 = vpop.permute.xlu1 %2269 }
 0x1b8   :  { %3108 = vrot.lane.b32.xlu0 %v7851_v10, %s6958_s6 }
 0x1b9   :  { %2293 = vrot.lane.b32.xlu1 %v7992_v12, %s6964_s27 }
 0x1ba   :  { %v8101_v13 = vpop.permute.xlu0 %2157 }
 0x1bb   :  { %11005 = vst [vmem:[#allocation12_spill] sm:$0xff] %v8101_v13  ;;  %v2404_v18 = vpop.permute.xlu1 %2403 }
 0x1bc   :  { %2029 = vrot.lane.b32.xlu0 %v7823_v43, %s6960_s16  ;;  %v2527_v43 = vsel %vm265_vm1, %v7631_v61, %v7937_v15 }
 0x1bd   :  { %2477 = vrot.lane.b32.xlu1 %v8105_v16, %s6968_s19 }
 0x1be   :  { %v8109_v7 = vpop.permute.xlu0 %2221 }
 0x1bf   :  { %11006 = vst [vmem:[#allocation13_spill] sm:$0xff] %v8109_v7  ;;  %v2468_v36 = vpop.permute.xlu1 %2467  ;;  %v8295_v7 = vld [vmem:[#allocation3 + $0x100] sm:$0xff] }
 0x1c0   :  { %2093 = vrot.lane.b32.xlu0 %v7841_v9, %s6958_s6 }
 0x1c1   :  { %2415 = vrot.lane.b32.xlu1 %v8105_v16, %s6967_s18 }
 0x1c2   :  { %v8115_v2 = vpop.permute.xlu0 %2159 }
 0x1c3   :  { %11007 = vst [vmem:[#allocation14_spill] sm:$0xff] %v8115_v2  ;;  %v8117_v0 = vpop.permute.xlu1 %2341  ;;  %v1095_v2 = vld [vmem:[%s10989_s0 + $0x2f0] sm:$0xff] }
 0x1c4   :  { %3046 = vrot.lane.b32.xlu0 %v7851_v10, %s6960_s16 }
 0x1c5   :  { %2353 = vrot.lane.b32.xlu1 %v8105_v16, %s6961_s21 }
 0x1c6   :  { %v2070_v29 = vpop.permute.xlu0 %2069 }
 0x1c7   :  { %v8126_v42 = vpop.permute.xlu1 %2405  ;;  %v2549_v34 = vsel %vm2547_vm3, %v2527_v43, %v2070_v29  ;;  %v1092_v43 = vld [vmem:[%s10989_s0 + $0x2d8] sm:$0xff] }
 0x1c8   :  { %v2571_v33 = vsel %vm2569_vm4, %v2549_v34, %v7973_v19  ;;  %2227 = vrot.lane.b32.xlu0 %v7833_v35, %s6963_s24  ;;  %v1093_v34 = vld [vmem:[%s10989_s0 + $0x2e0] sm:$0xff] }
 0x1c9   :  { %v2592_v32 = vsel %vm39_vm0, %v2571_v33, %v8003_v50  ;;  %2479 = vrot.lane.b32.xlu1 %v8133_v53, %s6968_s19 }
 0x1ca   :  { %v2614_v61 = vsel %vm2612_vm5, %v2592_v32, %v2268_v57  ;;  %v2008_v15 = vpop.permute.xlu0 %2007  ;;  %v6279_v32 = vpop.f32.mrb[30].mxu1 }
 0x1cb   :  { %v8140_v4 = vpop.permute.xlu1 %2343  ;;  %v2636_v47 = vsel %vm2634_vm6, %v2614_v61, %v7979_v17  ;;  %v2528_v55 = vsel %vm265_vm1, %v7655_v21, %v2008_v15  ;;  %1072 = vst.msk [vmem:[#allocation2 + $0x238] sm:$0xff] %vm265_vm1, %v6279_v32 }
 0x1cc   :  { %2031 = vrot.lane.b32.xlu0 %v7841_v9, %s6960_s16  ;;  %v2658_v19 = vsel %vm2656_vm7, %v2636_v47, %v8007_v27  ;;  %v8161_v9 = vld [vmem:[#allocation3 + $0xe8] sm:$0xff] }
 0x1cd   :  { %2417 = vrot.lane.b32.xlu1 %v8133_v53, %s6967_s18  ;;  %v2680_v50 = vsel %vm2678_vm8, %v2658_v19, %v2466_v58  ;;  %v1091_v58 = vld [vmem:[%s10989_s0 + $0x2d0] sm:$0xff]  ;;  %v1012_v19 = vpop.f32.mrb[31].mxu1 }
 0x1ce   :  { %6352 = vmatmul.mubr.msk.f32.gmra.mrb[42].mxu1 %vm2704_vm9, %v2680_v50  ;;  %v2072_v24 = vpop.permute.xlu0 %2071  ;;  %6315 = vmatprep.mubr.msk.f32.mxu0 %vm39_vm0, %v1091_v58  ;;  %1071 = vst.msk [vmem:[#allocation2 + $0x230] sm:$0xff] %vm265_vm1, %v1012_v19 }
 0x1cf   :  { %v8154_v57 = vpop.permute.xlu1 %2285  ;;  %v2550_v17 = vsel %vm2547_vm3, %v2528_v55, %v2072_v24  ;;  %6354 = vmatprep.mubr.msk.f32.mxu1 %vm6965_vm2, %v10995_v63  ;;  %6316 = vmatmul.mubr.msk.f32.gmra.mrb[50].mxu0 %vm39_vm0, %v1092_v43  ;;  %v8213_v24 = vld [vmem:[#allocation3 + $0x38] sm:$0xff]  ;;  %v8226_v43 = vld [vmem:[#allocation3 + $0xf0] sm:$0xff] }
 0x1d0   :  { %11008 = vst [vmem:[#allocation15_spill] sm:$0xff] %v8154_v57  ;;  %2165 = vrot.lane.b32.xlu0 %v7833_v35, %s6959_s7  ;;  %v2572_v21 = vsel %vm2569_vm4, %v2550_v17, %v8025_v1  ;;  %6318 = vmatprep.mubr.msk.f32.mxu0 %vm39_vm0, %v1093_v34  ;;  %11011 = vst [vmem:[#allocation18_spill] sm:$0xff] %v8226_v43 }
 0x1d1   :  { %2481 = vrot.lane.b32.xlu1 %v8161_v9, %s6968_s19 }
 0x1d2   :  { %v2206_v27 = vpop.permute.xlu0 %2205  ;;  %v1756_v17 = vld [vmem:[#allocation2 + $0x238] sm:$0xff] }
 0x1d3   :  { %v8173_v29 = vpop.permute.xlu1 %2223  ;;  %v2593_v35 = vsel %vm39_vm0, %v2572_v21, %v2206_v27 }
 0x1d4   :  { %11009 = vst [vmem:[#allocation16_spill] sm:$0xff] %v8173_v29  ;;  %v2615_v1 = vsel %vm2612_vm5, %v2593_v35, %v2270_v41  ;;  %2229 = vrot.lane.b32.xlu0 %v7851_v10, %s6963_s24 }
 0x1d5   :  { %v2637_v33 = vsel %vm2634_vm6, %v2615_v1, %v8029_v40  ;;  %2355 = vrot.lane.b32.xlu1 %v8133_v53, %s6961_s21  ;;  %v1094_v40 = vld [vmem:[%s10989_s0 + $0x2e8] sm:$0xff]  ;;  %v1755_v58 = vld [vmem:[#allocation2 + $0x230] sm:$0xff] }
 0x1d6   :  { %v8189_v61 = vpop.permute.xlu0 %2009  ;;  %v2659_v15 = vsel %vm2656_vm7, %v2637_v33, %v2404_v18  ;;  %v6282_v18 = vpop.f32.mrb[32].mxu1  ;;  %6319 = vmatmul.mubr.msk.f32.gmra.mrb[52].mxu0 %vm39_vm0, %v1094_v40  ;;  %v8230_v35 = vmax.f32 %v1755_v58, %v1756_v17 }
 0x1d7   :  { %v8193_v41 = vpop.permute.xlu1 %2287  ;;  %v2681_v47 = vsel %vm2678_vm8, %v2659_v15, %v2468_v36  ;;  %1074 = vst.msk [vmem:[#allocation2 + $0x248] sm:$0xff] %vm265_vm1, %v6282_v18  ;;  %v1022_v50 = vpop.f32.mrb[33].mxu1  ;;  %v8238_v15 = vld [vmem:[#allocation3 + $0x40] sm:$0xff]  ;;  %6321 = vmatprep.mubr.msk.f32.mxu0 %vm39_vm0, %v1095_v2 }
 0x1d8   :  { %11010 = vst [vmem:[#allocation17_spill] sm:$0xff] %v8193_v41  ;;  %6355 = vmatmul.mubr.msk.f32.gmra.mrb[44].mxu1 %vm2704_vm9, %v2681_v47  ;;  %2167 = vrot.lane.b32.xlu0 %v7851_v10, %s6959_s7  ;;  %1073 = vst.msk [vmem:[#allocation2 + $0x240] sm:$0xff] %vm265_vm1, %v1022_v50  ;;  %v8216_v10 = vld [vmem:[#allocation3 + $0xf8] sm:$0xff]  ;;  %v1774_v33 = vmax.f32 %v7893_v38, %v8230_v35 }
 0x1d9   :  { %2419 = vrot.lane.b32.xlu1 %v8161_v9, %s6967_s18  ;;  %6357 = vmatprep.mubr.msk.f32.mxu1 %vm6965_vm2, %v10995_v63 }
 0x1da   :  { %v8207_v36 = vpop.permute.xlu0 %2143  ;;  %v1783_v18 = vmax.f32 %v1774_v33, 0.0 }
 0x1db   :  { %v8211_v55 = vpop.permute.xlu1 %2271 }
 0x1dc   :  { %2077 = vrot.lane.b32.xlu0 %v8213_v24, %s6958_s6  ;;  %1792 = vst.msk [vmem:[#allocation3 + $0x1b0] sm:$0xff] %vm265_vm1, %v1783_v18 }
 0x1dd   :  { %3240 = vrot.lane.b32.xlu1 %v8216_v10, %s6963_s24 }
 0x1de   :  { %v8222_v21 = vpop.permute.xlu0 %2207  ;;  %v1758_v34 = vld [vmem:[#allocation2 + $0x248] sm:$0xff] }
 0x1df   :  { %v8224_v27 = vpop.permute.xlu1 %2469  ;;  %v1757_v32 = vld [vmem:[#allocation2 + $0x240] sm:$0xff] }
 0x1e0   :  { %2015 = vrot.lane.b32.xlu0 %v8213_v24, %s6960_s16  ;;  %v8242_v40 = vmax.f32 %v1756_v17, %v1757_v32  ;;  %v8244_v19 = vmax.f32 %v1757_v32, %v1758_v34 }
 0x1e1   :  { %2421 = vrot.lane.b32.xlu1 %v8226_v43, %s6967_s18 }
 0x1e2   :  { %v8234_v1 = vpop.permute.xlu0 %2145  ;;  %11012 = vst [vmem:[#allocation19_spill] sm:$0xff] %v8244_v19  ;;  %v1775_v50 = vmax.f32 %v7898_v60, %v8242_v40  ;;  %v1776_v38 = vmax.f32 %v7900_v5, %v8244_v19  ;;  %v6285_v60 = vpop.f32.mrb[34].mxu1 }
 0x1e3   :  { %v8240_v47 = vpop.permute.xlu1 %2273  ;;  %1076 = vst.msk [vmem:[#allocation2 + $0x258] sm:$0xff] %vm265_vm1, %v6285_v60  ;;  %v1032_v33 = vpop.f32.mrb[35].mxu1 }
 0x1e4   :  { %2079 = vrot.lane.b32.xlu0 %v8238_v15, %s6958_s6  ;;  %v1784_v32 = vmax.f32 %v1775_v50, 0.0  ;;  %v1785_v28 = vmax.f32 %v1776_v38, 0.0  ;;  %1075 = vst.msk [vmem:[#allocation2 + $0x250] sm:$0xff] %vm265_vm1, %v1032_v33 }
 0x1e5   :  { %2485 = vrot.lane.b32.xlu1 %v8216_v10, %s6968_s19 }
 0x1e6   :  { %v8254_v58 = vpop.permute.xlu0 %2087  ;;  %1793 = vst.msk [vmem:[#allocation3 + $0x1b8] sm:$0xff] %vm265_vm1, %v1784_v32  ;;  %1794 = vst.msk [vmem:[#allocation3 + $0x1c0] sm:$0xff] %vm265_vm1, %v1785_v28 }
 0x1e7   :  { %11013 = vst [vmem:[#allocation20_spill] sm:$0xff] %v8254_v58  ;;  %v8257_v17 = vpop.permute.xlu1 %2407  ;;  %v1096_v58 = vld [vmem:[%s10989_s0 + $0x2f8] sm:$0xff] }
 0x1e8   :  { %2213 = vrot.lane.b32.xlu0 %v7958_v56, %s6963_s24  ;;  %v6288_v50 = vpop.f32.mrb[36].mxu1  ;;  %6322 = vmatmul.mubr.msk.f32.gmra.mrb[54].mxu0 %vm39_vm0, %v1096_v58 }
 0x1e9   :  { %2359 = vrot.lane.b32.xlu1 %v8226_v43, %s6961_s21  ;;  %1078 = vst.msk [vmem:[#allocation2 + $0x268] sm:$0xff] %vm265_vm1, %v6288_v50  ;;  %v1042_v38 = vpop.f32.mrb[37].mxu1 }
 0x1ea   :  { %v8265_v5 = vpop.permute.xlu0 %2025  ;;  %1077 = vst.msk [vmem:[#allocation2 + $0x260] sm:$0xff] %vm265_vm1, %v1042_v38  ;;  %v1760_v33 = vld [vmem:[#allocation2 + $0x258] sm:$0xff] }
 0x1eb   :  { %11014 = vst [vmem:[#allocation21_spill] sm:$0xff] %v8265_v5  ;;  %v8268_v18 = vpop.permute.xlu1 %2471  ;;  %v1759_v38 = vld [vmem:[#allocation2 + $0x250] sm:$0xff] }
 0x1ec   :  { %2017 = vrot.lane.b32.xlu0 %v8238_v15, %s6960_s16  ;;  %v6291_v28 = vpop.f32.mrb[38].mxu1  ;;  %v8291_v57 = vmax.f32 %v1758_v34, %v1759_v38 }
 0x1ed   :  { %2423 = vrot.lane.b32.xlu1 %v8216_v10, %s6967_s18  ;;  %1080 = vst.msk [vmem:[#allocation2 + $0x278] sm:$0xff] %vm265_vm1, %v6291_v28  ;;  %v1052_v60 = vpop.f32.mrb[39].mxu1  ;;  %v8293_v28 = vmax.f32 %v1759_v38, %v1760_v33 }
 0x1ee   :  { %v8277_v32 = vpop.permute.xlu0 %2089  ;;  %1079 = vst.msk [vmem:[#allocation2 + $0x270] sm:$0xff] %vm265_vm1, %v1052_v60  ;;  %11017 = vst [vmem:[#allocation24_spill] sm:$0xff] %v8291_v57  ;;  %v1777_v34 = vmax.f32 %v7919_v46, %v8291_v57 }
 0x1ef   :  { %11015 = vst [vmem:[#allocation22_spill] sm:$0xff] %v8277_v32  ;;  %v8280_v63 = vpop.permute.xlu1 %2345  ;;  %v1778_v38 = vmax.f32 %v7921_v30, %v8293_v28 }
 0x1f0   :  { %2151 = vrot.lane.b32.xlu0 %v7958_v56, %s6959_s7  ;;  %v1762_v29 = vld [vmem:[#allocation2 + $0x268] sm:$0xff]  ;;  %v1786_v46 = vmax.f32 %v1777_v34, 0.0 }
 0x1f1   :  { %2361 = vrot.lane.b32.xlu1 %v8216_v10, %s6961_s21  ;;  %v1761_v60 = vld [vmem:[#allocation2 + $0x260] sm:$0xff]  ;;  %v1787_v57 = vmax.f32 %v1778_v38, 0.0 }
 0x1f2   :  { %v8287_v50 = vpop.permute.xlu0 %3042  ;;  %v8310_v13 = vmax.f32 %v1761_v60, %v1762_v29  ;;  %1795 = vst.msk [vmem:[#allocation3 + $0x1c8] sm:$0xff] %vm265_vm1, %v1786_v46 }
 0x1f3   :  { %11016 = vst [vmem:[#allocation23_spill] sm:$0xff] %v8287_v50  ;;  %v8289_v41 = vpop.permute.xlu1 %2409  ;;  %v8308_v50 = vmax.f32 %v1760_v33, %v1761_v60  ;;  %v8323_v33 = vld [vmem:[#allocation3 + $0x108] sm:$0xff]  ;;  %1796 = vst.msk [vmem:[#allocation3 + $0x1d0] sm:$0xff] %vm265_vm1, %v1787_v57 }
 0x1f4   :  { %2215 = vrot.lane.b32.xlu0 %v8016_v45, %s6963_s24  ;;  %v1764_v32 = vld [vmem:[#allocation2 + $0x278] sm:$0xff]  ;;  %v1780_v60 = vmax.f32 %v7949_v52, %v8310_v13 }
 0x1f5   :  { %3304 = vrot.lane.b32.xlu1 %v8295_v7, %s6964_s27  ;;  %v1763_v26 = vld [vmem:[#allocation2 + $0x270] sm:$0xff]  ;;  %v1779_v30 = vmax.f32 %v7946_v39, %v8308_v50 }
 0x1f6   :  { %v8315_v5 = vpop.permute.xlu0 %2027  ;;  %v8331_v2 = vmax.f32 %v1763_v26, %v1764_v32  ;;  %v1789_v34 = vmax.f32 %v1780_v60, 0.0 }
 0x1f7   :  { %11018 = vst [vmem:[#allocation25_spill] sm:$0xff] %v8315_v5  ;;  %v8318_v19 = vpop.permute.xlu1 %2347  ;;  %v8329_v5 = vmax.f32 %v1762_v29, %v1763_v26  ;;  %v1788_v39 = vmax.f32 %v1779_v30, 0.0  ;;  %v2529_v30 = vsel %vm265_vm1, %v7789_v11, %v8189_v61 }
 0x1f8   :  { %2153 = vrot.lane.b32.xlu0 %v8016_v45, %s6959_s7  ;;  %v1782_v52 = vmax.f32 %v8034_v51, %v8331_v2  ;;  %1798 = vst.msk [vmem:[#allocation3 + $0x1e0] sm:$0xff] %vm265_vm1, %v1789_v34 }
 0x1f9   :  { %3306 = vrot.lane.b32.xlu1 %v8323_v33, %s6964_s27  ;;  %v1781_v38 = vmax.f32 %v8032_v31, %v8329_v5  ;;  %1797 = vst.msk [vmem:[#allocation3 + $0x1d8] sm:$0xff] %vm265_vm1, %v1788_v39 }
 0x1fa   :  { %v8337_v58 = vpop.permute.xlu0 %2161  ;;  %v1791_v57 = vmax.f32 %v1782_v52, 0.0 }
 0x1fb   :  { %v8343_v29 = vpop.permute.xlu1 %3106  ;;  %v1790_v26 = vmax.f32 %v1781_v38, 0.0 }
 0x1fc   :  { %11019 = vst [vmem:[#allocation26_spill] sm:$0xff] %v8343_v29  ;;  %3110 = vrot.lane.b32.xlu0 %v7992_v12, %s6958_s6  ;;  %1800 = vst.msk [vmem:[#allocation3 + $0x1f0] sm:$0xff] %vm265_vm1, %v1791_v57 }
 0x1fd   :  { %2487 = vrot.lane.b32.xlu1 %v8295_v7, %s6968_s19  ;;  %1799 = vst.msk [vmem:[#allocation3 + $0x1e8] sm:$0xff] %vm265_vm1, %v1790_v26 }
 0x1fe   :  { %v8351_v32 = vpop.permute.xlu0 %2225 }
 0x1ff   :  { %11020 = vst [vmem:[#allocation27_spill] sm:$0xff] %v8351_v32  ;;  %v8355_v31 = vpop.permute.xlu1 %2091 }
 0x200   :  { %2095 = vrot.lane.b32.xlu0 %v7958_v56, %s6958_s6 }
 0x201   :  { %2425 = vrot.lane.b32.xlu1 %v8295_v7, %s6967_s18 }
 0x202   :  { %v8361_v51 = vpop.permute.xlu0 %2163 }
 0x203   :  { %11021 = vst [vmem:[#allocation28_spill] sm:$0xff] %v8361_v51  ;;  %v8363_v46 = vpop.permute.xlu1 %2289 }
 0x204   :  { %11022 = vst [vmem:[#allocation29_spill] sm:$0xff] %v8363_v46  ;;  %3048 = vrot.lane.b32.xlu0 %v7992_v12, %s6960_s16  ;;  %v6838_v46 = vld [vmem:[#allocation3 + $0x90] sm:$0xff] }
 0x205   :  { %2489 = vrot.lane.b32.xlu1 %v8323_v33, %s6968_s19 }
 0x206   :  { %v2074_v60 = vpop.permute.xlu0 %2073 }
 0x207   :  { %v8372_v39 = vpop.permute.xlu1 %2291  ;;  %v2551_v34 = vsel %vm2547_vm3, %v2529_v30, %v2074_v60 }
 0x208   :  { %11023 = vst [vmem:[#allocation30_spill] sm:$0xff] %v8372_v39  ;;  %v2573_v38 = vsel %vm2569_vm4, %v2551_v34, %v8207_v36  ;;  %3112 = vrot.lane.b32.xlu0 %v8064_v8, %s6958_s6 }
 0x209   :  { %v2594_v52 = vsel %vm39_vm0, %v2573_v38, %v8222_v21  ;;  %2363 = vrot.lane.b32.xlu1 %v8295_v7, %s6961_s21 }
 0x20a   :  { %v2616_v11 = vsel %vm2612_vm5, %v2594_v52, %v8211_v55  ;;  %v2012_v61 = vpop.permute.xlu0 %2011 }
 0x20b   :  { %v8385_v26 = vpop.permute.xlu1 %2275  ;;  %v2638_v57 = vsel %vm2634_vm6, %v2616_v11, %v8117_v0  ;;  %v2530_v55 = vsel %vm265_vm1, %v7801_v20, %v2012_v61 }
 0x20c   :  { %2033 = vrot.lane.b32.xlu0 %v7958_v56, %s6960_s16  ;;  %v2660_v36 = vsel %vm2656_vm7, %v2638_v57, %v8126_v42  ;;  %v11024_v56 = vmov 0.0   ;;  %v8405_v42 = vld [vmem:[#allocation3 + $0x110] sm:$0xff] }
 0x20d   :  { %2427 = vrot.lane.b32.xlu1 %v8323_v33, %s6967_s18  ;;  %v2682_v21 = vsel %vm2678_vm8, %v2660_v36, %v8224_v27 }
 0x20e   :  { %6358 = vmatmul.mubr.msk.f32.gmra.mrb[46].mxu1 %vm2704_vm9, %v2682_v21  ;;  %v2076_v30 = vpop.permute.xlu0 %2075 }
 0x20f   :  { %v2552_v0 = vsel %vm2547_vm3, %v2530_v55, %v2076_v30  ;;  %v8401_v60 = vpop.permute.xlu1 %2473  ;;  %6360 = vmatprep.mubr.msk.f32.mxu1 %vm6965_vm2, %v11024_v56  ;;  %v1099_v30 = vld [vmem:[%s10989_s0 + $0x310] sm:$0xff] }
 0x210   :  { %2097 = vrot.lane.b32.xlu0 %v8016_v45, %s6958_s6  ;;  %v2574_v20 = vsel %vm2569_vm4, %v2552_v0, %v8234_v1  ;;  %v1100_v0 = vld [vmem:[%s10989_s0 + $0x318] sm:$0xff] }
 0x211   :  { %3308 = vrot.lane.b32.xlu1 %v8405_v42, %s6964_s27 }
 0x212   :  { %v2210_v27 = vpop.permute.xlu0 %2209 }
 0x213   :  { %v2595_v34 = vsel %vm39_vm0, %v2574_v20, %v2210_v27  ;;  %v8414_v38 = vpop.permute.xlu1 %2277 }
 0x214   :  { %v2617_v52 = vsel %vm2612_vm5, %v2595_v34, %v8240_v47  ;;  %3050 = vrot.lane.b32.xlu0 %v8064_v8, %s6960_s16  ;;  %v8433_v47 = vld [vmem:[#allocation3 + $0x118] sm:$0xff] }
 0x215   :  { %v2639_v11 = vsel %vm2634_vm6, %v2617_v52, %v8140_v4  ;;  %2295 = vrot.lane.b32.xlu1 %v8064_v8, %s6964_s27  ;;  %v8479_v34 = vld [vmem:[#allocation3 + $0x138] sm:$0xff] }
 0x216   :  { %v8424_v61 = vpop.permute.xlu0 %2013  ;;  %v2661_v1 = vsel %vm2656_vm7, %v2639_v11, %v8257_v17  ;;  %11025 = vst [vmem:[#allocation31_spill] sm:$0xff] %v8479_v34 }
 0x217   :  { %v8428_v57 = vpop.permute.xlu1 %2411  ;;  %v2683_v36 = vsel %vm2678_vm8, %v2661_v1, %v8268_v18  ;;  %v1097_v18 = vld [vmem:[%s10989_s0 + $0x300] sm:$0xff] }
 0x218   :  { %6361 = vmatmul.mubr.msk.f32.gmra.mrb[48].mxu1 %vm2704_vm9, %v2683_v36  ;;  %2357 = vrot.lane.b32.xlu0 %v8161_v9, %s6961_s21  ;;  %v1098_v9 = vld [vmem:[%s10989_s0 + $0x308] sm:$0xff]  ;;  %v8489_v1 = vld [vmem:[#allocation3 + $0x140] sm:$0xff]  ;;  %s6975_s0 = smov 120  }
 0x219   :  { %3310 = vrot.lane.b32.xlu1 %v8433_v47, %s6964_s27  ;;  %6363 = vmatprep.mubr.msk.f32.mxu1 %vm6965_vm2, %v11024_v56  ;;  %11027 = vst [vmem:[#allocation33_spill] sm:$0xff] %v8489_v1 }
 0x21a   :  { %v8441_v4 = vpop.permute.xlu0 %2147  ;;  %6324 = vmatprep.mubr.msk.f32.mxu0 %vm39_vm0, %v1097_v18 }
 0x21b   :  { %v8443_v17 = vpop.permute.xlu1 %2475  ;;  %6325 = vmatmul.mubr.msk.f32.gmra.mrb[56].mxu0 %vm39_vm0, %v1098_v9 }
 0x21c   :  { %2483 = vrot.lane.b32.xlu0 %v8226_v43, %s6968_s19  ;;  %6327 = vmatprep.mubr.msk.f32.mxu0 %vm39_vm0, %v1099_v30  ;;  %v3000_v30 = vld [vmem:[#allocation3 + $0x148] sm:$0xff] }
 0x21d   :  { %2491 = vrot.lane.b32.xlu1 %v8405_v42, %s6968_s19 }
 0x21e   :  { %v8456_v21 = vpop.permute.xlu0 %2211 }
 0x21f   :  { %v8459_v55 = vpop.permute.xlu1 %2349  ;;  %6328 = vmatmul.mubr.msk.f32.gmra.mrb[58].mxu0 %vm39_vm0, %v1100_v0 }
 0x220   :  { %3176 = vrot.lane.b32.xlu0 %v8226_v43, %s6959_s7  ;;  %6429 = vmatprep.mubr.msk.f32.mxu0 %vm6965_vm2, %v11024_v56 }
 0x221   :  { %2365 = vrot.lane.b32.xlu1 %v8323_v33, %s6961_s21 }
 0x222   :  { %v8472_v20 = vpop.permute.xlu0 %2149 }
 0x223   :  { %v8475_v27 = vpop.permute.xlu1 %2413 }
 0x224   :  { %3178 = vrot.lane.b32.xlu0 %v8216_v10, %s6959_s7 }
 0x225   :  { %3374 = vrot.lane.b32.xlu1 %v8479_v34, %s6961_s21 }
 0x226   :  { %v8485_v52 = vpop.permute.xlu0 %3044 }
 0x227   :  { %11026 = vst [vmem:[#allocation32_spill] sm:$0xff] %v8485_v52  ;;  %v8487_v11 = vpop.permute.xlu1 %2351 }
 0x228   :  { %3242 = vrot.lane.b32.xlu0 %v8295_v7, %s6963_s24 }
 0x229   :  { %3438 = vrot.lane.b32.xlu1 %v8489_v1, %s6967_s18 }
 0x22a   :  { %v8495_v36 = vpop.permute.xlu0 %3108 }
 0x22b   :  { %11028 = vst [vmem:[#allocation34_spill] sm:$0xff] %v8495_v36  ;;  %v8497_v18 = vpop.permute.xlu1 %2293  ;;  %v3001_v36 = vld [vmem:[#allocation3 + $0x150] sm:$0xff] }
 0x22c   :  { %11029 = vst [vmem:[#allocation35_spill] sm:$0xff] %v8497_v18  ;;  %3180 = vrot.lane.b32.xlu0 %v8295_v7, %s6959_s7 }
 0x22d   :  { %3376 = vrot.lane.b32.xlu1 %v8489_v1, %s6961_s21 }
 0x22e   :  { %v8503_v10 = vpop.permute.xlu0 %2029 }
 0x22f   :  { %v8505_v9 = vpop.permute.xlu1 %2477 }
 0x230   :  { %3244 = vrot.lane.b32.xlu0 %v8323_v33, %s6963_s24 }
 0x231   :  { %3502 = vrot.lane.b32.xlu1 %v3000_v30, %s6968_s19 }
 0x232   :  { %v8510_v0 = vpop.permute.xlu0 %2093 }
 0x233   :  { %11030 = vst [vmem:[#allocation36_spill] sm:$0xff] %v8510_v0  ;;  %v8512_v34 = vpop.permute.xlu1 %2415  ;;  %v8570_v0 = vld [vmem:[#allocation3 + $0x160] sm:$0xff] }
 0x234   :  { %3182 = vrot.lane.b32.xlu0 %v8323_v33, %s6959_s7 }
 0x235   :  { %3440 = vrot.lane.b32.xlu1 %v3000_v30, %s6967_s18 }
 0x236   :  { %v8517_v7 = vpop.permute.xlu0 %3046 }
 0x237   :  { %11031 = vst [vmem:[#allocation37_spill] sm:$0xff] %v8517_v7  ;;  %v8519_v1 = vpop.permute.xlu1 %2353 }
 0x238   :  { %3246 = vrot.lane.b32.xlu0 %v8405_v42, %s6963_s24 }
 0x239   :  { %3504 = vrot.lane.b32.xlu1 %v3001_v36, %s6968_s19 }
 0x23a   :  { %v8524_v52 = vpop.permute.xlu0 %2227 }
 0x23b   :  { %11032 = vst [vmem:[#allocation38_spill] sm:$0xff] %v8524_v52  ;;  %v8526_v43 = vpop.permute.xlu1 %2479  ;;  %v8549_v52 = vld [vmem:[#allocation3 + $0x158] sm:$0xff] }
 0x23c   :  { %2231 = vrot.lane.b32.xlu0 %v7992_v12, %s6963_s24 }
 0x23d   :  { %3378 = vrot.lane.b32.xlu1 %v3000_v30, %s6961_s21 }
 0x23e   :  { %v8531_v33 = vpop.permute.xlu0 %2031 }
 0x23f   :  { %11033 = vst [vmem:[#allocation39_spill] sm:$0xff] %v8531_v33  ;;  %v8533_v7 = vpop.permute.xlu1 %2417 }
 0x240   :  { %3114 = vrot.lane.b32.xlu0 %v8105_v16, %s6958_s6 }
 0x241   :  { %3442 = vrot.lane.b32.xlu1 %v3001_v36, %s6967_s18 }
 0x242   :  { %v8538_v18 = vpop.permute.xlu0 %2165 }
 0x243   :  { %11034 = vst [vmem:[#allocation40_spill] sm:$0xff] %v8538_v18  ;;  %v8540_v39 = vpop.permute.xlu1 %2481 }
 0x244   :  { %2035 = vrot.lane.b32.xlu0 %v8016_v45, %s6960_s16  ;;  %v2531_v45 = vsel %vm265_vm1, %v7913_v22, %v8424_v61 }
 0x245   :  { %3380 = vrot.lane.b32.xlu1 %v3001_v36, %s6961_s21 }
 0x246   :  { %v8545_v29 = vpop.permute.xlu0 %2229 }
 0x247   :  { %11035 = vst [vmem:[#allocation41_spill] sm:$0xff] %v8545_v29  ;;  %v8547_v30 = vpop.permute.xlu1 %2355 }
 0x248   :  { %3184 = vrot.lane.b32.xlu0 %v8405_v42, %s6959_s7 }
 0x249   :  { %3506 = vrot.lane.b32.xlu1 %v8549_v52, %s6968_s19 }
 0x24a   :  { %v8555_v18 = vpop.permute.xlu0 %2167 }
 0x24b   :  { %11036 = vst [vmem:[#allocation42_spill] sm:$0xff] %v8555_v18  ;;  %v8557_v51 = vpop.permute.xlu1 %2419 }
 0x24c   :  { %2099 = vrot.lane.b32.xlu0 %v6838_v46, %s6958_s6 }
 0x24d   :  { %3444 = vrot.lane.b32.xlu1 %v8549_v52, %s6967_s18 }
 0x24e   :  { %v2078_v36 = vpop.permute.xlu0 %2077 }
 0x24f   :  { %v8565_v29 = vpop.permute.xlu1 %3240  ;;  %v2553_v33 = vsel %vm2547_vm3, %v2531_v45, %v2078_v36 }
 0x250   :  { %11037 = vst [vmem:[#allocation43_spill] sm:$0xff] %v8565_v29  ;;  %v2575_v18 = vsel %vm2569_vm4, %v2553_v33, %v8441_v4  ;;  %3248 = vrot.lane.b32.xlu0 %v8433_v47, %s6963_s24 }
 0x251   :  { %v2596_v32 = vsel %vm39_vm0, %v2575_v18, %v8456_v21  ;;  %3508 = vrot.lane.b32.xlu1 %v8570_v0, %s6968_s19 }
 0x252   :  { %v2618_v22 = vsel %vm2612_vm5, %v2596_v32, %v8385_v26  ;;  %v2016_v61 = vpop.permute.xlu0 %2015 }
 0x253   :  { %v8580_v29 = vpop.permute.xlu1 %2421  ;;  %v2640_v4 = vsel %vm2634_vm6, %v2618_v22, %v8280_v63  ;;  %v2532_v32 = vsel %vm265_vm1, %v7981_v3, %v2016_v61 }
 0x254   :  { %2169 = vrot.lane.b32.xlu0 %v7992_v12, %s6959_s7  ;;  %v2662_v33 = vsel %vm2656_vm7, %v2640_v4, %v8289_v41  ;;  %v8600_v12 = vld [vmem:[#allocation3 + $0x120] sm:$0xff] }
 0x255   :  { %2429 = vrot.lane.b32.xlu1 %v8405_v42, %s6967_s18  ;;  %v2684_v21 = vsel %vm2678_vm8, %v2662_v33, %v8401_v60 }
 0x256   :  { %6364 = vmatmul.mubr.msk.f32.gmra.mrb[50].mxu1 %vm2704_vm9, %v2684_v21  ;;  %v2080_v26 = vpop.permute.xlu0 %2079 }
 0x257   :  { %v8595_v18 = vpop.permute.xlu1 %2485  ;;  %v2554_v63 = vsel %vm2547_vm3, %v2532_v32, %v2080_v26  ;;  %6366 = vmatprep.mubr.msk.f32.mxu1 %vm6965_vm2, %v11024_v56 }
 0x258   :  { %3052 = vrot.lane.b32.xlu0 %v8105_v16, %s6960_s16  ;;  %v2576_v3 = vsel %vm2569_vm4, %v2554_v63, %v8472_v20 }
 0x259   :  { %3312 = vrot.lane.b32.xlu1 %v8600_v12, %s6964_s27 }
 0x25a   :  { %v2214_v41 = vpop.permute.xlu0 %2213 }
 0x25b   :  { %v8608_v60 = vpop.permute.xlu1 %2359  ;;  %v2597_v45 = vsel %vm39_vm0, %v2576_v3, %v2214_v41 }
 0x25c   :  { %v2619_v36 = vsel %vm2612_vm5, %v2597_v45, %v8414_v38  ;;  %2233 = vrot.lane.b32.xlu0 %v8064_v8, %s6963_s24 }
 0x25d   :  { %v2641_v22 = vsel %vm2634_vm6, %v2619_v36, %v8318_v19  ;;  %2493 = vrot.lane.b32.xlu1 %v8433_v47, %s6968_s19 }
 0x25e   :  { %v2018_v61 = vpop.permute.xlu0 %2017  ;;  %v2663_v20 = vsel %vm2656_vm7, %v2641_v22, %v8428_v57 }
 0x25f   :  { %v8621_v4 = vpop.permute.xlu1 %2423  ;;  %v2685_v33 = vsel %vm2678_vm8, %v2663_v20, %v8443_v17  ;;  %v2533_v19 = vsel %vm265_vm1, %v8213_v24, %v2018_v61  ;;  %v8672_v61 = vld [vmem:[%s10990_s1 + $0x68] ss:$0 sm:$0xff] }
 0x260   :  { %3116 = vrot.lane.b32.xlu0 %v8133_v53, %s6958_s6  ;;  %6367 = vmatmul.mubr.msk.f32.gmra.mrb[52].mxu1 %vm2704_vm9, %v2685_v33  ;;  %v2555_v17 = vsel %vm2547_vm3, %v2533_v19, %v7859_v14  ;;  %v2534_v14 = vsel %vm265_vm1, %v8238_v15, %v7865_v59 }
 0x261   :  { %3382 = vrot.lane.b32.xlu1 %v8549_v52, %s6961_s21  ;;  %6369 = vmatprep.mubr.msk.f32.mxu1 %vm6965_vm2, %v11024_v56 }
 0x262   :  { %v2152_v38 = vpop.permute.xlu0 %2151 }
 0x263   :  { %v8634_v57 = vpop.permute.xlu1 %2361  ;;  %v2577_v21 = vsel %vm2569_vm4, %v2555_v17, %v2152_v38 }
 0x264   :  { %2037 = vrot.lane.b32.xlu0 %v6838_v46, %s6960_s16  ;;  %v6839_v46 = vld [vmem:[#allocation3 + $0x48] sm:$0xff] }
 0x265   :  { %2297 = vrot.lane.b32.xlu1 %v8105_v16, %s6964_s27  ;;  %v2535_v3 = vsel %vm265_vm1, %v6839_v46, %v8071_v48 }
 0x266   :  { %v2216_v32 = vpop.permute.xlu0 %2215  ;;  %v2557_v45 = vsel %vm2547_vm3, %v2535_v3, %v8081_v25  ;;  %v8677_v25 = vld [vmem:[#allocation3 + $0x98] sm:$0xff] }
 0x267   :  { %v8642_v26 = vpop.permute.xlu1 %3304  ;;  %v2598_v63 = vsel %vm39_vm0, %v2577_v21, %v2216_v32  ;;  %v8702_v32 = vld [vmem:[#allocation3 + $0x168] sm:$0xff] }
 0x268   :  { %v2620_v24 = vsel %vm2612_vm5, %v2598_v63, %v7878_v44  ;;  %3186 = vrot.lane.b32.xlu0 %v8433_v47, %s6959_s7  ;;  %v2556_v44 = vsel %vm2547_vm3, %v2534_v14, %v8054_v6 }
 0x269   :  { %v2642_v41 = vsel %vm2634_vm6, %v2620_v24, %v8459_v55  ;;  %3446 = vrot.lane.b32.xlu1 %v8570_v0, %s6967_s18  ;;  %v6302_v15 = vpop.f32.mrb[40].mxu0 }
 0x26a   :  { %v2154_v36 = vpop.permute.xlu0 %2153  ;;  %v2664_v59 = vsel %vm2656_vm7, %v2642_v41, %v8475_v27  ;;  %1327 = vst.msk [vmem:[#allocation2 + $0x288] sm:$0xff] %vm265_vm1, %v6302_v15  ;;  %v1227_v27 = vpop.f32.mrb[41].mxu0  ;;  %v8746_v15 = vld [vmem:[#allocation3 + $0x128] sm:$0xff] }
 0x26b   :  { %v8664_v22 = vpop.permute.xlu1 %3306  ;;  %v2578_v48 = vsel %vm2569_vm4, %v2556_v44, %v2154_v36  ;;  %v2686_v55 = vsel %vm2678_vm8, %v2664_v59, %v8505_v9  ;;  %v2579_v9 = vsel %vm2569_vm4, %v2557_v45, %v7885_v23  ;;  %1326 = vst.msk [vmem:[#allocation2 + $0x280] sm:$0xff] %vm265_vm1, %v1227_v27 }
 0x26c   :  { %v2599_v6 = vsel %vm39_vm0, %v2578_v48, %v7875_v49  ;;  %2101 = vrot.lane.b32.xlu0 %v8677_v25, %s6958_s6  ;;  %6370 = vmatmul.mubr.msk.f32.gmra.mrb[54].mxu1 %vm2704_vm9, %v2686_v55  ;;  %v2600_v49 = vsel %vm39_vm0, %v2579_v9, %v8089_v62 }
 0x26d   :  { %v2621_v20 = vsel %vm2612_vm5, %v2599_v6, %v8058_v54  ;;  %2367 = vrot.lane.b32.xlu1 %v8405_v42, %s6961_s21  ;;  %v2834_v33 = vpop.f32.mrb[40].mxu1  ;;  %6372 = vmatprep.mubr.msk.f32.mxu1 %vm6965_vm2, %v11024_v56  ;;  %v6305_v63 = vpop.f32.mrb[42].mxu0  ;;  %v2622_v24 = vsel %vm2612_vm5, %v2600_v49, %v8074_v37 }
 0x26e   :  { %v2835_v19 = vadd.f32 %v8672_v61, %v2834_v33  ;;  %v6350_v38 = vpop.f32.mrb[41].mxu1  ;;  %v8694_v17 = vpop.permute.xlu0 %3110  ;;  %v2643_v23 = vsel %vm2634_vm6, %v2621_v20, %v8487_v11  ;;  %1329 = vst.msk [vmem:[#allocation2 + $0x298] sm:$0xff] %vm265_vm1, %v6305_v63  ;;  %v2644_v11 = vsel %vm2634_vm6, %v2622_v24, %v8519_v1 }
 0x26f   :  { %v8698_v54 = vpop.permute.xlu1 %2487  ;;  %v2665_v42 = vsel %vm2656_vm7, %v2643_v23, %v8512_v34  ;;  %v1237_v34 = vpop.f32.mrb[43].mxu0  ;;  %v2666_v46 = vsel %vm2656_vm7, %v2644_v11, %v8533_v7 }
 0x270   :  { %v2938_v21 = vmax.f32 %v2835_v19, 0.0  ;;  %3250 = vrot.lane.b32.xlu0 %v8600_v12, %s6963_s24  ;;  %v2687_v62 = vsel %vm2678_vm8, %v2665_v42, %v8526_v43  ;;  %1328 = vst.msk [vmem:[#allocation2 + $0x290] sm:$0xff] %vm265_vm1, %v1237_v34  ;;  %v2688_v1 = vsel %vm2678_vm8, %v2666_v46, %v8540_v39  ;;  %v11038_v42 = vld [vmem:[#allocation19_spill] sm:$0xff]  ;;  %v8782_v46 = vld [vmem:[#allocation3 + $0xe8] sm:$0xff] }
 0x271   :  { %3510 = vrot.lane.b32.xlu1 %v8702_v32, %s6968_s19  ;;  %6373 = vmatmul.mubr.msk.f32.gmra.mrb[56].mxu1 %vm2704_vm9, %v2687_v62  ;;  %v1821_v43 = vld [vmem:[#allocation2 + $0x288] sm:$0xff]  ;;  %v6308_v37 = vpop.f32.mrb[44].mxu0 }
 0x272   :  { %2959 = vst.msk [vmem:[#allocation4] sm:$0xff] %vm265_vm1, %v2938_v21  ;;  %v8717_v14 = vpop.permute.xlu0 %2095  ;;  %6375 = vmatprep.mubr.msk.f32.mxu1 %vm6965_vm2, %v11024_v56  ;;  %1331 = vst.msk [vmem:[#allocation2 + $0x2a8] sm:$0xff] %vm265_vm1, %v6308_v37  ;;  %v1247_v41 = vpop.f32.mrb[45].mxu0  ;;  %v1820_v44 = vld [vmem:[#allocation2 + $0x280] sm:$0xff] }
 0x273   :  { %v8724_v3 = vpop.permute.xlu1 %2425  ;;  %1330 = vst.msk [vmem:[#allocation2 + $0x2a0] sm:$0xff] %vm265_vm1, %v1247_v41  ;;  %v8735_v7 = vmax.f32 %v1820_v44, %v1821_v43 }
 0x274   :  { %2171 = vrot.lane.b32.xlu0 %v8064_v8, %s6959_s7 }
 0x275   :  { %2431 = vrot.lane.b32.xlu1 %v8433_v47, %s6967_s18  ;;  %6376 = vmatmul.mubr.msk.f32.gmra.mrb[58].mxu1 %vm2704_vm9, %v2688_v1  ;;  %v6311_v36 = vpop.f32.mrb[46].mxu0  ;;  %v1839_v8 = vmax.f32 %v8230_v35, %v8735_v7  ;;  %v1823_v48 = vld [vmem:[#allocation2 + $0x298] sm:$0xff] }
 0x276   :  { %v8737_v45 = vpop.permute.xlu0 %3048  ;;  %6378 = vmatprep.mubr.msk.f32.mxu1 %vm6965_vm2, %v11024_v56  ;;  %1333 = vst.msk [vmem:[#allocation2 + $0x2b8] sm:$0xff] %vm265_vm1, %v6311_v36  ;;  %v1257_v59 = vpop.f32.mrb[47].mxu0 }
 0x277   :  { %v8741_v39 = vpop.permute.xlu1 %2489  ;;  %1332 = vst.msk [vmem:[#allocation2 + $0x2b0] sm:$0xff] %vm265_vm1, %v1257_v59  ;;  %v1848_v55 = vmax.f32 %v1839_v8, 0.0  ;;  %v1822_v6 = vld [vmem:[#allocation2 + $0x290] sm:$0xff] }
 0x278   :  { %3054 = vrot.lane.b32.xlu0 %v8133_v53, %s6960_s16  ;;  %v8755_v9 = vmax.f32 %v1821_v43, %v1822_v6  ;;  %v8757_v35 = vmax.f32 %v1822_v6, %v1823_v48  ;;  %v6842_v6 = vld [vmem:[#allocation3 + $0x58] sm:$0xff] }
 0x279   :  { %3314 = vrot.lane.b32.xlu1 %v8746_v15, %s6964_s27  ;;  %v1825_v20 = vld [vmem:[#allocation2 + $0x2a8] sm:$0xff]  ;;  %v6314_v33 = vpop.f32.mrb[48].mxu0  ;;  %1857 = vst.msk [vmem:[#allocation3 + $0x1f8] sm:$0xff] %vm265_vm1, %v1848_v55  ;;  %v11040_v55 = vld [vmem:[#allocation11_spill] sm:$0xff] }
 0x27a   :  { %v8753_v27 = vpop.permute.xlu0 %3112  ;;  %v1824_v19 = vld [vmem:[#allocation2 + $0x2a0] sm:$0xff]  ;;  %1335 = vst.msk [vmem:[#allocation2 + $0x2c8] sm:$0xff] %vm265_vm1, %v6314_v33  ;;  %v1267_v38 = vpop.f32.mrb[49].mxu0  ;;  %v1840_v23 = vmax.f32 %v8242_v40, %v8755_v9  ;;  %v1841_v21 = vmax.f32 %v11038_v42, %v8757_v35 }
 0x27b   :  { %v8759_v49 = vpop.permute.xlu1 %2363  ;;  %v8769_v62 = vmax.f32 %v1823_v48, %v1824_v19  ;;  %1334 = vst.msk [vmem:[#allocation2 + $0x2c0] sm:$0xff] %vm265_vm1, %v1267_v38  ;;  %v8774_v63 = vmax.f32 %v1824_v19, %v1825_v20  ;;  %v6841_v48 = vld [vmem:[#allocation3 + $0x50] sm:$0xff]  ;;  %v11041_v33 = vld [vmem:[#allocation21_spill] sm:$0xff] }
 0x27c   :  { %2235 = vrot.lane.b32.xlu0 %v8105_v16, %s6963_s24  ;;  %v1849_v34 = vmax.f32 %v1840_v23, 0.0  ;;  %v1850_v11 = vmax.f32 %v1841_v21, 0.0  ;;  %v11039_v16 = vld [vmem:[#allocation24_spill] sm:$0xff]  ;;  %v2537_v19 = vsel %vm265_vm1, %v6842_v6, %v11041_v33 }
 0x27d   :  { %2495 = vrot.lane.b32.xlu1 %v8600_v12, %s6968_s19  ;;  %v1842_v43 = vmax.f32 %v11039_v16, %v8769_v62  ;;  %v1827_v40 = vld [vmem:[#allocation2 + $0x2b8] sm:$0xff]  ;;  %v1843_v41 = vmax.f32 %v8293_v28, %v8774_v63  ;;  %v2536_v28 = vsel %vm265_vm1, %v6841_v48, %v11040_v55 }
 0x27e   :  { %v8776_v24 = vpop.permute.xlu0 %2033  ;;  %v1826_v1 = vld [vmem:[#allocation2 + $0x2b0] sm:$0xff]  ;;  %1858 = vst.msk [vmem:[#allocation3 + $0x200] sm:$0xff] %vm265_vm1, %v1849_v34  ;;  %1859 = vst.msk [vmem:[#allocation3 + $0x208] sm:$0xff] %vm265_vm1, %v1850_v11  ;;  %v11042_v21 = vld [vmem:[#allocation20_spill] sm:$0xff] }
 0x27f   :  { %v8780_v37 = vpop.permute.xlu1 %2427  ;;  %v1851_v44 = vmax.f32 %v1842_v43, 0.0  ;;  %v8790_v36 = vmax.f32 %v1825_v20, %v1826_v1  ;;  %v8792_v8 = vmax.f32 %v1826_v1, %v1827_v40  ;;  %v1852_v59 = vmax.f32 %v1843_v41, 0.0  ;;  %v11043_v11 = vld [vmem:[#allocation22_spill] sm:$0xff]  ;;  %v11044_v48 = vld [vmem:[#allocation12_spill] sm:$0xff] }
 0x280   :  { %3118 = vrot.lane.b32.xlu0 %v8782_v46, %s6958_s6  ;;  %v2558_v34 = vsel %vm2547_vm3, %v2536_v28, %v11042_v21  ;;  %v2559_v16 = vsel %vm2547_vm3, %v2537_v19, %v11043_v11  ;;  %v11045_v28 = vld [vmem:[#allocation14_spill] sm:$0xff]  ;;  %v11046_v19 = vld [vmem:[#allocation13_spill] sm:$0xff] }
 0x281   :  { %3384 = vrot.lane.b32.xlu1 %v8570_v0, %s6961_s21  ;;  %1860 = vst.msk [vmem:[#allocation3 + $0x210] sm:$0xff] %vm265_vm1, %v1851_v44  ;;  %v1844_v20 = vmax.f32 %v8308_v50, %v8790_v36  ;;  %v1845_v23 = vmax.f32 %v8310_v13, %v8792_v8  ;;  %v1829_v42 = vld [vmem:[#allocation2 + $0x2c8] sm:$0xff]  ;;  %1861 = vst.msk [vmem:[#allocation3 + $0x218] sm:$0xff] %vm265_vm1, %v1852_v59  ;;  %v2580_v55 = vsel %vm2569_vm4, %v2558_v34, %v11044_v48 }
 0x282   :  { %v8800_v38 = vpop.permute.xlu0 %2097  ;;  %v1828_v41 = vld [vmem:[#allocation2 + $0x2c0] sm:$0xff]  ;;  %v2581_v6 = vsel %vm2569_vm4, %v2559_v16, %v11045_v28 }
 0x283   :  { %v8811_v43 = vpop.permute.xlu1 %3308  ;;  %v1853_v1 = vmax.f32 %v1844_v20, 0.0  ;;  %v1854_v50 = vmax.f32 %v1845_v23, 0.0  ;;  %v8816_v44 = vmax.f32 %v1827_v40, %v1828_v41  ;;  %v8820_v13 = vmax.f32 %v1828_v41, %v1829_v42  ;;  %v11047_v23 = vld [vmem:[#allocation16_spill] sm:$0xff]  ;;  %v11048_v34 = vld [vmem:[#allocation25_spill] sm:$0xff] }
 0x284   :  { %2039 = vrot.lane.b32.xlu0 %v8677_v25, %s6960_s16  ;;  %v2601_v20 = vsel %vm39_vm0, %v2580_v55, %v11046_v19  ;;  %v2602_v42 = vsel %vm39_vm0, %v2581_v6, %v11047_v23  ;;  %v11050_v48 = vld [vmem:[#allocation17_spill] sm:$0xff] }
 0x285   :  { %2299 = vrot.lane.b32.xlu1 %v8133_v53, %s6964_s27  ;;  %1862 = vst.msk [vmem:[#allocation3 + $0x220] sm:$0xff] %vm265_vm1, %v1853_v1  ;;  %1863 = vst.msk [vmem:[#allocation3 + $0x228] sm:$0xff] %vm265_vm1, %v1854_v50  ;;  %v1846_v25 = vmax.f32 %v8329_v5, %v8816_v44  ;;  %v1847_v53 = vmax.f32 %v8331_v2, %v8820_v13  ;;  %v6843_v5 = vld [vmem:[#allocation3 + $0x60] sm:$0xff]  ;;  %v11049_v1 = vld [vmem:[#allocation15_spill] sm:$0xff]  ;;  %v2624_v55 = vsel %vm2612_vm5, %v2602_v42, %v11050_v48 }
 0x286   :  { %v8826_v59 = vpop.permute.xlu0 %3050  ;;  %v2538_v11 = vsel %vm265_vm1, %v6843_v5, %v11048_v34  ;;  %v2623_v50 = vsel %vm2612_vm5, %v2601_v20, %v11049_v1  ;;  %v8856_v28 = vld [vmem:[#allocation3 + $0xa0] sm:$0xff]  ;;  %v6845_v23 = vld [vmem:[#allocation3 + $0x68] sm:$0xff] }
 0x287   :  { %v8832_v40 = vpop.permute.xlu1 %2295  ;;  %v1855_v33 = vmax.f32 %v1846_v25, 0.0  ;;  %v1856_v21 = vmax.f32 %v1847_v53, 0.0  ;;  %v2560_v2 = vsel %vm2547_vm3, %v2538_v11, %v8355_v31  ;;  %v2645_v6 = vsel %vm2634_vm6, %v2623_v50, %v8547_v30  ;;  %v11054_v50 = vld [vmem:[#allocation29_spill] sm:$0xff] }
 0x288   :  { %3188 = vrot.lane.b32.xlu0 %v8600_v12, %s6959_s7  ;;  %v2582_v25 = vsel %vm2569_vm4, %v2560_v2, %v8337_v58  ;;  %v2667_v53 = vsel %vm2656_vm7, %v2645_v6, %v8557_v51  ;;  %v2539_v42 = vsel %vm265_vm1, %v6845_v23, %v8503_v10  ;;  %v11051_v58 = vld [vmem:[#allocation27_spill] sm:$0xff] }
 0x289   :  { %3448 = vrot.lane.b32.xlu1 %v8702_v32, %s6967_s18  ;;  %1864 = vst.msk [vmem:[#allocation3 + $0x230] sm:$0xff] %vm265_vm1, %v1855_v33  ;;  %1865 = vst.msk [vmem:[#allocation3 + $0x238] sm:$0xff] %vm265_vm1, %v1856_v21  ;;  %v8874_v21 = vld [vmem:[#allocation3 + $0x170] sm:$0xff]  ;;  %v2603_v51 = vsel %vm39_vm0, %v2582_v25, %v11051_v58 }
 0x28a   :  { %v2358_v16 = vpop.permute.xlu0 %2357  ;;  %v11053_v10 = vld [vmem:[#allocation39_spill] sm:$0xff]  ;;  %v2625_v48 = vsel %vm2612_vm5, %v2603_v51, %v11054_v50  ;;  %v11056_v25 = vld [vmem:[#allocation38_spill] sm:$0xff] }
 0x28b   :  { %v8849_v41 = vpop.permute.xlu1 %3310  ;;  %v2646_v31 = vsel %vm2634_vm6, %v2624_v55, %v2358_v16  ;;  %v11055_v55 = vld [vmem:[#allocation28_spill] sm:$0xff] }
 0x28c   :  { %2103 = vrot.lane.b32.xlu0 %v8856_v28, %s6958_s6  ;;  %v2668_v30 = vsel %vm2656_vm7, %v2646_v31, %v8580_v29  ;;  %v6846_v29 = vld [vmem:[#allocation3 + $0x70] sm:$0xff]  ;;  %v8899_v31 = vld [vmem:[#allocation3 + $0xd8] sm:$0xff] }
 0x28d   :  { %2369 = vrot.lane.b32.xlu1 %v8433_v47, %s6961_s21  ;;  %v11052_v47 = vld [vmem:[#allocation36_spill] sm:$0xff]  ;;  %v2540_v34 = vsel %vm265_vm1, %v6846_v29, %v11053_v10  ;;  %v2690_v1 = vsel %vm2678_vm8, %v2668_v30, %v8595_v18  ;;  %v11058_v30 = vld [vmem:[#allocation23_spill] sm:$0xff]  ;;  %v11060_v29 = vld [vmem:[#allocation30_spill] sm:$0xff] }
 0x28e   :  { %v2484_v33 = vpop.permute.xlu0 %2483  ;;  %v2561_v5 = vsel %vm2547_vm3, %v2539_v42, %v11052_v47  ;;  %v2562_v16 = vsel %vm2547_vm3, %v2540_v34, %v8717_v14  ;;  %v8916_v42 = vld [vmem:[#allocation3 + $0xa8] sm:$0xff]  ;;  %v8927_v10 = vld [vmem:[#allocation3 + $0x130] sm:$0xff] }
 0x28f   :  { %v2492_v19 = vpop.permute.xlu1 %2491  ;;  %v2689_v20 = vsel %vm2678_vm8, %v2667_v53, %v2484_v33  ;;  %v2583_v6 = vsel %vm2569_vm4, %v2561_v5, %v11055_v55  ;;  %v2647_v53 = vsel %vm2634_vm6, %v2625_v48, %v8608_v60  ;;  %v11057_v33 = vld [vmem:[#allocation40_spill] sm:$0xff]  ;;  %v3565_v58 = vsel %vm265_vm1, %v8916_v42, %v11058_v30  ;;  %v11059_v47 = vld [vmem:[#allocation26_spill] sm:$0xff] }
 0x290   :  { %3252 = vrot.lane.b32.xlu0 %v8746_v15, %s6963_s24  ;;  %6379 = vmatmul.mubr.msk.f32.gmra.mrb[60].mxu1 %vm2704_vm9, %v2689_v20  ;;  %v2604_v14 = vsel %vm39_vm0, %v2583_v6, %v11056_v25  ;;  %v2669_v18 = vsel %vm2656_vm7, %v2647_v53, %v8621_v4  ;;  %v2584_v20 = vsel %vm2569_vm4, %v2562_v16, %v11057_v33  ;;  %v11061_v16 = vld [vmem:[#allocation41_spill] sm:$0xff]  ;;  %v11063_v25 = vld [vmem:[#allocation43_spill] sm:$0xff]  ;;  %v11064_v30 = vld [vmem:[#allocation18_spill] sm:$0xff] }
 0x291   :  { %3512 = vrot.lane.b32.xlu1 %v8874_v21, %s6968_s19  ;;  %6381 = vmatprep.mubr.msk.f32.mxu1 %vm6965_vm2, %v11024_v56  ;;  %v2691_v60 = vsel %vm2678_vm8, %v2669_v18, %v8698_v54  ;;  %v3586_v5 = vsel %vm2547_vm3, %v3565_v58, %v11059_v47  ;;  %v2626_v4 = vsel %vm2612_vm5, %v2604_v14, %v11060_v29  ;;  %v8949_v14 = vld [vmem:[#allocation3 + $0xe0] sm:$0xff] }
 0x292   :  { %v3177_v11 = vpop.permute.xlu0 %3176  ;;  %v2648_v34 = vsel %vm2634_vm6, %v2626_v4, %v8634_v57  ;;  %v2605_v54 = vsel %vm39_vm0, %v2584_v20, %v11061_v16  ;;  %v11062_v57 = vld [vmem:[#allocation35_spill] sm:$0xff]  ;;  %v11065_v47 = vld [vmem:[#allocation32_spill] sm:$0xff] }
 0x293   :  { %v8891_v2 = vpop.permute.xlu1 %2365  ;;  %v2670_v50 = vsel %vm2656_vm7, %v2648_v34, %v8724_v3  ;;  %v2627_v6 = vsel %vm2612_vm5, %v2605_v54, %v11062_v57  ;;  %v11066_v34 = vld [vmem:[#allocation34_spill] sm:$0xff] }
 0x294   :  { %2173 = vrot.lane.b32.xlu0 %v8899_v31, %s6959_s7  ;;  %6382 = vmatmul.mubr.msk.f32.gmra.mrb[62].mxu1 %vm2704_vm9, %v2690_v1  ;;  %v3607_v1 = vsel %vm2569_vm4, %v3586_v5, %v3177_v11  ;;  %v2692_v48 = vsel %vm2678_vm8, %v2670_v50, %v8741_v39  ;;  %v2649_v3 = vsel %vm2634_vm6, %v2627_v6, %v8759_v49  ;;  %v8990_v50 = vld [vmem:[#allocation3 + $0xe8] sm:$0xff] }
 0x295   :  { %2433 = vrot.lane.b32.xlu1 %v8600_v12, %s6967_s18  ;;  %6384 = vmatprep.mubr.msk.f32.mxu1 %vm6965_vm2, %v11024_v56  ;;  %v3628_v11 = vsel %vm39_vm0, %v3607_v1, %v11063_v25  ;;  %v2671_v39 = vsel %vm2656_vm7, %v2649_v3, %v8780_v37 }
 0x296   :  { %v3179_v23 = vpop.permute.xlu0 %3178  ;;  %v2693_v18 = vsel %vm2678_vm8, %v2671_v39, %v2492_v19  ;;  %v3649_v33 = vsel %vm2612_vm5, %v3628_v11, %v8642_v26  ;;  %v8978_v26 = vld [vmem:[#allocation3 + $0xb0] sm:$0xff] }
 0x297   :  { %v3375_v51 = vpop.permute.xlu1 %3374  ;;  %v3566_v5 = vsel %vm265_vm1, %v8978_v26, %v11065_v47  ;;  %v9027_v47 = vld [vmem:[#allocation3 + $0x178] sm:$0xff] }
 0x298   :  { %3056 = vrot.lane.b32.xlu0 %v8782_v46, %s6960_s16  ;;  %6385 = vmatmul.mubr.msk.f32.gmra.mrb[64].mxu1 %vm2704_vm9, %v2691_v60  ;;  %v3670_v37 = vsel %vm2634_vm6, %v3649_v33, %v3375_v51  ;;  %v3587_v16 = vsel %vm2547_vm3, %v3566_v5, %v11066_v34  ;;  %v11067_v34 = vld [vmem:[#allocation37_spill] sm:$0xff] }
 0x299   :  { %3316 = vrot.lane.b32.xlu1 %v8927_v10, %s6964_s27  ;;  %6387 = vmatprep.mubr.msk.f32.mxu1 %vm6965_vm2, %v11024_v56  ;;  %v3608_v1 = vsel %vm2569_vm4, %v3587_v16, %v3179_v23 }
 0x29a   :  { %v3243_v46 = vpop.permute.xlu0 %3242 }
 0x29b   :  { %v3439_v55 = vpop.permute.xlu1 %3438 }
 0x29c   :  { %2237 = vrot.lane.b32.xlu0 %v8949_v14, %s6963_s24  ;;  %6388 = vmatmul.mubr.msk.f32.gmra.mrb[66].mxu1 %vm2704_vm9, %v2692_v48  ;;  %v3691_v29 = vsel %vm2656_vm7, %v3670_v37, %v3439_v55  ;;  %v3629_v48 = vsel %vm39_vm0, %v3608_v1, %v3243_v46 }
 0x29d   :  { %2497 = vrot.lane.b32.xlu1 %v8746_v15, %s6968_s19  ;;  %6390 = vmatprep.mubr.msk.f32.mxu1 %vm6965_vm2, %v11024_v56  ;;  %v3650_v6 = vsel %vm2612_vm5, %v3629_v48, %v8664_v22 }
 0x29e   :  { %v8962_v53 = vpop.permute.xlu0 %3180 }
 0x29f   :  { %v3377_v20 = vpop.permute.xlu1 %3376 }
 0x2a0   :  { %3120 = vrot.lane.b32.xlu0 %v11064_v30, %s6958_s6  ;;  %6391 = vmatmul.mubr.msk.f32.gmra.mrb[68].mxu1 %vm2704_vm9, %v2693_v18  ;;  %v3671_v46 = vsel %vm2634_vm6, %v3650_v6, %v3377_v20 }
 0x2a1   :  { %3386 = vrot.lane.b32.xlu1 %v8702_v32, %s6961_s21  ;;  %v2839_v49 = vpop.f32.mrb[42].mxu1  ;;  %6393 = vmatprep.mubr.msk.f32.mxu1 %vm6965_vm2, %v11024_v56 }
 0x2a2   :  { %v2840_v19 = vadd.f32 %v8672_v61, %v2839_v49  ;;  %v6353_v58 = vpop.f32.mrb[43].mxu1  ;;  %v8976_v60 = vpop.permute.xlu0 %3244 }
 0x2a3   :  { %v3503_v4 = vpop.permute.xlu1 %3502 }
 0x2a4   :  { %v2939_v54 = vmax.f32 %v2840_v19, 0.0  ;;  %v3712_v51 = vsel %vm2678_vm8, %v3691_v29, %v3503_v4  ;;  %2041 = vrot.lane.b32.xlu0 %v8856_v28, %s6960_s16  ;;  %v6317_v28 = vpop.f32.mrb[50].mxu0  ;;  %v6852_v4 = vld [vmem:[#allocation3 + $0xb8] sm:$0xff] }
 0x2a5   :  { %2301 = vrot.lane.b32.xlu1 %v8990_v50, %s6964_s27  ;;  %6430 = vmatmul.mubr.msk.f32.vlgmr.msra.gmra.mrb[60].mxu0 %vm2704_vm9, %v3712_v51  ;;  %1337 = vst.msk [vmem:[#allocation2 + $0x2d8] sm:$0xff] %vm265_vm1, %v6317_v28  ;;  %v1277_v23 = vpop.f32.mrb[51].mxu0  ;;  %v3567_v16 = vsel %vm265_vm1, %v6852_v4, %v11067_v34  ;;  %v9088_v4 = vld [vmem:[#allocation3 + $0xf8] sm:$0xff] }
 0x2a6   :  { %2960 = vst.msk [vmem:[#allocation4 + $0x8] sm:$0xff] %vm265_vm1, %v2939_v54  ;;  %v8997_v55 = vpop.permute.xlu0 %3182  ;;  %6432 = vmatprep.mubr.msk.f32.mxu0 %vm6965_vm2, %v11024_v56  ;;  %1336 = vst.msk [vmem:[#allocation2 + $0x2d0] sm:$0xff] %vm265_vm1, %v1277_v23  ;;  %v3588_v1 = vsel %vm2547_vm3, %v3567_v16, %v8694_v17  ;;  %v6856_v16 = vld [vmem:[#allocation3 + $0x78] sm:$0xff] }
 0x2a7   :  { %v3441_v57 = vpop.permute.xlu1 %3440  ;;  %v3609_v48 = vsel %vm2569_vm4, %v3588_v1, %v8962_v53 }
 0x2a8   :  { %3190 = vrot.lane.b32.xlu0 %v8746_v15, %s6959_s7  ;;  %v3692_v11 = vsel %vm2656_vm7, %v3671_v46, %v3441_v57  ;;  %v3630_v23 = vsel %vm39_vm0, %v3609_v48, %v8976_v60 }
 0x2a9   :  { %3450 = vrot.lane.b32.xlu1 %v8874_v21, %s6967_s18  ;;  %v6320_v22 = vpop.f32.mrb[52].mxu0  ;;  %v3651_v53 = vsel %vm2612_vm5, %v3630_v23, %v8811_v43 }
 0x2aa   :  { %v9010_v25 = vpop.permute.xlu0 %3246  ;;  %1339 = vst.msk [vmem:[#allocation2 + $0x2e8] sm:$0xff] %vm265_vm1, %v6320_v22  ;;  %v1287_v37 = vpop.f32.mrb[53].mxu0  ;;  %v6854_v22 = vld [vmem:[#allocation3 + $0xc0] sm:$0xff] }
 0x2ab   :  { %v3505_v3 = vpop.permute.xlu1 %3504  ;;  %v2844_v39 = vpop.f32.mrb[44].mxu1  ;;  %1338 = vst.msk [vmem:[#allocation2 + $0x2e0] sm:$0xff] %vm265_vm1, %v1287_v37 }
 0x2ac   :  { %v3713_v18 = vsel %vm2678_vm8, %v3692_v11, %v3505_v3  ;;  %v2845_v33 = vadd.f32 %v8672_v61, %v2844_v39  ;;  %v6356_v30 = vpop.f32.mrb[45].mxu1  ;;  %2105 = vrot.lane.b32.xlu0 %v8916_v42, %s6958_s6  ;;  %v1886_v58 = vld [vmem:[#allocation2 + $0x2d8] sm:$0xff]  ;;  %v9054_v3 = vld [vmem:[#allocation3 + $0xf0] sm:$0xff] }
 0x2ad   :  { %2371 = vrot.lane.b32.xlu1 %v8600_v12, %s6961_s21  ;;  %6433 = vmatmul.mubr.msk.f32.gmra.mrb[62].mxu0 %vm2704_vm9, %v3713_v18  ;;  %v1885_v12 = vld [vmem:[#allocation2 + $0x2d0] sm:$0xff] }
 0x2ae   :  { %v2940_v20 = vmax.f32 %v2845_v33, 0.0  ;;  %v9020_v49 = vpop.permute.xlu0 %2231  ;;  %6435 = vmatprep.mubr.msk.f32.mxu0 %vm6965_vm2, %v11024_v56  ;;  %v1895_v5 = vmax.f32 %v1885_v12, %v1886_v58  ;;  %v11068_v39 = vld [vmem:[#allocation31_spill] sm:$0xff] }
 0x2af   :  { %v3379_v19 = vpop.permute.xlu1 %3378 }
 0x2b0   :  { %2961 = vst.msk [vmem:[#allocation4 + $0x10] sm:$0xff] %vm265_vm1, %v2940_v20  ;;  %3254 = vrot.lane.b32.xlu0 %v8927_v10, %s6963_s24  ;;  %v1904_v51 = vmax.f32 %v8735_v7, %v1895_v5  ;;  %v3672_v33 = vsel %vm2634_vm6, %v3651_v53, %v3379_v19  ;;  %v3568_v20 = vsel %vm265_vm1, %v6854_v22, %v8737_v45  ;;  %v9138_v22 = vld [vmem:[#allocation3 + $0x180] sm:$0xff] }
 0x2b1   :  { %3514 = vrot.lane.b32.xlu1 %v9027_v47, %s6968_s19  ;;  %v9046_v28 = vld [vmem:[#allocation2 + $0x2e8] sm:$0xff]  ;;  %v3589_v5 = vsel %vm2547_vm3, %v3568_v20, %v8753_v27 }
 0x2b2   :  { %v9033_v29 = vpop.permute.xlu0 %3114  ;;  %v1913_v57 = vmax.f32 %v1904_v51, 0.0  ;;  %v1887_v7 = vld [vmem:[#allocation2 + $0x2e0] sm:$0xff] }
 0x2b3   :  { %v3443_v54 = vpop.permute.xlu1 %3442  ;;  %v1896_v17 = vmax.f32 %v1886_v58, %v1887_v7  ;;  %v1897_v11 = vmax.f32 %v1887_v7, %v9046_v28 }
 0x2b4   :  { %2175 = vrot.lane.b32.xlu0 %v8949_v14, %s6959_s7  ;;  %1922 = vst.msk [vmem:[#allocation3 + $0x240] sm:$0xff] %vm265_vm1, %v1913_v57  ;;  %v3693_v37 = vsel %vm2656_vm7, %v3672_v33, %v3443_v54  ;;  %v2541_v54 = vsel %vm265_vm1, %v6856_v16, %v8776_v24  ;;  %v11069_v24 = vld [vmem:[#allocation42_spill] sm:$0xff] }
 0x2b5   :  { %2435 = vrot.lane.b32.xlu1 %v8746_v15, %s6967_s18  ;;  %v1905_v60 = vmax.f32 %v8755_v9, %v1896_v17  ;;  %v1906_v18 = vmax.f32 %v8757_v35, %v1897_v11  ;;  %v3610_v35 = vsel %vm2569_vm4, %v3589_v5, %v8997_v55  ;;  %v2563_v48 = vsel %vm2547_vm3, %v2541_v54, %v8800_v38 }
 0x2b6   :  { %v9050_v6 = vpop.permute.xlu0 %2035  ;;  %v3631_v45 = vsel %vm39_vm0, %v3610_v35, %v9010_v25  ;;  %v2585_v23 = vsel %vm2569_vm4, %v2563_v48, %v11069_v24 }
 0x2b7   :  { %v3381_v46 = vpop.permute.xlu1 %3380  ;;  %v1914_v12 = vmax.f32 %v1905_v60, 0.0  ;;  %v1915_v43 = vmax.f32 %v1906_v18, 0.0  ;;  %v3652_v55 = vsel %vm2612_vm5, %v3631_v45, %v8849_v41  ;;  %v2606_v38 = vsel %vm39_vm0, %v2585_v23, %v9020_v49 }
 0x2b8   :  { %3058 = vrot.lane.b32.xlu0 %v9054_v3, %s6960_s16  ;;  %v3673_v34 = vsel %vm2634_vm6, %v3652_v55, %v3381_v46  ;;  %v2628_v17 = vsel %vm2612_vm5, %v2606_v38, %v8832_v40 }
 0x2b9   :  { %3318 = vrot.lane.b32.xlu1 %v11068_v39, %s6964_s27  ;;  %1923 = vst.msk [vmem:[#allocation3 + $0x248] sm:$0xff] %vm265_vm1, %v1914_v12  ;;  %1924 = vst.msk [vmem:[#allocation3 + $0x250] sm:$0xff] %vm265_vm1, %v1915_v43  ;;  %v2650_v53 = vsel %vm2634_vm6, %v2628_v17, %v8891_v2 }
 0x2ba   :  { %v9065_v30 = vpop.permute.xlu0 %3184 }
 0x2bb   :  { %v3507_v58 = vpop.permute.xlu1 %3506  ;;  %v6323_v46 = vpop.f32.mrb[54].mxu0 }
 0x2bc   :  { %v3714_v9 = vsel %vm2678_vm8, %v3693_v37, %v3507_v58  ;;  %2239 = vrot.lane.b32.xlu0 %v8990_v50, %s6963_s24  ;;  %1341 = vst.msk [vmem:[#allocation2 + $0x2f8] sm:$0xff] %vm265_vm1, %v6323_v46  ;;  %v1297_v49 = vpop.f32.mrb[55].mxu0 }
 0x2bd   :  { %2499 = vrot.lane.b32.xlu1 %v8927_v10, %s6968_s19  ;;  %6436 = vmatmul.mubr.msk.f32.gmra.mrb[64].mxu0 %vm2704_vm9, %v3714_v9  ;;  %1340 = vst.msk [vmem:[#allocation2 + $0x2f0] sm:$0xff] %vm265_vm1, %v1297_v49 }
 0x2be   :  { %v9084_v27 = vpop.permute.xlu0 %2099  ;;  %6438 = vmatprep.mubr.msk.f32.mxu0 %vm6965_vm2, %v11024_v56 }
 0x2bf   :  { %v3445_v19 = vpop.permute.xlu1 %3444 }
 0x2c0   :  { %3122 = vrot.lane.b32.xlu0 %v9088_v4, %s6958_s6  ;;  %v3694_v51 = vsel %vm2656_vm7, %v3673_v34, %v3445_v19 }
 0x2c1   :  { %3388 = vrot.lane.b32.xlu1 %v8874_v21, %s6961_s21 }
 0x2c2   :  { %v9097_v25 = vpop.permute.xlu0 %3248 }
 0x2c3   :  { %v3509_v1 = vpop.permute.xlu1 %3508 }
 0x2c4   :  { %v3715_v57 = vsel %vm2678_vm8, %v3694_v51, %v3509_v1  ;;  %2043 = vrot.lane.b32.xlu0 %v8916_v42, %s6960_s16  ;;  %v1889_v20 = vld [vmem:[#allocation2 + $0x2f0] sm:$0xff]  ;;  %v9183_v1 = vld [vmem:[#allocation3 + $0x100] sm:$0xff] }
 0x2c5   :  { %2303 = vrot.lane.b32.xlu1 %v9054_v3, %s6964_s27  ;;  %6439 = vmatmul.mubr.msk.f32.gmra.mrb[66].mxu0 %vm2704_vm9, %v3715_v57  ;;  %v1898_v58 = vmax.f32 %v9046_v28, %v1889_v20  ;;  %v6857_v28 = vld [vmem:[#allocation3 + $0xc8] sm:$0xff] }
 0x2c6   :  { %v9110_v41 = vpop.permute.xlu0 %2169  ;;  %6441 = vmatprep.mubr.msk.f32.mxu0 %vm6965_vm2, %v11024_v56 }
 0x2c7   :  { %v2430_v7 = vpop.permute.xlu1 %2429  ;;  %v1907_v5 = vmax.f32 %v8769_v62, %v1898_v58  ;;  %v3569_v62 = vsel %vm265_vm1, %v6857_v28, %v8826_v59 }
 0x2c8   :  { %3192 = vrot.lane.b32.xlu0 %v8927_v10, %s6959_s7  ;;  %v2672_v18 = vsel %vm2656_vm7, %v2650_v53, %v2430_v7 }
 0x2c9   :  { %3452 = vrot.lane.b32.xlu1 %v9027_v47, %s6967_s18  ;;  %v1916_v45 = vmax.f32 %v1907_v5, 0.0 }
 0x2ca   :  { %v9122_v42 = vpop.permute.xlu0 %3052 }
 0x2cb   :  { %v3313_v11 = vpop.permute.xlu1 %3312  ;;  %1925 = vst.msk [vmem:[#allocation3 + $0x258] sm:$0xff] %vm265_vm1, %v1916_v45 }
 0x2cc   :  { %2107 = vrot.lane.b32.xlu0 %v8978_v26, %s6958_s6  ;;  %v9149_v26 = vld [vmem:[#allocation2 + $0x2f8] sm:$0xff] }
 0x2cd   :  { %2373 = vrot.lane.b32.xlu1 %v8746_v15, %s6961_s21  ;;  %v1899_v12 = vmax.f32 %v1889_v20, %v9149_v26 }
 0x2ce   :  { %v9133_v60 = vpop.permute.xlu0 %2233 }
 0x2cf   :  { %v2494_v40 = vpop.permute.xlu1 %2493  ;;  %v1908_v9 = vmax.f32 %v8774_v63, %v1899_v12  ;;  %v3590_v63 = vsel %vm2547_vm3, %v3569_v62, %v9033_v29 }
 0x2d0   :  { %v2694_v33 = vsel %vm2678_vm8, %v2672_v18, %v2494_v40  ;;  %3256 = vrot.lane.b32.xlu0 %v11068_v39, %s6963_s24  ;;  %v3611_v16 = vsel %vm2569_vm4, %v3590_v63, %v9065_v30 }
 0x2d1   :  { %3516 = vrot.lane.b32.xlu1 %v9138_v22, %s6968_s19  ;;  %6394 = vmatmul.mubr.msk.f32.gmra.mrb[70].mxu1 %vm2704_vm9, %v2694_v33  ;;  %v1917_v19 = vmax.f32 %v1908_v9, 0.0  ;;  %v3632_v51 = vsel %vm39_vm0, %v3611_v16, %v9097_v25  ;;  %v9243_v9 = vld [vmem:[#allocation3 + $0x138] sm:$0xff] }
 0x2d2   :  { %v9145_v15 = vpop.permute.xlu0 %3116  ;;  %6396 = vmatprep.mubr.msk.f32.mxu1 %vm6965_vm2, %v11024_v56  ;;  %v3653_v59 = vsel %vm2612_vm5, %v3632_v51, %v3313_v11  ;;  %v6859_v11 = vld [vmem:[#allocation3 + $0x80] sm:$0xff] }
 0x2d3   :  { %v3383_v2 = vpop.permute.xlu1 %3382  ;;  %1926 = vst.msk [vmem:[#allocation3 + $0x260] sm:$0xff] %vm265_vm1, %v1917_v19  ;;  %v2542_v49 = vsel %vm265_vm1, %v6859_v11, %v9050_v6  ;;  %v9254_v19 = vld [vmem:[#allocation3 + $0x198] sm:$0xff]  ;;  %v1981_v51 = vld [vmem:[#allocation3 + $0x140] sm:$0xff] }
 0x2d4   :  { %2177 = vrot.lane.b32.xlu0 %v8990_v50, %s6959_s7  ;;  %v11070_v50 = vld [vmem:[#allocation33_spill] sm:$0xff]  ;;  %v3674_v48 = vsel %vm2634_vm6, %v3653_v59, %v3383_v2  ;;  %v6862_v59 = vld [vmem:[#allocation3 + $0xd0] sm:$0xff] }
 0x2d5   :  { %2437 = vrot.lane.b32.xlu1 %v8927_v10, %s6967_s18 }
 0x2d6   :  { %v9155_v37 = vpop.permute.xlu0 %2037 }
 0x2d7   :  { %v2298_v43 = vpop.permute.xlu1 %2297 }
 0x2d8   :  { %3060 = vrot.lane.b32.xlu0 %v9088_v4, %s6960_s16 }
 0x2d9   :  { %3320 = vrot.lane.b32.xlu1 %v11070_v50, %s6964_s27 }
 0x2da   :  { %v9165_v35 = vpop.permute.xlu0 %3186 }
 0x2db   :  { %v3447_v55 = vpop.permute.xlu1 %3446 }
 0x2dc   :  { %2241 = vrot.lane.b32.xlu0 %v9054_v3, %s6963_s24  ;;  %v3695_v25 = vsel %vm2656_vm7, %v3674_v48, %v3447_v55  ;;  %v9256_v55 = vld [vmem:[#allocation3 + $0x148] sm:$0xff] }
 0x2dd   :  { %2501 = vrot.lane.b32.xlu1 %v11068_v39, %s6968_s19  ;;  %v9270_v48 = vld [vmem:[#allocation3 + $0x108] sm:$0xff] }
 0x2de   :  { %v9177_v34 = vpop.permute.xlu0 %2101 }
 0x2df   :  { %v2368_v54 = vpop.permute.xlu1 %2367 }
 0x2e0   :  { %3124 = vrot.lane.b32.xlu0 %v9183_v1, %s6958_s6 }
 0x2e1   :  { %3390 = vrot.lane.b32.xlu1 %v9027_v47, %s6961_s21  ;;  %v2849_v29 = vpop.f32.mrb[46].mxu1 }
 0x2e2   :  { %v2850_v57 = vadd.f32 %v8672_v61, %v2849_v29  ;;  %v6359_v30 = vpop.f32.mrb[47].mxu1  ;;  %v9192_v24 = vpop.permute.xlu0 %3250  ;;  %v3570_v29 = vsel %vm265_vm1, %v6862_v59, %v9122_v42 }
 0x2e3   :  { %v3511_v23 = vpop.permute.xlu1 %3510 }
 0x2e4   :  { %v2941_v7 = vmax.f32 %v2850_v57, 0.0  ;;  %v3716_v38 = vsel %vm2678_vm8, %v3695_v25, %v3511_v23  ;;  %2305 = vrot.lane.b32.xlu0 %v9088_v4, %s6964_s27  ;;  %v3591_v57 = vsel %vm2547_vm3, %v3570_v29, %v9145_v15 }
 0x2e5   :  { %3194 = vrot.lane.b32.xlu1 %v11068_v39, %s6959_s7  ;;  %6442 = vmatmul.mubr.msk.f32.gmra.mrb[68].mxu0 %vm2704_vm9, %v3716_v38  ;;  %v2564_v39 = vsel %vm2547_vm3, %v2542_v49, %v9084_v27  ;;  %v3612_v23 = vsel %vm2569_vm4, %v3591_v57, %v9165_v35 }
 0x2e6   :  { %2962 = vst.msk [vmem:[#allocation4 + $0x18] sm:$0xff] %vm265_vm1, %v2941_v7  ;;  %v9202_v46 = vpop.permute.xlu0 %2171  ;;  %6444 = vmatprep.mubr.msk.f32.mxu0 %vm6965_vm2, %v11024_v56  ;;  %v2586_v18 = vsel %vm2569_vm4, %v2564_v39, %v9110_v41  ;;  %v3633_v38 = vsel %vm39_vm0, %v3612_v23, %v9192_v24 }
 0x2e7   :  { %v2432_v17 = vpop.permute.xlu1 %2431  ;;  %v2607_v2 = vsel %vm39_vm0, %v2586_v18, %v9133_v60  ;;  %v9230_v60 = vld [vmem:[#allocation3 + $0x188] sm:$0xff] }
 0x2e8   :  { %3454 = vrot.lane.b32.xlu0 %v9138_v22, %s6967_s18 }
 0x2e9   :  { %4066 = vrot.lane.b32.xlu1 %v8549_v52, %s6960_s16  ;;  %v2629_v52 = vsel %vm2612_vm5, %v2607_v2, %v2298_v43 }
 0x2ea   :  { %v9214_v53 = vpop.permute.xlu0 %3054  ;;  %v2651_v6 = vsel %vm2634_vm6, %v2629_v52, %v2368_v54 }
 0x2eb   :  { %v3315_v40 = vpop.permute.xlu1 %3314  ;;  %v2854_v33 = vpop.f32.mrb[48].mxu1  ;;  %v2673_v12 = vsel %vm2656_vm7, %v2651_v6, %v2432_v17  ;;  %v9282_v17 = vld [vmem:[#allocation3 + $0x1a0] sm:$0xff] }
 0x2ec   :  { %v2855_v20 = vadd.f32 %v8672_v61, %v2854_v33  ;;  %v6362_v58 = vpop.f32.mrb[49].mxu1  ;;  %2375 = vrot.lane.b32.xlu0 %v8927_v10, %s6961_s21  ;;  %v3654_v11 = vsel %vm2612_vm5, %v3633_v38, %v3315_v40  ;;  %v9297_v6 = vld [vmem:[#allocation3 + $0x140] sm:$0xff] }
 0x2ed   :  { %3258 = vrot.lane.b32.xlu1 %v11070_v50, %s6963_s24 }
 0x2ee   :  { %v2942_v27 = vmax.f32 %v2855_v20, 0.0  ;;  %v9227_v41 = vpop.permute.xlu0 %2235  ;;  %v6326_v50 = vpop.f32.mrb[56].mxu0 }
 0x2ef   :  { %v2496_v5 = vpop.permute.xlu1 %2495  ;;  %1343 = vst.msk [vmem:[#allocation2 + $0x308] sm:$0xff] %vm265_vm1, %v6326_v50  ;;  %v1307_v28 = vpop.f32.mrb[57].mxu0  ;;  %v9312_v50 = vld [vmem:[#allocation3 + $0x1a8] sm:$0xff] }
 0x2f0   :  { %2963 = vst.msk [vmem:[#allocation4 + $0x20] sm:$0xff] %vm265_vm1, %v2942_v27  ;;  %v2695_v61 = vsel %vm2678_vm8, %v2673_v12, %v2496_v5  ;;  %3518 = vrot.lane.b32.xlu0 %v9230_v60, %s6968_s19  ;;  %1342 = vst.msk [vmem:[#allocation2 + $0x300] sm:$0xff] %vm265_vm1, %v1307_v28  ;;  %v9314_v28 = vld [vmem:[#allocation3 + $0x160] sm:$0xff] }
 0x2f1   :  { %4124 = vrot.lane.b32.xlu1 %v8570_v0, %s6958_s6  ;;  %6397 = vmatmul.mubr.msk.f32.gmra.mrb[72].mxu1 %vm2704_vm9, %v2695_v61 }
 0x2f2   :  { %v9239_v10 = vpop.permute.xlu0 %3118  ;;  %6399 = vmatprep.mubr.msk.f32.mxu1 %vm6965_vm2, %v11024_v56  ;;  %v6329_v62 = vpop.f32.mrb[58].mxu0 }
 0x2f3   :  { %v3385_v43 = vpop.permute.xlu1 %3384  ;;  %1345 = vst.msk [vmem:[#allocation2 + $0x318] sm:$0xff] %vm265_vm1, %v6329_v62  ;;  %v1317_v16 = vpop.f32.mrb[59].mxu0  ;;  %v6866_v62 = vld [vmem:[#allocation3 + $0x88] sm:$0xff] }
 0x2f4   :  { %2439 = vrot.lane.b32.xlu0 %v9243_v9, %s6967_s18  ;;  %1344 = vst.msk [vmem:[#allocation2 + $0x310] sm:$0xff] %vm265_vm1, %v1317_v16  ;;  %v3675_v35 = vsel %vm2634_vm6, %v3654_v11, %v3385_v43  ;;  %v2543_v16 = vsel %vm265_vm1, %v6866_v62, %v9155_v37  ;;  %v9332_v37 = vld [vmem:[#allocation3 + $0x190] sm:$0xff]  ;;  %v9418_v62 = vld [vmem:[%s10990_s1 + $0x68] ss:$0 sm:$0xff] }
 0x2f5   :  { %3062 = vrot.lane.b32.xlu1 %v9183_v1, %s6960_s16 }
 0x2f6   :  { %v9250_v0 = vpop.permute.xlu0 %2039  ;;  %v1892_v25 = vld [vmem:[#allocation2 + $0x308] sm:$0xff] }
 0x2f7   :  { %v9252_v45 = vpop.permute.xlu1 %2299  ;;  %v1891_v42 = vld [vmem:[#allocation2 + $0x300] sm:$0xff] }
 0x2f8   :  { %3322 = vrot.lane.b32.xlu0 %v9256_v55, %s6964_s27  ;;  %v1900_v15 = vmax.f32 %v9149_v26, %v1891_v42  ;;  %v1901_v49 = vmax.f32 %v1891_v42, %v1892_v25  ;;  %v9356_v42 = vld [vmem:[#allocation3 + $0x150] sm:$0xff] }
 0x2f9   :  { %4188 = vrot.lane.b32.xlu1 %v9254_v19, %s6959_s7 }
 0x2fa   :  { %v9263_v63 = vpop.permute.xlu0 %3188  ;;  %v1894_v39 = vld [vmem:[#allocation2 + $0x318] sm:$0xff]  ;;  %v1909_v20 = vmax.f32 %v8790_v36, %v1900_v15  ;;  %v1910_v58 = vmax.f32 %v8792_v8, %v1901_v49  ;;  %v4027_v49 = vld [vmem:[#allocation3 + $0x1e8] sm:$0xff] }
 0x2fb   :  { %v3449_v54 = vpop.permute.xlu1 %3448  ;;  %v1893_v24 = vld [vmem:[#allocation2 + $0x310] sm:$0xff] }
 0x2fc   :  { %2503 = vrot.lane.b32.xlu0 %v1981_v51, %s6968_s19  ;;  %v3696_v33 = vsel %vm2656_vm7, %v3675_v35, %v3449_v54  ;;  %v1902_v40 = vmax.f32 %v1892_v25, %v1893_v24  ;;  %v1903_v26 = vmax.f32 %v1893_v24, %v1894_v39  ;;  %v1918_v27 = vmax.f32 %v1909_v20, 0.0  ;;  %v9367_v24 = vld [vmem:[#allocation3 + $0x110] sm:$0xff] }
 0x2fd   :  { %3126 = vrot.lane.b32.xlu1 %v9270_v48, %s6958_s6  ;;  %v1919_v12 = vmax.f32 %v1910_v58, 0.0 }
 0x2fe   :  { %v9276_v30 = vpop.permute.xlu0 %2103  ;;  %v1911_v36 = vmax.f32 %v8816_v44, %v1902_v40  ;;  %v1912_v8 = vmax.f32 %v8820_v13, %v1903_v26  ;;  %1927 = vst.msk [vmem:[#allocation3 + $0x268] sm:$0xff] %vm265_vm1, %v1918_v27  ;;  %v2565_v13 = vsel %vm2547_vm3, %v2543_v16, %v9177_v34  ;;  %v9384_v26 = vld [vmem:[#allocation3 + $0x1f0] sm:$0xff] }
 0x2ff   :  { %v2370_v7 = vpop.permute.xlu1 %2369  ;;  %1928 = vst.msk [vmem:[#allocation3 + $0x270] sm:$0xff] %vm265_vm1, %v1919_v12  ;;  %v2587_v51 = vsel %vm2569_vm4, %v2565_v13, %v9202_v46 }
 0x300   :  { %3392 = vrot.lane.b32.xlu0 %v9138_v22, %s6961_s21  ;;  %v1920_v43 = vmax.f32 %v1911_v36, 0.0  ;;  %v1921_v44 = vmax.f32 %v1912_v8, 0.0  ;;  %v2608_v29 = vsel %vm39_vm0, %v2587_v51, %v9227_v41  ;;  %v9343_v41 = vld [vmem:[#allocation3 + $0x1e0] sm:$0xff]  ;;  %v9405_v8 = vld [vmem:[#allocation3 + $0x1b0] sm:$0xff] }
 0x301   :  { %4246 = vrot.lane.b32.xlu1 %v9282_v17, %s6963_s24  ;;  %v2630_v57 = vsel %vm2612_vm5, %v2608_v29, %v9252_v45 }
 0x302   :  { %v9291_v18 = vpop.permute.xlu0 %3252  ;;  %1929 = vst.msk [vmem:[#allocation3 + $0x278] sm:$0xff] %vm265_vm1, %v1920_v43  ;;  %1930 = vst.msk [vmem:[#allocation3 + $0x280] sm:$0xff] %vm265_vm1, %v1921_v44  ;;  %v2652_v34 = vsel %vm2634_vm6, %v2630_v57, %v2370_v7 }
 0x303   :  { %v3513_v2 = vpop.permute.xlu1 %3512 }
 0x304   :  { %v3717_v52 = vsel %vm2678_vm8, %v3696_v33, %v3513_v2  ;;  %3196 = vrot.lane.b32.xlu0 %v9297_v6, %s6959_s7  ;;  %v3571_v33 = vsel %vm265_vm1, %v8899_v31, %v9214_v53 }
 0x305   :  { %3456 = vrot.lane.b32.xlu1 %v9230_v60, %s6967_s18  ;;  %6445 = vmatmul.mubr.msk.f32.gmra.mrb[70].mxu0 %vm2704_vm9, %v3717_v52  ;;  %v3592_v2 = vsel %vm2547_vm3, %v3571_v33, %v9239_v10  ;;  %v9448_v33 = vld [vmem:[#allocation3 + $0x158] sm:$0xff] }
 0x306   :  { %v9305_v5 = vpop.permute.xlu0 %2173  ;;  %6447 = vmatprep.mubr.msk.f32.mxu0 %vm6965_vm2, %v11024_v56  ;;  %v3613_v58 = vsel %vm2569_vm4, %v3592_v2, %v9263_v63 }
 0x307   :  { %v2434_v61 = vpop.permute.xlu1 %2433  ;;  %v3634_v52 = vsel %vm39_vm0, %v3613_v58, %v9291_v18 }
 0x308   :  { %4068 = vrot.lane.b32.xlu0 %v9314_v28, %s6960_s16  ;;  %v2674_v46 = vsel %vm2656_vm7, %v2652_v34, %v2434_v61  ;;  %v6869_v61 = vld [vmem:[#allocation3 + $0x90] sm:$0xff] }
 0x309   :  { %4304 = vrot.lane.b32.xlu1 %v9312_v50, %s6964_s27 }
 0x30a   :  { %v9325_v54 = vpop.permute.xlu0 %3056 }
 0x30b   :  { %v3317_v59 = vpop.permute.xlu1 %3316 }
 0x30c   :  { %3260 = vrot.lane.b32.xlu0 %v9256_v55, %s6963_s24  ;;  %v3655_v31 = vsel %vm2612_vm5, %v3634_v52, %v3317_v59 }
 0x30d   :  { %3520 = vrot.lane.b32.xlu1 %v9332_v37, %s6968_s19 }
 0x30e   :  { %v2238_v25 = vpop.permute.xlu0 %2237 }
 0x30f   :  { %v2498_v23 = vpop.permute.xlu1 %2497 }
 0x310   :  { %v2696_v38 = vsel %vm2678_vm8, %v2674_v46, %v2498_v23  ;;  %4126 = vrot.lane.b32.xlu0 %v8702_v32, %s6958_s6 }
 0x311   :  { %4368 = vrot.lane.b32.xlu1 %v9343_v41, %s6961_s21  ;;  %6400 = vmatmul.mubr.msk.f32.gmra.mrb[74].mxu1 %vm2704_vm9, %v2696_v38 }
 0x312   :  { %v9350_v45 = vpop.permute.xlu0 %3120  ;;  %6402 = vmatprep.mubr.msk.f32.mxu1 %vm6965_vm2, %v11024_v56 }
 0x313   :  { %v3387_v7 = vpop.permute.xlu1 %3386 }
 0x314   :  { %3064 = vrot.lane.b32.xlu0 %v9270_v48, %s6960_s16  ;;  %v3676_v53 = vsel %vm2634_vm6, %v3655_v31, %v3387_v7  ;;  %v9461_v31 = vld [vmem:[#allocation3 + $0x118] sm:$0xff] }
 0x315   :  { %3324 = vrot.lane.b32.xlu1 %v9356_v42, %s6964_s27 }
 0x316   :  { %v9360_v11 = vpop.permute.xlu0 %2041 }
 0x317   :  { %v2302_v15 = vpop.permute.xlu1 %2301 }
 0x318   :  { %4190 = vrot.lane.b32.xlu0 %v9282_v17, %s6959_s7 }
 0x319   :  { %4426 = vrot.lane.b32.xlu1 %v4027_v49, %s6967_s18 }
 0x31a   :  { %v9365_v39 = vpop.permute.xlu0 %3190 }
 0x31b   :  { %v3451_v35 = vpop.permute.xlu1 %3450 }
 0x31c   :  { %3128 = vrot.lane.b32.xlu0 %v9367_v24, %s6958_s6  ;;  %v3697_v63 = vsel %vm2656_vm7, %v3676_v53, %v3451_v35  ;;  %v3572_v53 = vsel %vm265_vm1, %v8949_v14, %v9325_v54 }
 0x31d   :  { %3394 = vrot.lane.b32.xlu1 %v9230_v60, %s6961_s21 }
 0x31e   :  { %v9378_v20 = vpop.permute.xlu0 %2105 }
 0x31f   :  { %v2372_v40 = vpop.permute.xlu1 %2371 }
 0x320   :  { %4248 = vrot.lane.b32.xlu0 %v9312_v50, %s6963_s24 }
 0x321   :  { %4484 = vrot.lane.b32.xlu1 %v9384_v26, %s6968_s19 }
 0x322   :  { %v9392_v10 = vpop.permute.xlu0 %3254 }
 0x323   :  { %v3515_v27 = vpop.permute.xlu1 %3514 }
 0x324   :  { %v3718_v12 = vsel %vm2678_vm8, %v3697_v63, %v3515_v27  ;;  %3198 = vrot.lane.b32.xlu0 %v9256_v55, %s6959_s7  ;;  %v2544_v55 = vsel %vm265_vm1, %v6869_v61, %v9250_v0  ;;  %v3593_v63 = vsel %vm2547_vm3, %v3572_v53, %v9350_v45 }
 0x325   :  { %3458 = vrot.lane.b32.xlu1 %v9332_v37, %s6967_s18  ;;  %6448 = vmatmul.mubr.msk.f32.gmra.mrb[72].mxu0 %vm2704_vm9, %v3718_v12  ;;  %v2566_v44 = vsel %vm2547_vm3, %v2544_v55, %v9276_v30  ;;  %v3614_v12 = vsel %vm2569_vm4, %v3593_v63, %v9365_v39 }
 0x326   :  { %v9401_v18 = vpop.permute.xlu0 %2175  ;;  %6450 = vmatprep.mubr.msk.f32.mxu0 %vm6965_vm2, %v11024_v56  ;;  %v2588_v0 = vsel %vm2569_vm4, %v2566_v44, %v9305_v5  ;;  %v3635_v55 = vsel %vm39_vm0, %v3614_v12, %v9392_v10 }
 0x327   :  { %v2436_v36 = vpop.permute.xlu1 %2435  ;;  %v2609_v59 = vsel %vm39_vm0, %v2588_v0, %v2238_v25 }
 0x328   :  { %4070 = vrot.lane.b32.xlu0 %v8702_v32, %s6960_s16  ;;  %v2631_v30 = vsel %vm2612_vm5, %v2609_v59, %v2302_v15 }
 0x329   :  { %4306 = vrot.lane.b32.xlu1 %v9405_v8, %s6964_s27  ;;  %v2859_v43 = vpop.f32.mrb[50].mxu1  ;;  %v2653_v57 = vsel %vm2634_vm6, %v2631_v30, %v2372_v40 }
 0x32a   :  { %v2860_v16 = vadd.f32 %v9418_v62, %v2859_v43  ;;  %v6365_v13 = vpop.f32.mrb[51].mxu1  ;;  %v9421_v32 = vpop.permute.xlu0 %3058  ;;  %v2675_v5 = vsel %vm2656_vm7, %v2653_v57, %v2436_v36  ;;  %v9478_v43 = vld [vmem:[#allocation3 + $0x1f8] sm:$0xff] }
 0x32b   :  { %v3319_v51 = vpop.permute.xlu1 %3318  ;;  %v6873_v57 = vld [vmem:[#allocation3 + $0x98] sm:$0xff] }
 0x32c   :  { %v2943_v29 = vmax.f32 %v2860_v16, 0.0  ;;  %3262 = vrot.lane.b32.xlu0 %v9356_v42, %s6963_s24  ;;  %v3656_v14 = vsel %vm2612_vm5, %v3635_v55, %v3319_v51 }
 0x32d   :  { %3522 = vrot.lane.b32.xlu1 %v9254_v19, %s6968_s19 }
 0x32e   :  { %2964 = vst.msk [vmem:[#allocation4 + $0x28] sm:$0xff] %vm265_vm1, %v2943_v29  ;;  %v9433_v34 = vpop.permute.xlu0 %2239  ;;  %v9497_v29 = vld [vmem:[#allocation3 + $0x1b8] sm:$0xff] }
 0x32f   :  { %v2500_v46 = vpop.permute.xlu1 %2499 }
 0x330   :  { %v2697_v25 = vsel %vm2678_vm8, %v2675_v5, %v2500_v46  ;;  %4128 = vrot.lane.b32.xlu0 %v8874_v21, %s6958_s6 }
 0x331   :  { %4370 = vrot.lane.b32.xlu1 %v4027_v49, %s6961_s21  ;;  %6403 = vmatmul.mubr.msk.f32.gmra.mrb[76].mxu1 %vm2704_vm9, %v2697_v25 }
 0x332   :  { %v9441_v23 = vpop.permute.xlu0 %3122  ;;  %6405 = vmatprep.mubr.msk.f32.mxu1 %vm6965_vm2, %v11024_v56 }
 0x333   :  { %v3389_v38 = vpop.permute.xlu1 %3388  ;;  %v2864_v7 = vpop.f32.mrb[52].mxu1 }
 0x334   :  { %v2865_v15 = vadd.f32 %v9418_v62, %v2864_v7  ;;  %v6368_v35 = vpop.f32.mrb[53].mxu1  ;;  %3066 = vrot.lane.b32.xlu0 %v9367_v24, %s6960_s16  ;;  %v3677_v54 = vsel %vm2634_vm6, %v3656_v14, %v3389_v38 }
 0x335   :  { %3326 = vrot.lane.b32.xlu1 %v9448_v33, %s6964_s27 }
 0x336   :  { %v2944_v49 = vmax.f32 %v2865_v15, 0.0  ;;  %v9452_v2 = vpop.permute.xlu0 %2043 }
 0x337   :  { %v2304_v58 = vpop.permute.xlu1 %2303 }
 0x338   :  { %2965 = vst.msk [vmem:[#allocation4 + $0x30] sm:$0xff] %vm265_vm1, %v2944_v49  ;;  %4192 = vrot.lane.b32.xlu0 %v9312_v50, %s6959_s7 }
 0x339   :  { %4428 = vrot.lane.b32.xlu1 %v9384_v26, %s6967_s18 }
 0x33a   :  { %v9459_v40 = vpop.permute.xlu0 %3192 }
 0x33b   :  { %v3453_v52 = vpop.permute.xlu1 %3452 }
 0x33c   :  { %3130 = vrot.lane.b32.xlu0 %v9461_v31, %s6958_s6  ;;  %v3698_v39 = vsel %vm2656_vm7, %v3677_v54, %v3453_v52 }
 0x33d   :  { %3396 = vrot.lane.b32.xlu1 %v9332_v37, %s6961_s21 }
 0x33e   :  { %v9472_v27 = vpop.permute.xlu0 %2107 }
 0x33f   :  { %v2374_v36 = vpop.permute.xlu1 %2373  ;;  %v2869_v61 = vpop.f32.mrb[54].mxu1 }
 0x340   :  { %v6371_v44 = vpop.f32.mrb[55].mxu1  ;;  %4250 = vrot.lane.b32.xlu0 %v9405_v8, %s6963_s24  ;;  %v6874_v61 = vld [vmem:[#allocation3 + $0xe8] sm:$0xff] }
 0x341   :  { %4486 = vrot.lane.b32.xlu1 %v9478_v43, %s6968_s19  ;;  %v3573_v55 = vsel %vm265_vm1, %v6874_v61, %v9421_v32  ;;  %v9546_v44 = vld [vmem:[#allocation3 + $0x120] sm:$0xff] }
 0x342   :  { %v3257_v45 = vpop.permute.xlu0 %3256  ;;  %v3594_v14 = vsel %vm2547_vm3, %v3573_v55, %v9441_v23 }
 0x343   :  { %v3517_v16 = vpop.permute.xlu1 %3516  ;;  %v3615_v54 = vsel %vm2569_vm4, %v3594_v14, %v9459_v40 }
 0x344   :  { %v3719_v13 = vsel %vm2678_vm8, %v3698_v39, %v3517_v16  ;;  %v2874_v10 = vpop.f32.mrb[56].mxu1  ;;  %3200 = vrot.lane.b32.xlu0 %v9356_v42, %s6959_s7  ;;  %v2545_v42 = vsel %vm265_vm1, %v6873_v57, %v9360_v11  ;;  %v3636_v16 = vsel %vm39_vm0, %v3615_v54, %v3257_v45 }
 0x345   :  { %3460 = vrot.lane.b32.xlu1 %v9254_v19, %s6967_s18  ;;  %6451 = vmatmul.mubr.msk.f32.gmra.mrb[74].mxu0 %vm2704_vm9, %v3719_v13  ;;  %v6374_v0 = vpop.f32.mrb[57].mxu1  ;;  %v2567_v25 = vsel %vm2547_vm3, %v2545_v42, %v9378_v20  ;;  %v9560_v10 = vld [vmem:[#allocation3 + $0x200] sm:$0xff] }
 0x346   :  { %v9493_v51 = vpop.permute.xlu0 %2177  ;;  %6453 = vmatprep.mubr.msk.f32.mxu0 %vm6965_vm2, %v11024_v56  ;;  %v2589_v7 = vsel %vm2569_vm4, %v2567_v25, %v9401_v18 }
 0x347   :  { %v2438_v59 = vpop.permute.xlu1 %2437  ;;  %v2610_v35 = vsel %vm39_vm0, %v2589_v7, %v9433_v34 }
 0x348   :  { %v2879_v30 = vpop.f32.mrb[58].mxu1  ;;  %4072 = vrot.lane.b32.xlu0 %v8874_v21, %s6960_s16  ;;  %v2632_v11 = vsel %vm2612_vm5, %v2610_v35, %v2304_v58 }
 0x349   :  { %4308 = vrot.lane.b32.xlu1 %v9497_v29, %s6964_s27  ;;  %v2880_v5 = vadd.f32 %v9418_v62, %v2879_v30  ;;  %v6377_v46 = vpop.f32.mrb[59].mxu1  ;;  %v2654_v20 = vsel %vm2634_vm6, %v2632_v11, %v2374_v36  ;;  %v9585_v11 = vld [vmem:[#allocation3 + $0x1c0] sm:$0xff] }
 0x34a   :  { %v9508_v38 = vpop.permute.xlu0 %3060  ;;  %v2676_v18 = vsel %vm2656_vm7, %v2654_v20, %v2438_v59 }
 0x34b   :  { %v2947_v15 = vmax.f32 %v2880_v5, 0.0  ;;  %v3321_v21 = vpop.permute.xlu1 %3320 }
 0x34c   :  { %3264 = vrot.lane.b32.xlu0 %v9448_v33, %s6963_s24  ;;  %v3657_v32 = vsel %vm2612_vm5, %v3636_v16, %v3321_v21 }
 0x34d   :  { %2968 = vst.msk [vmem:[#allocation4 + $0x48] sm:$0xff] %vm265_vm1, %v2947_v15  ;;  %3524 = vrot.lane.b32.xlu1 %v9282_v17, %s6968_s19  ;;  %v6876_v15 = vld [vmem:[#allocation3 + $0xa0] sm:$0xff] }
 0x34e   :  { %v2242_v49 = vpop.permute.xlu0 %2241  ;;  %v2546_v21 = vsel %vm265_vm1, %v6876_v15, %v9452_v2 }
 0x34f   :  { %v2502_v52 = vpop.permute.xlu1 %2501 }
 0x350   :  { %v2698_v53 = vsel %vm2678_vm8, %v2676_v18, %v2502_v52  ;;  %4130 = vrot.lane.b32.xlu0 %v9027_v47, %s6958_s6  ;;  %v2568_v18 = vsel %vm2547_vm3, %v2546_v21, %v9472_v27  ;;  %v3574_v21 = vsel %vm265_vm1, %v9054_v3, %v9508_v38  ;;  %v9648_v3 = vld [vmem:[#allocation3 + $0x128] sm:$0xff] }
 0x351   :  { %4372 = vrot.lane.b32.xlu1 %v9384_v26, %s6961_s21  ;;  %6406 = vmatmul.mubr.msk.f32.gmra.mrb[78].mxu1 %vm2704_vm9, %v2698_v53  ;;  %v2590_v52 = vsel %vm2569_vm4, %v2568_v18, %v9493_v51 }
 0x352   :  { %v9528_v34 = vpop.permute.xlu0 %3124  ;;  %6408 = vmatprep.mubr.msk.f32.mxu1 %vm6965_vm2, %v11024_v56 }
 0x353   :  { %v3391_v58 = vpop.permute.xlu1 %3390  ;;  %v3595_v18 = vsel %vm2547_vm3, %v3574_v21, %v9528_v34 }
 0x354   :  { %3068 = vrot.lane.b32.xlu0 %v9461_v31, %s6960_s16  ;;  %v3678_v23 = vsel %vm2634_vm6, %v3657_v32, %v3391_v58  ;;  %v2611_v58 = vsel %vm39_vm0, %v2590_v52, %v2242_v49 }
 0x355   :  { %3328 = vrot.lane.b32.xlu1 %v9314_v28, %s6964_s27 }
 0x356   :  { %v2306_v63 = vpop.permute.xlu0 %2305 }
 0x357   :  { %v9536_v12 = vpop.permute.xlu1 %3194  ;;  %v2633_v55 = vsel %vm2612_vm5, %v2611_v58, %v2306_v63 }
 0x358   :  { %4194 = vrot.lane.b32.xlu0 %v9405_v8, %s6959_s7 }
 0x359   :  { %4430 = vrot.lane.b32.xlu1 %v9478_v43, %s6967_s18 }
 0x35a   :  { %v3455_v26 = vpop.permute.xlu0 %3454 }
 0x35b   :  { %v9542_v36 = vpop.permute.xlu1 %4066  ;;  %v3699_v0 = vsel %vm2656_vm7, %v3678_v23, %v3455_v26 }
 0x35c   :  { %3132 = vrot.lane.b32.xlu0 %v9546_v44, %s6958_s6 }
 0x35d   :  { %3398 = vrot.lane.b32.xlu1 %v9254_v19, %s6961_s21 }
 0x35e   :  { %v2376_v39 = vpop.permute.xlu0 %2375 }
 0x35f   :  { %v9557_v13 = vpop.permute.xlu1 %3258  ;;  %v2655_v14 = vsel %vm2634_vm6, %v2633_v55, %v2376_v39 }
 0x360   :  { %4252 = vrot.lane.b32.xlu0 %v9497_v29, %s6963_s24 }
 0x361   :  { %4488 = vrot.lane.b32.xlu1 %v9560_v10, %s6968_s19 }
 0x362   :  { %v3519_v40 = vpop.permute.xlu0 %3518 }
 0x363   :  { %v9568_v59 = vpop.permute.xlu1 %4124  ;;  %v3720_v45 = vsel %vm2678_vm8, %v3699_v0, %v3519_v40  ;;  %v2884_v30 = vpop.f32.mrb[60].mxu1 }
 0x364   :  { %v2885_v57 = vadd.f32 %v9418_v62, %v2884_v30  ;;  %v6380_v42 = vpop.f32.mrb[61].mxu1  ;;  %3202 = vrot.lane.b32.xlu0 %v9448_v33, %s6959_s7  ;;  %6454 = vmatmul.mubr.msk.f32.gmra.mrb[76].mxu0 %vm2704_vm9, %v3720_v45 }
 0x365   :  { %3462 = vrot.lane.b32.xlu1 %v9282_v17, %s6967_s18  ;;  %6456 = vmatprep.mubr.msk.f32.mxu0 %vm6965_vm2, %v11024_v56 }
 0x366   :  { %v2948_v5 = vmax.f32 %v2885_v57, 0.0  ;;  %v2440_v46 = vpop.permute.xlu0 %2439 }
 0x367   :  { %v9579_v25 = vpop.permute.xlu1 %3062  ;;  %v2889_v7 = vpop.f32.mrb[62].mxu1  ;;  %v2677_v51 = vsel %vm2656_vm7, %v2655_v14, %v2440_v46 }
 0x368   :  { %2969 = vst.msk [vmem:[#allocation4 + $0x50] sm:$0xff] %vm265_vm1, %v2948_v5  ;;  %v2890_v35 = vadd.f32 %v9418_v62, %v2889_v7  ;;  %v6383_v20 = vpop.f32.mrb[63].mxu1  ;;  %4074 = vrot.lane.b32.xlu0 %v9027_v47, %s6960_s16  ;;  %v9625_v5 = vld [vmem:[#allocation3 + $0x168] sm:$0xff] }
 0x369   :  { %4310 = vrot.lane.b32.xlu1 %v9585_v11, %s6964_s27 }
 0x36a   :  { %v2949_v2 = vmax.f32 %v2890_v35, 0.0  ;;  %v3323_v53 = vpop.permute.xlu0 %3322 }
 0x36b   :  { %v9596_v26 = vpop.permute.xlu1 %4188  ;;  %v2894_v61 = vpop.f32.mrb[64].mxu1 }
 0x36c   :  { %2970 = vst.msk [vmem:[#allocation4 + $0x58] sm:$0xff] %vm265_vm1, %v2949_v2  ;;  %v2895_v47 = vadd.f32 %v9418_v62, %v2894_v61  ;;  %v6386_v27 = vpop.f32.mrb[65].mxu1  ;;  %3266 = vrot.lane.b32.xlu0 %v9314_v28, %s6963_s24  ;;  %v3616_v2 = vsel %vm2569_vm4, %v3595_v18, %v9536_v12 }
 0x36d   :  { %3526 = vrot.lane.b32.xlu1 %v9312_v50, %s6968_s19  ;;  %v3637_v55 = vsel %vm39_vm0, %v3616_v2, %v9557_v13 }
 0x36e   :  { %v2950_v49 = vmax.f32 %v2895_v47, 0.0  ;;  %v2504_v54 = vpop.permute.xlu0 %2503  ;;  %v3658_v38 = vsel %vm2612_vm5, %v3637_v55, %v3323_v53 }
 0x36f   :  { %v9607_v16 = vpop.permute.xlu1 %3126  ;;  %v2699_v63 = vsel %vm2678_vm8, %v2677_v51, %v2504_v54  ;;  %v2899_v32 = vpop.f32.mrb[66].mxu1  ;;  %v9661_v51 = vld [vmem:[#allocation3 + $0x208] sm:$0xff] }
 0x370   :  { %2971 = vst.msk [vmem:[#allocation4 + $0x60] sm:$0xff] %vm265_vm1, %v2950_v49  ;;  %v2900_v23 = vadd.f32 %v9418_v62, %v2899_v32  ;;  %v6389_v0 = vpop.f32.mrb[67].mxu1  ;;  %4132 = vrot.lane.b32.xlu0 %v9138_v22, %s6958_s6  ;;  %6409 = vmatmul.mubr.msk.f32.gmra.mrb[80].mxu1 %vm2704_vm9, %v2699_v63 }
 0x371   :  { %4374 = vrot.lane.b32.xlu1 %v9478_v43, %s6961_s21  ;;  %6510 = vmatprep.mubr.msk.f32.mxu1 %vm6965_vm2, %v11024_v56  ;;  %v9680_v0 = vld [vmem:[#allocation3 + $0x1c8] sm:$0xff] }
 0x372   :  { %v2951_v39 = vmax.f32 %v2900_v23, 0.0  ;;  %v3393_v40 = vpop.permute.xlu0 %3392 }
 0x373   :  { %v9619_v45 = vpop.permute.xlu1 %4246  ;;  %v2904_v30 = vpop.f32.mrb[68].mxu1  ;;  %v3679_v34 = vsel %vm2634_vm6, %v3658_v38, %v3393_v40 }
 0x374   :  { %2972 = vst.msk [vmem:[#allocation4 + $0x68] sm:$0xff] %vm265_vm1, %v2951_v39  ;;  %v2905_v57 = vadd.f32 %v9418_v62, %v2904_v30  ;;  %v6392_v42 = vpop.f32.mrb[69].mxu1  ;;  %3070 = vrot.lane.b32.xlu0 %v9546_v44, %s6960_s16  ;;  %v4008_v30 = vld [vmem:[#allocation3 + $0x150] sm:$0xff] }
 0x375   :  { %3330 = vrot.lane.b32.xlu1 %v9625_v5, %s6964_s27 }
 0x376   :  { %v2952_v43 = vmax.f32 %v2905_v57, 0.0  ;;  %v9629_v46 = vpop.permute.xlu0 %3196  ;;  %v4541_v57 = vsel %vm265_vm1, %v4008_v30, %v9542_v36 }
 0x377   :  { %v3457_v7 = vpop.permute.xlu1 %3456  ;;  %v4560_v42 = vsel %vm2547_vm3, %v4541_v57, %v9568_v59 }
 0x378   :  { %2973 = vst.msk [vmem:[#allocation4 + $0x70] sm:$0xff] %vm265_vm1, %v2952_v43  ;;  %v3862_v15 = vpop.f32.mrb[60].mxu0  ;;  %4196 = vrot.lane.b32.xlu0 %v9497_v29, %s6959_s7  ;;  %v3700_v47 = vsel %vm2656_vm7, %v3679_v34, %v3457_v7  ;;  %v4579_v43 = vsel %vm2569_vm4, %v4560_v42, %v9596_v26  ;;  %v9752_v42 = vld [vmem:[#allocation3 + $0x210] sm:$0xff] }
 0x379   :  { %v3863_v35 = vadd.f32 %v9418_v62, %v3862_v15  ;;  %4432 = vrot.lane.b32.xlu1 %v9560_v10, %s6967_s18  ;;  %v6431_v20 = vpop.f32.mrb[61].mxu0  ;;  %v4598_v15 = vsel %vm39_vm0, %v4579_v43, %v9619_v45 }
 0x37a   :  { %v9642_v52 = vpop.permute.xlu0 %4068 }
 0x37b   :  { %v3966_v58 = vmax.f32 %v3863_v35, 0.0  ;;  %v4305_v61 = vpop.permute.xlu1 %4304 }
 0x37c   :  { %3134 = vrot.lane.b32.xlu0 %v9648_v3, %s6958_s6  ;;  %v4617_v36 = vsel %vm2612_vm5, %v4598_v15, %v4305_v61  ;;  %v9716_v61 = vld [vmem:[#allocation3 + $0x170] sm:$0xff] }
 0x37d   :  { %3987 = vst.msk [vmem:[#allocation4 + $0xa8] sm:$0xff] %vm265_vm1, %v3966_v58  ;;  %3400 = vrot.lane.b32.xlu1 %v9282_v17, %s6961_s21 }
 0x37e   :  { %v9657_v12 = vpop.permute.xlu0 %3260 }
 0x37f   :  { %v3521_v27 = vpop.permute.xlu1 %3520 }
 0x380   :  { %v3721_v13 = vsel %vm2678_vm8, %v3700_v47, %v3521_v27  ;;  %v3867_v14 = vpop.f32.mrb[62].mxu0  ;;  %4254 = vrot.lane.b32.xlu0 %v9585_v11, %s6963_s24  ;;  %v3575_v47 = vsel %vm265_vm1, %v9088_v4, %v9579_v25  ;;  %v9741_v4 = vld [vmem:[#allocation3 + $0x130] sm:$0xff] }
 0x381   :  { %v3868_v53 = vadd.f32 %v9418_v62, %v3867_v14  ;;  %4490 = vrot.lane.b32.xlu1 %v9661_v51, %s6968_s19  ;;  %v6434_v17 = vpop.f32.mrb[63].mxu0  ;;  %6457 = vmatmul.mubr.msk.f32.gmra.mrb[78].mxu0 %vm2704_vm9, %v3721_v13  ;;  %v3596_v14 = vsel %vm2547_vm3, %v3575_v47, %v9607_v16 }
 0x382   :  { %v9669_v49 = vpop.permute.xlu0 %4126  ;;  %6459 = vmatprep.mubr.msk.f32.mxu0 %vm6965_vm2, %v11024_v56  ;;  %v3617_v17 = vsel %vm2569_vm4, %v3596_v14, %v9629_v46 }
 0x383   :  { %v3967_v54 = vmax.f32 %v3868_v53, 0.0  ;;  %v4369_v63 = vpop.permute.xlu1 %4368 }
 0x384   :  { %3204 = vrot.lane.b32.xlu0 %v9314_v28, %s6959_s7  ;;  %v4636_v20 = vsel %vm2634_vm6, %v4617_v36, %v4369_v63 }
 0x385   :  { %3988 = vst.msk [vmem:[#allocation4 + $0xb0] sm:$0xff] %vm265_vm1, %v3967_v54  ;;  %3464 = vrot.lane.b32.xlu1 %v9312_v50, %s6967_s18 }
 0x386   :  { %v9678_v32 = vpop.permute.xlu0 %3064 }
 0x387   :  { %v3325_v23 = vpop.permute.xlu1 %3324 }
 0x388   :  { %4076 = vrot.lane.b32.xlu0 %v9138_v22, %s6960_s16 }
 0x389   :  { %4312 = vrot.lane.b32.xlu1 %v9680_v0, %s6964_s27 }
 0x38a   :  { %v9686_v39 = vpop.permute.xlu0 %4190 }
 0x38b   :  { %v4427_v40 = vpop.permute.xlu1 %4426 }
 0x38c   :  { %3268 = vrot.lane.b32.xlu0 %v9625_v5, %s6963_s24  ;;  %v4655_v26 = vsel %vm2656_vm7, %v4636_v20, %v4427_v40  ;;  %v3638_v40 = vsel %vm39_vm0, %v3617_v17, %v9657_v12 }
 0x38d   :  { %3528 = vrot.lane.b32.xlu1 %v9405_v8, %s6968_s19  ;;  %v3659_v25 = vsel %vm2612_vm5, %v3638_v40, %v3325_v23 }
 0x38e   :  { %v9696_v22 = vpop.permute.xlu0 %3128 }
 0x38f   :  { %v3395_v7 = vpop.permute.xlu1 %3394 }
 0x390   :  { %v3872_v21 = vpop.f32.mrb[64].mxu0  ;;  %4134 = vrot.lane.b32.xlu0 %v9230_v60, %s6958_s6  ;;  %v3680_v16 = vsel %vm2634_vm6, %v3659_v25, %v3395_v7 }
 0x391   :  { %v3873_v35 = vadd.f32 %v9418_v62, %v3872_v21  ;;  %4376 = vrot.lane.b32.xlu1 %v9560_v10, %s6961_s21  ;;  %v6437_v59 = vpop.f32.mrb[65].mxu0 }
 0x392   :  { %v9709_v18 = vpop.permute.xlu0 %4248  ;;  %v9770_v59 = vld [vmem:[#allocation3 + $0x1d0] sm:$0xff] }
 0x393   :  { %v3968_v2 = vmax.f32 %v3873_v35, 0.0  ;;  %v4485_v45 = vpop.permute.xlu1 %4484 }
 0x394   :  { %v4674_v58 = vsel %vm2678_vm8, %v4655_v26, %v4485_v45  ;;  %3072 = vrot.lane.b32.xlu0 %v9648_v3, %s6960_s16 }
 0x395   :  { %3989 = vst.msk [vmem:[#allocation4 + $0xb8] sm:$0xff] %vm265_vm1, %v3968_v2  ;;  %3332 = vrot.lane.b32.xlu1 %v9716_v61, %s6964_s27  ;;  %6511 = vmatmul.mubr.msk.f32.vlgmr.msra.gmra.mrb[82].mxu1 %vm2704_vm9, %v4674_v58  ;;  %v4542_v2 = vsel %vm265_vm1, %v9448_v33, %v9642_v52 }
 0x396   :  { %v9721_v55 = vpop.permute.xlu0 %3198  ;;  %6513 = vmatprep.mubr.msk.f32.mxu1 %vm6965_vm2, %v11024_v56 }
 0x397   :  { %v3459_v38 = vpop.permute.xlu1 %3458 }
 0x398   :  { %v3877_v34 = vpop.f32.mrb[66].mxu0  ;;  %4198 = vrot.lane.b32.xlu0 %v9585_v11, %s6959_s7  ;;  %v3701_v30 = vsel %vm2656_vm7, %v3680_v16, %v3459_v38 }
 0x399   :  { %v3878_v27 = vadd.f32 %v9418_v62, %v3877_v34  ;;  %4434 = vrot.lane.b32.xlu1 %v9661_v51, %s6967_s18  ;;  %v6440_v13 = vpop.f32.mrb[67].mxu0 }
 0x39a   :  { %v9735_v53 = vpop.permute.xlu0 %4070 }
 0x39b   :  { %v3969_v54 = vmax.f32 %v3878_v27, 0.0  ;;  %v4307_v63 = vpop.permute.xlu1 %4306 }
 0x39c   :  { %3136 = vrot.lane.b32.xlu0 %v9741_v4, %s6958_s6 }
 0x39d   :  { %3990 = vst.msk [vmem:[#allocation4 + $0xc0] sm:$0xff] %vm265_vm1, %v3969_v54  ;;  %3402 = vrot.lane.b32.xlu1 %v9312_v50, %s6961_s21  ;;  %v3576_v54 = vsel %vm265_vm1, %v9183_v1, %v9678_v32 }
 0x39e   :  { %v3263_v46 = vpop.permute.xlu0 %3262  ;;  %v3597_v40 = vsel %vm2547_vm3, %v3576_v54, %v9696_v22 }
 0x39f   :  { %v3523_v57 = vpop.permute.xlu1 %3522  ;;  %v3618_v16 = vsel %vm2569_vm4, %v3597_v40, %v9721_v55  ;;  %v9835_v55 = vld [vmem:[#allocation3 + $0x218] sm:$0xff] }
 0x3a0   :  { %v3722_v12 = vsel %vm2678_vm8, %v3701_v30, %v3523_v57  ;;  %4256 = vrot.lane.b32.xlu0 %v9680_v0, %s6963_s24  ;;  %v3639_v57 = vsel %vm39_vm0, %v3618_v16, %v3263_v46 }
 0x3a1   :  { %4492 = vrot.lane.b32.xlu1 %v9752_v42, %s6968_s19  ;;  %6460 = vmatmul.mubr.msk.f32.gmra.mrb[80].mxu0 %vm2704_vm9, %v3722_v12 }
 0x3a2   :  { %v9759_v23 = vpop.permute.xlu0 %4128  ;;  %6462 = vmatprep.mubr.msk.f32.mxu0 %vm6965_vm2, %v11024_v56 }
 0x3a3   :  { %v4371_v50 = vpop.permute.xlu1 %4370 }
 0x3a4   :  { %v2909_v43 = vpop.f32.mrb[70].mxu1  ;;  %3206 = vrot.lane.b32.xlu0 %v9625_v5, %s6959_s7 }
 0x3a5   :  { %v2910_v7 = vadd.f32 %v9418_v62, %v2909_v43  ;;  %3466 = vrot.lane.b32.xlu1 %v9405_v8, %s6967_s18  ;;  %v6395_v15 = vpop.f32.mrb[71].mxu1 }
 0x3a6   :  { %v9768_v21 = vpop.permute.xlu0 %3066 }
 0x3a7   :  { %v2953_v36 = vmax.f32 %v2910_v7, 0.0  ;;  %v3327_v35 = vpop.permute.xlu1 %3326 }
 0x3a8   :  { %4078 = vrot.lane.b32.xlu0 %v9230_v60, %s6960_s16  ;;  %v4561_v60 = vsel %vm2547_vm3, %v4542_v2, %v9669_v49  ;;  %v3660_v1 = vsel %vm2612_vm5, %v3639_v57, %v3327_v35 }
 0x3a9   :  { %2974 = vst.msk [vmem:[#allocation4 + $0x78] sm:$0xff] %vm265_vm1, %v2953_v36  ;;  %4314 = vrot.lane.b32.xlu1 %v9770_v59, %s6964_s27  ;;  %v4580_v58 = vsel %vm2569_vm4, %v4561_v60, %v9686_v39 }
 0x3aa   :  { %v9777_v20 = vpop.permute.xlu0 %4192  ;;  %v4599_v34 = vsel %vm39_vm0, %v4580_v58, %v9709_v18  ;;  %v9804_v18 = vld [vmem:[#allocation3 + $0x178] sm:$0xff]  ;;  %v4543_v58 = vsel %vm265_vm1, %v9314_v28, %v9735_v53 }
 0x3ab   :  { %v4429_v26 = vpop.permute.xlu1 %4428  ;;  %v4618_v33 = vsel %vm2612_vm5, %v4599_v34, %v4307_v63 }
 0x3ac   :  { %3270 = vrot.lane.b32.xlu0 %v9716_v61, %s6963_s24  ;;  %v4637_v52 = vsel %vm2634_vm6, %v4618_v33, %v4371_v50 }
 0x3ad   :  { %3530 = vrot.lane.b32.xlu1 %v9497_v29, %s6968_s19  ;;  %v4656_v47 = vsel %vm2656_vm7, %v4637_v52, %v4429_v26  ;;  %v9852_v26 = vld [vmem:[#allocation3 + $0x1d8] sm:$0xff] }
 0x3ae   :  { %v9788_v45 = vpop.permute.xlu0 %3130 }
 0x3af   :  { %v3397_v38 = vpop.permute.xlu1 %3396 }
 0x3b0   :  { %4136 = vrot.lane.b32.xlu0 %v9332_v37, %s6958_s6  ;;  %v3681_v32 = vsel %vm2634_vm6, %v3660_v1, %v3397_v38  ;;  %v4562_v38 = vsel %vm2547_vm3, %v4543_v58, %v9759_v23 }
 0x3b1   :  { %4378 = vrot.lane.b32.xlu1 %v9661_v51, %s6961_s21  ;;  %v4581_v34 = vsel %vm2569_vm4, %v4562_v38, %v9777_v20  ;;  %v9884_v20 = vld [vmem:[#allocation3 + $0x180] sm:$0xff] }
 0x3b2   :  { %v4251_v49 = vpop.permute.xlu0 %4250 }
 0x3b3   :  { %v4487_v27 = vpop.permute.xlu1 %4486  ;;  %v4600_v52 = vsel %vm39_vm0, %v4581_v34, %v4251_v49 }
 0x3b4   :  { %v4675_v39 = vsel %vm2678_vm8, %v4656_v47, %v4487_v27  ;;  %3074 = vrot.lane.b32.xlu0 %v9741_v4, %s6960_s16 }
 0x3b5   :  { %3334 = vrot.lane.b32.xlu1 %v9804_v18, %s6964_s27  ;;  %6514 = vmatmul.mubr.msk.f32.gmra.mrb[84].mxu1 %vm2704_vm9, %v4675_v39 }
 0x3b6   :  { %v9809_v13 = vpop.permute.xlu0 %3200  ;;  %6516 = vmatprep.mubr.msk.f32.mxu1 %vm6965_vm2, %v11024_v56 }
 0x3b7   :  { %v3461_v14 = vpop.permute.xlu1 %3460 }
 0x3b8   :  { %v3882_v17 = vpop.f32.mrb[68].mxu0  ;;  %4200 = vrot.lane.b32.xlu0 %v9680_v0, %s6959_s7  ;;  %v3702_v22 = vsel %vm2656_vm7, %v3681_v32, %v3461_v14 }
 0x3b9   :  { %4436 = vrot.lane.b32.xlu1 %v9752_v42, %s6967_s18  ;;  %v6443_v63 = vpop.f32.mrb[69].mxu0 }
 0x3ba   :  { %v9822_v25 = vpop.permute.xlu0 %4072 }
 0x3bb   :  { %v4309_v30 = vpop.permute.xlu1 %4308 }
 0x3bc   :  { %3138 = vrot.lane.b32.xlu0 %v9243_v9, %s6958_s6  ;;  %v4619_v47 = vsel %vm2612_vm5, %v4600_v52, %v4309_v30 }
 0x3bd   :  { %3404 = vrot.lane.b32.xlu1 %v9405_v8, %s6961_s21 }
 0x3be   :  { %v3265_v12 = vpop.permute.xlu0 %3264 }
 0x3bf   :  { %v3525_v50 = vpop.permute.xlu1 %3524 }
 0x3c0   :  { %v3723_v43 = vsel %vm2678_vm8, %v3702_v22, %v3525_v50  ;;  %4258 = vrot.lane.b32.xlu0 %v9770_v59, %s6963_s24 }
 0x3c1   :  { %4494 = vrot.lane.b32.xlu1 %v9835_v55, %s6968_s19  ;;  %6463 = vmatmul.mubr.msk.f32.gmra.mrb[82].mxu0 %vm2704_vm9, %v3723_v43 }
 0x3c2   :  { %v9842_v46 = vpop.permute.xlu0 %4130  ;;  %6465 = vmatprep.mubr.msk.f32.mxu0 %vm6965_vm2, %v11024_v56 }
 0x3c3   :  { %v4373_v8 = vpop.permute.xlu1 %4372 }
 0x3c4   :  { %v2914_v7 = vpop.f32.mrb[72].mxu1  ;;  %3208 = vrot.lane.b32.xlu0 %v9716_v61, %s6959_s7  ;;  %v4638_v28 = vsel %vm2634_vm6, %v4619_v47, %v4373_v8  ;;  %v9954_v47 = vld [vmem:[#allocation3 + $0x1a0] sm:$0xff] }
 0x3c5   :  { %3468 = vrot.lane.b32.xlu1 %v9497_v29, %s6967_s18  ;;  %v6398_v15 = vpop.f32.mrb[73].mxu1  ;;  %v9932_v7 = vld [vmem:[#allocation3 + $0x198] sm:$0xff] }
 0x3c6   :  { %v9850_v36 = vpop.permute.xlu0 %3068 }
 0x3c7   :  { %v3329_v35 = vpop.permute.xlu1 %3328 }
 0x3c8   :  { %4080 = vrot.lane.b32.xlu0 %v9332_v37, %s6960_s16 }
 0x3c9   :  { %4316 = vrot.lane.b32.xlu1 %v9852_v26, %s6964_s27 }
 0x3ca   :  { %v9858_v2 = vpop.permute.xlu0 %4194 }
 0x3cb   :  { %v4431_v60 = vpop.permute.xlu1 %4430 }
 0x3cc   :  { %3272 = vrot.lane.b32.xlu0 %v9804_v18, %s6963_s24  ;;  %v4657_v23 = vsel %vm2656_vm7, %v4638_v28, %v4431_v60  ;;  %v4544_v60 = vsel %vm265_vm1, %v9625_v5, %v9822_v25 }
 0x3cd   :  { %3532 = vrot.lane.b32.xlu1 %v9585_v11, %s6968_s19  ;;  %v4563_v58 = vsel %vm2547_vm3, %v4544_v60, %v9842_v46 }
 0x3ce   :  { %v9869_v37 = vpop.permute.xlu0 %3132  ;;  %v4582_v34 = vsel %vm2569_vm4, %v4563_v58, %v9858_v2 }
 0x3cf   :  { %v3399_v33 = vpop.permute.xlu1 %3398 }
 0x3d0   :  { %4138 = vrot.lane.b32.xlu0 %v9254_v19, %s6958_s6 }
 0x3d1   :  { %4380 = vrot.lane.b32.xlu1 %v9752_v42, %s6961_s21 }
 0x3d2   :  { %v4253_v53 = vpop.permute.xlu0 %4252 }
 0x3d3   :  { %v4489_v27 = vpop.permute.xlu1 %4488  ;;  %v4601_v52 = vsel %vm39_vm0, %v4582_v34, %v4253_v53  ;;  %v6885_v53 = vld [vmem:[#allocation3 + $0x140] sm:$0xff] }
 0x3d4   :  { %v4676_v39 = vsel %vm2678_vm8, %v4657_v23, %v4489_v27  ;;  %3076 = vrot.lane.b32.xlu0 %v9243_v9, %s6960_s16  ;;  %v3577_v9 = vsel %vm265_vm1, %v9270_v48, %v9768_v21  ;;  %v9967_v27 = vld [vmem:[#allocation3 + $0x188] sm:$0xff] }
 0x3d5   :  { %3336 = vrot.lane.b32.xlu1 %v9884_v20, %s6964_s27  ;;  %6517 = vmatmul.mubr.msk.f32.gmra.mrb[86].mxu1 %vm2704_vm9, %v4676_v39  ;;  %v3598_v54 = vsel %vm2547_vm3, %v3577_v9, %v9788_v45  ;;  %v3578_v9 = vsel %vm265_vm1, %v9367_v24, %v9850_v36 }
 0x3d6   :  { %v9889_v19 = vpop.permute.xlu0 %3202  ;;  %6519 = vmatprep.mubr.msk.f32.mxu1 %vm6965_vm2, %v11024_v56  ;;  %v3619_v40 = vsel %vm2569_vm4, %v3598_v54, %v9809_v13  ;;  %v9915_v13 = vld [vmem:[#allocation3 + $0x220] sm:$0xff] }
 0x3d7   :  { %v3463_v49 = vpop.permute.xlu1 %3462  ;;  %v3640_v30 = vsel %vm39_vm0, %v3619_v40, %v3265_v12  ;;  %v3599_v40 = vsel %vm2547_vm3, %v3578_v9, %v9869_v37 }
 0x3d8   :  { %v3887_v14 = vpop.f32.mrb[70].mxu0  ;;  %4202 = vrot.lane.b32.xlu0 %v9770_v59, %s6959_s7  ;;  %v3661_v48 = vsel %vm2612_vm5, %v3640_v30, %v3329_v35  ;;  %v3620_v30 = vsel %vm2569_vm4, %v3599_v40, %v9889_v19 }
 0x3d9   :  { %4438 = vrot.lane.b32.xlu1 %v9835_v55, %s6967_s18  ;;  %v6446_v17 = vpop.f32.mrb[71].mxu0  ;;  %v3682_v21 = vsel %vm2634_vm6, %v3661_v48, %v3399_v33 }
 0x3da   :  { %v9902_v63 = vpop.permute.xlu0 %4074  ;;  %v3703_v45 = vsel %vm2656_vm7, %v3682_v21, %v3463_v49 }
 0x3db   :  { %v4311_v16 = vpop.permute.xlu1 %4310 }
 0x3dc   :  { %3140 = vrot.lane.b32.xlu0 %v9297_v6, %s6958_s6  ;;  %v4620_v5 = vsel %vm2612_vm5, %v4601_v52, %v4311_v16 }
 0x3dd   :  { %3406 = vrot.lane.b32.xlu1 %v9497_v29, %s6961_s21 }
 0x3de   :  { %v3267_v57 = vpop.permute.xlu0 %3266 }
 0x3df   :  { %v3527_v1 = vpop.permute.xlu1 %3526 }
 0x3e0   :  { %v3724_v32 = vsel %vm2678_vm8, %v3703_v45, %v3527_v1  ;;  %4260 = vrot.lane.b32.xlu0 %v9852_v26, %s6963_s24  ;;  %v3641_v45 = vsel %vm39_vm0, %v3620_v30, %v3267_v57  ;;  %v9991_v1 = vld [vmem:[#allocation3 + $0x148] sm:$0xff] }
 0x3e1   :  { %4496 = vrot.lane.b32.xlu1 %v9915_v13, %s6968_s19  ;;  %6466 = vmatmul.mubr.msk.f32.gmra.mrb[84].mxu0 %vm2704_vm9, %v3724_v32 }
 0x3e2   :  { %v9922_v6 = vpop.permute.xlu0 %4132  ;;  %6468 = vmatprep.mubr.msk.f32.mxu0 %vm6965_vm2, %v11024_v56 }
 0x3e3   :  { %v4375_v12 = vpop.permute.xlu1 %4374 }
 0x3e4   :  { %v2919_v22 = vpop.f32.mrb[74].mxu1  ;;  %3210 = vrot.lane.b32.xlu0 %v9804_v18, %s6959_s7  ;;  %v4639_v25 = vsel %vm2634_vm6, %v4620_v5, %v4375_v12  ;;  %v10002_v12 = vld [vmem:[#allocation3 + $0x228] sm:$0xff] }
 0x3e5   :  { %3470 = vrot.lane.b32.xlu1 %v9585_v11, %s6967_s18  ;;  %v6401_v50 = vpop.f32.mrb[75].mxu1 }
 0x3e6   :  { %v9930_v43 = vpop.permute.xlu0 %3070 }
 0x3e7   :  { %v3331_v8 = vpop.permute.xlu1 %3330 }
 0x3e8   :  { %4082 = vrot.lane.b32.xlu0 %v9932_v7, %s6960_s16  ;;  %v3662_v24 = vsel %vm2612_vm5, %v3641_v45, %v3331_v8 }
 0x3e9   :  { %4318 = vrot.lane.b32.xlu1 %v9343_v41, %s6964_s27 }
 0x3ea   :  { %v9938_v15 = vpop.permute.xlu0 %4196 }
 0x3eb   :  { %v4433_v35 = vpop.permute.xlu1 %4432 }
 0x3ec   :  { %3274 = vrot.lane.b32.xlu0 %v9884_v20, %s6963_s24  ;;  %v4658_v28 = vsel %vm2656_vm7, %v4639_v25, %v4433_v35  ;;  %v4545_v25 = vsel %vm265_vm1, %v9716_v61, %v9902_v63 }
 0x3ed   :  { %3534 = vrot.lane.b32.xlu1 %v9680_v0, %s6968_s19 }
 0x3ee   :  { %v9949_v38 = vpop.permute.xlu0 %3134 }
 0x3ef   :  { %v3401_v33 = vpop.permute.xlu1 %3400 }
 0x3f0   :  { %4140 = vrot.lane.b32.xlu0 %v9954_v47, %s6958_s6  ;;  %v3683_v36 = vsel %vm2634_vm6, %v3662_v24, %v3401_v33  ;;  %v10023_v33 = vld [vmem:[#allocation3 + $0x1e8] sm:$0xff] }
 0x3f1   :  { %4382 = vrot.lane.b32.xlu1 %v9835_v55, %s6961_s21 }
 0x3f2   :  { %v9962_v46 = vpop.permute.xlu0 %4254 }
 0x3f3   :  { %v4491_v2 = vpop.permute.xlu1 %4490 }
 0x3f4   :  { %v4677_v23 = vsel %vm2678_vm8, %v4658_v28, %v4491_v2  ;;  %3078 = vrot.lane.b32.xlu0 %v6885_v53, %s6960_s16  ;;  %v4564_v28 = vsel %vm2547_vm3, %v4545_v25, %v9922_v6  ;;  %v10111_v25 = vld [vmem:[%s10990_s1 + $0x68] ss:$0 sm:$0xff] }
 0x3f5   :  { %3338 = vrot.lane.b32.xlu1 %v9967_v27, %s6964_s27  ;;  %6520 = vmatmul.mubr.msk.f32.gmra.mrb[88].mxu1 %vm2704_vm9, %v4677_v23  ;;  %v4583_v23 = vsel %vm2569_vm4, %v4564_v28, %v9938_v15 }
 0x3f6   :  { %v9972_v39 = vpop.permute.xlu0 %3204  ;;  %6522 = vmatprep.mubr.msk.f32.mxu1 %vm6965_vm2, %v11024_v56 }
 0x3f7   :  { %v3465_v49 = vpop.permute.xlu1 %3464 }
 0x3f8   :  { %v3892_v14 = vpop.f32.mrb[72].mxu0  ;;  %4204 = vrot.lane.b32.xlu0 %v9852_v26, %s6959_s7  ;;  %v3704_v19 = vsel %vm2656_vm7, %v3683_v36, %v3465_v49  ;;  %v4602_v49 = vsel %vm39_vm0, %v4583_v23, %v9962_v46  ;;  %v10056_v46 = vld [vmem:[#allocation3 + $0x190] sm:$0xff] }
 0x3f9   :  { %v3893_v17 = vadd.f32 %v9418_v62, %v3892_v14  ;;  %4440 = vrot.lane.b32.xlu1 %v9915_v13, %s6967_s18  ;;  %v6449_v54 = vpop.f32.mrb[73].mxu0  ;;  %v10044_v14 = vld [vmem:[#allocation3 + $0x1a8] sm:$0xff] }
 0x3fa   :  { %v9986_v16 = vpop.permute.xlu0 %4076  ;;  %v10060_v54 = vld [vmem:[#allocation3 + $0x1e0] sm:$0xff] }
 0x3fb   :  { %v3972_v48 = vmax.f32 %v3893_v17, 0.0  ;;  %v4313_v21 = vpop.permute.xlu1 %4312 }
 0x3fc   :  { %3142 = vrot.lane.b32.xlu0 %v9991_v1, %s6958_s6  ;;  %v4621_v61 = vsel %vm2612_vm5, %v4602_v49, %v4313_v21  ;;  %v3579_v21 = vsel %vm265_vm1, %v9461_v31, %v9930_v43 }
 0x3fd   :  { %3993 = vst.msk [vmem:[#allocation4 + $0xd8] sm:$0xff] %vm265_vm1, %v3972_v48  ;;  %3408 = vrot.lane.b32.xlu1 %v9585_v11, %s6961_s21  ;;  %v3600_v36 = vsel %vm2547_vm3, %v3579_v21, %v9949_v38 }
 0x3fe   :  { %v3269_v37 = vpop.permute.xlu0 %3268 }
 0x3ff   :  { %v3529_v32 = vpop.permute.xlu1 %3528 }
 0x400   :  { %v3725_v57 = vsel %vm2678_vm8, %v3704_v19, %v3529_v32  ;;  %4262 = vrot.lane.b32.xlu0 %v9343_v41, %s6963_s24  ;;  %v3621_v32 = vsel %vm2569_vm4, %v3600_v36, %v9972_v39  ;;  %v10142_v36 = vld [vmem:[#allocation3 + $0x238] sm:$0xff] }
 0x401   :  { %4498 = vrot.lane.b32.xlu1 %v10002_v12, %s6968_s19  ;;  %6469 = vmatmul.mubr.msk.f32.gmra.mrb[86].mxu0 %vm2704_vm9, %v3725_v57 }
 0x402   :  { %v10009_v22 = vpop.permute.xlu0 %4134  ;;  %6471 = vmatprep.mubr.msk.f32.mxu0 %vm6965_vm2, %v11024_v56 }
 0x403   :  { %v4377_v50 = vpop.permute.xlu1 %4376 }
 0x404   :  { %v2924_v8 = vpop.f32.mrb[76].mxu1  ;;  %3212 = vrot.lane.b32.xlu0 %v9884_v20, %s6959_s7  ;;  %v4640_v63 = vsel %vm2634_vm6, %v4621_v61, %v4377_v50 }
 0x405   :  { %v2925_v35 = vadd.f32 %v9418_v62, %v2924_v8  ;;  %3472 = vrot.lane.b32.xlu1 %v9680_v0, %s6967_s18  ;;  %v6404_v41 = vpop.f32.mrb[77].mxu1  ;;  %v3642_v8 = vsel %vm39_vm0, %v3621_v32, %v3269_v37 }
 0x406   :  { %v10018_v60 = vpop.permute.xlu0 %3072 }
 0x407   :  { %v2956_v58 = vmax.f32 %v2925_v35, 0.0  ;;  %v3333_v34 = vpop.permute.xlu1 %3332  ;;  %v10084_v35 = vld [vmem:[#allocation3 + $0x230] sm:$0xff] }
 0x408   :  { %4084 = vrot.lane.b32.xlu0 %v9954_v47, %s6960_s16 }
 0x409   :  { %2977 = vst.msk [vmem:[#allocation4 + $0x90] sm:$0xff] %vm265_vm1, %v2956_v58  ;;  %4320 = vrot.lane.b32.xlu1 %v10023_v33, %s6964_s27 }
 0x40a   :  { %v10027_v52 = vpop.permute.xlu0 %4198 }
 0x40b   :  { %v4435_v5 = vpop.permute.xlu1 %4434 }
 0x40c   :  { %3276 = vrot.lane.b32.xlu0 %v9967_v27, %s6963_s24  ;;  %v4659_v15 = vsel %vm2656_vm7, %v4640_v63, %v4435_v5  ;;  %v10104_v5 = vld [vmem:[#allocation3 + $0x1f0] sm:$0xff] }
 0x40d   :  { %3536 = vrot.lane.b32.xlu1 %v9770_v59, %s6968_s19  ;;  %v10118_v63 = vld [vmem:[#allocation3 + $0x1b0] sm:$0xff] }
 0x40e   :  { %v10038_v2 = vpop.permute.xlu0 %3136 }
 0x40f   :  { %v3403_v53 = vpop.permute.xlu1 %3402 }
 0x410   :  { %4142 = vrot.lane.b32.xlu0 %v10044_v14, %s6958_s6 }
 0x411   :  { %4384 = vrot.lane.b32.xlu1 %v9915_v13, %s6961_s21 }
 0x412   :  { %v10052_v6 = vpop.permute.xlu0 %4256 }
 0x413   :  { %v4493_v9 = vpop.permute.xlu1 %4492 }
 0x414   :  { %v4678_v17 = vsel %vm2678_vm8, %v4659_v15, %v4493_v9  ;;  %3340 = vrot.lane.b32.xlu0 %v10056_v46, %s6964_s27 }
 0x415   :  { %4206 = vrot.lane.b32.xlu1 %v10060_v54, %s6959_s7  ;;  %6523 = vmatmul.mubr.msk.f32.gmra.mrb[90].mxu1 %vm2704_vm9, %v4678_v17  ;;  %v4546_v17 = vsel %vm265_vm1, %v9804_v18, %v9986_v16 }
 0x416   :  { %v10065_v40 = vpop.permute.xlu0 %3206  ;;  %6525 = vmatprep.mubr.msk.f32.mxu1 %vm6965_vm2, %v11024_v56 }
 0x417   :  { %v3467_v30 = vpop.permute.xlu1 %3466 }
 0x418   :  { %v3897_v48 = vpop.f32.mrb[74].mxu0  ;;  %4442 = vrot.lane.b32.xlu0 %v10002_v12, %s6967_s18 }
 0x419   :  { %v3898_v45 = vadd.f32 %v9418_v62, %v3897_v48  ;;  %3410 = vrot.lane.b32.xlu1 %v9680_v0, %s6961_s21  ;;  %v6452_v24 = vpop.f32.mrb[75].mxu0  ;;  %v3663_v62 = vsel %vm2612_vm5, %v3642_v8, %v3333_v34 }
 0x41a   :  { %v10079_v19 = vpop.permute.xlu0 %4078  ;;  %v3684_v31 = vsel %vm2634_vm6, %v3663_v62, %v3403_v53 }
 0x41b   :  { %v3973_v57 = vmax.f32 %v3898_v45, 0.0  ;;  %v4315_v50 = vpop.permute.xlu1 %4314  ;;  %v3705_v38 = vsel %vm2656_vm7, %v3684_v31, %v3467_v30  ;;  %v4565_v30 = vsel %vm2547_vm3, %v4546_v17, %v10009_v22 }
 0x41c   :  { %4264 = vrot.lane.b32.xlu0 %v10023_v33, %s6963_s24  ;;  %v4584_v21 = vsel %vm2569_vm4, %v4565_v30, %v10027_v52 }
 0x41d   :  { %3994 = vst.msk [vmem:[#allocation4 + $0xe0] sm:$0xff] %vm265_vm1, %v3973_v57  ;;  %4500 = vrot.lane.b32.xlu1 %v10084_v35, %s6968_s19  ;;  %v4603_v24 = vsel %vm39_vm0, %v4584_v21, %v10052_v6  ;;  %v6895_v6 = vld [vmem:[#allocation3 + $0x1f8] sm:$0xff] }
 0x41e   :  { %v3271_v43 = vpop.permute.xlu0 %3270  ;;  %v4622_v18 = vsel %vm2612_vm5, %v4603_v24, %v4315_v50  ;;  %v10197_v24 = vld [vmem:[#allocation3 + $0x1b8] sm:$0xff] }
 0x41f   :  { %v3531_v39 = vpop.permute.xlu1 %3530 }
 0x420   :  { %v3726_v37 = vsel %vm2678_vm8, %v3705_v38, %v3531_v39  ;;  %3474 = vrot.lane.b32.xlu0 %v9770_v59, %s6967_s18  ;;  %v3580_v39 = vsel %vm265_vm1, %v9546_v44, %v10018_v60 }
 0x421   :  { %4086 = vrot.lane.b32.xlu1 %v10044_v14, %s6960_s16  ;;  %6472 = vmatmul.mubr.msk.f32.gmra.mrb[88].mxu0 %vm2704_vm9, %v3726_v37  ;;  %v3601_v37 = vsel %vm2547_vm3, %v3580_v39, %v10038_v2 }
 0x422   :  { %v10100_v41 = vpop.permute.xlu0 %4136  ;;  %6474 = vmatprep.mubr.msk.f32.mxu0 %vm6965_vm2, %v11024_v56 }
 0x423   :  { %v4379_v58 = vpop.permute.xlu1 %4378 }
 0x424   :  { %v2929_v34 = vpop.f32.mrb[78].mxu1  ;;  %4322 = vrot.lane.b32.xlu0 %v10104_v5, %s6964_s27  ;;  %v4641_v16 = vsel %vm2634_vm6, %v4622_v18, %v4379_v58 }
 0x425   :  { %v2930_v28 = vadd.f32 %v10111_v25, %v2929_v34  ;;  %3538 = vrot.lane.b32.xlu1 %v9852_v26, %s6968_s19  ;;  %v6407_v23 = vpop.f32.mrb[79].mxu1 }
 0x426   :  { %v10116_v53 = vpop.permute.xlu0 %3074 }
 0x427   :  { %v2957_v49 = vmax.f32 %v2930_v28, 0.0  ;;  %v3335_v61 = vpop.permute.xlu1 %3334  ;;  %v3622_v28 = vsel %vm2569_vm4, %v3601_v37, %v10065_v40  ;;  %v6897_v37 = vld [vmem:[#allocation3 + $0x150] sm:$0xff] }
 0x428   :  { %4144 = vrot.lane.b32.xlu0 %v10118_v63, %s6958_s6 }
 0x429   :  { %2978 = vst.msk [vmem:[#allocation4 + $0x98] sm:$0xff] %vm265_vm1, %v2957_v49  ;;  %4386 = vrot.lane.b32.xlu1 %v10002_v12, %s6961_s21  ;;  %v3643_v49 = vsel %vm39_vm0, %v3622_v28, %v3271_v43  ;;  %v10186_v43 = vld [vmem:[#allocation3 + $0x240] sm:$0xff]  ;;  %v10232_v28 = vld [vmem:[#allocation3 + $0x248] sm:$0xff] }
 0x42a   :  { %v10125_v15 = vpop.permute.xlu0 %4200 }
 0x42b   :  { %v4437_v9 = vpop.permute.xlu1 %4436 }
 0x42c   :  { %4208 = vrot.lane.b32.xlu0 %v10023_v33, %s6959_s7  ;;  %v4660_v32 = vsel %vm2656_vm7, %v4641_v16, %v4437_v9 }
 0x42d   :  { %4444 = vrot.lane.b32.xlu1 %v10084_v35, %s6967_s18 }
 0x42e   :  { %v10136_v48 = vpop.permute.xlu0 %3138 }
 0x42f   :  { %v3405_v45 = vpop.permute.xlu1 %3404 }
 0x430   :  { %4266 = vrot.lane.b32.xlu0 %v10104_v5, %s6963_s24 }
 0x431   :  { %4502 = vrot.lane.b32.xlu1 %v10142_v36, %s6968_s19 }
 0x432   :  { %v4259_v22 = vpop.permute.xlu0 %4258 }
 0x433   :  { %v4495_v52 = vpop.permute.xlu1 %4494 }
 0x434   :  { %v4679_v57 = vsel %vm2678_vm8, %v4660_v32, %v4495_v52  ;;  %4088 = vrot.lane.b32.xlu0 %v10118_v63, %s6960_s16 }
 0x435   :  { %4324 = vrot.lane.b32.xlu1 %v6895_v6, %s6964_s27  ;;  %6526 = vmatmul.mubr.msk.f32.gmra.mrb[92].mxu1 %vm2704_vm9, %v4679_v57 }
 0x436   :  { %v10156_v50 = vpop.permute.xlu0 %3208  ;;  %6528 = vmatprep.mubr.msk.f32.mxu1 %vm6965_vm2, %v11024_v56 }
 0x437   :  { %v3469_v8 = vpop.permute.xlu1 %3468  ;;  %v3902_v62 = vpop.f32.mrb[76].mxu0 }
 0x438   :  { %v3903_v31 = vadd.f32 %v10111_v25, %v3902_v62  ;;  %v6455_v38 = vpop.f32.mrb[77].mxu0  ;;  %4146 = vrot.lane.b32.xlu0 %v9497_v29, %s6958_s6  ;;  %v3664_v29 = vsel %vm2612_vm5, %v3643_v49, %v3335_v61 }
 0x439   :  { %4388 = vrot.lane.b32.xlu1 %v10084_v35, %s6961_s21  ;;  %v3685_v44 = vsel %vm2634_vm6, %v3664_v29, %v3405_v45 }
 0x43a   :  { %v3974_v58 = vmax.f32 %v3903_v31, 0.0  ;;  %v10170_v34 = vpop.permute.xlu0 %4080  ;;  %v3706_v2 = vsel %vm2656_vm7, %v3685_v44, %v3469_v8 }
 0x43b   :  { %v4317_v23 = vpop.permute.xlu1 %4316 }
 0x43c   :  { %3995 = vst.msk [vmem:[#allocation4 + $0xe8] sm:$0xff] %vm265_vm1, %v3974_v58  ;;  %4210 = vrot.lane.b32.xlu0 %v10104_v5, %s6959_s7 }
 0x43d   :  { %4446 = vrot.lane.b32.xlu1 %v10142_v36, %s6967_s18 }
 0x43e   :  { %v10182_v60 = vpop.permute.xlu0 %3272 }
 0x43f   :  { %v3533_v40 = vpop.permute.xlu1 %3532 }
 0x440   :  { %v3727_v9 = vsel %vm2678_vm8, %v3706_v2, %v3533_v40  ;;  %4268 = vrot.lane.b32.xlu0 %v6895_v6, %s6963_s24  ;;  %v3581_v40 = vsel %vm265_vm1, %v9648_v3, %v10116_v53 }
 0x441   :  { %4504 = vrot.lane.b32.xlu1 %v10186_v43, %s6968_s19  ;;  %6475 = vmatmul.mubr.msk.f32.gmra.mrb[90].mxu0 %vm2704_vm9, %v3727_v9  ;;  %v3602_v9 = vsel %vm2547_vm3, %v3581_v40, %v10136_v48 }
 0x442   :  { %v10192_v61 = vpop.permute.xlu0 %4138  ;;  %6477 = vmatprep.mubr.msk.f32.mxu0 %vm6965_vm2, %v11024_v56 }
 0x443   :  { %v4381_v17 = vpop.permute.xlu1 %4380  ;;  %v2934_v30 = vpop.f32.mrb[80].mxu1 }
 0x444   :  { %v2935_v21 = vadd.f32 %v10111_v25, %v2934_v30  ;;  %v6410_v45 = vpop.f32.mrb[81].mxu1  ;;  %4090 = vrot.lane.b32.xlu0 %v10197_v24, %s6960_s16  ;;  %v3623_v30 = vsel %vm2569_vm4, %v3602_v9, %v10156_v50 }
 0x445   :  { %4326 = vrot.lane.b32.xlu1 %v9560_v10, %s6964_s27  ;;  %v4547_v10 = vsel %vm265_vm1, %v9884_v20, %v10079_v19  ;;  %v3644_v45 = vsel %vm39_vm0, %v3623_v30, %v10182_v60 }
 0x446   :  { %v2958_v18 = vmax.f32 %v2935_v21, 0.0  ;;  %v10203_v16 = vpop.permute.xlu0 %3076  ;;  %v4566_v8 = vsel %vm2547_vm3, %v4547_v10, %v10100_v41 }
 0x447   :  { %v3337_v32 = vpop.permute.xlu1 %3336  ;;  %v4585_v31 = vsel %vm2569_vm4, %v4566_v8, %v10125_v15 }
 0x448   :  { %2979 = vst.msk [vmem:[#allocation4 + $0xa0] sm:$0xff] %vm265_vm1, %v2958_v18  ;;  %4148 = vrot.lane.b32.xlu0 %v9585_v11, %s6958_s6  ;;  %v4604_v39 = vsel %vm39_vm0, %v4585_v31, %v4259_v22  ;;  %v6898_v22 = vld [vmem:[#allocation3 + $0x200] sm:$0xff]  ;;  %v3665_v3 = vsel %vm2612_vm5, %v3644_v45, %v3337_v32 }
 0x449   :  { %4390 = vrot.lane.b32.xlu1 %v10142_v36, %s6961_s21 }
 0x44a   :  { %v10210_v52 = vpop.permute.xlu0 %4202 }
 0x44b   :  { %v4439_v57 = vpop.permute.xlu1 %4438 }
 0x44c   :  { %3080 = vrot.lane.b32.xlu0 %v9991_v1, %s6960_s16  ;;  %v4623_v1 = vsel %vm2612_vm5, %v4604_v39, %v4317_v23 }
 0x44d   :  { %4212 = vrot.lane.b32.xlu1 %v6895_v6, %s6959_s7  ;;  %v4642_v20 = vsel %vm2634_vm6, %v4623_v1, %v4381_v17 }
 0x44e   :  { %v10220_v62 = vpop.permute.xlu0 %3140  ;;  %v4661_v41 = vsel %vm2656_vm7, %v4642_v20, %v4439_v57  ;;  %v4548_v20 = vsel %vm265_vm1, %v9967_v27, %v10170_v34 }
 0x44f   :  { %v3407_v38 = vpop.permute.xlu1 %3406 }
 0x450   :  { %4448 = vrot.lane.b32.xlu0 %v10186_v43, %s6967_s18 }
 0x451   :  { %3144 = vrot.lane.b32.xlu1 %v6897_v37, %s6958_s6 }
 0x452   :  { %v4261_v19 = vpop.permute.xlu0 %4260 }
 0x453   :  { %v4497_v6 = vpop.permute.xlu1 %4496 }
 0x454   :  { %v4680_v58 = vsel %vm2678_vm8, %v4661_v41, %v4497_v6  ;;  %v3907_v15 = vpop.f32.mrb[78].mxu0  ;;  %4270 = vrot.lane.b32.xlu0 %v6898_v22, %s6963_s24  ;;  %v4567_v41 = vsel %vm2547_vm3, %v4548_v20, %v10192_v61 }
 0x455   :  { %v3908_v49 = vadd.f32 %v10111_v25, %v3907_v15  ;;  %4506 = vrot.lane.b32.xlu1 %v10232_v28, %s6968_s19  ;;  %v6458_v23 = vpop.f32.mrb[79].mxu0  ;;  %6529 = vmatmul.mubr.msk.f32.gmra.mrb[94].mxu1 %vm2704_vm9, %v4680_v58  ;;  %v4586_v58 = vsel %vm2569_vm4, %v4567_v41, %v10210_v52 }
 0x456   :  { %v10239_v29 = vpop.permute.xlu0 %3210  ;;  %6531 = vmatprep.mubr.msk.f32.mxu1 %vm6965_vm2, %v11024_v56 }
 0x457   :  { %v3975_v44 = vmax.f32 %v3908_v49, 0.0  ;;  %v3471_v2 = vpop.permute.xlu1 %3470  ;;  %v10301_v49 = vld [vmem:[#allocation3 + $0x250] sm:$0xff] }
 0x458   :  { %3214 = vrot.lane.b32.xlu0 %v9967_v27, %s6959_s7 }
 0x459   :  { %3996 = vst.msk [vmem:[#allocation4 + $0xf0] sm:$0xff] %vm265_vm1, %v3975_v44  ;;  %4092 = vrot.lane.b32.xlu1 %v9585_v11, %s6960_s16  ;;  %v3686_v11 = vsel %vm2634_vm6, %v3665_v3, %v3407_v38 }
 0x45a   :  { %v10253_v17 = vpop.permute.xlu0 %4082  ;;  %v3707_v48 = vsel %vm2656_vm7, %v3686_v11, %v3471_v2 }
 0x45b   :  { %v4319_v21 = vpop.permute.xlu1 %4318 }
 0x45c   :  { %4328 = vrot.lane.b32.xlu0 %v9661_v51, %s6964_s27 }
 0x45d   :  { %3278 = vrot.lane.b32.xlu1 %v10056_v46, %s6963_s24 }
 0x45e   :  { %v3275_v53 = vpop.permute.xlu0 %3274 }
 0x45f   :  { %v3535_v18 = vpop.permute.xlu1 %3534 }
 0x460   :  { %v3728_v50 = vsel %vm2678_vm8, %v3707_v48, %v3535_v18  ;;  %4150 = vrot.lane.b32.xlu0 %v9680_v0, %s6958_s6  ;;  %v3019_v18 = vld [vmem:[#allocation3 + $0x1e0] sm:$0xff] }
 0x461   :  { %4392 = vrot.lane.b32.xlu1 %v10186_v43, %s6961_s21  ;;  %6478 = vmatmul.mubr.msk.f32.gmra.mrb[92].mxu0 %vm2704_vm9, %v3728_v50 }
 0x462   :  { %v10272_v60 = vpop.permute.xlu0 %4140  ;;  %6480 = vmatprep.mubr.msk.f32.mxu0 %vm6965_vm2, %v11024_v56 }
 0x463   :  { %v4383_v32 = vpop.permute.xlu1 %4382 }
 0x464   :  { %3082 = vrot.lane.b32.xlu0 %v6897_v37, %s6960_s16  ;;  %v6899_v37 = vld [vmem:[#allocation3 + $0x158] sm:$0xff] }
 0x465   :  { %3342 = vrot.lane.b32.xlu1 %v9932_v7, %s6964_s27 }
 0x466   :  { %v10279_v57 = vpop.permute.xlu0 %3078 }
 0x467   :  { %v3339_v10 = vpop.permute.xlu1 %3338 }
 0x468   :  { %v4816_v8 = vpop.f32.mrb[82].mxu1  ;;  %4214 = vrot.lane.b32.xlu0 %v6898_v22, %s6959_s7  ;;  %v4605_v22 = vsel %vm39_vm0, %v4586_v58, %v4261_v19 }
 0x469   :  { %v4817_v43 = vadd.f32 %v10111_v25, %v4816_v8  ;;  %4450 = vrot.lane.b32.xlu1 %v10232_v28, %s6967_s18  ;;  %v6512_v31 = vpop.f32.mrb[83].mxu1  ;;  %v4624_v27 = vsel %vm2612_vm5, %v4605_v22, %v4319_v21  ;;  %v3582_v21 = vsel %vm265_vm1, %v9741_v4, %v10203_v16  ;;  %v10363_v22 = vld [vmem:[#allocation3 + $0x258] sm:$0xff] }
 0x46a   :  { %v10285_v38 = vpop.permute.xlu0 %4204  ;;  %v4643_v34 = vsel %vm2634_vm6, %v4624_v27, %v4383_v32  ;;  %v3603_v45 = vsel %vm2547_vm3, %v3582_v21, %v10220_v62 }
 0x46b   :  { %v4910_v39 = vmax.f32 %v4817_v43, 0.0  ;;  %v4441_v1 = vpop.permute.xlu1 %4440  ;;  %v3624_v11 = vsel %vm2569_vm4, %v3603_v45, %v10239_v29 }
 0x46c   :  { %3146 = vrot.lane.b32.xlu0 %v6899_v37, %s6958_s6  ;;  %v4662_v23 = vsel %vm2656_vm7, %v4643_v34, %v4441_v1 }
 0x46d   :  { %4929 = vst.msk [vmem:[#allocation4 + $0x150] sm:$0xff] %vm265_vm1, %v4910_v39  ;;  %3412 = vrot.lane.b32.xlu1 %v9770_v59, %s6961_s21 }
 0x46e   :  { %v10296_v6 = vpop.permute.xlu0 %3142 }
 0x46f   :  { %v3409_v15 = vpop.permute.xlu1 %3408 }
 0x470   :  { %4272 = vrot.lane.b32.xlu0 %v9661_v51, %s6963_s24 }
 0x471   :  { %4508 = vrot.lane.b32.xlu1 %v10301_v49, %s6968_s19 }
 0x472   :  { %v4263_v61 = vpop.permute.xlu0 %4262 }
 0x473   :  { %v4499_v44 = vpop.permute.xlu1 %4498 }
 0x474   :  { %v4681_v52 = vsel %vm2678_vm8, %v4662_v23, %v4499_v44  ;;  %v3912_v2 = vpop.f32.mrb[80].mxu0  ;;  %3216 = vrot.lane.b32.xlu0 %v10056_v46, %s6959_s7 }
 0x475   :  { %v3913_v19 = vadd.f32 %v10111_v25, %v3912_v2  ;;  %3476 = vrot.lane.b32.xlu1 %v9852_v26, %s6967_s18  ;;  %v6461_v51 = vpop.f32.mrb[81].mxu0  ;;  %6532 = vmatmul.mubr.msk.f32.gmra.mrb[96].mxu1 %vm2704_vm9, %v4681_v52 }
 0x476   :  { %v3213_v40 = vpop.permute.xlu0 %3212  ;;  %6534 = vmatprep.mubr.msk.f32.mxu1 %vm6965_vm2, %v11024_v56 }
 0x477   :  { %v3976_v9 = vmax.f32 %v3913_v19, 0.0  ;;  %v3473_v30 = vpop.permute.xlu1 %3472 }
 0x478   :  { %4094 = vrot.lane.b32.xlu0 %v9680_v0, %s6960_s16  ;;  %v3645_v0 = vsel %vm39_vm0, %v3624_v11, %v3275_v53 }
 0x479   :  { %3997 = vst.msk [vmem:[#allocation4 + $0xf8] sm:$0xff] %vm265_vm1, %v3976_v9  ;;  %4330 = vrot.lane.b32.xlu1 %v9752_v42, %s6964_s27  ;;  %v3666_v4 = vsel %vm2612_vm5, %v3645_v0, %v3339_v10  ;;  %v6900_v10 = vld [vmem:[#allocation3 + $0x208] sm:$0xff] }
 0x47a   :  { %v10329_v3 = vpop.permute.xlu0 %4084  ;;  %v3687_v16 = vsel %vm2634_vm6, %v3666_v4, %v3409_v15 }
 0x47b   :  { %v4321_v48 = vpop.permute.xlu1 %4320  ;;  %v3708_v62 = vsel %vm2656_vm7, %v3687_v16, %v3473_v30  ;;  %v3020_v30 = vld [vmem:[#allocation3 + $0x1e8] sm:$0xff]  ;;  %v4550_v16 = vsel %vm265_vm1, %v9932_v7, %v10329_v3 }
 0x47c   :  { %3280 = vrot.lane.b32.xlu0 %v9932_v7, %s6963_s24 }
 0x47d   :  { %3540 = vrot.lane.b32.xlu1 %v3019_v18, %s6968_s19 }
 0x47e   :  { %v3277_v50 = vpop.permute.xlu0 %3276 }
 0x47f   :  { %v3537_v32 = vpop.permute.xlu1 %3536 }
 0x480   :  { %v3729_v8 = vsel %vm2678_vm8, %v3708_v62, %v3537_v32  ;;  %4152 = vrot.lane.b32.xlu0 %v9770_v59, %s6958_s6 }
 0x481   :  { %4394 = vrot.lane.b32.xlu1 %v10232_v28, %s6961_s21  ;;  %6481 = vmatmul.mubr.msk.f32.gmra.mrb[94].mxu0 %vm2704_vm9, %v3729_v8  ;;  %v4549_v28 = vsel %vm265_vm1, %v10056_v46, %v10253_v17 }
 0x482   :  { %v4143_v29 = vpop.permute.xlu0 %4142  ;;  %6483 = vmatprep.mubr.msk.f32.mxu0 %vm6965_vm2, %v11024_v56  ;;  %v4568_v37 = vsel %vm2547_vm3, %v4549_v28, %v10272_v60 }
 0x483   :  { %v4385_v53 = vpop.permute.xlu1 %4384  ;;  %v4587_v41 = vsel %vm2569_vm4, %v4568_v37, %v10285_v38 }
 0x484   :  { %3344 = vrot.lane.b32.xlu0 %v9954_v47, %s6964_s27  ;;  %v4606_v15 = vsel %vm39_vm0, %v4587_v41, %v4263_v61  ;;  %v6901_v61 = vld [vmem:[#allocation3 + $0x138] sm:$0xff] }
 0x485   :  { %4216 = vrot.lane.b32.xlu1 %v6900_v10, %s6959_s7  ;;  %v4625_v46 = vsel %vm2612_vm5, %v4606_v15, %v4321_v48  ;;  %v3583_v23 = vsel %vm265_vm1, %v6901_v61, %v10279_v57 }
 0x486   :  { %v3341_v43 = vpop.permute.xlu0 %3340  ;;  %v4644_v17 = vsel %vm2634_vm6, %v4625_v46, %v4385_v53  ;;  %v3604_v44 = vsel %vm2547_vm3, %v3583_v23, %v10296_v6  ;;  %v4042_v53 = vld [vmem:[#allocation3 + $0x260] sm:$0xff] }
 0x487   :  { %v4207_v31 = vpop.permute.xlu1 %4206  ;;  %v3625_v2 = vsel %vm2569_vm4, %v3604_v44, %v3213_v40 }
 0x488   :  { %v4821_v39 = vpop.f32.mrb[84].mxu1  ;;  %4452 = vrot.lane.b32.xlu0 %v10301_v49, %s6967_s18  ;;  %v3646_v51 = vsel %vm39_vm0, %v3625_v2, %v3277_v50  ;;  %v4569_v50 = vsel %vm2547_vm3, %v4550_v16, %v4143_v29 }
 0x489   :  { %3414 = vrot.lane.b32.xlu1 %v9852_v26, %s6961_s21  ;;  %v6515_v1 = vpop.f32.mrb[85].mxu1  ;;  %v4588_v62 = vsel %vm2569_vm4, %v4569_v50, %v4207_v31  ;;  %v4045_v50 = vld [vmem:[#allocation3 + $0x278] sm:$0xff] }
 0x48a   :  { %v4443_v20 = vpop.permute.xlu0 %4442 }
 0x48b   :  { %v3411_v58 = vpop.permute.xlu1 %3410  ;;  %v4663_v27 = vsel %vm2656_vm7, %v4644_v17, %v4443_v20 }
 0x48c   :  { %4274 = vrot.lane.b32.xlu0 %v9752_v42, %s6963_s24 }
 0x48d   :  { %4510 = vrot.lane.b32.xlu1 %v10363_v22, %s6968_s19 }
 0x48e   :  { %v4265_v60 = vpop.permute.xlu0 %4264 }
 0x48f   :  { %v4501_v34 = vpop.permute.xlu1 %4500  ;;  %v4607_v8 = vsel %vm39_vm0, %v4588_v62, %v4265_v60 }
 0x490   :  { %v4682_v38 = vsel %vm2678_vm8, %v4663_v27, %v4501_v34  ;;  %3478 = vrot.lane.b32.xlu0 %v3019_v18, %s6967_s18 }
 0x491   :  { %4096 = vrot.lane.b32.xlu1 %v9770_v59, %s6960_s16  ;;  %6535 = vmatmul.mubr.msk.f32.gmra.mrb[98].mxu1 %vm2704_vm9, %v4682_v38  ;;  %v3667_v59 = vsel %vm2612_vm5, %v3646_v51, %v3341_v43 }
 0x492   :  { %v3475_v52 = vpop.permute.xlu0 %3474  ;;  %6537 = vmatprep.mubr.msk.f32.mxu1 %vm6965_vm2, %v11024_v56  ;;  %v3688_v21 = vsel %vm2634_vm6, %v3667_v59, %v3411_v58  ;;  %v4044_v59 = vld [vmem:[#allocation3 + $0x270] sm:$0xff] }
 0x493   :  { %v4087_v19 = vpop.permute.xlu1 %4086  ;;  %v3709_v40 = vsel %vm2656_vm7, %v3688_v21, %v3475_v52 }
 0x494   :  { %v3917_v9 = vpop.f32.mrb[82].mxu0  ;;  %4332 = vrot.lane.b32.xlu0 %v9835_v55, %s6964_s27  ;;  %v4551_v20 = vsel %vm265_vm1, %v9954_v47, %v4087_v19 }
 0x495   :  { %v3918_v57 = vadd.f32 %v10111_v25, %v3917_v9  ;;  %3542 = vrot.lane.b32.xlu1 %v3020_v30, %s6968_s19  ;;  %v6464_v6 = vpop.f32.mrb[83].mxu0 }
 0x496   :  { %v4323_v45 = vpop.permute.xlu0 %4322 }
 0x497   :  { %v3977_v11 = vmax.f32 %v3918_v57, 0.0  ;;  %v3539_v48 = vpop.permute.xlu1 %3538 }
 0x498   :  { %v3730_v0 = vsel %vm2678_vm8, %v3709_v40, %v3539_v48  ;;  %4154 = vrot.lane.b32.xlu0 %v9852_v26, %s6958_s6 }
 0x499   :  { %3998 = vst.msk [vmem:[#allocation4 + $0x100] sm:$0xff] %vm265_vm1, %v3977_v11  ;;  %4396 = vrot.lane.b32.xlu1 %v10301_v49, %s6961_s21  ;;  %6484 = vmatmul.mubr.msk.f32.gmra.mrb[96].mxu0 %vm2704_vm9, %v3730_v0 }
 0x49a   :  { %v4145_v18 = vpop.permute.xlu0 %4144  ;;  %6486 = vmatprep.mubr.msk.f32.mxu0 %vm6965_vm2, %v11024_v56 }
 0x49b   :  { %v4387_v4 = vpop.permute.xlu1 %4386  ;;  %v4570_v41 = vsel %vm2547_vm3, %v4551_v20, %v4145_v18  ;;  %v5017_v20 = vld [vmem:[#allocation4 + $0xb8] sm:$0xff] }
 0x49c   :  { %4218 = vrot.lane.b32.xlu0 %v9752_v42, %s6959_s7  ;;  %v4626_v42 = vsel %vm2612_vm5, %v4607_v8, %v4323_v45 }
 0x49d   :  { %4454 = vrot.lane.b32.xlu1 %v10363_v22, %s6967_s18  ;;  %v4645_v7 = vsel %vm2634_vm6, %v4626_v42, %v4387_v4 }
 0x49e   :  { %v4209_v49 = vpop.permute.xlu0 %4208 }
 0x49f   :  { %v4445_v32 = vpop.permute.xlu1 %4444  ;;  %v4589_v15 = vsel %vm2569_vm4, %v4570_v41, %v4209_v49  ;;  %v5018_v41 = vld [vmem:[#allocation4 + $0xc0] sm:$0xff] }
 0x4a0   :  { %4276 = vrot.lane.b32.xlu0 %v9835_v55, %s6963_s24  ;;  %v4664_v10 = vsel %vm2656_vm7, %v4645_v7, %v4445_v32 }
 0x4a1   :  { %4512 = vrot.lane.b32.xlu1 %v4042_v53, %s6968_s19 }
 0x4a2   :  { %v4267_v3 = vpop.permute.xlu0 %4266 }
 0x4a3   :  { %v4503_v29 = vpop.permute.xlu1 %4502  ;;  %v4608_v17 = vsel %vm39_vm0, %v4589_v15, %v4267_v3  ;;  %v5001_v15 = vld [vmem:[#allocation4 + $0x18] sm:$0xff] }
 0x4a4   :  { %v4683_v43 = vsel %vm2678_vm8, %v4664_v10, %v4503_v29  ;;  %4098 = vrot.lane.b32.xlu0 %v9852_v26, %s6960_s16 }
 0x4a5   :  { %4334 = vrot.lane.b32.xlu1 %v9915_v13, %s6964_s27  ;;  %6538 = vmatmul.mubr.msk.f32.gmra.mrb[100].mxu1 %vm2704_vm9, %v4683_v43 }
 0x4a6   :  { %v4089_v31 = vpop.permute.xlu0 %4088  ;;  %6540 = vmatprep.mubr.msk.f32.mxu1 %vm6965_vm2, %v11024_v56 }
 0x4a7   :  { %v4325_v39 = vpop.permute.xlu1 %4324  ;;  %v4552_v57 = vsel %vm265_vm1, %v10044_v14, %v4089_v31  ;;  %v5015_v31 = vld [vmem:[#allocation4 + $0xa8] sm:$0xff] }
 0x4a8   :  { %v4826_v28 = vpop.f32.mrb[86].mxu1  ;;  %4156 = vrot.lane.b32.xlu0 %v10060_v54, %s6958_s6  ;;  %v4627_v60 = vsel %vm2612_vm5, %v4608_v17, %v4325_v39  ;;  %v4046_v39 = vld [vmem:[#allocation3 + $0x280] sm:$0xff] }
 0x4a9   :  { %4398 = vrot.lane.b32.xlu1 %v10363_v22, %s6961_s21  ;;  %v6518_v1 = vpop.f32.mrb[87].mxu1  ;;  %v4043_v22 = vld [vmem:[#allocation3 + $0x268] sm:$0xff] }
 0x4aa   :  { %v4147_v37 = vpop.permute.xlu0 %4146  ;;  %v5000_v1 = vld [vmem:[#allocation4 + $0x10] sm:$0xff] }
 0x4ab   :  { %v4389_v26 = vpop.permute.xlu1 %4388  ;;  %v4571_v6 = vsel %vm2547_vm3, %v4552_v57, %v4147_v37 }
 0x4ac   :  { %4220 = vrot.lane.b32.xlu0 %v9835_v55, %s6959_s7  ;;  %v4646_v55 = vsel %vm2634_vm6, %v4627_v60, %v4389_v26  ;;  %v6769_v60 = vpack.i.bf16 %v5001_v15, %v5017_v20 }
 0x4ad   :  { %4456 = vrot.lane.b32.xlu1 %v4042_v53, %s6967_s18 }
 0x4ae   :  { %v4211_v58 = vpop.permute.xlu0 %4210 }
 0x4af   :  { %v4447_v46 = vpop.permute.xlu1 %4446 }
 0x4b0   :  { %4278 = vrot.lane.b32.xlu0 %v9915_v13, %s6963_s24  ;;  %v4665_v27 = vsel %vm2656_vm7, %v4646_v55, %v4447_v46 }
 0x4b1   :  { %4514 = vrot.lane.b32.xlu1 %v4043_v22, %s6968_s19 }
 0x4b2   :  { %v4269_v47 = vpop.permute.xlu0 %4268 }
 0x4b3   :  { %v4505_v34 = vpop.permute.xlu1 %4504 }
 0x4b4   :  { %v4684_v38 = vsel %vm2678_vm8, %v4665_v27, %v4505_v34  ;;  %v3922_v61 = vpop.f32.mrb[84].mxu0  ;;  %4100 = vrot.lane.b32.xlu0 %v10060_v54, %s6960_s16  ;;  %v5019_v34 = vld [vmem:[#allocation4 + $0xd8] sm:$0xff] }
 0x4b5   :  { %v3923_v23 = vadd.f32 %v10111_v25, %v3922_v61  ;;  %4336 = vrot.lane.b32.xlu1 %v10002_v12, %s6964_s27  ;;  %v6467_v44 = vpop.f32.mrb[85].mxu0  ;;  %6541 = vmatmul.mubr.msk.f32.gmra.mrb[102].mxu1 %vm2704_vm9, %v4684_v38 }
 0x4b6   :  { %v10450_v52 = vpop.permute.xlu0 %4090  ;;  %6543 = vmatprep.mubr.msk.f32.mxu1 %vm6965_vm2, %v11024_v56 }
 0x4b7   :  { %v3978_v2 = vmax.f32 %v3923_v23, 0.0  ;;  %v4327_v19 = vpop.permute.xlu1 %4326  ;;  %v5003_v23 = vld [vmem:[#allocation4 + $0x28] sm:$0xff] }
 0x4b8   :  { %4158 = vrot.lane.b32.xlu0 %v10023_v33, %s6958_s6 }
 0x4b9   :  { %3999 = vst.msk [vmem:[#allocation4 + $0x108] sm:$0xff] %vm265_vm1, %v3978_v2  ;;  %4400 = vrot.lane.b32.xlu1 %v4042_v53, %s6961_s21  ;;  %v5004_v2 = vld [vmem:[#allocation4 + $0x30] sm:$0xff] }
 0x4ba   :  { %v10458_v54 = vpop.permute.xlu0 %4148 }
 0x4bb   :  { %v4391_v51 = vpop.permute.xlu1 %4390 }
 0x4bc   :  { %4222 = vrot.lane.b32.xlu0 %v9915_v13, %s6959_s7  ;;  %v4590_v13 = vsel %vm2569_vm4, %v4571_v6, %v4211_v58  ;;  %v4553_v58 = vsel %vm265_vm1, %v10118_v63, %v10450_v52  ;;  %v5020_v63 = vld [vmem:[#allocation4 + $0xe0] sm:$0xff]  ;;  %v5022_v6 = vld [vmem:[#allocation4 + $0xf0] sm:$0xff] }
 0x4bd   :  { %4458 = vrot.lane.b32.xlu1 %v4043_v22, %s6967_s18  ;;  %v4609_v40 = vsel %vm39_vm0, %v4590_v13, %v4269_v47  ;;  %v4572_v46 = vsel %vm2547_vm3, %v4553_v58, %v10458_v54 }
 0x4be   :  { %v10463_v9 = vpop.permute.xlu0 %3080  ;;  %v4628_v11 = vsel %vm2612_vm5, %v4609_v40, %v4327_v19  ;;  %v6779_v19 = vpack.i.bf16 %v5003_v23, %v5019_v34  ;;  %v5006_v40 = vld [vmem:[#allocation4 + $0x50] sm:$0xff] }
 0x4bf   :  { %v10465_v30 = vpop.permute.xlu1 %4212  ;;  %v4647_v14 = vsel %vm2634_vm6, %v4628_v11, %v4391_v51 }
 0x4c0   :  { %4280 = vrot.lane.b32.xlu0 %v10002_v12, %s6963_s24  ;;  %v4591_v55 = vsel %vm2569_vm4, %v4572_v46, %v10465_v30  ;;  %v6784_v30 = vpack.i.bf16 %v5004_v2, %v5020_v63 }
 0x4c1   :  { %4516 = vrot.lane.b32.xlu1 %v4044_v59, %s6968_s19 }
 0x4c2   :  { %v4449_v21 = vpop.permute.xlu0 %4448 }
 0x4c3   :  { %v10474_v45 = vpop.permute.xlu1 %3144  ;;  %v4666_v0 = vsel %vm2656_vm7, %v4647_v14, %v4449_v21  ;;  %v5005_v21 = vld [vmem:[#allocation4 + $0x48] sm:$0xff] }
 0x4c4   :  { %4338 = vrot.lane.b32.xlu0 %v10084_v35, %s6964_s27 }
 0x4c5   :  { %4402 = vrot.lane.b32.xlu1 %v4043_v22, %s6961_s21  ;;  %v5002_v22 = vld [vmem:[#allocation4 + $0x20] sm:$0xff] }
 0x4c6   :  { %v4271_v48 = vpop.permute.xlu0 %4270  ;;  %v6774_v27 = vpack.i.bf16 %v5002_v22, %v5018_v41 }
 0x4c7   :  { %v4507_v18 = vpop.permute.xlu1 %4506  ;;  %v4610_v38 = vsel %vm39_vm0, %v4591_v55, %v4271_v48  ;;  %v6794_v48 = vpack.i.bf16 %v5006_v40, %v5022_v6 }
 0x4c8   :  { %v4685_v4 = vsel %vm2678_vm8, %v4666_v0, %v4507_v18  ;;  %v4831_v16 = vpop.f32.mrb[88].mxu1  ;;  %4460 = vrot.lane.b32.xlu0 %v4044_v59, %s6967_s18  ;;  %v5023_v0 = vld [vmem:[#allocation4 + $0xf8] sm:$0xff] }
 0x4c9   :  { %v4832_v49 = vadd.f32 %v10111_v25, %v4831_v16  ;;  %4518 = vrot.lane.b32.xlu1 %v4045_v50, %s6968_s19  ;;  %v6521_v62 = vpop.f32.mrb[89].mxu1  ;;  %6544 = vmatmul.mubr.msk.f32.gmra.mrb[104].mxu1 %vm2704_vm9, %v4685_v4  ;;  %v5024_v4 = vld [vmem:[#allocation4 + $0x100] sm:$0xff]  ;;  %v6902_v16 = vld [vmem:[#allocation3 + $0x140] sm:$0xff] }
 0x4ca   :  { %v10488_v32 = vpop.permute.xlu0 %3214  ;;  %6546 = vmatprep.mubr.msk.f32.mxu1 %vm6965_vm2, %v11024_v56 }
 0x4cb   :  { %v4913_v8 = vmax.f32 %v4832_v49, 0.0  ;;  %v10492_v53 = vpop.permute.xlu1 %4092 }
 0x4cc   :  { %4102 = vrot.lane.b32.xlu0 %v10023_v33, %s6960_s16  ;;  %v4554_v55 = vsel %vm265_vm1, %v10197_v24, %v10492_v53  ;;  %v6903_v53 = vld [vmem:[#allocation3 + $0x148] sm:$0xff] }
 0x4cd   :  { %4932 = vst.msk [vmem:[#allocation4 + $0x168] sm:$0xff] %vm265_vm1, %v4913_v8  ;;  %4160 = vrot.lane.b32.xlu1 %v10104_v5, %s6958_s6  ;;  %v5007_v8 = vld [vmem:[#allocation4 + $0x58] sm:$0xff] }
 0x4ce   :  { %v4329_v42 = vpop.permute.xlu0 %4328 }
 0x4cf   :  { %v10499_v7 = vpop.permute.xlu1 %3278  ;;  %v4629_v61 = vsel %vm2612_vm5, %v4610_v38, %v4329_v42 }
 0x4d0   :  { %4224 = vrot.lane.b32.xlu0 %v10002_v12, %s6959_s7  ;;  %v5016_v12 = vld [vmem:[#allocation4 + $0xb0] sm:$0xff] }
 0x4d1   :  { %4282 = vrot.lane.b32.xlu1 %v10084_v35, %s6963_s24  ;;  %v4999_v35 = vld [vmem:[#allocation4 + $0x8] sm:$0xff]  ;;  %v6764_v26 = vpack.i.bf16 %v5000_v1, %v5016_v12 }
 0x4d2   :  { %v10505_v3 = vpop.permute.xlu0 %4150  ;;  %v6759_v37 = vpack.i.bf16 %v4999_v35, %v5015_v31 }
 0x4d3   :  { %v4393_v10 = vpop.permute.xlu1 %4392 }
 0x4d4   :  { %v3927_v29 = vpop.f32.mrb[86].mxu0  ;;  %4340 = vrot.lane.b32.xlu0 %v10142_v36, %s6964_s27  ;;  %v4648_v44 = vsel %vm2634_vm6, %v4629_v61, %v4393_v10 }
 0x4d5   :  { %4404 = vrot.lane.b32.xlu1 %v4044_v59, %s6961_s21  ;;  %v6470_v33 = vpop.f32.mrb[87].mxu0  ;;  %v5021_v59 = vld [vmem:[#allocation4 + $0xe8] sm:$0xff]  ;;  %v5008_v29 = vld [vmem:[#allocation4 + $0x60] sm:$0xff] }
 0x4d6   :  { %v10510_v5 = vpop.permute.xlu0 %3082  ;;  %v6789_v11 = vpack.i.bf16 %v5005_v21, %v5021_v59  ;;  %v6799_v33 = vpack.i.bf16 %v5007_v8, %v5023_v0  ;;  %v6804_v35 = vpack.i.bf16 %v5008_v29, %v5024_v4 }
 0x4d7   :  { %v10512_v43 = vpop.permute.xlu1 %3342 }
 0x4d8   :  { %4462 = vrot.lane.b32.xlu0 %v4045_v50, %s6967_s18  ;;  %v3584_v50 = vsel %vm265_vm1, %v6902_v16, %v10463_v9  ;;  %v5025_v9 = vld [vmem:[#allocation4 + $0x108] sm:$0xff] }
 0x4d9   :  { %4520 = vrot.lane.b32.xlu1 %v4046_v39, %s6968_s19  ;;  %v3605_v42 = vsel %vm2547_vm3, %v3584_v50, %v10474_v45 }
 0x4da   :  { %v10516_v28 = vpop.permute.xlu0 %4214  ;;  %v3626_v31 = vsel %vm2569_vm4, %v3605_v42, %v10488_v32 }
 0x4db   :  { %v4451_v36 = vpop.permute.xlu1 %4450  ;;  %v3647_v1 = vsel %vm39_vm0, %v3626_v31, %v10499_v7 }
 0x4dc   :  { %6760 = vrot.lane.b32.xlu0 %v6759_v37, %s6960_s16  ;;  %v4667_v54 = vsel %vm2656_vm7, %v4648_v44, %v4451_v36  ;;  %v3668_v45 = vsel %vm2612_vm5, %v3647_v1, %v10512_v43  ;;  %v5009_v37 = vld [vmem:[#allocation4 + $0x68] sm:$0xff] }
 0x4dd   :  { %6765 = vrot.lane.b32.xlu1 %v6764_v26, %s6958_s6  ;;  %v6809_v26 = vpack.i.bf16 %v5009_v37, %v5025_v9 }
 0x4de   :  { %v10525_v17 = vpop.permute.xlu0 %3146 }
 0x4df   :  { %v3413_v47 = vpop.permute.xlu1 %3412 }
 0x4e0   :  { %6770 = vrot.lane.b32.xlu0 %v6769_v60, %s6959_s7  ;;  %v3689_v32 = vsel %vm2634_vm6, %v3668_v45, %v3413_v47  ;;  %v4573_v47 = vsel %vm2547_vm3, %v4554_v55, %v10505_v3  ;;  %v3585_v3 = vsel %vm265_vm1, %v6903_v53, %v10510_v5 }
 0x4e1   :  { %6775 = vrot.lane.b32.xlu1 %v6774_v27, %s6963_s24  ;;  %v4592_v34 = vsel %vm2569_vm4, %v4573_v47, %v10516_v28  ;;  %v3606_v28 = vsel %vm2547_vm3, %v3585_v3, %v10525_v17 }
 0x4e2   :  { %v10534_v52 = vpop.permute.xlu0 %4272 }
 0x4e3   :  { %v4509_v51 = vpop.permute.xlu1 %4508  ;;  %v4611_v63 = vsel %vm39_vm0, %v4592_v34, %v10534_v52 }
 0x4e4   :  { %v4686_v57 = vsel %vm2678_vm8, %v4667_v54, %v4509_v51  ;;  %6780 = vrot.lane.b32.xlu0 %v6779_v19, %s6964_s27 }
 0x4e5   :  { %6785 = vrot.lane.b32.xlu1 %v6784_v30, %s6961_s21  ;;  %6547 = vmatmul.mubr.msk.f32.gmra.mrb[106].mxu1 %vm2704_vm9, %v4686_v57 }
 0x4e6   :  { %v10541_v13 = vpop.permute.xlu0 %3216  ;;  %6549 = vmatprep.mubr.msk.f32.mxu1 %vm6965_vm2, %v11024_v56 }
 0x4e7   :  { %v3477_v14 = vpop.permute.xlu1 %3476  ;;  %v3627_v54 = vsel %vm2569_vm4, %v3606_v28, %v10541_v13  ;;  %v6907_v28 = vld [vmem:[#allocation3 + $0x1d0] sm:$0xff] }
 0x4e8   :  { %v4836_v18 = vpop.f32.mrb[90].mxu1  ;;  %6790 = vrot.lane.b32.xlu0 %v6789_v11, %s6967_s18  ;;  %v3710_v20 = vsel %vm2656_vm7, %v3689_v32, %v3477_v14 }
 0x4e9   :  { %v4837_v49 = vadd.f32 %v10111_v25, %v4836_v18  ;;  %6795 = vrot.lane.b32.xlu1 %v6794_v48, %s6968_s19  ;;  %v6524_v62 = vpop.f32.mrb[91].mxu1  ;;  %v6904_v18 = vld [vmem:[#allocation3 + $0x1c0] sm:$0xff] }
 0x4ea   :  { %v10552_v10 = vpop.permute.xlu0 %4094 }
 0x4eb   :  { %v4914_v39 = vmax.f32 %v4837_v49, 0.0  ;;  %v4331_v12 = vpop.permute.xlu1 %4330  ;;  %v4555_v4 = vsel %vm265_vm1, %v6904_v18, %v10552_v10 }
 0x4ec   :  { %6800 = vrot.lane.b32.xlu0 %v6799_v33, %s6969_s30  ;;  %v4630_v61 = vsel %vm2612_vm5, %v4611_v63, %v4331_v12 }
 0x4ed   :  { %4933 = vst.msk [vmem:[#allocation4 + $0x170] sm:$0xff] %vm265_vm1, %v4914_v39  ;;  %6805 = vrot.lane.b32.xlu1 %v6804_v35, %s6970_s4 }
 0x4ee   :  { %v3281_v36 = vpop.permute.xlu0 %3280 }
 0x4ef   :  { %v3541_v41 = vpop.permute.xlu1 %3540  ;;  %v3648_v30 = vsel %vm39_vm0, %v3627_v54, %v3281_v36 }
 0x4f0   :  { %v3731_v7 = vsel %vm2678_vm8, %v3710_v20, %v3541_v41  ;;  %6810 = vrot.lane.b32.xlu0 %v6809_v26, %s6971_s5  ;;  %v6905_v26 = vld [vmem:[#allocation3 + $0x1c8] sm:$0xff] }
 0x4f1   :  { %6487 = vmatmul.mubr.msk.f32.gmra.mrb[98].mxu0 %vm2704_vm9, %v3731_v7 }
 0x4f2   :  { %v4153_v43 = vpop.permute.xlu0 %4152  ;;  %6489 = vmatprep.mubr.msk.f32.mxu0 %vm6965_vm2, %v11024_v56 }
 0x4f3   :  { %v4395_v58 = vpop.permute.xlu1 %4394  ;;  %v4574_v16 = vsel %vm2547_vm3, %v4555_v4, %v4153_v43 }
 0x4f4   :  { %v3932_v15 = vpop.f32.mrb[88].mxu0  ;;  %v4649_v23 = vsel %vm2634_vm6, %v4630_v61, %v4395_v58 }
 0x4f5   :  { %v6473_v46 = vpop.f32.mrb[89].mxu0  ;;  %v5010_v15 = vld [vmem:[#allocation4 + $0x70] sm:$0xff] }
 0x4f6   :  { %v3345_v22 = vpop.permute.xlu0 %3344 }
 0x4f7   :  { %v4217_v60 = vpop.permute.xlu1 %4216  ;;  %v3669_v59 = vsel %vm2612_vm5, %v3648_v30, %v3345_v22 }
 0x4f8   :  { %v4593_v49 = vsel %vm2569_vm4, %v4574_v16, %v4217_v60 }
 0x4fa   :  { %v4453_v27 = vpop.permute.xlu0 %4452 }
 0x4fb   :  { %v3415_v38 = vpop.permute.xlu1 %3414  ;;  %v4668_v2 = vsel %vm2656_vm7, %v4649_v23, %v4453_v27 }
 0x4fc   :  { %v3690_v57 = vsel %vm2634_vm6, %v3669_v59, %v3415_v38 }
 0x4fe   :  { %v4275_v44 = vpop.permute.xlu0 %4274 }
 0x4ff   :  { %v4511_v19 = vpop.permute.xlu1 %4510  ;;  %v4612_v8 = vsel %vm39_vm0, %v4593_v49, %v4275_v44  ;;  %v10629_v44 = vld [vmem:[%s10990_s1 + $0x68] ss:$0 sm:$0xff] }
 0x500   :  { %v4687_v24 = vsel %vm2678_vm8, %v4668_v2, %v4511_v19 }
 0x501   :  { %6550 = vmatmul.mubr.msk.f32.gmra.mrb[108].mxu1 %vm2704_vm9, %v4687_v24 }
 0x502   :  { %v3479_v52 = vpop.permute.xlu0 %3478  ;;  %6552 = vmatprep.mubr.msk.f32.mxu1 %vm6965_vm2, %v11024_v56 }
 0x503   :  { %v4097_v51 = vpop.permute.xlu1 %4096  ;;  %v3711_v6 = vsel %vm2656_vm7, %v3690_v57, %v3479_v52 }
 0x504   :  { %v4556_v20 = vsel %vm265_vm1, %v6905_v26, %v4097_v51 }
 0x506   :  { %v4333_v5 = vpop.permute.xlu0 %4332 }
 0x507   :  { %v3543_v21 = vpop.permute.xlu1 %3542  ;;  %v4631_v42 = vsel %vm2612_vm5, %v4612_v8, %v4333_v5 }
 0x508   :  { %v3732_v17 = vsel %vm2678_vm8, %v3711_v6, %v3543_v21  ;;  %v4841_v40 = vpop.f32.mrb[92].mxu1 }
 0x509   :  { %v4842_v11 = vadd.f32 %v10111_v25, %v4841_v40  ;;  %6490 = vmatmul.mubr.msk.f32.gmra.mrb[100].mxu0 %vm2704_vm9, %v3732_v17  ;;  %v6527_v14 = vpop.f32.mrb[93].mxu1  ;;  %v6908_v17 = vld [vmem:[#allocation3 + $0x1d8] sm:$0xff] }
 0x50a   :  { %v4155_v13 = vpop.permute.xlu0 %4154 }
 0x50b   :  { %v4915_v48 = vmax.f32 %v4842_v11, 0.0  ;;  %v4397_v0 = vpop.permute.xlu1 %4396  ;;  %v4575_v41 = vsel %vm2547_vm3, %v4556_v20, %v4155_v13 }
 0x50c   :  { %v4650_v29 = vsel %vm2634_vm6, %v4631_v42, %v4397_v0 }
 0x50d   :  { %4934 = vst.msk [vmem:[#allocation4 + $0x178] sm:$0xff] %vm265_vm1, %v4915_v48 }
 0x50e   :  { %v4219_v50 = vpop.permute.xlu0 %4218 }
 0x50f   :  { %v4455_v62 = vpop.permute.xlu1 %4454 }
 0x510   :  { %v4669_v31 = vsel %vm2656_vm7, %v4650_v29, %v4455_v62 }
 0x512   :  { %v4277_v33 = vpop.permute.xlu0 %4276 }
 0x513   :  { %v4513_v39 = vpop.permute.xlu1 %4512 }
 0x514   :  { %v4688_v10 = vsel %vm2678_vm8, %v4669_v31, %v4513_v39  ;;  %v3937_v12 = vpop.f32.mrb[90].mxu0 }
 0x515   :  { %v3938_v35 = vadd.f32 %v10111_v25, %v3937_v12  ;;  %v6476_v9 = vpop.f32.mrb[91].mxu0  ;;  %6553 = vmatmul.mubr.msk.f32.gmra.mrb[110].mxu1 %vm2704_vm9, %v4688_v10  ;;  %v4594_v25 = vsel %vm2569_vm4, %v4575_v41, %v4219_v50 }
 0x516   :  { %v4099_v1 = vpop.permute.xlu0 %4098  ;;  %6555 = vmatprep.mubr.msk.f32.mxu1 %vm6965_vm2, %v11024_v56  ;;  %v4613_v58 = vsel %vm39_vm0, %v4594_v25, %v4277_v33  ;;  %v6909_v9 = vld [vmem:[#allocation3 + $0x1e0] sm:$0xff] }
 0x517   :  { %v3981_v45 = vmax.f32 %v3938_v35, 0.0  ;;  %v4335_v37 = vpop.permute.xlu1 %4334  ;;  %v4557_v52 = vsel %vm265_vm1, %v6907_v28, %v4099_v1 }
 0x518   :  { %v4632_v22 = vsel %vm2612_vm5, %v4613_v58, %v4335_v37 }
 0x519   :  { %4002 = vst.msk [vmem:[#allocation4 + $0x120] sm:$0xff] %vm265_vm1, %v3981_v45  ;;  %v5011_v45 = vld [vmem:[#allocation4 + $0x78] sm:$0xff] }
 0x51a   :  { %v4157_v32 = vpop.permute.xlu0 %4156 }
 0x51b   :  { %v4399_v36 = vpop.permute.xlu1 %4398  ;;  %v4576_v54 = vsel %vm2547_vm3, %v4557_v52, %v4157_v32 }
 0x51c   :  { %v4651_v55 = vsel %vm2634_vm6, %v4632_v22, %v4399_v36 }
 0x51e   :  { %v4221_v7 = vpop.permute.xlu0 %4220 }
 0x51f   :  { %v4457_v43 = vpop.permute.xlu1 %4456  ;;  %v4595_v30 = vsel %vm2569_vm4, %v4576_v54, %v4221_v7  ;;  %v4966_v54 = vld [vmem:[%s10990_s1 + $0x100] sm:$0xff] }
 0x520   :  { %v5026_v46 = vld [vmem:[#allocation4 + $0x120] sm:$0xff]  ;;  %v4670_v27 = vsel %vm2656_vm7, %v4651_v55, %v4457_v43  ;;  %v4965_v55 = vld [vmem:[%s10990_s1 + $0xf8] sm:$0xff] }
 0x521   :  { %v6814_v60 = vpack.i.bf16 %v5010_v15, %v5026_v46 }
 0x522   :  { %v4279_v47 = vpop.permute.xlu0 %4278 }
 0x523   :  { %v4515_v34 = vpop.permute.xlu1 %4514  ;;  %6815 = vrot.lane.b32.xlu1 %v6814_v60, %s6972_s8  ;;  %v4614_v57 = vsel %vm39_vm0, %v4595_v30, %v4279_v47  ;;  %v4964_v60 = vld [vmem:[%s10990_s1 + $0xf0] sm:$0xff]  ;;  %v4950_v30 = vld [vmem:[%s10990_s1 + $0x80] sm:$0xff] }
 0x524   :  { %v4689_v38 = vsel %vm2678_vm8, %v4670_v27, %v4515_v34  ;;  %v4948_v47 = vld [vmem:[%s10990_s1 + $0x70] sm:$0xff] }
 0x525   :  { %6556 = vmatmul.mubr.msk.f32.gmra.mrb[112].mxu1 %vm2704_vm9, %v4689_v38  ;;  %v6668_v38 = vpack.c.bf16 %v4965_v55, %v4964_v60  ;;  %v4979_v60 = vld [vmem:[%s10990_s1 + $0x168] sm:$0xff] }
 0x526   :  { %v4101_v63 = vpop.permute.xlu0 %4100  ;;  %6558 = vmatprep.mubr.msk.f32.mxu1 %vm6965_vm2, %v11024_v56 }
 0x527   :  { %v4337_v61 = vpop.permute.xlu1 %4336  ;;  %v4558_v40 = vsel %vm265_vm1, %v6908_v17, %v4101_v63  ;;  %v4949_v63 = vld [vmem:[%s10990_s1 + $0x78] sm:$0xff]  ;;  %6669 = vmatprep.subr.bf16.mxu0 %v6668_v38  ;;  %v4963_v38 = vld [vmem:[%s10990_s1 + $0xe8] sm:$0xff] }
 0x528   :  { %v4846_v23 = vpop.f32.mrb[94].mxu1  ;;  %v4633_v5 = vsel %vm2612_vm5, %v4614_v57, %v4337_v61  ;;  %v4951_v57 = vld [vmem:[%s10990_s1 + $0x88] sm:$0xff] }
 0x529   :  { %v4847_v2 = vadd.f32 %v10629_v44, %v4846_v23  ;;  %v6530_v19 = vpop.f32.mrb[95].mxu1 }
 0x52a   :  { %v4159_v24 = vpop.permute.xlu0 %4158  ;;  %v6670_v19 = vpack.c.bf16 %v4949_v63, %v4948_v47 }
 0x52b   :  { %v4916_v53 = vmax.f32 %v4847_v2, 0.0  ;;  %v4401_v3 = vpop.permute.xlu1 %4400  ;;  %v4577_v13 = vsel %vm2547_vm3, %v4558_v40, %v4159_v24  ;;  %v4952_v40 = vld [vmem:[%s10990_s1 + $0x90] sm:$0xff] }
 0x52c   :  { %v4652_v6 = vsel %vm2634_vm6, %v4633_v5, %v4401_v3  ;;  %6671 = vmatpush3.bf16.msra.mxu0 %v6670_v19  ;;  %v4968_v5 = vld [vmem:[%s10990_s1 + $0x110] sm:$0xff] }
 0x52d   :  { %4935 = vst.msk [vmem:[#allocation4 + $0x180] sm:$0xff] %vm265_vm1, %v4916_v53 }
 0x52e   :  { %v4223_v51 = vpop.permute.xlu0 %4222 }
 0x52f   :  { %v4459_v59 = vpop.permute.xlu1 %4458  ;;  %v4596_v18 = vsel %vm2569_vm4, %v4577_v13, %v4223_v51  ;;  %v4967_v51 = vld [vmem:[%s10990_s1 + $0x108] sm:$0xff]  ;;  %v5012_v13 = vld [vmem:[#allocation4 + $0x90] sm:$0xff] }
 0x530   :  { %v4671_v11 = vsel %vm2656_vm7, %v4652_v6, %v4459_v59  ;;  %v6672_v59 = vpack.c.bf16 %v4967_v51, %v4966_v54  ;;  %v4969_v6 = vld [vmem:[%s10990_s1 + $0x118] sm:$0xff] }
 0x531   :  { %v6676_v17 = vpack.c.bf16 %v4969_v6, %v4968_v5  ;;  %v5034_v54 = vld [vmem:[#allocation4 + $0x170] sm:$0xff] }
 0x532   :  { %v4281_v21 = vpop.permute.xlu0 %4280  ;;  %6673 = vmatprep.subr.bf16.mxu0 %v6672_v59 }
 0x533   :  { %v4517_v14 = vpop.permute.xlu1 %4516  ;;  %v4615_v50 = vsel %vm39_vm0, %v4596_v18, %v4281_v21  ;;  %v6674_v21 = vpack.c.bf16 %v4951_v57, %v4950_v30  ;;  %v4970_v18 = vld [vmem:[%s10990_s1 + $0x120] sm:$0xff] }
 0x534   :  { %v4690_v48 = vsel %vm2678_vm8, %v4671_v11, %v4517_v14  ;;  %v3942_v0 = vpop.f32.mrb[92].mxu0  ;;  %v4953_v11 = vld [vmem:[%s10990_s1 + $0x98] sm:$0xff]  ;;  %v5036_v51 = vld [vmem:[#allocation4 + $0x180] sm:$0xff] }
 0x535   :  { %v3943_v4 = vadd.f32 %v10629_v44, %v3942_v0  ;;  %v6479_v16 = vpop.f32.mrb[93].mxu0  ;;  %6559 = vmatmul.mubr.msk.f32.gmra.mrb[114].mxu1 %vm2704_vm9, %v4690_v48  ;;  %6675 = vmatpush3.bf16.msra.mxu0 %v6674_v21  ;;  %v6678_v14 = vpack.c.bf16 %v4953_v11, %v4952_v40 }
 0x536   :  { %v4339_v49 = vpop.permute.xlu0 %4338  ;;  %6561 = vmatprep.mubr.msk.f32.mxu1 %vm6965_vm2, %v11024_v56  ;;  %6677 = vmatprep.subr.bf16.mxu0 %v6676_v17  ;;  %v4954_v16 = vld [vmem:[%s10990_s1 + $0xa0] sm:$0xff] }
 0x537   :  { %v3982_v62 = vmax.f32 %v3943_v4, 0.0  ;;  %v4403_v8 = vpop.permute.xlu1 %4402  ;;  %v4634_v42 = vsel %vm2612_vm5, %v4615_v50, %v4339_v49  ;;  %v4971_v4 = vld [vmem:[%s10990_s1 + $0x128] sm:$0xff] }
 0x538   :  { %v4653_v29 = vsel %vm2634_vm6, %v4634_v42, %v4403_v8  ;;  %v6680_v50 = vpack.c.bf16 %v4971_v4, %v4970_v18  ;;  %v4955_v49 = vld [vmem:[%s10990_s1 + $0xa8] sm:$0xff]  ;;  %v4973_v8 = vld [vmem:[%s10990_s1 + $0x138] sm:$0xff] }
 0x539   :  { %4003 = vst.msk [vmem:[#allocation4 + $0x128] sm:$0xff] %vm265_vm1, %v3982_v62  ;;  %6679 = vmatpush3.bf16.msra.mxu0 %v6678_v14  ;;  %v4972_v62 = vld [vmem:[%s10990_s1 + $0x130] sm:$0xff]  ;;  %v6682_v42 = vpack.c.bf16 %v4955_v49, %v4954_v16 }
 0x53a   :  { %v4461_v33 = vpop.permute.xlu0 %4460  ;;  %6681 = vmatprep.subr.bf16.mxu0 %v6680_v50 }
 0x53b   :  { %v4519_v31 = vpop.permute.xlu1 %4518  ;;  %v4672_v39 = vsel %vm2656_vm7, %v4653_v29, %v4461_v33  ;;  %v6684_v29 = vpack.c.bf16 %v4973_v8, %v4972_v62  ;;  %v4956_v33 = vld [vmem:[%s10990_s1 + $0xb0] sm:$0xff] }
 0x53c   :  { %v4691_v10 = vsel %vm2678_vm8, %v4672_v39, %v4519_v31  ;;  %v4957_v31 = vld [vmem:[%s10990_s1 + $0xb8] sm:$0xff]  ;;  %v4974_v39 = vld [vmem:[%s10990_s1 + $0x140] sm:$0xff] }
 0x53d   :  { %6562 = vmatmul.mubr.msk.f32.gmra.mrb[116].mxu1 %vm2704_vm9, %v4691_v10  ;;  %6683 = vmatpush3.bf16.msra.mxu0 %v6682_v42 }
 0x53e   :  { %v4103_v12 = vpop.permute.xlu0 %4102  ;;  %6564 = vmatprep.mubr.msk.f32.mxu1 %vm6965_vm2, %v11024_v56  ;;  %6685 = vmatprep.subr.bf16.mxu0 %v6684_v29 }
 0x53f   :  { %v4161_v35 = vpop.permute.xlu1 %4160  ;;  %v4559_v1 = vsel %vm265_vm1, %v6909_v9, %v4103_v12  ;;  %v4975_v12 = vld [vmem:[%s10990_s1 + $0x148] sm:$0xff] }
 0x540   :  { %v5027_v37 = vld [vmem:[#allocation4 + $0x128] sm:$0xff]  ;;  %v4578_v36 = vsel %vm2547_vm3, %v4559_v1, %v4161_v35  ;;  %v6686_v1 = vpack.c.bf16 %v4957_v31, %v4956_v33  ;;  %v4998_v31 = vld [vmem:[#allocation4] sm:$0xff] }
 0x541   :  { %v6819_v32 = vpack.i.bf16 %v5011_v45, %v5027_v37  ;;  %v6688_v45 = vpack.c.bf16 %v4975_v12, %v4974_v39  ;;  %v4958_v37 = vld [vmem:[%s10990_s1 + $0xc0] sm:$0xff] }
 0x542   :  { %v4225_v26 = vpop.permute.xlu0 %4224  ;;  %6687 = vmatpush3.bf16.msra.mxu0 %v6686_v1 }
 0x543   :  { %v4283_v20 = vpop.permute.xlu1 %4282  ;;  %6820 = vrot.lane.b32.xlu0 %v6819_v32, %s6973_s11  ;;  %v4597_v41 = vsel %vm2569_vm4, %v4578_v36, %v4225_v26  ;;  %v4959_v32 = vld [vmem:[%s10990_s1 + $0xc8] sm:$0xff]  ;;  %6689 = vmatprep.subr.bf16.mxu0 %v6688_v45 }
 0x544   :  { %v4616_v7 = vsel %vm39_vm0, %v4597_v41, %v4283_v20  ;;  %v6690_v26 = vpack.c.bf16 %v4959_v32, %v4958_v37 }
 0x546   :  { %v4341_v25 = vpop.permute.xlu0 %4340  ;;  %6691 = vmatpush3.bf16.msra.mxu0 %v6690_v26 }
 0x547   :  { %v4405_v43 = vpop.permute.xlu1 %4404  ;;  %v4635_v58 = vsel %vm2612_vm5, %v4616_v7, %v4341_v25  ;;  %v4976_v25 = vld [vmem:[%s10990_s1 + $0x150] sm:$0xff] }
 0x548   :  { %v4851_v15 = vpop.f32.mrb[96].mxu1  ;;  %v4654_v27 = vsel %vm2634_vm6, %v4635_v58, %v4405_v43  ;;  %v4977_v43 = vld [vmem:[%s10990_s1 + $0x158] sm:$0xff]  ;;  %v4960_v58 = vld [vmem:[%s10990_s1 + $0xd0] sm:$0xff] }
 0x549   :  { %v4852_v46 = vadd.f32 %v10629_v44, %v4851_v15  ;;  %v6533_v22 = vpop.f32.mrb[97].mxu1  ;;  %v6692_v15 = vpack.c.bf16 %v4977_v43, %v4976_v25 }
 0x54a   :  { %v4463_v34 = vpop.permute.xlu0 %4462  ;;  %v4978_v22 = vld [vmem:[%s10990_s1 + $0x160] sm:$0xff] }
 0x54b   :  { %v4917_v61 = vmax.f32 %v4852_v46, 0.0  ;;  %v4521_v23 = vpop.permute.xlu1 %4520  ;;  %v4673_v2 = vsel %vm2656_vm7, %v4654_v27, %v4463_v34  ;;  %v4961_v46 = vld [vmem:[%s10990_s1 + $0xd8] sm:$0xff]  ;;  %v6696_v27 = vpack.c.bf16 %v4979_v60, %v4978_v22  ;;  %v4962_v34 = vld [vmem:[%s10990_s1 + $0xe0] sm:$0xff]  ;;  %6693 = vmatprep.subr.bf16.mxu0 %v6692_v15 }
 0x54c   :  { %v4692_v24 = vsel %vm2678_vm8, %v4673_v2, %v4521_v23  ;;  %v6694_v47 = vpack.c.bf16 %v4961_v46, %v4960_v58  ;;  %v6698_v63 = vpack.c.bf16 %v4963_v38, %v4962_v34  ;;  %v5013_v2 = vld [vmem:[#allocation4 + $0x98] sm:$0xff] }
 0x54d   :  { %4936 = vst.msk [vmem:[#allocation4 + $0x188] sm:$0xff] %vm265_vm1, %v4917_v61  ;;  %6565 = vmatmul.mubr.msk.f32.gmra.mrb[118].mxu1 %vm2704_vm9, %v4692_v24  ;;  %v11071_v61 = vmov 0.0|0.0  }
 0x54e   :  { %6589 = vmatprep.mubr.msk.f32.mxu1 %vm6965_vm2, %v11024_v56  ;;  %6695 = vmatpush3.bf16.msra.mxu0 %v6694_v47 }
 0x54f   :  { %6697 = vmatprep.subr.bf16.mxu0 %v6696_v27  ;;  %v6766_v16 = vpop.permute.xlu1 %6765 }
 0x550   :  { %v6768_v12 = vunpack.i.h.bf16 %v6766_v16 }
 0x552   :  { %6699 = vmatpush3.bf16.msra.mxu0 %v6698_v63 }
 0x553   :  { %6700 = vmatprep.subr.bf16.mxu0 %v11071_v61  ;;  %v6776_v49 = vpop.permute.xlu1 %6775 }
 0x554   :  { %v3947_v53 = vpop.f32.mrb[94].mxu0 }
 0x555   :  { %v3948_v3 = vadd.f32 %v10629_v44, %v3947_v53  ;;  %v6482_v28 = vpop.f32.mrb[95].mxu0 }
 0x557   :  { %v3983_v52 = vmax.f32 %v3948_v3, 0.0  ;;  %v6786_v29 = vpop.permute.xlu1 %6785 }
 0x558   :  { %v6788_v34 = vunpack.i.h.bf16 %v6786_v29 }
 0x559   :  { %4004 = vst.msk [vmem:[#allocation4 + $0x130] sm:$0xff] %vm265_vm1, %v3983_v52  ;;  %v5032_v52 = vld [vmem:[#allocation4 + $0x150] sm:$0xff] }
 0x55b   :  { %v6796_v43 = vpop.permute.xlu1 %6795 }
 0x560   :  { %v5028_v48 = vld [vmem:[#allocation4 + $0x130] sm:$0xff] }
 0x561   :  { %v6824_v0 = vpack.i.bf16 %v5012_v13, %v5028_v48  ;;  %v6761_v48 = vpop.permute.xlu0 %6760 }
 0x562   :  { %v6763_v8 = vunpack.i.h.bf16 %v6761_v48  ;;  %v6762_v42 = vunpack.i.l.bf16 %v6761_v48 }
 0x563   :  { %6825 = vrot.lane.b32.xlu1 %v6824_v0, %s6974_s22 }
 0x564   :  { %v4856_v10 = vpop.f32.mrb[98].mxu1  ;;  %v5107_v1 = vsel %vm265_vm1, %v4998_v31, %v6763_v8 }
 0x565   :  { %v4857_v35 = vadd.f32 %v10629_v44, %v4856_v10  ;;  %v6536_v9 = vpop.f32.mrb[99].mxu1  ;;  %v6771_v50 = vpop.permute.xlu0 %6770 }
 0x566   :  { %v5014_v9 = vld [vmem:[#allocation4 + $0xa0] sm:$0xff]  ;;  %v6773_v37 = vunpack.i.h.bf16 %v6771_v50  ;;  %v6772_v32 = vunpack.i.l.bf16 %v6771_v50 }
 0x567   :  { %v4918_v36 = vmax.f32 %v4857_v35, 0.0  ;;  %v6767_v35 = vunpack.i.l.bf16 %v6766_v16  ;;  %v5188_v45 = vsel %vm265_vm1, %v5014_v9, %v6762_v42 }
 0x569   :  { %4937 = vst.msk [vmem:[#allocation4 + $0x190] sm:$0xff] %vm265_vm1, %v4918_v36  ;;  %v6781_v62 = vpop.permute.xlu0 %6780  ;;  %v5189_v25 = vsel %vm2547_vm3, %v5188_v45, %v6767_v35 }
 0x56a   :  { %v5190_v15 = vsel %vm2569_vm4, %v5189_v25, %v6772_v32  ;;  %v6783_v46 = vunpack.i.h.bf16 %v6781_v62  ;;  %v6782_v22 = vunpack.i.l.bf16 %v6781_v62  ;;  %v5033_v32 = vld [vmem:[#allocation4 + $0x168] sm:$0xff] }
 0x56c   :  { %v3952_v20 = vpop.f32.mrb[96].mxu0 }
 0x56d   :  { %v3953_v41 = vadd.f32 %v10629_v44, %v3952_v20  ;;  %v6485_v7 = vpop.f32.mrb[97].mxu0  ;;  %v6791_v36 = vpop.permute.xlu0 %6790  ;;  %v6778_v20 = vunpack.i.h.bf16 %v6776_v49 }
 0x56e   :  { %v5108_v7 = vsel %vm2547_vm3, %v5107_v1, %v6768_v12 }
 0x56f   :  { %v3984_v55 = vmax.f32 %v3953_v41, 0.0  ;;  %v6777_v41 = vunpack.i.l.bf16 %v6776_v49  ;;  %v5109_v58 = vsel %vm2569_vm4, %v5108_v7, %v6773_v37 }
 0x570   :  { %v5038_v57 = vld [vmem:[#allocation4 + $0x190] sm:$0xff]  ;;  %v5110_v38 = vsel %vm39_vm0, %v5109_v58, %v6778_v20 }
 0x571   :  { %4005 = vst.msk [vmem:[#allocation4 + $0x138] sm:$0xff] %vm265_vm1, %v3984_v55  ;;  %v6801_v55 = vpop.permute.xlu0 %6800  ;;  %v5191_v63 = vsel %vm39_vm0, %v5190_v15, %v6777_v41  ;;  %v5035_v15 = vld [vmem:[#allocation4 + $0x178] sm:$0xff] }
 0x578   :  { %v4861_v23 = vpop.f32.mrb[100].mxu1  ;;  %v5029_v19 = vld [vmem:[#allocation4 + $0x138] sm:$0xff] }
 0x579   :  { %v4862_v24 = vadd.f32 %v10629_v44, %v4861_v23  ;;  %v6539_v53 = vpop.f32.mrb[101].mxu1  ;;  %v6829_v3 = vpack.i.bf16 %v5013_v2, %v5029_v19  ;;  %v6787_v23 = vunpack.i.l.bf16 %v6786_v29  ;;  %v5111_v2 = vsel %vm2612_vm5, %v5110_v38, %v6783_v46  ;;  %v4983_v38 = vld [vmem:[%s10990_s1 + $0x188] sm:$0xff] }
 0x57a   :  { %v6793_v19 = vunpack.i.h.bf16 %v6791_v36  ;;  %v5192_v53 = vsel %vm2612_vm5, %v5191_v63, %v6782_v22 }
 0x57b   :  { %v4919_v28 = vmax.f32 %v4862_v24, 0.0  ;;  %6830 = vrot.lane.b32.xlu0 %v6829_v3, %s6975_s0  ;;  %v6792_v3 = vunpack.i.l.bf16 %v6791_v36 }
 0x57d   :  { %4938 = vst.msk [vmem:[#allocation4 + $0x198] sm:$0xff] %vm265_vm1, %v4919_v28  ;;  %v6806_v28 = vpop.permute.xlu1 %6805 }
 0x57f   :  { %5208 = vrot.lane.b32.xlu0 %v5032_v52, %s6958_s6  ;;  %v6798_v52 = vunpack.i.h.bf16 %v6796_v43 }
 0x583   :  { %5216 = vrot.lane.b32.xlu0 %v5034_v54, %s6963_s24  ;;  %v5112_v54 = vsel %vm2634_vm6, %v5111_v2, %v6788_v34 }
 0x587   :  { %5224 = vrot.lane.b32.xlu0 %v5036_v51, %s6961_s21  ;;  %v6797_v51 = vunpack.i.l.bf16 %v6796_v43 }
 0x588   :  { %v4866_v30 = vpop.f32.mrb[102].mxu1 }
 0x589   :  { %v6542_v59 = vpop.f32.mrb[103].mxu1  ;;  %v5113_v30 = vsel %vm2656_vm7, %v5112_v54, %v6793_v19  ;;  %v5039_v19 = vld [vmem:[#allocation4 + $0x198] sm:$0xff] }
 0x58a   :  { %v5193_v59 = vsel %vm2634_vm6, %v5192_v53, %v6787_v23  ;;  %v5037_v23 = vld [vmem:[#allocation4 + $0x188] sm:$0xff] }
 0x58b   :  { %5232 = vrot.lane.b32.xlu0 %v5038_v57, %s6968_s19  ;;  %v6803_v57 = vunpack.i.h.bf16 %v6801_v55  ;;  %v4984_v53 = vld [vmem:[%s10990_s1 + $0x190] sm:$0xff] }
 0x59c   :  { %v4871_v5 = vpop.f32.mrb[104].mxu1 }
 0x59d   :  { %v6545_v6 = vpop.f32.mrb[105].mxu1  ;;  %v6811_v5 = vpop.permute.xlu0 %6810 }
 0x59e   :  { %v5194_v6 = vsel %vm2656_vm7, %v5193_v59, %v6792_v3  ;;  %v6812_v16 = vunpack.i.l.bf16 %v6811_v5  ;;  %v4985_v3 = vld [vmem:[%s10990_s1 + $0x198] sm:$0xff] }
 0x59f   :  { %v5195_v48 = vsel %vm2678_vm8, %v5194_v6, %v6797_v51  ;;  %v6707_v51 = vpack.c.bf16 %v4985_v3, %v4984_v53  ;;  %v4988_v6 = vld [vmem:[%s10990_s1 + $0x1b0] sm:$0xff] }
 0x5b8   :  { %v4876_v21 = vpop.f32.mrb[106].mxu1 }
 0x5b9   :  { %v4877_v17 = vadd.f32 %v10629_v44, %v4876_v21  ;;  %v6548_v40 = vpop.f32.mrb[107].mxu1  ;;  %v6802_v21 = vunpack.i.l.bf16 %v6801_v55  ;;  %v4980_v55 = vld [vmem:[%s10990_s1 + $0x170] sm:$0xff] }
 0x5ba   :  { %v6808_v40 = vunpack.i.h.bf16 %v6806_v28 }
 0x5bb   :  { %v4922_v11 = vmax.f32 %v4877_v17, 0.0  ;;  %v6816_v17 = vpop.permute.xlu1 %6815 }
 0x5bc   :  { %v6818_v8 = vunpack.i.h.bf16 %v6816_v17  ;;  %v6817_v42 = vunpack.i.l.bf16 %v6816_v17 }
 0x5bd   :  { %4941 = vst.msk [vmem:[#allocation4 + $0x1b0] sm:$0xff] %vm265_vm1, %v4922_v11  ;;  %v5114_v11 = vsel %vm2678_vm8, %v5113_v30, %v6798_v52  ;;  %v4987_v30 = vld [vmem:[%s10990_s1 + $0x1a8] sm:$0xff] }
 0x5c4   :  { %v3957_v14 = vpop.f32.mrb[98].mxu0  ;;  %v5040_v13 = vld [vmem:[#allocation4 + $0x1b0] sm:$0xff] }
 0x5c5   :  { %v3958_v0 = vadd.f32 %v10629_v44, %v3957_v14  ;;  %v6488_v18 = vpop.f32.mrb[99].mxu0  ;;  %5240 = vrot.lane.b32.xlu0 %v5040_v13, %s6970_s4  ;;  %v6807_v14 = vunpack.i.l.bf16 %v6806_v28  ;;  %v5115_v13 = vsel %vm2704_vm9, %v5114_v11, %v6803_v57  ;;  %v4986_v28 = vld [vmem:[%s10990_s1 + $0x1a0] sm:$0xff]  ;;  %v4991_v11 = vld [vmem:[%s10990_s1 + $0x1c8] sm:$0xff] }
 0x5c6   :  { %v5196_v18 = vsel %vm2704_vm9, %v5195_v48, %v6802_v21  ;;  %v5117_v31 = vsel %vm5116_vm10, %v5115_v13, %v6808_v40  ;;  %v6710_v57 = vpack.c.bf16 %v4987_v30, %v4986_v28  ;;  %v4989_v21 = vld [vmem:[%s10990_s1 + $0x1b8] sm:$0xff]  ;;  %v4990_v40 = vld [vmem:[%s10990_s1 + $0x1c0] sm:$0xff] }
 0x5c7   :  { %v3985_v4 = vmax.f32 %v3958_v0, 0.0  ;;  %v6821_v0 = vpop.permute.xlu0 %6820  ;;  %v5197_v12 = vsel %vm5116_vm10, %v5196_v18, %v6807_v14  ;;  %v6713_v17 = vpack.c.bf16 %v4989_v21, %v4988_v6  ;;  %v6716_v14 = vpack.c.bf16 %v4991_v11, %v4990_v40  ;;  %v4993_v18 = vld [vmem:[%s10990_s1 + $0x1d8] sm:$0xff]  ;;  %v5432_v21 = vld [vmem:[%s10990_s1 + $0x200] sm:$0xff] }
 0x5c8   :  { %v5198_v37 = vsel %vm5118_vm11, %v5197_v12, %v6812_v16 }
 0x5c9   :  { %4006 = vst.msk [vmem:[#allocation4 + $0x140] sm:$0xff] %vm265_vm1, %v3985_v4  ;;  %v6813_v4 = vunpack.i.h.bf16 %v6811_v5 }
 0x5cb   :  { %v5119_v45 = vsel %vm5118_vm11, %v5117_v31, %v6813_v4  ;;  %v4994_v4 = vld [vmem:[%s10990_s1 + $0x1e0] sm:$0xff] }
 0x5cc   :  { %v5121_v36 = vsel %vm5120_vm12, %v5119_v45, %v6818_v8 }
 0x5d4   :  { %v4881_v33 = vpop.f32.mrb[108].mxu1 }
 0x5d5   :  { %v4882_v39 = vadd.f32 %v10629_v44, %v4881_v33  ;;  %v6551_v10 = vpop.f32.mrb[109].mxu1  ;;  %v6826_v50 = vpop.permute.xlu1 %6825 }
 0x5d6   :  { %v6822_v10 = vunpack.i.l.bf16 %v6821_v0  ;;  %v6828_v35 = vunpack.i.h.bf16 %v6826_v50  ;;  %v6827_v9 = vunpack.i.l.bf16 %v6826_v50 }
 0x5d7   :  { %v4923_v26 = vmax.f32 %v4882_v39, 0.0  ;;  %v6823_v39 = vunpack.i.h.bf16 %v6821_v0  ;;  %v4992_v0 = vld [vmem:[%s10990_s1 + $0x1d0] sm:$0xff] }
 0x5d9   :  { %4942 = vst.msk [vmem:[#allocation4 + $0x1b8] sm:$0xff] %vm265_vm1, %v4923_v26  ;;  %v5199_v26 = vsel %vm5120_vm12, %v5198_v37, %v6817_v42  ;;  %v5123_v41 = vsel %vm5122_vm13, %v5121_v36, %v6823_v39 }
 0x5da   :  { %v5200_v43 = vsel %vm5122_vm13, %v5199_v26, %v6822_v10  ;;  %v5125_v58 = vsel %vm5124_vm14, %v5123_v41, %v6828_v35 }
 0x5db   :  { %v5201_v46 = vsel %vm5124_vm14, %v5200_v43, %v6827_v9 }
 0x5dc   :  { %v3962_v60 = vpop.f32.mrb[100].mxu0 }
 0x5dd   :  { %v3963_v47 = vadd.f32 %v10629_v44, %v3962_v60  ;;  %v6491_v27 = vpop.f32.mrb[101].mxu0 }
 0x5de   :  { %v4982_v27 = vld [vmem:[%s10990_s1 + $0x180] sm:$0xff] }
 0x5df   :  { %v3986_v24 = vmax.f32 %v3963_v47, 0.0  ;;  %v4981_v47 = vld [vmem:[%s10990_s1 + $0x178] sm:$0xff]  ;;  %v6704_v63 = vpack.c.bf16 %v4983_v38, %v4982_v27 }
 0x5e0   :  { %v6701_v34 = vpack.c.bf16 %v4981_v47, %v4980_v55  ;;  %v5041_v5 = vld [vmem:[#allocation4 + $0x1b8] sm:$0xff] }
 0x5e1   :  { %4007 = vst.msk [vmem:[#allocation4 + $0x148] sm:$0xff] %vm265_vm1, %v3986_v24 }
 0x5e8   :  { %v4886_v49 = vpop.f32.mrb[110].mxu1  ;;  %v5031_v62 = vld [vmem:[#allocation4 + $0x148] sm:$0xff] }
 0x5e9   :  { %v4887_v29 = vadd.f32 %v10629_v44, %v4886_v49  ;;  %5204 = vrot.lane.b32.xlu1 %v5031_v62, %s6960_s16  ;;  %v6554_v33 = vpop.f32.mrb[111].mxu1  ;;  %v6719_v49 = vpack.c.bf16 %v4993_v18, %v4992_v0  ;;  %v4995_v62 = vld [vmem:[%s10990_s1 + $0x1e8] sm:$0xff]  ;;  %v5440_v18 = vld [vmem:[%s10990_s1 + $0x240] sm:$0xff]  ;;  %s6977_s16 = smov [#allocation5]  }
 0x5ea   :  { %v6722_v42 = vpack.c.bf16 %v4995_v62, %v4994_v4  ;;  %v4996_v33 = vld [vmem:[%s10990_s1 + $0x1f0] sm:$0xff] }
 0x5eb   :  { %v4924_v1 = vmax.f32 %v4887_v29, 0.0 }
 0x5ed   :  { %4943 = vst.msk [vmem:[#allocation4 + $0x1c0] sm:$0xff] %vm265_vm1, %v4924_v1  ;;  %5212 = vrot.lane.b32.xlu1 %v5033_v32, %s6959_s7  ;;  %v6831_v20 = vpop.permute.xlu0 %6830  ;;  %s5694_s7 = sshll.u32 %s6977_s16, 4  ;;  %s5695_s7 = int_to_ptr.vmem [resolvable:$true] %s5694_s7 }
 0x5ee   :  { %v6833_v7 = vunpack.i.h.bf16 %v6831_v20  ;;  %v6832_v25 = vunpack.i.l.bf16 %v6831_v20  ;;  %s6910_s21 = scalar_lea.vmem %s5695_s7, 64  ;;  %p6915_p1 = scmp.lt.s32.totalorder %s5695_s7, %s5695_s7 }
 0x5ef   :  { %p6911_p0 = scmp.ne.s32.totalorder %s5695_s7, %s6910_s21  ;;  %p6916_p2 = scmp.lt.s32.totalorder %s6910_s21, %s6910_s21 }
 0x5f0   :  { %v5202_v22 = vsel %vm5126_vm15, %v5201_v46, %v6832_v25  ;;  %v5127_v60 = vsel %vm5126_vm15, %v5125_v58, %v6833_v7  ;;  %v5030_v7 = vld [vmem:[#allocation4 + $0x140] sm:$0xff] }
 0x5f1   :  { %5220 = vrot.lane.b32.xlu1 %v5035_v15, %s6964_s27  ;;  %5349 = vmatprep.mubr.f32.mxu0 %v5202_v22  ;;  %v5209_v26 = vpop.permute.xlu0 %5208  ;;  %p6917_p3 = por %p6916_p2, %p6915_p1 }
 0x5f2   :  { %5350 = vmatmul.mubr.f32.vlgmr.msra.gmra.mrb[102].mxu0 %v5127_v60 }
 0x5f3   :  { %6702 = vmatpush1.bf16.msra.mxu0 %v6701_v34  ;;  %p6918_p4 = pnand %p6917_p3, %p6911_p0 }
 0x5f4   :  { %v5042_v2 = vld [vmem:[#allocation4 + $0x1c0] sm:$0xff]  ;;  %6703 = vmatprep.subr.bf16.mxu0 %v11071_v61 }
 0x5f5   :  { %5228 = vrot.lane.b32.xlu1 %v5037_v23, %s6967_s18  ;;  %5248 = vrot.lane.b32.xlu0 %v5042_v2, %s6972_s8  ;;  %v5217_v41 = vpop.permute.xlu0 %5216 }
 0x5f7   :  { %6705 = vmatpush1.bf16.msra.mxu0 %v6704_v63 }
 0x5f8   :  { %v4891_v24 = vpop.f32.mrb[112].mxu1  ;;  %6706 = vmatprep.subr.bf16.mxu0 %v11071_v61 }
 0x5f9   :  { %v4892_v52 = vadd.f32 %v10629_v44, %v4891_v24  ;;  %5236 = vrot.lane.b32.xlu1 %v5039_v19, %s6969_s30  ;;  %v6557_v54 = vpop.f32.mrb[113].mxu1  ;;  %v5225_v15 = vpop.permute.xlu0 %5224 }
 0x5fb   :  { %v4925_v59 = vmax.f32 %v4892_v52, 0.0  ;;  %6708 = vmatpush1.bf16.msra.mxu0 %v6707_v51 }
 0x5fc   :  { %6709 = vmatprep.subr.bf16.mxu0 %v11071_v61 }
 0x5fd   :  { %4944 = vst.msk [vmem:[#allocation4 + $0x1c8] sm:$0xff] %vm265_vm1, %v4925_v59  ;;  %5244 = vrot.lane.b32.xlu1 %v5041_v5, %s6971_s5  ;;  %v5233_v55 = vpop.permute.xlu0 %5232 }
 0x5ff   :  { %6711 = vmatpush1.bf16.msra.mxu0 %v6710_v57 }
 0x600   :  { %6712 = vmatprep.subr.bf16.mxu0 %v11071_v61 }
 0x603   :  { %6714 = vmatpush1.bf16.msra.mxu0 %v6713_v17  ;;  %v5433_v17 = vld [vmem:[%s10990_s1 + $0x208] sm:$0x3] }
 0x604   :  { %v5043_v13 = vld [vmem:[#allocation4 + $0x1c8] sm:$0xff]  ;;  %6715 = vmatprep.subr.bf16.mxu0 %v11071_v61  ;;  %v6725_v40 = vpack.c.bf16 %v5433_v17, %v5432_v21 }
 0x605   :  { %5252 = vrot.lane.b32.xlu1 %v5043_v13, %s6973_s11  ;;  %v5438_v13 = vld [vmem:[%s10990_s1 + $0x230] sm:$0xff] }
 0x607   :  { %6717 = vmatpush1.bf16.msra.mxu0 %v6716_v14  ;;  %v5437_v14 = vld [vmem:[%s10990_s1 + $0x228] sm:$0xff] }
 0x608   :  { %v4896_v48 = vpop.f32.mrb[114].mxu1  ;;  %6718 = vmatprep.subr.bf16.mxu0 %v11071_v61  ;;  %v6733_v0 = vpack.c.bf16 %v5438_v13, %v5437_v14 }
 0x609   :  { %v4897_v16 = vadd.f32 %v10629_v44, %v4896_v48  ;;  %v6560_v50 = vpop.f32.mrb[115].mxu1  ;;  %v5439_v48 = vld [vmem:[%s10990_s1 + $0x238] sm:$0xff] }
 0x60a   :  { %6734 = vmatpush3.bf16.msra.mxu1 %v6733_v0  ;;  %v6736_v4 = vpack.c.bf16 %v5440_v18, %v5439_v48 }
 0x60b   :  { %v4926_v8 = vmax.f32 %v4897_v16, 0.0  ;;  %6720 = vmatpush1.bf16.msra.mxu0 %v6719_v49  ;;  %6735 = vmatprep.subr.bf16.mxu1 %v11071_v61  ;;  %v5878_v16 = vld [vmem:[%s10990_s1 + $0x1f8] ss:$0 sm:$0xff] }
 0x60c   :  { %6721 = vmatprep.subr.bf16.mxu0 %v11071_v61 }
 0x60d   :  { %4945 = vst.msk [vmem:[#allocation4 + $0x1d0] sm:$0xff] %vm265_vm1, %v4926_v8 }
 0x60e   :  { %6737 = vmatpush3.bf16.msra.mxu1 %v6736_v4 }
 0x60f   :  { %6723 = vmatpush1.bf16.msra.mxu0 %v6722_v42 }
 0x610   :  { %v4901_v29 = vpop.f32.mrb[116].mxu1  ;;  %5387 = vmatprep.subr.mxu0 %v11024_v56 }
 0x611   :  { %v4902_v31 = vadd.f32 %v10629_v44, %v4901_v29  ;;  %v6563_v39 = vpop.f32.mrb[117].mxu1 }
 0x612   :  { %v5434_v39 = vld [vmem:[%s10990_s1 + $0x210] sm:$0xff] }
 0x613   :  { %v4927_v10 = vmax.f32 %v4902_v31, 0.0  ;;  %5388 = vmatpush1.msra.mxu0 %v4996_v33 }
 0x614   :  { %v5044_v12 = vld [vmem:[#allocation4 + $0x1d0] sm:$0xff]  ;;  %6724 = vmatprep.subr.bf16.mxu0 %v11071_v61 }
 0x615   :  { %4946 = vst.msk [vmem:[#allocation4 + $0x1d8] sm:$0xff] %vm265_vm1, %v4927_v10  ;;  %5256 = vrot.lane.b32.xlu0 %v5044_v12, %s6974_s22 }
 0x61c   :  { %v5045_v35 = vld [vmem:[#allocation4 + $0x1d8] sm:$0xff] }
 0x61d   :  { %5260 = vrot.lane.b32.xlu1 %v5045_v35, %s6975_s0 }
 0x620   :  { %v4906_v9 = vpop.f32.mrb[118].mxu1 }
 0x621   :  { %v4907_v1 = vadd.f32 %v10629_v44, %v4906_v9  ;;  %v6566_v45 = vpop.f32.mrb[119].mxu1 }
 0x623   :  { %v4928_v37 = vmax.f32 %v4907_v1, 0.0  ;;  %v5436_v1 = vld [vmem:[%s10990_s1 + $0x220] sm:$0x1] }
 0x625   :  { %4947 = vst.msk [vmem:[#allocation4 + $0x1e0] sm:$0xff] %vm265_vm1, %v4928_v37 }
 0x62c   :  { %v5046_v32 = vld [vmem:[#allocation4 + $0x1e0] sm:$0xff] }
 0x62d   :  { %5879 = vmatprep.mubr.msk.f32.mxu0 %vm265_vm1, %v5046_v32  ;;  %v5600_v32 = vrot.slane %v5436_v1, 6 }
 0x637   :  { %v5241_v38 = vpop.permute.xlu0 %5240 }
 0x65b   :  { %v5205_v36 = vpop.permute.xlu1 %5204 }
 0x65c   :  { %v5263_v43 = vsel %vm265_vm1, %v5030_v7, %v5205_v36  ;;  %vm5446_vm1 = vcmask 1041408  }
 0x65d   :  { %v5264_v58 = vsel %vm2547_vm3, %v5263_v43, %v5209_v26  ;;  %vm6976_vm3 = vmmov 1  }
 0x65f   :  { %v5213_v20 = vpop.permute.xlu1 %5212 }
 0x660   :  { %v5265_v44 = vsel %vm2569_vm4, %v5264_v58, %v5213_v20  ;;  %vm10925_vm4 = vmpackc.low %vm5446_vm1, %vm6976_vm3 }
 0x661   :  { %v5266_v22 = vsel %vm39_vm0, %v5265_v44, %v5217_v41 }
 0x663   :  { %v5221_v25 = vpop.permute.xlu1 %5220 }
 0x664   :  { %v5267_v60 = vsel %vm2612_vm5, %v5266_v22, %v5221_v25  ;;  %vm5442_vm5 = vcmask 80896  }
 0x665   :  { %v5268_v47 = vsel %vm2634_vm6, %v5267_v60, %v5225_v15  ;;  %vm5430_vm6 = vcmask 76800  }
 0x667   :  { %v5229_v46 = vpop.permute.xlu1 %5228  ;;  %v5249_v19 = vpop.permute.xlu0 %5248 }
 0x668   :  { %v5269_v34 = vsel %vm2656_vm7, %v5268_v47, %v5229_v46  ;;  %vm5607_vm7 = vcmask 1040384  }
 0x669   :  { %v5270_v63 = vsel %vm2678_vm8, %v5269_v34, %v5233_v55 }
 0x66b   :  { %v5237_v27 = vpop.permute.xlu1 %5236 }
 0x66c   :  { %v5271_v23 = vsel %vm2704_vm9, %v5270_v63, %v5237_v27 }
 0x66d   :  { %v5272_v24 = vsel %vm5116_vm10, %v5271_v23, %v5241_v38 }
 0x66f   :  { %v5245_v2 = vpop.permute.xlu1 %5244 }
 0x670   :  { %v5273_v53 = vsel %vm5118_vm11, %v5272_v24, %v5245_v2 }
 0x671   :  { %v5274_v52 = vsel %vm5120_vm12, %v5273_v53, %v5249_v19 }
 0x677   :  { %v5253_v3 = vpop.permute.xlu1 %5252 }
 0x678   :  { %v5275_v54 = vsel %vm5122_vm13, %v5274_v52, %v5253_v3 }
 0x687   :  { %v5257_v28 = vpop.permute.xlu0 %5256 }
 0x688   :  { %v5276_v51 = vsel %vm5124_vm14, %v5275_v54, %v5257_v28 }
 0x68f   :  { %v5261_v30 = vpop.permute.xlu1 %5260 }
 0x690   :  { %v5277_v59 = vsel %vm5126_vm15, %v5276_v51, %v5261_v30 }
 0x691   :  { %5420 = vmatmul.mubr.f32.vlgmr.msra.gmra.mrb[104].mxu0 %v5277_v59 }
 0x692   :  { %6571 = vmatprep.mubr.msk.f32.mxu0 %vm6965_vm2, %v11024_v56  ;;  %6727 = vmatpush3.bf16.msk.msra.mxu0 %vm10925_vm4, %v6725_v40 }
 0x693   :  { %6728 = vmatprep.subr.bf16.mxu0 %v11071_v61  ;;  %v5435_v61 = vld [vmem:[%s10990_s1 + $0x218] sm:$0x3] }
 0x694   :  { %v6729_v10 = vpack.c.bf16 %v5435_v61, %v5434_v39 }
 0x6c5   :  { %v6126_v57 = vpop.f32.mrb[102].mxu0 }
 0x6c6   :  { %v6127_v5 = vpop.f32.mrb[103].mxu0 }
 0x6c7   :  { %v6128_v6 = vadd.f32 %v6127_v5, %v6126_v57 }
 0x6c9   :  { %v5352_v50 = vadd.f32 %v6128_v6, %v5878_v16 }
 0x764   :  { %v5421_v49 = vpop.f32.mrb[104].mxu0 }
 0x765   :  { %v5422_v62 = vadd.f32 %v5421_v49, %v5352_v50  ;;  %v5423_v8 = vpop.f32.mrb[105].mxu0 }
 0x767   :  { %v5425_v42 = vsub.f32 0.0, %v5422_v62 }
 0x769   :  { %v5426_v29 = vmul.f32 1.442695, %v5425_v42 }
 0x76b   :  { %6834 = vpow2.f32 %v5426_v29 }
 0x775   :  { %v6835_v33 = vpop.eup %6834 }
 0x776   :  { %v5428_v31 = vadd.f32 1.0, %v6835_v33 }
 0x778   :  { %6836 = vrcp.f32 %v5428_v31 }
 0x782   :  { %v6837_v12 = vpop.eup %6836 }
 0x783   :  { %6572 = vmatmul.mubr.msk.f32.vlgmr.msra.gmra.mrb[106].mxu0 %vm5442_vm5, %v6837_v12  ;;  %5431 = vst.msk [vmem:[#allocation5] sm:$0xf] %vm5430_vm6, %v6837_v12 }
 0x784   :  { %6731 = vmatpush3.bf16.msk.msra.mxu0 %vm10925_vm4, %v6729_v10  ;;  %6578 = vmatprep.mubr.msk.f32.mxu0 %vm6965_vm2, %v11024_v56 }
 0x787   :  { %6579 = vmatmul.mubr.msk.f32.vlgmr.msra.gmra.mrb[108].mxu0 %vm5442_vm5, %v6837_v12 }
 0x856   :  { %v5516_v35 = vpop.f32.mrb[106].mxu0 }
 0x857   :  { %v6573_v9 = vpop.f32.mrb[107].mxu0 }
 0x85a   :  { %v5589_v45 = vpop.f32.mrb[108].mxu0 }
 0x85b   :  { %v5594_v37 = vrot.slane %v5589_v45, 1  ;;  %v6580_v36 = vpop.f32.mrb[109].mxu0 }
 0x85d   :  { %v5596_v26 = vadd.f32 %v5594_v37, %v5516_v35 }
 0x85f   :  { %v5597_v20 = vadd.f32 %v5596_v26, %v5436_v1  ;;  %v5602_v41 = vadd.f32 %v5600_v32, %v5596_v26 }
 0x861   :  { %v5603_v7 = vmax.f32 %v5602_v41, 0.0  ;;  %v5598_v25 = vmax.f32 %v5597_v20, 0.0 }
 0x863   :  { %v5605_v43 = vrot.slane %v5603_v7, 1 }
 0x865   :  { %v5608_v58 = vsel %vm5607_vm7, %v5598_v25, %v5605_v43 }
 0x866   :  { %6590 = vmatmul.mubr.msk.f32.vlgmr.msra.gmra.mrb[120].mxu1 %vm39_vm0, %v5608_v58 }
 0x867   :  { %6921 = shalt.err (!%p6918_p4)
}
 0x868   :  { %s6922_s19 = scalar_lea.hbm %s10991_s2, 64 }
 0x869   :  { %p6923_p5 = scmp.ne.s32.totalorder %s10991_s2, %s6922_s19  ;;  %p6926_p6 = scmp.lt.u32.totalorder %s6922_s19, %s10991_s2 }
 0x86b   :  { %p6928_p7 = pnand %p6926_p6, %p6923_p5 }
 0x86d   :  { %6931 = shalt.err (!%p6928_p7)
}
 0x86e   :  { %5697 = dma.vmem_to_hbm [thread:$0]  %s5695_s7, 64, %s10991_s2, [#allocation6]   ;;  %v5884_v56 = vld [vmem:[%s10990_s1 + $0x248] ss:$0 sm:$0xff]  ;;  %vm5686_vm0 = vcmask 9216  }
 0x86f   :  { %s6978_s29 = smov [#allocation7]  }
 0x870   :  { %s5704_s9 = sshll.u32 %s6978_s29, 4  ;;  %s5705_s9 = int_to_ptr.vmem [resolvable:$true] %s5704_s9 }
 0x871   :  { %s6932_s18 = scalar_lea.vmem %s5705_s9, 32  ;;  %p6937_p9 = scmp.lt.s32.totalorder %s5705_s9, %s5705_s9 }
 0x872   :  { %p6933_p8 = scmp.ne.s32.totalorder %s5705_s9, %s6932_s18  ;;  %p6938_p10 = scmp.lt.s32.totalorder %s6932_s18, %s6932_s18 }
 0x874   :  { %p6939_p11 = por %p6938_p10, %p6937_p9 }
 0x876   :  { %p6940_p12 = pnand %p6939_p11, %p6933_p8 }
 0x939   :  { %v5682_v15 = vpop.f32.mrb[120].mxu1 }
 0x93a   :  { %v5683_v44 = vadd.f32 %v5884_v56, %v5682_v15  ;;  %v6591_v46 = vpop.f32.mrb[121].mxu1 }
 0x93c   :  { %5687 = vst.msk [vmem:[#allocation7] sm:$0x3] %vm5686_vm0, %v5683_v44 }
 0x93d   :  { %6943 = shalt.err (!%p6940_p12)
}
 0x93e   :  { %s6944_s10 = scalar_lea.hbm %s10992_s3, 32 }
 0x93f   :  { %p6945_p13 = scmp.ne.s32.totalorder %s10992_s3, %s6944_s10  ;;  %p6948_p0 = scmp.lt.u32.totalorder %s6944_s10, %s10992_s3 }
 0x941   :  { %p6950_p1 = pnand %p6948_p0, %p6945_p13 }
 0x943   :  { %6953 = shalt.err (!%p6950_p1)
}
 0x944   :  { %5707 = dma.vmem_to_hbm [thread:$0]  %s5705_s9, 32, %s10992_s3, [#allocation8]  }
 0x945   :  { %6954 = dma.done.wait [#allocation6], 64  }
 0x946   :  { %6955 = vsyncadd [#allocation6], 4294967232 }
 0x947   :  { %6956 = dma.done.wait [#allocation8], 32  }
 0x948   :  { %6957 = vsyncadd [#allocation8], 4294967264 }
 0x949   :  { %5714 = vsyncpa [#allocation6], 1 }
 0x94a   :  { %5715 = vsyncpa [#allocation8], 1 }

</bundles_post_ra>
